<compile_context>
chip_gen: v5e
topology: v5e:2x2
jax: 0.10.0
libtpu: 0.0.40
codegen_flags: <defaults>
</compile_context>

<pallas_src>
import functools

import numpy as np

import jax
import jax.numpy as jnp
from jax.experimental import pallas as pl
from jax.experimental.pallas import tpu as pltpu


def _ceil8(n):
    return -(-n // 8) * 8


# ------------------------- host-side static matrices -------------------------

def _conv_masks(H, W):
    """(9, H*W) f32 validity masks, taps ordered (dh, dw) in {-1,0,1}^2 row-major."""
    h = np.arange(H * W) // W
    w = np.arange(H * W) % W
    rows = []
    for dh in (-1, 0, 1):
        for dw in (-1, 0, 1):
            valid = (h + dh >= 0) & (h + dh < H) & (w + dw >= 0) & (w + dw < W)
            rows.append(valid.astype(np.float32))
    return np.stack(rows, axis=0)


def _pool_matrix(H, W):
    """(H*W, (H/2)*(W/2)) 0/1 matrix selecting the top-left pixel of each 2x2 window."""
    def sel(n):
        m = np.zeros((n, n // 2), np.float32)
        m[np.arange(0, n, 2), np.arange(n // 2)] = 1.0
        return m
    return np.kron(sel(H), sel(W))


def _upsample_matrix(H, W):
    """(H*W, 4*H*W) bilinear x2 matrix, PyTorch align_corners=False semantics."""
    def up1(n):
        u = np.zeros((n, 2 * n), np.float32)
        for i in range(2 * n):
            src = max(0.5 * (i + 0.5) - 0.5, 0.0)
            i0 = int(np.floor(src))
            lam = src - i0
            i1 = min(i0 + 1, n - 1)
            u[i0, i] += 1.0 - lam
            u[i1, i] += lam
        return u
    return np.kron(up1(H), up1(W))


def _flatten_matrices(C, HW):
    """T (HW, C*HW), Tt (C*HW, HW), Mask (C, C*HW): NCHW flatten/unflatten of a
    (C, HW) activation expressed with matmuls + masking (no in-kernel reshape)."""
    j = np.arange(C * HW)
    T = np.zeros((HW, C * HW), np.float32)
    T[j % HW, j] = 1.0
    M = np.zeros((C, C * HW), np.float32)
    M[j // HW, j] = 1.0
    return T, np.ascontiguousarray(T.T), M


# --------------------- one-time parameter / plan preparation -----------------

def _prep_conv(w, b):
    """torch OIHW (Cout,Cin,3,3) -> (Cout, 9*ceil8(Cin)) with zero-padded Cin cols."""
    Cout, Cin = int(w.shape[0]), int(w.shape[1])
    Cin8 = _ceil8(Cin)
    wt = jnp.transpose(w, (0, 2, 3, 1)).reshape(Cout, 9, Cin)   # (Cout, tap, cin)
    if Cin8 != Cin:
        wt = jnp.pad(wt, ((0, 0), (0, 0), (0, Cin8 - Cin)))
    return wt.reshape(Cout, 9 * Cin8), b.reshape(Cout, 1)


def build_plan(params, H0=28, W0=28):
    """Static op plan + flat operand list, already in kernel layout (done once)."""
    plan, ops = [], []
    H, W, cin = H0, W0, 1

    def add_conv(w, b, relu, H, W, cin):
        cout = int(w.shape[0])
        wmat, bcol = _prep_conv(w, b)
        plan.append(("conv", H, W, cin, cout, relu))
        ops.extend([wmat, bcol, jnp.asarray(_conv_masks(H, W))])
        return cout

    for block in params["enc"]:
        for (w, b) in block:
            cin = add_conv(w, b, True, H, W, cin)
        plan.append(("pool", H, W))
        ops.append(jnp.asarray(_pool_matrix(H, W)))
        H, W = H // 2, W // 2

    if params["bottleneck"] is not None:
        (w1, b1), (w2, b2) = params["bottleneck"]
        T, Tt, M = _flatten_matrices(cin, H * W)
        plan.append(("fc",))
        ops.extend([jnp.transpose(w1), b1.reshape(1, -1),
                    jnp.transpose(w2), b2.reshape(1, -1),
                    jnp.asarray(T), jnp.asarray(Tt), jnp.asarray(M)])

    for block in params["dec"]:
        plan.append(("up",))
        ops.append(jnp.asarray(_upsample_matrix(H, W)))
        H, W = 2 * H, 2 * W
        for (w, b) in block:
            cin = add_conv(w, b, True, H, W, cin)

    wf, bf = params["final"]
    add_conv(wf, bf, False, H, W, cin)

    return tuple(plan), [jnp.asarray(o, jnp.float32) for o in ops]


def _scratch_dims(plan):
    rows, hw, w_max, k = 8, 128, 8, 72
    for op in plan:
        if op[0] == "conv":
            _, H, W, cin, cout, _ = op
            rows = max(rows, cin, cout)
            hw = max(hw, H * W)
            w_max = max(w_max, W)
            k = max(k, 9 * _ceil8(cin))
        elif op[0] == "pool":
            _, H, W = op
            hw = max(hw, H * W)
            w_max = max(w_max, W)
    pad = ((w_max + 1 + 127) // 128) * 128     # 128-aligned staging offset
    return rows, hw + 2 * pad, k, hw, pad


# ------------------------------- fused kernel --------------------------------

def _fused_kernel(*refs, plan, n_ops, pad):
    x_ref = refs[0]
    op_refs = refs[1:1 + n_ops]
    out_ref = refs[1 + n_ops]
    pad_ref = refs[2 + n_ops]       # (rows, 2*pad + HW_max) staging buffer
    xcol_ref = refs[3 + n_ops]      # (9*Cin8_max, HW_max) im2col buffer

    # One-time init: guarantees every value ever read from scratch is finite,
    # so boundary masking can be a multiply and padded K-rows contribute 0.
    pad_ref[...] = jnp.zeros(pad_ref.shape, jnp.float32)
    xcol_ref[...] = jnp.zeros(xcol_ref.shape, jnp.float32)

    it = iter(op_refs)
    x = x_ref[...]                                   # (C, H*W), lane-dense

    for op in plan:
        kind = op[0]
        if kind == "conv":
            _, H, W, Cin, Cout, relu = op
            w_ref, b_ref, m_ref = next(it), next(it), next(it)
            HW = H * W
            Cin8 = _ceil8(Cin)
            K = 9 * Cin8
            pad_ref[0:Cin, pad:pad + HW] = x         # stage activation once
            staged = pad_ref[0:Cin, :]
            t = 0
            for dh in (-1, 0, 1):                    # 9 in-VMEM shifted taps
                for dw in (-1, 0, 1):
                    s = dh * W + dw
                    tap = staged[:, pad + s:pad + s + HW]
                    xcol_ref[t * Cin8:t * Cin8 + Cin, 0:HW] = tap * m_ref[t:t + 1, :]
                    t += 1
            acc = jnp.dot(w_ref[...], xcol_ref[0:K, 0:HW],
                          preferred_element_type=jnp.float32) + b_ref[...]
            x = jnp.maximum(acc, 0.0) if relu else acc

        elif kind == "pool":                         # 2x2 / stride-2 max-pool
            _, H, W = op
            s_ref = next(it)
            HW = H * W
            C = x.shape[0]
            pad_ref[0:C, pad:pad + HW] = x
            staged = pad_ref[0:C, :]
            m = x
            for s in (1, W, W + 1):
                m = jnp.maximum(m, staged[:, pad + s:pad + s + HW])
            x = jnp.dot(m, s_ref[...], preferred_element_type=jnp.float32)

        elif kind == "up":                           # bilinear x2 + ReLU
            u_ref = next(it)
            x = jnp.maximum(
                jnp.dot(x, u_ref[...], preferred_element_type=jnp.float32), 0.0)

        elif kind == "fc":                           # Linear -> Linear bottleneck
            w1t_ref, b1_ref, w2t_ref, b2_ref, t_ref, tt_ref, msk_ref = (
                next(it), next(it), next(it), next(it), next(it), next(it), next(it))
            msk = msk_ref[...]                       # (C, C*HW)
            # NCHW flatten of (C, HW) -> (1, C*HW) via matmul + mask + row-sum
            f = jnp.sum(jnp.dot(x, t_ref[...],
                                preferred_element_type=jnp.float32) * msk,
                        axis=0, keepdims=True)
            h = jnp.dot(f, w1t_ref[...],
                        preferred_element_type=jnp.float32) + b1_ref[...]
            y = jnp.dot(h, w2t_ref[...],
                        preferred_element_type=jnp.float32) + b2_ref[...]
            # unflatten (1, C*HW) -> (C, HW)
            x = jnp.dot(y * msk, tt_ref[...], preferred_element_type=jnp.float32)

    out_ref[...] = x


# --------------------------------- wrapper -----------------------------------

def _zero_index_map(n, *, nd):
    return (0,) * nd


def forward(x_nchw, operands, *, plan, H0=28, W0=28):
    N, C0 = x_nchw.shape[0], x_nchw.shape[1]
    HW0 = H0 * W0
    x_flat = x_nchw.astype(jnp.float32).reshape(N, C0, HW0)

    pad_rows, pad_cols, xcol_rows, xcol_cols, pad = _scratch_dims(plan)
    kernel = functools.partial(_fused_kernel, plan=plan,
                               n_ops=len(operands), pad=pad)

    in_specs = [pl.BlockSpec((None, C0, HW0), lambda n: (n, 0, 0))]
    in_specs += [pl.BlockSpec(o.shape, functools.partial(_zero_index_map, nd=o.ndim))
                 for o in operands]

    out = pl.pallas_call(
        kernel,
        grid=(N,),
        in_specs=in_specs,
        out_specs=pl.BlockSpec((None, 1, HW0), lambda n: (n, 0, 0)),
        out_shape=jax.ShapeDtypeStruct((N, 1, HW0), jnp.float32),
        scratch_shapes=[pltpu.VMEM((pad_rows, pad_cols), jnp.float32),
                        pltpu.VMEM((xcol_rows, xcol_cols), jnp.float32)],
        compiler_params=pltpu.CompilerParams(
            dimension_semantics=("parallel",),          # batch across TCs (v7x)
            vmem_limit_bytes=32 * 1024 * 1024),          # explicit, v5e-safe
    )(x_flat, *operands)
    return out.reshape(N, 1, H0, W0)


# ------------------------- parameters (deterministic) -------------------------

def _make_conv(key, cin, cout):
    k1, k2 = jax.random.split(key)
    fan_in = cin * 9
    w = (2.0 / fan_in) ** 0.5 * jax.random.normal(k1, (cout, cin, 3, 3),
                                                  jnp.float32)  # ~kaiming_normal
    bound = 1.0 / fan_in ** 0.5
    b = jax.random.uniform(k2, (cout,), jnp.float32, -bound, bound)
    return w, b


def _make_linear(key, din, dout):
    k1, k2 = jax.random.split(key)
    w = (2.0 / din) ** 0.5 * jax.random.normal(k1, (dout, din), jnp.float32)
    bound = 1.0 / din ** 0.5
    b = jax.random.uniform(k2, (dout,), jnp.float32, -bound, bound)
    return w, b


def init_params(key, nb_f, nb_l, nb_b, fc):
    keys = iter(jax.random.split(key, 128))
    enc = []
    prev_in, prev_f = 1, nb_f
    for _ in range(nb_b):
        block, cin = [], prev_in
        for _ in range(nb_l):
            block.append(_make_conv(next(keys), cin, prev_f))
            cin = prev_f
        enc.append(block)
        prev_in, prev_f = prev_f, prev_f * 2

    bottleneck = None
    if fc:
        in_dim = (28 // 2 ** nb_b) ** 2 * (prev_f // 2)
        bottleneck = (_make_linear(next(keys), in_dim, fc),
                      _make_linear(next(keys), fc, in_dim))

    dec = []
    for _ in range(nb_b):
        prev_f //= 2
        block, cin, cout = [], prev_f, prev_f // 2
        for _ in range(nb_l):
            block.append(_make_conv(next(keys), cin, cout))
            cin = cout
        dec.append(block)

    final = _make_conv(next(keys), prev_f // 2, 1)
    return {"enc": enc, "bottleneck": bottleneck, "dec": dec, "final": final}


# ----------------------------------- main -------------------------------------

if __name__ == "__main__":
    NB_F, NB_L, NB_B, FC = 8, 1, 2, 32
    key = jax.random.PRNGKey(0)
    kp, kx = jax.random.split(key)
    params = init_params(kp, NB_F, NB_L, NB_B, FC)
    x = jax.random.normal(kx, (2, 1, 28, 28), dtype=jnp.float32)

    plan, operands = build_plan(params)          # one-time weight/matrix prep
    fwd = jax.jit(functools.partial(forward, plan=plan))
    y = fwd(x, operands)
    jax.block_until_ready(y)
    assert y.shape == (2, 1, 28, 28) and y.dtype == jnp.float32
    assert bool(jnp.isfinite(y).all())
    print("KERNEL_OK")
</pallas_src>

<mosaic_0001>
module attributes {stable_mosaic.version = 11 : i64} {
  func.func @_fused_kernel(%arg0: i32, %arg1: memref<1x1x784xf32, #tpu.memory_space<vmem>>, %arg2: memref<8x72xf32, #tpu.memory_space<vmem>>, %arg3: memref<8x1xf32, #tpu.memory_space<vmem>>, %arg4: memref<9x784xf32, #tpu.memory_space<vmem>>, %arg5: memref<784x196xf32, #tpu.memory_space<vmem>>, %arg6: memref<16x72xf32, #tpu.memory_space<vmem>>, %arg7: memref<16x1xf32, #tpu.memory_space<vmem>>, %arg8: memref<9x196xf32, #tpu.memory_space<vmem>>, %arg9: memref<196x49xf32, #tpu.memory_space<vmem>>, %arg10: memref<784x32xf32, #tpu.memory_space<vmem>>, %arg11: memref<1x32xf32, #tpu.memory_space<vmem>>, %arg12: memref<32x784xf32, #tpu.memory_space<vmem>>, %arg13: memref<1x784xf32, #tpu.memory_space<vmem>>, %arg14: memref<49x784xf32, #tpu.memory_space<vmem>>, %arg15: memref<784x49xf32, #tpu.memory_space<vmem>>, %arg16: memref<16x784xf32, #tpu.memory_space<vmem>>, %arg17: memref<49x196xf32, #tpu.memory_space<vmem>>, %arg18: memref<8x144xf32, #tpu.memory_space<vmem>>, %arg19: memref<8x1xf32, #tpu.memory_space<vmem>>, %arg20: memref<9x196xf32, #tpu.memory_space<vmem>>, %arg21: memref<196x784xf32, #tpu.memory_space<vmem>>, %arg22: memref<4x72xf32, #tpu.memory_space<vmem>>, %arg23: memref<4x1xf32, #tpu.memory_space<vmem>>, %arg24: memref<9x784xf32, #tpu.memory_space<vmem>>, %arg25: memref<1x72xf32, #tpu.memory_space<vmem>>, %arg26: memref<1x1xf32, #tpu.memory_space<vmem>>, %arg27: memref<9x784xf32, #tpu.memory_space<vmem>>, %arg28: memref<1x1x784xf32, #tpu.memory_space<vmem>>, %arg29: memref<16x1040xf32, #tpu.memory_space<vmem>>, %arg30: memref<144x784xf32, #tpu.memory_space<vmem>>) attributes {dimension_semantics = [#tpu.dimension_semantics<parallel>], iteration_bounds = array<i64: 2>, scalar_prefetch = 0 : i64, scratch_operands = 2 : i64, tpu.core_type = #tpu.core_type<tc>, window_params = [{transform_indices = @transform_0, window_bounds = array<i64: 1, 1, 784>}, {pipeline_mode = #tpu.pipeline_mode<synchronous>, transform_indices = @transform_1, window_bounds = array<i64: 8, 72>}, {pipeline_mode = #tpu.pipeline_mode<synchronous>, transform_indices = @transform_2, window_bounds = array<i64: 8, 1>}, {pipeline_mode = #tpu.pipeline_mode<synchronous>, transform_indices = @transform_3, window_bounds = array<i64: 9, 784>}, {pipeline_mode = #tpu.pipeline_mode<synchronous>, transform_indices = @transform_4, window_bounds = array<i64: 784, 196>}, {pipeline_mode = #tpu.pipeline_mode<synchronous>, transform_indices = @transform_5, window_bounds = array<i64: 16, 72>}, {pipeline_mode = #tpu.pipeline_mode<synchronous>, transform_indices = @transform_6, window_bounds = array<i64: 16, 1>}, {pipeline_mode = #tpu.pipeline_mode<synchronous>, transform_indices = @transform_7, window_bounds = array<i64: 9, 196>}, {pipeline_mode = #tpu.pipeline_mode<synchronous>, transform_indices = @transform_8, window_bounds = array<i64: 196, 49>}, {pipeline_mode = #tpu.pipeline_mode<synchronous>, transform_indices = @transform_9, window_bounds = array<i64: 784, 32>}, {pipeline_mode = #tpu.pipeline_mode<synchronous>, transform_indices = @transform_10, window_bounds = array<i64: 1, 32>}, {pipeline_mode = #tpu.pipeline_mode<synchronous>, transform_indices = @transform_11, window_bounds = array<i64: 32, 784>}, {pipeline_mode = #tpu.pipeline_mode<synchronous>, transform_indices = @transform_12, window_bounds = array<i64: 1, 784>}, {pipeline_mode = #tpu.pipeline_mode<synchronous>, transform_indices = @transform_13, window_bounds = array<i64: 49, 784>}, {pipeline_mode = #tpu.pipeline_mode<synchronous>, transform_indices = @transform_14, window_bounds = array<i64: 784, 49>}, {pipeline_mode = #tpu.pipeline_mode<synchronous>, transform_indices = @transform_15, window_bounds = array<i64: 16, 784>}, {pipeline_mode = #tpu.pipeline_mode<synchronous>, transform_indices = @transform_16, window_bounds = array<i64: 49, 196>}, {pipeline_mode = #tpu.pipeline_mode<synchronous>, transform_indices = @transform_17, window_bounds = array<i64: 8, 144>}, {pipeline_mode = #tpu.pipeline_mode<synchronous>, transform_indices = @transform_18, window_bounds = array<i64: 8, 1>}, {pipeline_mode = #tpu.pipeline_mode<synchronous>, transform_indices = @transform_19, window_bounds = array<i64: 9, 196>}, {pipeline_mode = #tpu.pipeline_mode<synchronous>, transform_indices = @transform_20, window_bounds = array<i64: 196, 784>}, {pipeline_mode = #tpu.pipeline_mode<synchronous>, transform_indices = @transform_21, window_bounds = array<i64: 4, 72>}, {pipeline_mode = #tpu.pipeline_mode<synchronous>, transform_indices = @transform_22, window_bounds = array<i64: 4, 1>}, {pipeline_mode = #tpu.pipeline_mode<synchronous>, transform_indices = @transform_23, window_bounds = array<i64: 9, 784>}, {pipeline_mode = #tpu.pipeline_mode<synchronous>, transform_indices = @transform_24, window_bounds = array<i64: 1, 72>}, {pipeline_mode = #tpu.pipeline_mode<synchronous>, transform_indices = @transform_25, window_bounds = array<i64: 1, 1>}, {pipeline_mode = #tpu.pipeline_mode<synchronous>, transform_indices = @transform_26, window_bounds = array<i64: 9, 784>}, {transform_indices = @transform_27, window_bounds = array<i64: 1, 1, 784>}]} {
    %cst = arith.constant 0.000000e+00 : f32
    %0 = vector.broadcast %cst : f32 to vector<16x1040xf32>
    %c0 = arith.constant 0 : index
    %c0_0 = arith.constant 0 : index
    %1 = vector.load %arg29[%c0, %c0_0] : memref<16x1040xf32, #tpu.memory_space<vmem>>, vector<16x1040xf32>
    tpu.vector_store %arg29[%c0, %c0_0], %0 {strides = array<i32>} : memref<16x1040xf32, #tpu.memory_space<vmem>>, vector<16x1040xf32>,
    %cst_1 = arith.constant 0.000000e+00 : f32
    %2 = vector.broadcast %cst_1 : f32 to vector<144x784xf32>
    %c0_2 = arith.constant 0 : index
    %c0_3 = arith.constant 0 : index
    %3 = vector.load %arg30[%c0_2, %c0_3] : memref<144x784xf32, #tpu.memory_space<vmem>>, vector<144x784xf32>
    tpu.vector_store %arg30[%c0_2, %c0_3], %2 {strides = array<i32>} : memref<144x784xf32, #tpu.memory_space<vmem>>, vector<144x784xf32>,
    %c0_4 = arith.constant 0 : index
    %c0_5 = arith.constant 0 : index
    %c0_6 = arith.constant 0 : index
    %4 = vector.load %arg1[%c0_4, %c0_5, %c0_6] : memref<1x1x784xf32, #tpu.memory_space<vmem>>, vector<1x1x784xf32>
    %5 = vector.shape_cast %4 : vector<1x1x784xf32> to vector<1x784xf32>
    %c0_7 = arith.constant 0 : index
    %c128 = arith.constant 128 : index
    %6 = vector.load %arg29[%c0_7, %c128] : memref<16x1040xf32, #tpu.memory_space<vmem>>, vector<1x784xf32>
    tpu.vector_store %arg29[%c0_7, %c128], %5 {strides = array<i32>} : memref<16x1040xf32, #tpu.memory_space<vmem>>, vector<1x784xf32>,
    %c0_8 = arith.constant 0 : index
    %c0_9 = arith.constant 0 : index
    %7 = vector.load %arg29[%c0_8, %c0_9] : memref<16x1040xf32, #tpu.memory_space<vmem>>, vector<1x1040xf32>
    %8 = vector.extract_strided_slice %7 {offsets = [0, 99], sizes = [1, 784], strides = [1, 1]} : vector<1x1040xf32> to vector<1x784xf32>
    %c0_10 = arith.constant 0 : index
    %c0_11 = arith.constant 0 : index
    %9 = vector.load %arg4[%c0_10, %c0_11] : memref<9x784xf32, #tpu.memory_space<vmem>>, vector<1x784xf32>
    %10 = arith.mulf %8, %9 : vector<1x784xf32>
    %c0_12 = arith.constant 0 : index
    %c0_13 = arith.constant 0 : index
    %11 = vector.load %arg30[%c0_12, %c0_13] : memref<144x784xf32, #tpu.memory_space<vmem>>, vector<1x784xf32>
    tpu.vector_store %arg30[%c0_12, %c0_13], %10 {strides = array<i32>} : memref<144x784xf32, #tpu.memory_space<vmem>>, vector<1x784xf32>,
    %12 = vector.extract_strided_slice %7 {offsets = [0, 100], sizes = [1, 784], strides = [1, 1]} : vector<1x1040xf32> to vector<1x784xf32>
    %c1 = arith.constant 1 : index
    %c0_14 = arith.constant 0 : index
    %13 = vector.load %arg4[%c1, %c0_14] : memref<9x784xf32, #tpu.memory_space<vmem>>, vector<1x784xf32>
    %14 = arith.mulf %12, %13 : vector<1x784xf32>
    %c8 = arith.constant 8 : index
    %c0_15 = arith.constant 0 : index
    %15 = vector.load %arg30[%c8, %c0_15] : memref<144x784xf32, #tpu.memory_space<vmem>>, vector<1x784xf32>
    tpu.vector_store %arg30[%c8, %c0_15], %14 {strides = array<i32>} : memref<144x784xf32, #tpu.memory_space<vmem>>, vector<1x784xf32>,
    %16 = vector.extract_strided_slice %7 {offsets = [0, 101], sizes = [1, 784], strides = [1, 1]} : vector<1x1040xf32> to vector<1x784xf32>
    %c2 = arith.constant 2 : index
    %c0_16 = arith.constant 0 : index
    %17 = vector.load %arg4[%c2, %c0_16] : memref<9x784xf32, #tpu.memory_space<vmem>>, vector<1x784xf32>
    %18 = arith.mulf %16, %17 : vector<1x784xf32>
    %c16 = arith.constant 16 : index
    %c0_17 = arith.constant 0 : index
    %19 = vector.load %arg30[%c16, %c0_17] : memref<144x784xf32, #tpu.memory_space<vmem>>, vector<1x784xf32>
    tpu.vector_store %arg30[%c16, %c0_17], %18 {strides = array<i32>} : memref<144x784xf32, #tpu.memory_space<vmem>>, vector<1x784xf32>,
    %20 = vector.extract_strided_slice %7 {offsets = [0, 127], sizes = [1, 784], strides = [1, 1]} : vector<1x1040xf32> to vector<1x784xf32>
    %c3 = arith.constant 3 : index
    %c0_18 = arith.constant 0 : index
    %21 = vector.load %arg4[%c3, %c0_18] : memref<9x784xf32, #tpu.memory_space<vmem>>, vector<1x784xf32>
    %22 = arith.mulf %20, %21 : vector<1x784xf32>
    %c24 = arith.constant 24 : index
    %c0_19 = arith.constant 0 : index
    %23 = vector.load %arg30[%c24, %c0_19] : memref<144x784xf32, #tpu.memory_space<vmem>>, vector<1x784xf32>
    tpu.vector_store %arg30[%c24, %c0_19], %22 {strides = array<i32>} : memref<144x784xf32, #tpu.memory_space<vmem>>, vector<1x784xf32>,
    %24 = vector.extract_strided_slice %7 {offsets = [0, 128], sizes = [1, 784], strides = [1, 1]} : vector<1x1040xf32> to vector<1x784xf32>
    %c4 = arith.constant 4 : index
    %c0_20 = arith.constant 0 : index
    %25 = vector.load %arg4[%c4, %c0_20] : memref<9x784xf32, #tpu.memory_space<vmem>>, vector<1x784xf32>
    %26 = arith.mulf %24, %25 : vector<1x784xf32>
    %c32 = arith.constant 32 : index
    %c0_21 = arith.constant 0 : index
    %27 = vector.load %arg30[%c32, %c0_21] : memref<144x784xf32, #tpu.memory_space<vmem>>, vector<1x784xf32>
    tpu.vector_store %arg30[%c32, %c0_21], %26 {strides = array<i32>} : memref<144x784xf32, #tpu.memory_space<vmem>>, vector<1x784xf32>,
    %28 = vector.extract_strided_slice %7 {offsets = [0, 129], sizes = [1, 784], strides = [1, 1]} : vector<1x1040xf32> to vector<1x784xf32>
    %c5 = arith.constant 5 : index
    %c0_22 = arith.constant 0 : index
    %29 = vector.load %arg4[%c5, %c0_22] : memref<9x784xf32, #tpu.memory_space<vmem>>, vector<1x784xf32>
    %30 = arith.mulf %28, %29 : vector<1x784xf32>
    %c40 = arith.constant 40 : index
    %c0_23 = arith.constant 0 : index
    %31 = vector.load %arg30[%c40, %c0_23] : memref<144x784xf32, #tpu.memory_space<vmem>>, vector<1x784xf32>
    tpu.vector_store %arg30[%c40, %c0_23], %30 {strides = array<i32>} : memref<144x784xf32, #tpu.memory_space<vmem>>, vector<1x784xf32>,
    %32 = vector.extract_strided_slice %7 {offsets = [0, 155], sizes = [1, 784], strides = [1, 1]} : vector<1x1040xf32> to vector<1x784xf32>
    %c6 = arith.constant 6 : index
    %c0_24 = arith.constant 0 : index
    %33 = vector.load %arg4[%c6, %c0_24] : memref<9x784xf32, #tpu.memory_space<vmem>>, vector<1x784xf32>
    %34 = arith.mulf %32, %33 : vector<1x784xf32>
    %c48 = arith.constant 48 : index
    %c0_25 = arith.constant 0 : index
    %35 = vector.load %arg30[%c48, %c0_25] : memref<144x784xf32, #tpu.memory_space<vmem>>, vector<1x784xf32>
    tpu.vector_store %arg30[%c48, %c0_25], %34 {strides = array<i32>} : memref<144x784xf32, #tpu.memory_space<vmem>>, vector<1x784xf32>,
    %36 = vector.extract_strided_slice %7 {offsets = [0, 156], sizes = [1, 784], strides = [1, 1]} : vector<1x1040xf32> to vector<1x784xf32>
    %c7 = arith.constant 7 : index
    %c0_26 = arith.constant 0 : index
    %37 = vector.load %arg4[%c7, %c0_26] : memref<9x784xf32, #tpu.memory_space<vmem>>, vector<1x784xf32>
    %38 = arith.mulf %36, %37 : vector<1x784xf32>
    %c56 = arith.constant 56 : index
    %c0_27 = arith.constant 0 : index
    %39 = vector.load %arg30[%c56, %c0_27] : memref<144x784xf32, #tpu.memory_space<vmem>>, vector<1x784xf32>
    tpu.vector_store %arg30[%c56, %c0_27], %38 {strides = array<i32>} : memref<144x784xf32, #tpu.memory_space<vmem>>, vector<1x784xf32>,
    %40 = vector.extract_strided_slice %7 {offsets = [0, 157], sizes = [1, 784], strides = [1, 1]} : vector<1x1040xf32> to vector<1x784xf32>
    %c8_28 = arith.constant 8 : index
    %c0_29 = arith.constant 0 : index
    %41 = vector.load %arg4[%c8_28, %c0_29] : memref<9x784xf32, #tpu.memory_space<vmem>>, vector<1x784xf32>
    %42 = arith.mulf %40, %41 : vector<1x784xf32>
    %c64 = arith.constant 64 : index
    %c0_30 = arith.constant 0 : index
    %43 = vector.load %arg30[%c64, %c0_30] : memref<144x784xf32, #tpu.memory_space<vmem>>, vector<1x784xf32>
    tpu.vector_store %arg30[%c64, %c0_30], %42 {strides = array<i32>} : memref<144x784xf32, #tpu.memory_space<vmem>>, vector<1x784xf32>,
    %c0_31 = arith.constant 0 : index
    %c0_32 = arith.constant 0 : index
    %44 = vector.load %arg2[%c0_31, %c0_32] : memref<8x72xf32, #tpu.memory_space<vmem>>, vector<8x72xf32>
    %c0_33 = arith.constant 0 : index
    %c0_34 = arith.constant 0 : index
    %45 = vector.load %arg30[%c0_33, %c0_34] : memref<144x784xf32, #tpu.memory_space<vmem>>, vector<72x784xf32>
    %cst_35 = arith.constant dense<0.000000e+00> : vector<8x784xf32>
    %46 = tpu.matmul %44, %45, %cst_35 {dimension_numbers = #tpu.dot_dimension_numbers<[1], [0], [0], [1], [0, 0, 1, 1], [], []>} : vector<8x72xf32>, vector<72x784xf32>, vector<8x784xf32> -> vector<8x784xf32>
    %c0_36 = arith.constant 0 : index
    %c0_37 = arith.constant 0 : index
    %47 = vector.load %arg3[%c0_36, %c0_37] : memref<8x1xf32, #tpu.memory_space<vmem>>, vector<8x1xf32>
    %48 = vector.broadcast %47 : vector<8x1xf32> to vector<8x784xf32>
    %49 = arith.addf %46, %48 : vector<8x784xf32>
    %cst_38 = arith.constant 0.000000e+00 : f32
    %50 = vector.broadcast %cst_38 : f32 to vector<8x784xf32>
    %51 = arith.maximumf %49, %50 : vector<8x784xf32>
    %c0_39 = arith.constant 0 : index
    %c128_40 = arith.constant 128 : index
    %52 = vector.load %arg29[%c0_39, %c128_40] : memref<16x1040xf32, #tpu.memory_space<vmem>>, vector<8x784xf32>
    tpu.vector_store %arg29[%c0_39, %c128_40], %51 {strides = array<i32>} : memref<16x1040xf32, #tpu.memory_space<vmem>>, vector<8x784xf32>,
    %c0_41 = arith.constant 0 : index
    %c0_42 = arith.constant 0 : index
    %53 = vector.load %arg29[%c0_41, %c0_42] : memref<16x1040xf32, #tpu.memory_space<vmem>>, vector<8x1040xf32>
    %54 = vector.extract_strided_slice %53 {offsets = [0, 129], sizes = [8, 784], strides = [1, 1]} : vector<8x1040xf32> to vector<8x784xf32>
    %55 = arith.maximumf %51, %54 : vector<8x784xf32>
    %56 = vector.extract_strided_slice %53 {offsets = [0, 156], sizes = [8, 784], strides = [1, 1]} : vector<8x1040xf32> to vector<8x784xf32>
    %57 = arith.maximumf %55, %56 : vector<8x784xf32>
    %58 = vector.extract_strided_slice %53 {offsets = [0, 157], sizes = [8, 784], strides = [1, 1]} : vector<8x1040xf32> to vector<8x784xf32>
    %59 = arith.maximumf %57, %58 : vector<8x784xf32>
    %c0_43 = arith.constant 0 : index
    %c0_44 = arith.constant 0 : index
    %60 = vector.load %arg5[%c0_43, %c0_44] : memref<784x196xf32, #tpu.memory_space<vmem>>, vector<784x196xf32>
    %cst_45 = arith.constant dense<0.000000e+00> : vector<8x196xf32>
    %61 = tpu.matmul %59, %60, %cst_45 {dimension_numbers = #tpu.dot_dimension_numbers<[1], [0], [0], [1], [0, 0, 1, 1], [], []>} : vector<8x784xf32>, vector<784x196xf32>, vector<8x196xf32> -> vector<8x196xf32>
    %c0_46 = arith.constant 0 : index
    %c128_47 = arith.constant 128 : index
    %62 = vector.load %arg29[%c0_46, %c128_47] : memref<16x1040xf32, #tpu.memory_space<vmem>>, vector<8x196xf32>
    tpu.vector_store %arg29[%c0_46, %c128_47], %61 {strides = array<i32>} : memref<16x1040xf32, #tpu.memory_space<vmem>>, vector<8x196xf32>,
    %c0_48 = arith.constant 0 : index
    %c0_49 = arith.constant 0 : index
    %63 = vector.load %arg29[%c0_48, %c0_49] : memref<16x1040xf32, #tpu.memory_space<vmem>>, vector<8x1040xf32>
    %64 = vector.extract_strided_slice %63 {offsets = [0, 113], sizes = [8, 196], strides = [1, 1]} : vector<8x1040xf32> to vector<8x196xf32>
    %c0_50 = arith.constant 0 : index
    %c0_51 = arith.constant 0 : index
    %65 = vector.load %arg8[%c0_50, %c0_51] : memref<9x196xf32, #tpu.memory_space<vmem>>, vector<1x196xf32>
    %66 = vector.broadcast %65 : vector<1x196xf32> to vector<8x196xf32>
    %67 = arith.mulf %64, %66 : vector<8x196xf32>
    %c0_52 = arith.constant 0 : index
    %c0_53 = arith.constant 0 : index
    %68 = vector.load %arg30[%c0_52, %c0_53] : memref<144x784xf32, #tpu.memory_space<vmem>>, vector<8x196xf32>
    tpu.vector_store %arg30[%c0_52, %c0_53], %67 {strides = array<i32>} : memref<144x784xf32, #tpu.memory_space<vmem>>, vector<8x196xf32>,
    %69 = vector.extract_strided_slice %63 {offsets = [0, 114], sizes = [8, 196], strides = [1, 1]} : vector<8x1040xf32> to vector<8x196xf32>
    %c1_54 = arith.constant 1 : index
    %c0_55 = arith.constant 0 : index
    %70 = vector.load %arg8[%c1_54, %c0_55] : memref<9x196xf32, #tpu.memory_space<vmem>>, vector<1x196xf32>
    %71 = vector.broadcast %70 : vector<1x196xf32> to vector<8x196xf32>
    %72 = arith.mulf %69, %71 : vector<8x196xf32>
    %c8_56 = arith.constant 8 : index
    %c0_57 = arith.constant 0 : index
    %73 = vector.load %arg30[%c8_56, %c0_57] : memref<144x784xf32, #tpu.memory_space<vmem>>, vector<8x196xf32>
    tpu.vector_store %arg30[%c8_56, %c0_57], %72 {strides = array<i32>} : memref<144x784xf32, #tpu.memory_space<vmem>>, vector<8x196xf32>,
    %74 = vector.extract_strided_slice %63 {offsets = [0, 115], sizes = [8, 196], strides = [1, 1]} : vector<8x1040xf32> to vector<8x196xf32>
    %c2_58 = arith.constant 2 : index
    %c0_59 = arith.constant 0 : index
    %75 = vector.load %arg8[%c2_58, %c0_59] : memref<9x196xf32, #tpu.memory_space<vmem>>, vector<1x196xf32>
    %76 = vector.broadcast %75 : vector<1x196xf32> to vector<8x196xf32>
    %77 = arith.mulf %74, %76 : vector<8x196xf32>
    %c16_60 = arith.constant 16 : index
    %c0_61 = arith.constant 0 : index
    %78 = vector.load %arg30[%c16_60, %c0_61] : memref<144x784xf32, #tpu.memory_space<vmem>>, vector<8x196xf32>
    tpu.vector_store %arg30[%c16_60, %c0_61], %77 {strides = array<i32>} : memref<144x784xf32, #tpu.memory_space<vmem>>, vector<8x196xf32>,
    %79 = vector.extract_strided_slice %63 {offsets = [0, 127], sizes = [8, 196], strides = [1, 1]} : vector<8x1040xf32> to vector<8x196xf32>
    %c3_62 = arith.constant 3 : index
    %c0_63 = arith.constant 0 : index
    %80 = vector.load %arg8[%c3_62, %c0_63] : memref<9x196xf32, #tpu.memory_space<vmem>>, vector<1x196xf32>
    %81 = vector.broadcast %80 : vector<1x196xf32> to vector<8x196xf32>
    %82 = arith.mulf %79, %81 : vector<8x196xf32>
    %c24_64 = arith.constant 24 : index
    %c0_65 = arith.constant 0 : index
    %83 = vector.load %arg30[%c24_64, %c0_65] : memref<144x784xf32, #tpu.memory_space<vmem>>, vector<8x196xf32>
    tpu.vector_store %arg30[%c24_64, %c0_65], %82 {strides = array<i32>} : memref<144x784xf32, #tpu.memory_space<vmem>>, vector<8x196xf32>,
    %84 = vector.extract_strided_slice %63 {offsets = [0, 128], sizes = [8, 196], strides = [1, 1]} : vector<8x1040xf32> to vector<8x196xf32>
    %c4_66 = arith.constant 4 : index
    %c0_67 = arith.constant 0 : index
    %85 = vector.load %arg8[%c4_66, %c0_67] : memref<9x196xf32, #tpu.memory_space<vmem>>, vector<1x196xf32>
    %86 = vector.broadcast %85 : vector<1x196xf32> to vector<8x196xf32>
    %87 = arith.mulf %84, %86 : vector<8x196xf32>
    %c32_68 = arith.constant 32 : index
    %c0_69 = arith.constant 0 : index
    %88 = vector.load %arg30[%c32_68, %c0_69] : memref<144x784xf32, #tpu.memory_space<vmem>>, vector<8x196xf32>
    tpu.vector_store %arg30[%c32_68, %c0_69], %87 {strides = array<i32>} : memref<144x784xf32, #tpu.memory_space<vmem>>, vector<8x196xf32>,
    %89 = vector.extract_strided_slice %63 {offsets = [0, 129], sizes = [8, 196], strides = [1, 1]} : vector<8x1040xf32> to vector<8x196xf32>
    %c5_70 = arith.constant 5 : index
    %c0_71 = arith.constant 0 : index
    %90 = vector.load %arg8[%c5_70, %c0_71] : memref<9x196xf32, #tpu.memory_space<vmem>>, vector<1x196xf32>
    %91 = vector.broadcast %90 : vector<1x196xf32> to vector<8x196xf32>
    %92 = arith.mulf %89, %91 : vector<8x196xf32>
    %c40_72 = arith.constant 40 : index
    %c0_73 = arith.constant 0 : index
    %93 = vector.load %arg30[%c40_72, %c0_73] : memref<144x784xf32, #tpu.memory_space<vmem>>, vector<8x196xf32>
    tpu.vector_store %arg30[%c40_72, %c0_73], %92 {strides = array<i32>} : memref<144x784xf32, #tpu.memory_space<vmem>>, vector<8x196xf32>,
    %94 = vector.extract_strided_slice %63 {offsets = [0, 141], sizes = [8, 196], strides = [1, 1]} : vector<8x1040xf32> to vector<8x196xf32>
    %c6_74 = arith.constant 6 : index
    %c0_75 = arith.constant 0 : index
    %95 = vector.load %arg8[%c6_74, %c0_75] : memref<9x196xf32, #tpu.memory_space<vmem>>, vector<1x196xf32>
    %96 = vector.broadcast %95 : vector<1x196xf32> to vector<8x196xf32>
    %97 = arith.mulf %94, %96 : vector<8x196xf32>
    %c48_76 = arith.constant 48 : index
    %c0_77 = arith.constant 0 : index
    %98 = vector.load %arg30[%c48_76, %c0_77] : memref<144x784xf32, #tpu.memory_space<vmem>>, vector<8x196xf32>
    tpu.vector_store %arg30[%c48_76, %c0_77], %97 {strides = array<i32>} : memref<144x784xf32, #tpu.memory_space<vmem>>, vector<8x196xf32>,
    %99 = vector.extract_strided_slice %63 {offsets = [0, 142], sizes = [8, 196], strides = [1, 1]} : vector<8x1040xf32> to vector<8x196xf32>
    %c7_78 = arith.constant 7 : index
    %c0_79 = arith.constant 0 : index
    %100 = vector.load %arg8[%c7_78, %c0_79] : memref<9x196xf32, #tpu.memory_space<vmem>>, vector<1x196xf32>
    %101 = vector.broadcast %100 : vector<1x196xf32> to vector<8x196xf32>
    %102 = arith.mulf %99, %101 : vector<8x196xf32>
    %c56_80 = arith.constant 56 : index
    %c0_81 = arith.constant 0 : index
    %103 = vector.load %arg30[%c56_80, %c0_81] : memref<144x784xf32, #tpu.memory_space<vmem>>, vector<8x196xf32>
    tpu.vector_store %arg30[%c56_80, %c0_81], %102 {strides = array<i32>} : memref<144x784xf32, #tpu.memory_space<vmem>>, vector<8x196xf32>,
    %104 = vector.extract_strided_slice %63 {offsets = [0, 143], sizes = [8, 196], strides = [1, 1]} : vector<8x1040xf32> to vector<8x196xf32>
    %c8_82 = arith.constant 8 : index
    %c0_83 = arith.constant 0 : index
    %105 = vector.load %arg8[%c8_82, %c0_83] : memref<9x196xf32, #tpu.memory_space<vmem>>, vector<1x196xf32>
    %106 = vector.broadcast %105 : vector<1x196xf32> to vector<8x196xf32>
    %107 = arith.mulf %104, %106 : vector<8x196xf32>
    %c64_84 = arith.constant 64 : index
    %c0_85 = arith.constant 0 : index
    %108 = vector.load %arg30[%c64_84, %c0_85] : memref<144x784xf32, #tpu.memory_space<vmem>>, vector<8x196xf32>
    tpu.vector_store %arg30[%c64_84, %c0_85], %107 {strides = array<i32>} : memref<144x784xf32, #tpu.memory_space<vmem>>, vector<8x196xf32>,
    %c0_86 = arith.constant 0 : index
    %c0_87 = arith.constant 0 : index
    %109 = vector.load %arg6[%c0_86, %c0_87] : memref<16x72xf32, #tpu.memory_space<vmem>>, vector<16x72xf32>
    %c0_88 = arith.constant 0 : index
    %c0_89 = arith.constant 0 : index
    %110 = vector.load %arg30[%c0_88, %c0_89] : memref<144x784xf32, #tpu.memory_space<vmem>>, vector<72x196xf32>
    %cst_90 = arith.constant dense<0.000000e+00> : vector<16x196xf32>
    %111 = tpu.matmul %109, %110, %cst_90 {dimension_numbers = #tpu.dot_dimension_numbers<[1], [0], [0], [1], [0, 0, 1, 1], [], []>} : vector<16x72xf32>, vector<72x196xf32>, vector<16x196xf32> -> vector<16x196xf32>
    %c0_91 = arith.constant 0 : index
    %c0_92 = arith.constant 0 : index
    %112 = vector.load %arg7[%c0_91, %c0_92] : memref<16x1xf32, #tpu.memory_space<vmem>>, vector<16x1xf32>
    %113 = vector.broadcast %112 : vector<16x1xf32> to vector<16x196xf32>
    %114 = arith.addf %111, %113 : vector<16x196xf32>
    %cst_93 = arith.constant 0.000000e+00 : f32
    %115 = vector.broadcast %cst_93 : f32 to vector<16x196xf32>
    %116 = arith.maximumf %114, %115 : vector<16x196xf32>
    %c0_94 = arith.constant 0 : index
    %c128_95 = arith.constant 128 : index
    %117 = vector.load %arg29[%c0_94, %c128_95] : memref<16x1040xf32, #tpu.memory_space<vmem>>, vector<16x196xf32>
    tpu.vector_store %arg29[%c0_94, %c128_95], %116 {strides = array<i32>} : memref<16x1040xf32, #tpu.memory_space<vmem>>, vector<16x196xf32>,
    %c0_96 = arith.constant 0 : index
    %c0_97 = arith.constant 0 : index
    %118 = vector.load %arg29[%c0_96, %c0_97] : memref<16x1040xf32, #tpu.memory_space<vmem>>, vector<16x1040xf32>
    %119 = vector.extract_strided_slice %118 {offsets = [0, 129], sizes = [16, 196], strides = [1, 1]} : vector<16x1040xf32> to vector<16x196xf32>
    %120 = arith.maximumf %116, %119 : vector<16x196xf32>
    %121 = vector.extract_strided_slice %118 {offsets = [0, 142], sizes = [16, 196], strides = [1, 1]} : vector<16x1040xf32> to vector<16x196xf32>
    %122 = arith.maximumf %120, %121 : vector<16x196xf32>
    %123 = vector.extract_strided_slice %118 {offsets = [0, 143], sizes = [16, 196], strides = [1, 1]} : vector<16x1040xf32> to vector<16x196xf32>
    %124 = arith.maximumf %122, %123 : vector<16x196xf32>
    %c0_98 = arith.constant 0 : index
    %c0_99 = arith.constant 0 : index
    %125 = vector.load %arg9[%c0_98, %c0_99] : memref<196x49xf32, #tpu.memory_space<vmem>>, vector<196x49xf32>
    %cst_100 = arith.constant dense<0.000000e+00> : vector<16x49xf32>
    %126 = tpu.matmul %124, %125, %cst_100 {dimension_numbers = #tpu.dot_dimension_numbers<[1], [0], [0], [1], [0, 0, 1, 1], [], []>} : vector<16x196xf32>, vector<196x49xf32>, vector<16x49xf32> -> vector<16x49xf32>
    %c0_101 = arith.constant 0 : index
    %c0_102 = arith.constant 0 : index
    %127 = vector.load %arg16[%c0_101, %c0_102] : memref<16x784xf32, #tpu.memory_space<vmem>>, vector<16x784xf32>
    %c0_103 = arith.constant 0 : index
    %c0_104 = arith.constant 0 : index
    %128 = vector.load %arg14[%c0_103, %c0_104] : memref<49x784xf32, #tpu.memory_space<vmem>>, vector<49x784xf32>
    %cst_105 = arith.constant dense<0.000000e+00> : vector<16x784xf32>
    %129 = tpu.matmul %126, %128, %cst_105 {dimension_numbers = #tpu.dot_dimension_numbers<[1], [0], [0], [1], [0, 0, 1, 1], [], []>} : vector<16x49xf32>, vector<49x784xf32>, vector<16x784xf32> -> vector<16x784xf32>
    %130 = arith.mulf %129, %127 : vector<16x784xf32>
    %cst_106 = arith.constant dense<0.000000e+00> : vector<784xf32>
    %131 = vector.multi_reduction <add>, %130, %cst_106 [0] : vector<16x784xf32> to vector<784xf32>
    %132 = vector.shape_cast %131 : vector<784xf32> to vector<1x784xf32>
    %c0_107 = arith.constant 0 : index
    %c0_108 = arith.constant 0 : index
    %133 = vector.load %arg10[%c0_107, %c0_108] : memref<784x32xf32, #tpu.memory_space<vmem>>, vector<784x32xf32>
    %cst_109 = arith.constant dense<0.000000e+00> : vector<1x32xf32>
    %134 = tpu.matmul %132, %133, %cst_109 {dimension_numbers = #tpu.dot_dimension_numbers<[1], [0], [0], [1], [0, 0, 1, 1], [], []>} : vector<1x784xf32>, vector<784x32xf32>, vector<1x32xf32> -> vector<1x32xf32>
    %c0_110 = arith.constant 0 : index
    %c0_111 = arith.constant 0 : index
    %135 = vector.load %arg11[%c0_110, %c0_111] : memref<1x32xf32, #tpu.memory_space<vmem>>, vector<1x32xf32>
    %136 = arith.addf %134, %135 : vector<1x32xf32>
    %c0_112 = arith.constant 0 : index
    %c0_113 = arith.constant 0 : index
    %137 = vector.load %arg12[%c0_112, %c0_113] : memref<32x784xf32, #tpu.memory_space<vmem>>, vector<32x784xf32>
    %cst_114 = arith.constant dense<0.000000e+00> : vector<1x784xf32>
    %138 = tpu.matmul %136, %137, %cst_114 {dimension_numbers = #tpu.dot_dimension_numbers<[1], [0], [0], [1], [0, 0, 1, 1], [], []>} : vector<1x32xf32>, vector<32x784xf32>, vector<1x784xf32> -> vector<1x784xf32>
    %c0_115 = arith.constant 0 : index
    %c0_116 = arith.constant 0 : index
    %139 = vector.load %arg13[%c0_115, %c0_116] : memref<1x784xf32, #tpu.memory_space<vmem>>, vector<1x784xf32>
    %140 = arith.addf %138, %139 : vector<1x784xf32>
    %141 = vector.broadcast %140 : vector<1x784xf32> to vector<16x784xf32>
    %142 = arith.mulf %141, %127 : vector<16x784xf32>
    %c0_117 = arith.constant 0 : index
    %c0_118 = arith.constant 0 : index
    %143 = vector.load %arg15[%c0_117, %c0_118] : memref<784x49xf32, #tpu.memory_space<vmem>>, vector<784x49xf32>
    %cst_119 = arith.constant dense<0.000000e+00> : vector<16x49xf32>
    %144 = tpu.matmul %142, %143, %cst_119 {dimension_numbers = #tpu.dot_dimension_numbers<[1], [0], [0], [1], [0, 0, 1, 1], [], []>} : vector<16x784xf32>, vector<784x49xf32>, vector<16x49xf32> -> vector<16x49xf32>
    %c0_120 = arith.constant 0 : index
    %c0_121 = arith.constant 0 : index
    %145 = vector.load %arg17[%c0_120, %c0_121] : memref<49x196xf32, #tpu.memory_space<vmem>>, vector<49x196xf32>
    %cst_122 = arith.constant dense<0.000000e+00> : vector<16x196xf32>
    %146 = tpu.matmul %144, %145, %cst_122 {dimension_numbers = #tpu.dot_dimension_numbers<[1], [0], [0], [1], [0, 0, 1, 1], [], []>} : vector<16x49xf32>, vector<49x196xf32>, vector<16x196xf32> -> vector<16x196xf32>
    %cst_123 = arith.constant 0.000000e+00 : f32
    %147 = vector.broadcast %cst_123 : f32 to vector<16x196xf32>
    %148 = arith.maximumf %146, %147 : vector<16x196xf32>
    %c0_124 = arith.constant 0 : index
    %c128_125 = arith.constant 128 : index
    %149 = vector.load %arg29[%c0_124, %c128_125] : memref<16x1040xf32, #tpu.memory_space<vmem>>, vector<16x196xf32>
    tpu.vector_store %arg29[%c0_124, %c128_125], %148 {strides = array<i32>} : memref<16x1040xf32, #tpu.memory_space<vmem>>, vector<16x196xf32>,
    %c0_126 = arith.constant 0 : index
    %c0_127 = arith.constant 0 : index
    %150 = vector.load %arg29[%c0_126, %c0_127] : memref<16x1040xf32, #tpu.memory_space<vmem>>, vector<16x1040xf32>
    %151 = vector.extract_strided_slice %150 {offsets = [0, 113], sizes = [16, 196], strides = [1, 1]} : vector<16x1040xf32> to vector<16x196xf32>
    %c0_128 = arith.constant 0 : index
    %c0_129 = arith.constant 0 : index
    %152 = vector.load %arg20[%c0_128, %c0_129] : memref<9x196xf32, #tpu.memory_space<vmem>>, vector<1x196xf32>
    %153 = vector.broadcast %152 : vector<1x196xf32> to vector<16x196xf32>
    %154 = arith.mulf %151, %153 : vector<16x196xf32>
    %c0_130 = arith.constant 0 : index
    %c0_131 = arith.constant 0 : index
    %155 = vector.load %arg30[%c0_130, %c0_131] : memref<144x784xf32, #tpu.memory_space<vmem>>, vector<16x196xf32>
    tpu.vector_store %arg30[%c0_130, %c0_131], %154 {strides = array<i32>} : memref<144x784xf32, #tpu.memory_space<vmem>>, vector<16x196xf32>,
    %156 = vector.extract_strided_slice %150 {offsets = [0, 114], sizes = [16, 196], strides = [1, 1]} : vector<16x1040xf32> to vector<16x196xf32>
    %c1_132 = arith.constant 1 : index
    %c0_133 = arith.constant 0 : index
    %157 = vector.load %arg20[%c1_132, %c0_133] : memref<9x196xf32, #tpu.memory_space<vmem>>, vector<1x196xf32>
    %158 = vector.broadcast %157 : vector<1x196xf32> to vector<16x196xf32>
    %159 = arith.mulf %156, %158 : vector<16x196xf32>
    %c16_134 = arith.constant 16 : index
    %c0_135 = arith.constant 0 : index
    %160 = vector.load %arg30[%c16_134, %c0_135] : memref<144x784xf32, #tpu.memory_space<vmem>>, vector<16x196xf32>
    tpu.vector_store %arg30[%c16_134, %c0_135], %159 {strides = array<i32>} : memref<144x784xf32, #tpu.memory_space<vmem>>, vector<16x196xf32>,
    %161 = vector.extract_strided_slice %150 {offsets = [0, 115], sizes = [16, 196], strides = [1, 1]} : vector<16x1040xf32> to vector<16x196xf32>
    %c2_136 = arith.constant 2 : index
    %c0_137 = arith.constant 0 : index
    %162 = vector.load %arg20[%c2_136, %c0_137] : memref<9x196xf32, #tpu.memory_space<vmem>>, vector<1x196xf32>
    %163 = vector.broadcast %162 : vector<1x196xf32> to vector<16x196xf32>
    %164 = arith.mulf %161, %163 : vector<16x196xf32>
    %c32_138 = arith.constant 32 : index
    %c0_139 = arith.constant 0 : index
    %165 = vector.load %arg30[%c32_138, %c0_139] : memref<144x784xf32, #tpu.memory_space<vmem>>, vector<16x196xf32>
    tpu.vector_store %arg30[%c32_138, %c0_139], %164 {strides = array<i32>} : memref<144x784xf32, #tpu.memory_space<vmem>>, vector<16x196xf32>,
    %166 = vector.extract_strided_slice %150 {offsets = [0, 127], sizes = [16, 196], strides = [1, 1]} : vector<16x1040xf32> to vector<16x196xf32>
    %c3_140 = arith.constant 3 : index
    %c0_141 = arith.constant 0 : index
    %167 = vector.load %arg20[%c3_140, %c0_141] : memref<9x196xf32, #tpu.memory_space<vmem>>, vector<1x196xf32>
    %168 = vector.broadcast %167 : vector<1x196xf32> to vector<16x196xf32>
    %169 = arith.mulf %166, %168 : vector<16x196xf32>
    %c48_142 = arith.constant 48 : index
    %c0_143 = arith.constant 0 : index
    %170 = vector.load %arg30[%c48_142, %c0_143] : memref<144x784xf32, #tpu.memory_space<vmem>>, vector<16x196xf32>
    tpu.vector_store %arg30[%c48_142, %c0_143], %169 {strides = array<i32>} : memref<144x784xf32, #tpu.memory_space<vmem>>, vector<16x196xf32>,
    %171 = vector.extract_strided_slice %150 {offsets = [0, 128], sizes = [16, 196], strides = [1, 1]} : vector<16x1040xf32> to vector<16x196xf32>
    %c4_144 = arith.constant 4 : index
    %c0_145 = arith.constant 0 : index
    %172 = vector.load %arg20[%c4_144, %c0_145] : memref<9x196xf32, #tpu.memory_space<vmem>>, vector<1x196xf32>
    %173 = vector.broadcast %172 : vector<1x196xf32> to vector<16x196xf32>
    %174 = arith.mulf %171, %173 : vector<16x196xf32>
    %c64_146 = arith.constant 64 : index
    %c0_147 = arith.constant 0 : index
    %175 = vector.load %arg30[%c64_146, %c0_147] : memref<144x784xf32, #tpu.memory_space<vmem>>, vector<16x196xf32>
    tpu.vector_store %arg30[%c64_146, %c0_147], %174 {strides = array<i32>} : memref<144x784xf32, #tpu.memory_space<vmem>>, vector<16x196xf32>,
    %176 = vector.extract_strided_slice %150 {offsets = [0, 129], sizes = [16, 196], strides = [1, 1]} : vector<16x1040xf32> to vector<16x196xf32>
    %c5_148 = arith.constant 5 : index
    %c0_149 = arith.constant 0 : index
    %177 = vector.load %arg20[%c5_148, %c0_149] : memref<9x196xf32, #tpu.memory_space<vmem>>, vector<1x196xf32>
    %178 = vector.broadcast %177 : vector<1x196xf32> to vector<16x196xf32>
    %179 = arith.mulf %176, %178 : vector<16x196xf32>
    %c80 = arith.constant 80 : index
    %c0_150 = arith.constant 0 : index
    %180 = vector.load %arg30[%c80, %c0_150] : memref<144x784xf32, #tpu.memory_space<vmem>>, vector<16x196xf32>
    tpu.vector_store %arg30[%c80, %c0_150], %179 {strides = array<i32>} : memref<144x784xf32, #tpu.memory_space<vmem>>, vector<16x196xf32>,
    %181 = vector.extract_strided_slice %150 {offsets = [0, 141], sizes = [16, 196], strides = [1, 1]} : vector<16x1040xf32> to vector<16x196xf32>
    %c6_151 = arith.constant 6 : index
    %c0_152 = arith.constant 0 : index
    %182 = vector.load %arg20[%c6_151, %c0_152] : memref<9x196xf32, #tpu.memory_space<vmem>>, vector<1x196xf32>
    %183 = vector.broadcast %182 : vector<1x196xf32> to vector<16x196xf32>
    %184 = arith.mulf %181, %183 : vector<16x196xf32>
    %c96 = arith.constant 96 : index
    %c0_153 = arith.constant 0 : index
    %185 = vector.load %arg30[%c96, %c0_153] : memref<144x784xf32, #tpu.memory_space<vmem>>, vector<16x196xf32>
    tpu.vector_store %arg30[%c96, %c0_153], %184 {strides = array<i32>} : memref<144x784xf32, #tpu.memory_space<vmem>>, vector<16x196xf32>,
    %186 = vector.extract_strided_slice %150 {offsets = [0, 142], sizes = [16, 196], strides = [1, 1]} : vector<16x1040xf32> to vector<16x196xf32>
    %c7_154 = arith.constant 7 : index
    %c0_155 = arith.constant 0 : index
    %187 = vector.load %arg20[%c7_154, %c0_155] : memref<9x196xf32, #tpu.memory_space<vmem>>, vector<1x196xf32>
    %188 = vector.broadcast %187 : vector<1x196xf32> to vector<16x196xf32>
    %189 = arith.mulf %186, %188 : vector<16x196xf32>
    %c112 = arith.constant 112 : index
    %c0_156 = arith.constant 0 : index
    %190 = vector.load %arg30[%c112, %c0_156] : memref<144x784xf32, #tpu.memory_space<vmem>>, vector<16x196xf32>
    tpu.vector_store %arg30[%c112, %c0_156], %189 {strides = array<i32>} : memref<144x784xf32, #tpu.memory_space<vmem>>, vector<16x196xf32>,
    %191 = vector.extract_strided_slice %150 {offsets = [0, 143], sizes = [16, 196], strides = [1, 1]} : vector<16x1040xf32> to vector<16x196xf32>
    %c8_157 = arith.constant 8 : index
    %c0_158 = arith.constant 0 : index
    %192 = vector.load %arg20[%c8_157, %c0_158] : memref<9x196xf32, #tpu.memory_space<vmem>>, vector<1x196xf32>
    %193 = vector.broadcast %192 : vector<1x196xf32> to vector<16x196xf32>
    %194 = arith.mulf %191, %193 : vector<16x196xf32>
    %c128_159 = arith.constant 128 : index
    %c0_160 = arith.constant 0 : index
    %195 = vector.load %arg30[%c128_159, %c0_160] : memref<144x784xf32, #tpu.memory_space<vmem>>, vector<16x196xf32>
    tpu.vector_store %arg30[%c128_159, %c0_160], %194 {strides = array<i32>} : memref<144x784xf32, #tpu.memory_space<vmem>>, vector<16x196xf32>,
    %c0_161 = arith.constant 0 : index
    %c0_162 = arith.constant 0 : index
    %196 = vector.load %arg18[%c0_161, %c0_162] : memref<8x144xf32, #tpu.memory_space<vmem>>, vector<8x144xf32>
    %c0_163 = arith.constant 0 : index
    %c0_164 = arith.constant 0 : index
    %197 = vector.load %arg30[%c0_163, %c0_164] : memref<144x784xf32, #tpu.memory_space<vmem>>, vector<144x196xf32>
    %cst_165 = arith.constant dense<0.000000e+00> : vector<8x196xf32>
    %198 = tpu.matmul %196, %197, %cst_165 {dimension_numbers = #tpu.dot_dimension_numbers<[1], [0], [0], [1], [0, 0, 1, 1], [], []>} : vector<8x144xf32>, vector<144x196xf32>, vector<8x196xf32> -> vector<8x196xf32>
    %c0_166 = arith.constant 0 : index
    %c0_167 = arith.constant 0 : index
    %199 = vector.load %arg19[%c0_166, %c0_167] : memref<8x1xf32, #tpu.memory_space<vmem>>, vector<8x1xf32>
    %200 = vector.broadcast %199 : vector<8x1xf32> to vector<8x196xf32>
    %201 = arith.addf %198, %200 : vector<8x196xf32>
    %cst_168 = arith.constant 0.000000e+00 : f32
    %202 = vector.broadcast %cst_168 : f32 to vector<8x196xf32>
    %203 = arith.maximumf %201, %202 : vector<8x196xf32>
    %c0_169 = arith.constant 0 : index
    %c0_170 = arith.constant 0 : index
    %204 = vector.load %arg21[%c0_169, %c0_170] : memref<196x784xf32, #tpu.memory_space<vmem>>, vector<196x784xf32>
    %cst_171 = arith.constant dense<0.000000e+00> : vector<8x784xf32>
    %205 = tpu.matmul %203, %204, %cst_171 {dimension_numbers = #tpu.dot_dimension_numbers<[1], [0], [0], [1], [0, 0, 1, 1], [], []>} : vector<8x196xf32>, vector<196x784xf32>, vector<8x784xf32> -> vector<8x784xf32>
    %cst_172 = arith.constant 0.000000e+00 : f32
    %206 = vector.broadcast %cst_172 : f32 to vector<8x784xf32>
    %207 = arith.maximumf %205, %206 : vector<8x784xf32>
    %c0_173 = arith.constant 0 : index
    %c128_174 = arith.constant 128 : index
    %208 = vector.load %arg29[%c0_173, %c128_174] : memref<16x1040xf32, #tpu.memory_space<vmem>>, vector<8x784xf32>
    tpu.vector_store %arg29[%c0_173, %c128_174], %207 {strides = array<i32>} : memref<16x1040xf32, #tpu.memory_space<vmem>>, vector<8x784xf32>,
    %c0_175 = arith.constant 0 : index
    %c0_176 = arith.constant 0 : index
    %209 = vector.load %arg29[%c0_175, %c0_176] : memref<16x1040xf32, #tpu.memory_space<vmem>>, vector<8x1040xf32>
    %210 = vector.extract_strided_slice %209 {offsets = [0, 99], sizes = [8, 784], strides = [1, 1]} : vector<8x1040xf32> to vector<8x784xf32>
    %c0_177 = arith.constant 0 : index
    %c0_178 = arith.constant 0 : index
    %211 = vector.load %arg24[%c0_177, %c0_178] : memref<9x784xf32, #tpu.memory_space<vmem>>, vector<1x784xf32>
    %212 = vector.broadcast %211 : vector<1x784xf32> to vector<8x784xf32>
    %213 = arith.mulf %210, %212 : vector<8x784xf32>
    %c0_179 = arith.constant 0 : index
    %c0_180 = arith.constant 0 : index
    %214 = vector.load %arg30[%c0_179, %c0_180] : memref<144x784xf32, #tpu.memory_space<vmem>>, vector<8x784xf32>
    tpu.vector_store %arg30[%c0_179, %c0_180], %213 {strides = array<i32>} : memref<144x784xf32, #tpu.memory_space<vmem>>, vector<8x784xf32>,
    %215 = vector.extract_strided_slice %209 {offsets = [0, 100], sizes = [8, 784], strides = [1, 1]} : vector<8x1040xf32> to vector<8x784xf32>
    %c1_181 = arith.constant 1 : index
    %c0_182 = arith.constant 0 : index
    %216 = vector.load %arg24[%c1_181, %c0_182] : memref<9x784xf32, #tpu.memory_space<vmem>>, vector<1x784xf32>
    %217 = vector.broadcast %216 : vector<1x784xf32> to vector<8x784xf32>
    %218 = arith.mulf %215, %217 : vector<8x784xf32>
    %c8_183 = arith.constant 8 : index
    %c0_184 = arith.constant 0 : index
    %219 = vector.load %arg30[%c8_183, %c0_184] : memref<144x784xf32, #tpu.memory_space<vmem>>, vector<8x784xf32>
    tpu.vector_store %arg30[%c8_183, %c0_184], %218 {strides = array<i32>} : memref<144x784xf32, #tpu.memory_space<vmem>>, vector<8x784xf32>,
    %220 = vector.extract_strided_slice %209 {offsets = [0, 101], sizes = [8, 784], strides = [1, 1]} : vector<8x1040xf32> to vector<8x784xf32>
    %c2_185 = arith.constant 2 : index
    %c0_186 = arith.constant 0 : index
    %221 = vector.load %arg24[%c2_185, %c0_186] : memref<9x784xf32, #tpu.memory_space<vmem>>, vector<1x784xf32>
    %222 = vector.broadcast %221 : vector<1x784xf32> to vector<8x784xf32>
    %223 = arith.mulf %220, %222 : vector<8x784xf32>
    %c16_187 = arith.constant 16 : index
    %c0_188 = arith.constant 0 : index
    %224 = vector.load %arg30[%c16_187, %c0_188] : memref<144x784xf32, #tpu.memory_space<vmem>>, vector<8x784xf32>
    tpu.vector_store %arg30[%c16_187, %c0_188], %223 {strides = array<i32>} : memref<144x784xf32, #tpu.memory_space<vmem>>, vector<8x784xf32>,
    %225 = vector.extract_strided_slice %209 {offsets = [0, 127], sizes = [8, 784], strides = [1, 1]} : vector<8x1040xf32> to vector<8x784xf32>
    %c3_189 = arith.constant 3 : index
    %c0_190 = arith.constant 0 : index
    %226 = vector.load %arg24[%c3_189, %c0_190] : memref<9x784xf32, #tpu.memory_space<vmem>>, vector<1x784xf32>
    %227 = vector.broadcast %226 : vector<1x784xf32> to vector<8x784xf32>
    %228 = arith.mulf %225, %227 : vector<8x784xf32>
    %c24_191 = arith.constant 24 : index
    %c0_192 = arith.constant 0 : index
    %229 = vector.load %arg30[%c24_191, %c0_192] : memref<144x784xf32, #tpu.memory_space<vmem>>, vector<8x784xf32>
    tpu.vector_store %arg30[%c24_191, %c0_192], %228 {strides = array<i32>} : memref<144x784xf32, #tpu.memory_space<vmem>>, vector<8x784xf32>,
    %230 = vector.extract_strided_slice %209 {offsets = [0, 128], sizes = [8, 784], strides = [1, 1]} : vector<8x1040xf32> to vector<8x784xf32>
    %c4_193 = arith.constant 4 : index
    %c0_194 = arith.constant 0 : index
    %231 = vector.load %arg24[%c4_193, %c0_194] : memref<9x784xf32, #tpu.memory_space<vmem>>, vector<1x784xf32>
    %232 = vector.broadcast %231 : vector<1x784xf32> to vector<8x784xf32>
    %233 = arith.mulf %230, %232 : vector<8x784xf32>
    %c32_195 = arith.constant 32 : index
    %c0_196 = arith.constant 0 : index
    %234 = vector.load %arg30[%c32_195, %c0_196] : memref<144x784xf32, #tpu.memory_space<vmem>>, vector<8x784xf32>
    tpu.vector_store %arg30[%c32_195, %c0_196], %233 {strides = array<i32>} : memref<144x784xf32, #tpu.memory_space<vmem>>, vector<8x784xf32>,
    %235 = vector.extract_strided_slice %209 {offsets = [0, 129], sizes = [8, 784], strides = [1, 1]} : vector<8x1040xf32> to vector<8x784xf32>
    %c5_197 = arith.constant 5 : index
    %c0_198 = arith.constant 0 : index
    %236 = vector.load %arg24[%c5_197, %c0_198] : memref<9x784xf32, #tpu.memory_space<vmem>>, vector<1x784xf32>
    %237 = vector.broadcast %236 : vector<1x784xf32> to vector<8x784xf32>
    %238 = arith.mulf %235, %237 : vector<8x784xf32>
    %c40_199 = arith.constant 40 : index
    %c0_200 = arith.constant 0 : index
    %239 = vector.load %arg30[%c40_199, %c0_200] : memref<144x784xf32, #tpu.memory_space<vmem>>, vector<8x784xf32>
    tpu.vector_store %arg30[%c40_199, %c0_200], %238 {strides = array<i32>} : memref<144x784xf32, #tpu.memory_space<vmem>>, vector<8x784xf32>,
    %240 = vector.extract_strided_slice %209 {offsets = [0, 155], sizes = [8, 784], strides = [1, 1]} : vector<8x1040xf32> to vector<8x784xf32>
    %c6_201 = arith.constant 6 : index
    %c0_202 = arith.constant 0 : index
    %241 = vector.load %arg24[%c6_201, %c0_202] : memref<9x784xf32, #tpu.memory_space<vmem>>, vector<1x784xf32>
    %242 = vector.broadcast %241 : vector<1x784xf32> to vector<8x784xf32>
    %243 = arith.mulf %240, %242 : vector<8x784xf32>
    %c48_203 = arith.constant 48 : index
    %c0_204 = arith.constant 0 : index
    %244 = vector.load %arg30[%c48_203, %c0_204] : memref<144x784xf32, #tpu.memory_space<vmem>>, vector<8x784xf32>
    tpu.vector_store %arg30[%c48_203, %c0_204], %243 {strides = array<i32>} : memref<144x784xf32, #tpu.memory_space<vmem>>, vector<8x784xf32>,
    %245 = vector.extract_strided_slice %209 {offsets = [0, 156], sizes = [8, 784], strides = [1, 1]} : vector<8x1040xf32> to vector<8x784xf32>
    %c7_205 = arith.constant 7 : index
    %c0_206 = arith.constant 0 : index
    %246 = vector.load %arg24[%c7_205, %c0_206] : memref<9x784xf32, #tpu.memory_space<vmem>>, vector<1x784xf32>
    %247 = vector.broadcast %246 : vector<1x784xf32> to vector<8x784xf32>
    %248 = arith.mulf %245, %247 : vector<8x784xf32>
    %c56_207 = arith.constant 56 : index
    %c0_208 = arith.constant 0 : index
    %249 = vector.load %arg30[%c56_207, %c0_208] : memref<144x784xf32, #tpu.memory_space<vmem>>, vector<8x784xf32>
    tpu.vector_store %arg30[%c56_207, %c0_208], %248 {strides = array<i32>} : memref<144x784xf32, #tpu.memory_space<vmem>>, vector<8x784xf32>,
    %250 = vector.extract_strided_slice %209 {offsets = [0, 157], sizes = [8, 784], strides = [1, 1]} : vector<8x1040xf32> to vector<8x784xf32>
    %c8_209 = arith.constant 8 : index
    %c0_210 = arith.constant 0 : index
    %251 = vector.load %arg24[%c8_209, %c0_210] : memref<9x784xf32, #tpu.memory_space<vmem>>, vector<1x784xf32>
    %252 = vector.broadcast %251 : vector<1x784xf32> to vector<8x784xf32>
    %253 = arith.mulf %250, %252 : vector<8x784xf32>
    %c64_211 = arith.constant 64 : index
    %c0_212 = arith.constant 0 : index
    %254 = vector.load %arg30[%c64_211, %c0_212] : memref<144x784xf32, #tpu.memory_space<vmem>>, vector<8x784xf32>
    tpu.vector_store %arg30[%c64_211, %c0_212], %253 {strides = array<i32>} : memref<144x784xf32, #tpu.memory_space<vmem>>, vector<8x784xf32>,
    %c0_213 = arith.constant 0 : index
    %c0_214 = arith.constant 0 : index
    %255 = vector.load %arg22[%c0_213, %c0_214] : memref<4x72xf32, #tpu.memory_space<vmem>>, vector<4x72xf32>
    %c0_215 = arith.constant 0 : index
    %c0_216 = arith.constant 0 : index
    %256 = vector.load %arg30[%c0_215, %c0_216] : memref<144x784xf32, #tpu.memory_space<vmem>>, vector<72x784xf32>
    %cst_217 = arith.constant dense<0.000000e+00> : vector<4x784xf32>
    %257 = tpu.matmul %255, %256, %cst_217 {dimension_numbers = #tpu.dot_dimension_numbers<[1], [0], [0], [1], [0, 0, 1, 1], [], []>} : vector<4x72xf32>, vector<72x784xf32>, vector<4x784xf32> -> vector<4x784xf32>
    %c0_218 = arith.constant 0 : index
    %c0_219 = arith.constant 0 : index
    %258 = vector.load %arg23[%c0_218, %c0_219] : memref<4x1xf32, #tpu.memory_space<vmem>>, vector<4x1xf32>
    %259 = vector.broadcast %258 : vector<4x1xf32> to vector<4x784xf32>
    %260 = arith.addf %257, %259 : vector<4x784xf32>
    %cst_220 = arith.constant 0.000000e+00 : f32
    %261 = vector.broadcast %cst_220 : f32 to vector<4x784xf32>
    %262 = arith.maximumf %260, %261 : vector<4x784xf32>
    %c0_221 = arith.constant 0 : index
    %c128_222 = arith.constant 128 : index
    %263 = vector.load %arg29[%c0_221, %c128_222] : memref<16x1040xf32, #tpu.memory_space<vmem>>, vector<4x784xf32>
    tpu.vector_store %arg29[%c0_221, %c128_222], %262 {strides = array<i32>} : memref<16x1040xf32, #tpu.memory_space<vmem>>, vector<4x784xf32>,
    %c0_223 = arith.constant 0 : index
    %c0_224 = arith.constant 0 : index
    %264 = vector.load %arg29[%c0_223, %c0_224] : memref<16x1040xf32, #tpu.memory_space<vmem>>, vector<4x1040xf32>
    %265 = vector.extract_strided_slice %264 {offsets = [0, 99], sizes = [4, 784], strides = [1, 1]} : vector<4x1040xf32> to vector<4x784xf32>
    %c0_225 = arith.constant 0 : index
    %c0_226 = arith.constant 0 : index
    %266 = vector.load %arg27[%c0_225, %c0_226] : memref<9x784xf32, #tpu.memory_space<vmem>>, vector<1x784xf32>
    %267 = vector.broadcast %266 : vector<1x784xf32> to vector<4x784xf32>
    %268 = arith.mulf %265, %267 : vector<4x784xf32>
    %c0_227 = arith.constant 0 : index
    %c0_228 = arith.constant 0 : index
    %269 = vector.load %arg30[%c0_227, %c0_228] : memref<144x784xf32, #tpu.memory_space<vmem>>, vector<4x784xf32>
    tpu.vector_store %arg30[%c0_227, %c0_228], %268 {strides = array<i32>} : memref<144x784xf32, #tpu.memory_space<vmem>>, vector<4x784xf32>,
    %270 = vector.extract_strided_slice %264 {offsets = [0, 100], sizes = [4, 784], strides = [1, 1]} : vector<4x1040xf32> to vector<4x784xf32>
    %c1_229 = arith.constant 1 : index
    %c0_230 = arith.constant 0 : index
    %271 = vector.load %arg27[%c1_229, %c0_230] : memref<9x784xf32, #tpu.memory_space<vmem>>, vector<1x784xf32>
    %272 = vector.broadcast %271 : vector<1x784xf32> to vector<4x784xf32>
    %273 = arith.mulf %270, %272 : vector<4x784xf32>
    %c8_231 = arith.constant 8 : index
    %c0_232 = arith.constant 0 : index
    %274 = vector.load %arg30[%c8_231, %c0_232] : memref<144x784xf32, #tpu.memory_space<vmem>>, vector<4x784xf32>
    tpu.vector_store %arg30[%c8_231, %c0_232], %273 {strides = array<i32>} : memref<144x784xf32, #tpu.memory_space<vmem>>, vector<4x784xf32>,
    %275 = vector.extract_strided_slice %264 {offsets = [0, 101], sizes = [4, 784], strides = [1, 1]} : vector<4x1040xf32> to vector<4x784xf32>
    %c2_233 = arith.constant 2 : index
    %c0_234 = arith.constant 0 : index
    %276 = vector.load %arg27[%c2_233, %c0_234] : memref<9x784xf32, #tpu.memory_space<vmem>>, vector<1x784xf32>
    %277 = vector.broadcast %276 : vector<1x784xf32> to vector<4x784xf32>
    %278 = arith.mulf %275, %277 : vector<4x784xf32>
    %c16_235 = arith.constant 16 : index
    %c0_236 = arith.constant 0 : index
    %279 = vector.load %arg30[%c16_235, %c0_236] : memref<144x784xf32, #tpu.memory_space<vmem>>, vector<4x784xf32>
    tpu.vector_store %arg30[%c16_235, %c0_236], %278 {strides = array<i32>} : memref<144x784xf32, #tpu.memory_space<vmem>>, vector<4x784xf32>,
    %280 = vector.extract_strided_slice %264 {offsets = [0, 127], sizes = [4, 784], strides = [1, 1]} : vector<4x1040xf32> to vector<4x784xf32>
    %c3_237 = arith.constant 3 : index
    %c0_238 = arith.constant 0 : index
    %281 = vector.load %arg27[%c3_237, %c0_238] : memref<9x784xf32, #tpu.memory_space<vmem>>, vector<1x784xf32>
    %282 = vector.broadcast %281 : vector<1x784xf32> to vector<4x784xf32>
    %283 = arith.mulf %280, %282 : vector<4x784xf32>
    %c24_239 = arith.constant 24 : index
    %c0_240 = arith.constant 0 : index
    %284 = vector.load %arg30[%c24_239, %c0_240] : memref<144x784xf32, #tpu.memory_space<vmem>>, vector<4x784xf32>
    tpu.vector_store %arg30[%c24_239, %c0_240], %283 {strides = array<i32>} : memref<144x784xf32, #tpu.memory_space<vmem>>, vector<4x784xf32>,
    %285 = vector.extract_strided_slice %264 {offsets = [0, 128], sizes = [4, 784], strides = [1, 1]} : vector<4x1040xf32> to vector<4x784xf32>
    %c4_241 = arith.constant 4 : index
    %c0_242 = arith.constant 0 : index
    %286 = vector.load %arg27[%c4_241, %c0_242] : memref<9x784xf32, #tpu.memory_space<vmem>>, vector<1x784xf32>
    %287 = vector.broadcast %286 : vector<1x784xf32> to vector<4x784xf32>
    %288 = arith.mulf %285, %287 : vector<4x784xf32>
    %c32_243 = arith.constant 32 : index
    %c0_244 = arith.constant 0 : index
    %289 = vector.load %arg30[%c32_243, %c0_244] : memref<144x784xf32, #tpu.memory_space<vmem>>, vector<4x784xf32>
    tpu.vector_store %arg30[%c32_243, %c0_244], %288 {strides = array<i32>} : memref<144x784xf32, #tpu.memory_space<vmem>>, vector<4x784xf32>,
    %290 = vector.extract_strided_slice %264 {offsets = [0, 129], sizes = [4, 784], strides = [1, 1]} : vector<4x1040xf32> to vector<4x784xf32>
    %c5_245 = arith.constant 5 : index
    %c0_246 = arith.constant 0 : index
    %291 = vector.load %arg27[%c5_245, %c0_246] : memref<9x784xf32, #tpu.memory_space<vmem>>, vector<1x784xf32>
    %292 = vector.broadcast %291 : vector<1x784xf32> to vector<4x784xf32>
    %293 = arith.mulf %290, %292 : vector<4x784xf32>
    %c40_247 = arith.constant 40 : index
    %c0_248 = arith.constant 0 : index
    %294 = vector.load %arg30[%c40_247, %c0_248] : memref<144x784xf32, #tpu.memory_space<vmem>>, vector<4x784xf32>
    tpu.vector_store %arg30[%c40_247, %c0_248], %293 {strides = array<i32>} : memref<144x784xf32, #tpu.memory_space<vmem>>, vector<4x784xf32>,
    %295 = vector.extract_strided_slice %264 {offsets = [0, 155], sizes = [4, 784], strides = [1, 1]} : vector<4x1040xf32> to vector<4x784xf32>
    %c6_249 = arith.constant 6 : index
    %c0_250 = arith.constant 0 : index
    %296 = vector.load %arg27[%c6_249, %c0_250] : memref<9x784xf32, #tpu.memory_space<vmem>>, vector<1x784xf32>
    %297 = vector.broadcast %296 : vector<1x784xf32> to vector<4x784xf32>
    %298 = arith.mulf %295, %297 : vector<4x784xf32>
    %c48_251 = arith.constant 48 : index
    %c0_252 = arith.constant 0 : index
    %299 = vector.load %arg30[%c48_251, %c0_252] : memref<144x784xf32, #tpu.memory_space<vmem>>, vector<4x784xf32>
    tpu.vector_store %arg30[%c48_251, %c0_252], %298 {strides = array<i32>} : memref<144x784xf32, #tpu.memory_space<vmem>>, vector<4x784xf32>,
    %300 = vector.extract_strided_slice %264 {offsets = [0, 156], sizes = [4, 784], strides = [1, 1]} : vector<4x1040xf32> to vector<4x784xf32>
    %c7_253 = arith.constant 7 : index
    %c0_254 = arith.constant 0 : index
    %301 = vector.load %arg27[%c7_253, %c0_254] : memref<9x784xf32, #tpu.memory_space<vmem>>, vector<1x784xf32>
    %302 = vector.broadcast %301 : vector<1x784xf32> to vector<4x784xf32>
    %303 = arith.mulf %300, %302 : vector<4x784xf32>
    %c56_255 = arith.constant 56 : index
    %c0_256 = arith.constant 0 : index
    %304 = vector.load %arg30[%c56_255, %c0_256] : memref<144x784xf32, #tpu.memory_space<vmem>>, vector<4x784xf32>
    tpu.vector_store %arg30[%c56_255, %c0_256], %303 {strides = array<i32>} : memref<144x784xf32, #tpu.memory_space<vmem>>, vector<4x784xf32>,
    %305 = vector.extract_strided_slice %264 {offsets = [0, 157], sizes = [4, 784], strides = [1, 1]} : vector<4x1040xf32> to vector<4x784xf32>
    %c8_257 = arith.constant 8 : index
    %c0_258 = arith.constant 0 : index
    %306 = vector.load %arg27[%c8_257, %c0_258] : memref<9x784xf32, #tpu.memory_space<vmem>>, vector<1x784xf32>
    %307 = vector.broadcast %306 : vector<1x784xf32> to vector<4x784xf32>
    %308 = arith.mulf %305, %307 : vector<4x784xf32>
    %c64_259 = arith.constant 64 : index
    %c0_260 = arith.constant 0 : index
    %309 = vector.load %arg30[%c64_259, %c0_260] : memref<144x784xf32, #tpu.memory_space<vmem>>, vector<4x784xf32>
    tpu.vector_store %arg30[%c64_259, %c0_260], %308 {strides = array<i32>} : memref<144x784xf32, #tpu.memory_space<vmem>>, vector<4x784xf32>,
    %c0_261 = arith.constant 0 : index
    %c0_262 = arith.constant 0 : index
    %310 = vector.load %arg25[%c0_261, %c0_262] : memref<1x72xf32, #tpu.memory_space<vmem>>, vector<1x72xf32>
    %c0_263 = arith.constant 0 : index
    %c0_264 = arith.constant 0 : index
    %311 = vector.load %arg30[%c0_263, %c0_264] : memref<144x784xf32, #tpu.memory_space<vmem>>, vector<72x784xf32>
    %cst_265 = arith.constant dense<0.000000e+00> : vector<1x784xf32>
    %312 = tpu.matmul %310, %311, %cst_265 {dimension_numbers = #tpu.dot_dimension_numbers<[1], [0], [0], [1], [0, 0, 1, 1], [], []>} : vector<1x72xf32>, vector<72x784xf32>, vector<1x784xf32> -> vector<1x784xf32>
    %c0_266 = arith.constant 0 : index
    %c0_267 = arith.constant 0 : index
    %313 = vector.load %arg26[%c0_266, %c0_267] : memref<1x1xf32, #tpu.memory_space<vmem>>, vector<1x1xf32>
    %314 = vector.broadcast %313 : vector<1x1xf32> to vector<1x784xf32>
    %315 = arith.addf %312, %314 : vector<1x784xf32>
    %c0_268 = arith.constant 0 : index
    %c0_269 = arith.constant 0 : index
    %c0_270 = arith.constant 0 : index
    %316 = vector.load %arg28[%c0_268, %c0_269, %c0_270] : memref<1x1x784xf32, #tpu.memory_space<vmem>>, vector<1x1x784xf32>
    %317 = vector.shape_cast %316 : vector<1x1x784xf32> to vector<1x784xf32>
    %318 = vector.shape_cast %315 : vector<1x784xf32> to vector<1x1x784xf32>
    tpu.vector_store %arg28[%c0_268, %c0_269, %c0_270], %318 {strides = array<i32>} : memref<1x1x784xf32, #tpu.memory_space<vmem>>, vector<1x1x784xf32>,
    return
  }
  func.func @transform_0(%arg0: i32) -> (i32, i32, i32) {
    %c0_i32 = arith.constant 0 : i32
    %c0_i32_0 = arith.constant 0 : i32
    %c0_i32_1 = arith.constant 0 : i32
    return %arg0, %c0_i32, %c0_i32_0 : i32, i32, i32
  }
  func.func @transform_1(%arg0: i32) -> (i32, i32) {
    %c0_i32 = arith.constant 0 : i32
    %c0_i32_0 = arith.constant 0 : i32
    %c0_i32_1 = arith.constant 0 : i32
    return %c0_i32, %c0_i32_0 : i32, i32
  }
  func.func @transform_2(%arg0: i32) -> (i32, i32) {
    %c0_i32 = arith.constant 0 : i32
    %c0_i32_0 = arith.constant 0 : i32
    %c0_i32_1 = arith.constant 0 : i32
    return %c0_i32, %c0_i32_0 : i32, i32
  }
  func.func @transform_3(%arg0: i32) -> (i32, i32) {
    %c0_i32 = arith.constant 0 : i32
    %c0_i32_0 = arith.constant 0 : i32
    %c0_i32_1 = arith.constant 0 : i32
    return %c0_i32, %c0_i32_0 : i32, i32
  }
  func.func @transform_4(%arg0: i32) -> (i32, i32) {
    %c0_i32 = arith.constant 0 : i32
    %c0_i32_0 = arith.constant 0 : i32
    %c0_i32_1 = arith.constant 0 : i32
    return %c0_i32, %c0_i32_0 : i32, i32
  }
  func.func @transform_5(%arg0: i32) -> (i32, i32) {
    %c0_i32 = arith.constant 0 : i32
    %c0_i32_0 = arith.constant 0 : i32
    %c0_i32_1 = arith.constant 0 : i32
    return %c0_i32, %c0_i32_0 : i32, i32
  }
  func.func @transform_6(%arg0: i32) -> (i32, i32) {
    %c0_i32 = arith.constant 0 : i32
    %c0_i32_0 = arith.constant 0 : i32
    %c0_i32_1 = arith.constant 0 : i32
    return %c0_i32, %c0_i32_0 : i32, i32
  }
  func.func @transform_7(%arg0: i32) -> (i32, i32) {
    %c0_i32 = arith.constant 0 : i32
    %c0_i32_0 = arith.constant 0 : i32
    %c0_i32_1 = arith.constant 0 : i32
    return %c0_i32, %c0_i32_0 : i32, i32
  }
  func.func @transform_8(%arg0: i32) -> (i32, i32) {
    %c0_i32 = arith.constant 0 : i32
    %c0_i32_0 = arith.constant 0 : i32
    %c0_i32_1 = arith.constant 0 : i32
    return %c0_i32, %c0_i32_0 : i32, i32
  }
  func.func @transform_9(%arg0: i32) -> (i32, i32) {
    %c0_i32 = arith.constant 0 : i32
    %c0_i32_0 = arith.constant 0 : i32
    %c0_i32_1 = arith.constant 0 : i32
    return %c0_i32, %c0_i32_0 : i32, i32
  }
  func.func @transform_10(%arg0: i32) -> (i32, i32) {
    %c0_i32 = arith.constant 0 : i32
    %c0_i32_0 = arith.constant 0 : i32
    %c0_i32_1 = arith.constant 0 : i32
    return %c0_i32, %c0_i32_0 : i32, i32
  }
  func.func @transform_11(%arg0: i32) -> (i32, i32) {
    %c0_i32 = arith.constant 0 : i32
    %c0_i32_0 = arith.constant 0 : i32
    %c0_i32_1 = arith.constant 0 : i32
    return %c0_i32, %c0_i32_0 : i32, i32
  }
  func.func @transform_12(%arg0: i32) -> (i32, i32) {
    %c0_i32 = arith.constant 0 : i32
    %c0_i32_0 = arith.constant 0 : i32
    %c0_i32_1 = arith.constant 0 : i32
    return %c0_i32, %c0_i32_0 : i32, i32
  }
  func.func @transform_13(%arg0: i32) -> (i32, i32) {
    %c0_i32 = arith.constant 0 : i32
    %c0_i32_0 = arith.constant 0 : i32
    %c0_i32_1 = arith.constant 0 : i32
    return %c0_i32, %c0_i32_0 : i32, i32
  }
  func.func @transform_14(%arg0: i32) -> (i32, i32) {
    %c0_i32 = arith.constant 0 : i32
    %c0_i32_0 = arith.constant 0 : i32
    %c0_i32_1 = arith.constant 0 : i32
    return %c0_i32, %c0_i32_0 : i32, i32
  }
  func.func @transform_15(%arg0: i32) -> (i32, i32) {
    %c0_i32 = arith.constant 0 : i32
    %c0_i32_0 = arith.constant 0 : i32
    %c0_i32_1 = arith.constant 0 : i32
    return %c0_i32, %c0_i32_0 : i32, i32
  }
  func.func @transform_16(%arg0: i32) -> (i32, i32) {
    %c0_i32 = arith.constant 0 : i32
    %c0_i32_0 = arith.constant 0 : i32
    %c0_i32_1 = arith.constant 0 : i32
    return %c0_i32, %c0_i32_0 : i32, i32
  }
  func.func @transform_17(%arg0: i32) -> (i32, i32) {
    %c0_i32 = arith.constant 0 : i32
    %c0_i32_0 = arith.constant 0 : i32
    %c0_i32_1 = arith.constant 0 : i32
    return %c0_i32, %c0_i32_0 : i32, i32
  }
  func.func @transform_18(%arg0: i32) -> (i32, i32) {
    %c0_i32 = arith.constant 0 : i32
    %c0_i32_0 = arith.constant 0 : i32
    %c0_i32_1 = arith.constant 0 : i32
    return %c0_i32, %c0_i32_0 : i32, i32
  }
  func.func @transform_19(%arg0: i32) -> (i32, i32) {
    %c0_i32 = arith.constant 0 : i32
    %c0_i32_0 = arith.constant 0 : i32
    %c0_i32_1 = arith.constant 0 : i32
    return %c0_i32, %c0_i32_0 : i32, i32
  }
  func.func @transform_20(%arg0: i32) -> (i32, i32) {
    %c0_i32 = arith.constant 0 : i32
    %c0_i32_0 = arith.constant 0 : i32
    %c0_i32_1 = arith.constant 0 : i32
    return %c0_i32, %c0_i32_0 : i32, i32
  }
  func.func @transform_21(%arg0: i32) -> (i32, i32) {
    %c0_i32 = arith.constant 0 : i32
    %c0_i32_0 = arith.constant 0 : i32
    %c0_i32_1 = arith.constant 0 : i32
    return %c0_i32, %c0_i32_0 : i32, i32
  }
  func.func @transform_22(%arg0: i32) -> (i32, i32) {
    %c0_i32 = arith.constant 0 : i32
    %c0_i32_0 = arith.constant 0 : i32
    %c0_i32_1 = arith.constant 0 : i32
    return %c0_i32, %c0_i32_0 : i32, i32
  }
  func.func @transform_23(%arg0: i32) -> (i32, i32) {
    %c0_i32 = arith.constant 0 : i32
    %c0_i32_0 = arith.constant 0 : i32
    %c0_i32_1 = arith.constant 0 : i32
    return %c0_i32, %c0_i32_0 : i32, i32
  }
  func.func @transform_24(%arg0: i32) -> (i32, i32) {
    %c0_i32 = arith.constant 0 : i32
    %c0_i32_0 = arith.constant 0 : i32
    %c0_i32_1 = arith.constant 0 : i32
    return %c0_i32, %c0_i32_0 : i32, i32
  }
  func.func @transform_25(%arg0: i32) -> (i32, i32) {
    %c0_i32 = arith.constant 0 : i32
    %c0_i32_0 = arith.constant 0 : i32
    %c0_i32_1 = arith.constant 0 : i32
    return %c0_i32, %c0_i32_0 : i32, i32
  }
  func.func @transform_26(%arg0: i32) -> (i32, i32) {
    %c0_i32 = arith.constant 0 : i32
    %c0_i32_0 = arith.constant 0 : i32
    %c0_i32_1 = arith.constant 0 : i32
    return %c0_i32, %c0_i32_0 : i32, i32
  }
  func.func @transform_27(%arg0: i32) -> (i32, i32, i32) {
    %c0_i32 = arith.constant 0 : i32
    %c0_i32_0 = arith.constant 0 : i32
    %c0_i32_1 = arith.constant 0 : i32
    return %arg0, %c0_i32, %c0_i32_0 : i32, i32, i32
  }
}

</mosaic_0001>

<bundles_post_ra>
// kernel: forward.1
= control target key start
LH: loop header
LB: loop body
LE: loop exit
PB: predicated region body
PF: predicated region fallthrough
CT: control target
= control target key end

     0   :  { %s11670_s0 = inlined_call_operand.vmem [shape: f32[2,1,784], index: 0, kind: input, shape index: {}]   ;;  %s11671_s1 = inlined_call_operand.vmem [shape: f32[8,72], index: 1, kind: input, shape index: {}]   ;;  %s11672_s2 = inlined_call_operand.vmem [shape: f32[8,1], index: 2, kind: input, shape index: {}]   ;;  %s11673_s3 = inlined_call_operand.vmem [shape: f32[9,784], index: 3, kind: input, shape index: {}]   ;;  %s11674_s4 = inlined_call_operand.vmem [shape: f32[784,196], index: 4, kind: input, shape index: {}]   ;;  %s11675_s5 = inlined_call_operand.vmem [shape: f32[16,72], index: 5, kind: input, shape index: {}]   ;;  %s11676_s6 = inlined_call_operand.vmem [shape: f32[16,1], index: 6, kind: input, shape index: {}]   ;;  %s11677_s7 = inlined_call_operand.vmem [shape: f32[9,196], index: 7, kind: input, shape index: {}]   ;;  %s11678_s8 = inlined_call_operand.vmem [shape: f32[196,49], index: 8, kind: input, shape index: {}]   ;;  %s11679_s9 = inlined_call_operand.vmem [shape: f32[784,32], index: 9, kind: input, shape index: {}]   ;;  %s11680_s10 = inlined_call_operand.vmem [shape: f32[1,32], index: 10, kind: input, shape index: {}]   ;;  %s11681_s11 = inlined_call_operand.vmem [shape: f32[32,784], index: 11, kind: input, shape index: {}]   ;;  %s11682_s12 = inlined_call_operand.vmem [shape: f32[1,784], index: 12, kind: input, shape index: {}]   ;;  %s11683_s13 = inlined_call_operand.vmem [shape: f32[49,784], index: 13, kind: input, shape index: {}]   ;;  %s11684_s14 = inlined_call_operand.vmem [shape: f32[784,49], index: 14, kind: input, shape index: {}]   ;;  %s11685_s15 = inlined_call_operand.vmem [shape: f32[16,784], index: 15, kind: input, shape index: {}]   ;;  %s11686_s16 = inlined_call_operand.vmem [shape: f32[49,196], index: 16, kind: input, shape index: {}]   ;;  %s11687_s17 = inlined_call_operand.vmem [shape: f32[8,144], index: 17, kind: input, shape index: {}]   ;;  %s11688_s18 = inlined_call_operand.vmem [shape: f32[8,1], index: 18, kind: input, shape index: {}]   ;;  %s11689_s19 = inlined_call_operand.vmem [shape: f32[9,196], index: 19, kind: input, shape index: {}]   ;;  %s11690_s20 = inlined_call_operand.vmem [shape: f32[196,784], index: 20, kind: input, shape index: {}]   ;;  %s11691_s21 = inlined_call_operand.vmem [shape: f32[4,72], index: 21, kind: input, shape index: {}]   ;;  %s11692_s22 = inlined_call_operand.vmem [shape: f32[4,1], index: 22, kind: input, shape index: {}]   ;;  %s11693_s23 = inlined_call_operand.vmem [shape: f32[9,784], index: 23, kind: input, shape index: {}]   ;;  %s11694_s24 = inlined_call_operand.vmem [shape: f32[1,72], index: 24, kind: input, shape index: {}]   ;;  %s11695_s25 = inlined_call_operand.<no memory space> [shape: f32[1,1], index: 25, kind: input, shape index: {}]   ;;  %s11696_s26 = inlined_call_operand.vmem [shape: f32[9,784], index: 26, kind: input, shape index: {}]   ;;  %s11697_s27 = inlined_call_operand.vmem [shape: f32[2,1,784], index: 27, kind: output, shape index: {}]  }
   0x1   :  { %11770 = sst [smem:[#allocation31_spill]] %s11670_s0  ;;  %v32_v0 = vstv %s11695_s25 }
   0x2   :  { %11771 = sst [smem:[#allocation32_spill]] %s11671_s1  ;;  %33 = vst [vmem:[#allocation4] sm:$0x1] %v32_v0 }
   0x3   :  { %11772 = sst [smem:[#allocation33_spill]] %s11672_s2 }
   0x4   :  { %11773 = sst [smem:[#allocation34_spill]] %s11673_s3 }
   0x5   :  { %11774 = sst [smem:[#allocation35_spill]] %s11674_s4 }
   0x6   :  { %11775 = sst [smem:[#allocation36_spill]] %s11675_s5 }
   0x7   :  { %11776 = sst [smem:[#allocation37_spill]] %s11676_s6 }
   0x8   :  { %11777 = sst [smem:[#allocation38_spill]] %s11677_s7 }
   0x9   :  { %11778 = sst [smem:[#allocation39_spill]] %s11678_s8  ;;  %s6930_s8 = smov 0  }
   0xa   :  { %11779 = sst [smem:[#allocation40_spill]] %s11679_s9 }
   0xb   :  { %11780 = sst [smem:[#allocation41_spill]] %s11680_s10 }
   0xc   :  { %11781 = sst [smem:[#allocation42_spill]] %s11681_s11 }
   0xd   :  { %11782 = sst [smem:[#allocation43_spill]] %s11683_s13 }
   0xe   :  { %11783 = sst [smem:[#allocation44_spill]] %s11685_s15 }
   0xf   :  { %11784 = sst [smem:[#allocation45_spill]] %s11691_s21 }
  0x10   :  { %11785 = sst [smem:[#allocation46_spill]] %s11694_s24 }
  0x11   :  { %11786 = sst [smem:[#allocation47_spill]] %s11696_s26 }
  0x12   :  { %11787 = sst [smem:[#allocation48_spill]] %s11697_s27 }
  0x13 LB: > { %11788 = sst [smem:[#allocation5_spill]] %s6769_s8  ;;  %s6537_s30 = sadd.s32 4294967295, %s6769_s8   ;;  %s6769_s8 = sphi %s6930_s8, %s39_s8  }
  0x14   : > { %p6541_p0 = scmp.ge.s32.totalorder %s6769_s8, 1  ;;  %p738_p1 = scmp.lt.s32.totalorder %s6769_s8, 3 }
  0x16   : > { %p739_p2 = pnand %p6541_p0, %p738_p1 }
  0x18   : > { %742 = sbr.rel (%p739_p2) target bundleno = 3324 (0xcfc), region = 128 }
  0x1d   : > { %s11789_s28 = sld [smem:[#allocation34_spill]]  ;;  %s11721_s11 = smov 127   ;;  %v6772_v7 = vmov 0.0   ;;  %v962_v12 = vlaneseq  ;;  %v11791_v15 = vmov 0  ;;  %vm1044_vm1 = vcmask 1039360  }
  0x1e   : > { %816 = vst [vmem:[#allocation2] sm:$0xff] %v6772_v7  ;;  %s11719_s9 = smov 100   ;;  %p808_p3 = scmp.lt.s32.totalorder %s6537_s30, 1  ;;  %vm979_vm2 = vcmask 809984   ;;  %vm11747_vm3 = vcmask 818176   ;;  %vm824_vm4 = vcmask 130048  }
  0x1f   : > { %817 = vst [vmem:[#allocation2 + $0x8] sm:$0xff] %v6772_v7  ;;  %vm6974_vm0 = vcmp.lt.s32.totalorder %v962_v12, 784  ;;  %s11711_s1 = smov 101   ;;  %s11794_s3 = sld [smem:[#allocation31_spill]]  ;;  %vm11749_vm5 = vcmask 826368   ;;  %vm1052_vm6 = vcmask 7168  }
  0x20   : > { %818 = vst [vmem:[#allocation2 + $0x10] sm:$0xff] %v6772_v7  ;;  %s11998_s30 = smov (!%p808_p3, %s6537_s30), 1  ;;  %v11792_v15 = vsel %vm6974_vm0, 4294967295, %v11791_v15  ;;  %s11717_s4 = smov 99   ;;  %vm11746_vm7 = vcmask 236544   ;;  %vm11738_vm8 = vcmask 228352  }
  0x21   : > { %11790 = sst [smem:[#allocation6_spill]] %s11998_s30  ;;  %819 = vst [vmem:[#allocation2 + $0x18] sm:$0xff] %v6772_v7  ;;  %s11706_s29 = smul.u32 7, %s11998_s30  ;;  %vm11737_vm9 = vcmask 220160   ;;  %vm11741_vm10 = vcmask 588800   ;;  %vm2028_vm11 = vcmask 941056  }
  0x22   : > { %820 = vst [vmem:[#allocation2 + $0x20] sm:$0xff] %v6772_v7  ;;  %s11715_s6 = smov 1   ;;  %s11707_s2 = smov 28   ;;  %vm1949_vm12 = vcmask 556032   ;;  %vm1979_vm13 = vcmask 121856   ;;  %vm2012_vm14 = vcmask 113664  }
  0x23   : > { %v6546_v1 = vld [vmem:[%s11789_s28 + $0x3] ss:$8 sm:$0xf]  ;;  %v6542_v4 = vld [vmem:[%s11789_s28 + $0x1] ss:$8 sm:$0xf] }
  0x24   : > { %v6547_v2 = vld [vmem:[%s11789_s28 + $0x3] ss:$8 sm:$0x70]  ;;  %v6543_v5 = vld [vmem:[%s11789_s28 + $0x1] ss:$8 sm:$0x70] }
  0x25   : > { %v1039_v3 = vor.u32 %v6547_v2, %v6546_v1  ;;  %v995_v6 = vor.u32 %v6543_v5, %v6542_v4  ;;  %v6544_v8 = vld [vmem:[%s11789_s28 + $0x2] ss:$8 sm:$0xf]  ;;  %v972_v10 = vld [vmem:[%s11789_s28] ss:$8 sm:$0xf]  ;;  %s811_s7 = scalar_lea.vmem %s11794_s3, %s11706_s29 }
  0x26   : > { %v6545_v9 = vld [vmem:[%s11789_s28 + $0x2] ss:$8 sm:$0x70]  ;;  %v973_v11 = vld [vmem:[%s11789_s28] ss:$8 sm:$0x70] }
  0x27   : > { %1041 = vrot.lane.b32.xlu0 %v1039_v3, %s11721_s11  ;;  %997 = vrot.lane.b32.xlu1 %v995_v6, %s11719_s9  ;;  %v1017_v13 = vor.u32 %v6545_v9, %v6544_v8  ;;  %v974_v14 = vor.u32 %v973_v11, %v972_v10  ;;  %821 = vst [vmem:[#allocation2 + $0x28] sm:$0xff] %v6772_v7  ;;  %v961_v16 = vld [vmem:[%s811_s7] sm:$0x7f]  ;;  %v6554_v44 = vld [vmem:[%s11789_s28 + $0x7] ss:$8 sm:$0xf] }
  0x28   : > { %822 = vst [vmem:[#allocation2 + $0x30] sm:$0xff] %v6772_v7  ;;  %v6556_v20 = vld [vmem:[%s11789_s28 + $0x38] ss:$8 sm:$0xf]  ;;  %s11709_s5 = smov 27   ;;  %s11713_s10 = smov 29  }
  0x29   : > { %11793 = vst [vmem:[#allocation7_spill] sm:$0xff] %v11792_v15  ;;  %v6557_v21 = vld [vmem:[%s11789_s28 + $0x38] ss:$8 sm:$0x70]  ;;  %s11795_s25 = sld [smem:[#allocation33_spill]]  ;;  %s11723_s29 = smov 14  }
  0x2a   : > { %823 = vst [vmem:[#allocation2 + $0x38] sm:$0xff] %v6772_v7  ;;  %v1114_v22 = vor.u32 %v6557_v21, %v6556_v20  ;;  %v6555_v46 = vld [vmem:[%s11789_s28 + $0x7] ss:$8 sm:$0x70]  ;;  %s11797_s3 = sld [smem:[#allocation35_spill]]  ;;  %s11802_s8 = smov 14  }
  0x2b   : > { %967 = vst.msk [vmem:[#allocation2 + $0x8] ss:$8 sm:$0xf] %vm6974_vm0, %v961_v16  ;;  %v6552_v49 = vld [vmem:[%s11789_s28 + $0x6] ss:$8 sm:$0xf]  ;;  %v1100_v51 = vor.u32 %v6555_v46, %v6554_v44 }
  0x2c   : > { %968 = vst.msk [vmem:[#allocation2 + $0x8] ss:$8 sm:$0x70] %vm6974_vm0, %v961_v16  ;;  %v6553_v50 = vld [vmem:[%s11789_s28 + $0x6] ss:$8 sm:$0x70] }
  0x2d   : > { %828 = vst [vmem:[#allocation2 + $0x58] sm:$0xff] %v6772_v7  ;;  %v6550_v52 = vld [vmem:[%s11789_s28 + $0x5] ss:$8 sm:$0xf]  ;;  %v1086_v56 = vor.u32 %v6553_v50, %v6552_v49  ;;  %s11803_s0 = smov 115   ;;  %s11805_s27 = smov 113  }
  0x2e   : > { %835 = vst [vmem:[#allocation3] sm:$0xff] %v6772_v7  ;;  %v6551_v54 = vld [vmem:[%s11789_s28 + $0x5] ss:$8 sm:$0x70]  ;;  %vm2045_vm15 = vcmask 105472   ;;  %s11810_s7 = sld [smem:[#allocation39_spill]] }
  0x2f   : > { %1019 = vrot.lane.b32.xlu0 %v1017_v13, %s11711_s1  ;;  %976 = vrot.lane.b32.xlu1 %v974_v14, %s11717_s4  ;;  %836 = vst [vmem:[#allocation3 + $0x8] sm:$0xff] %v6772_v7  ;;  %v1072_v58 = vor.u32 %v6551_v54, %v6550_v52  ;;  %v6548_v4 = vld [vmem:[%s11789_s28 + $0x4] ss:$8 sm:$0xf]  ;;  %s11811_s13 = sld [smem:[#allocation43_spill]]  ;;  %s11816_s26 = smov 29  }
  0x30   : > { %837 = vst [vmem:[#allocation3 + $0x10] sm:$0xff] %v6772_v7  ;;  %v6549_v5 = vld [vmem:[%s11789_s28 + $0x4] ss:$8 sm:$0x70]  ;;  %s11735_s28 = smov 113   ;;  %s11812_s24 = sld [smem:[#allocation40_spill]] }
  0x31   : > { %838 = vst [vmem:[#allocation3 + $0x18] sm:$0xff] %v6772_v7  ;;  %v1061_v6 = vor.u32 %v6549_v5, %v6548_v4  ;;  %v1189_v44 = vld [vmem:[%s11795_s25] sm:$0xff]  ;;  %s11808_s25 = sld [smem:[#allocation37_spill]]  ;;  %s11820_s21 = smov 28  }
  0x32   : > { %v969_v17 = vld [vmem:[#allocation2] ss:$8 sm:$0xf]  ;;  %839 = vst [vmem:[#allocation3 + $0x20] sm:$0xff] %v6772_v7  ;;  %s11813_s15 = sld [smem:[#allocation44_spill]] }
  0x33   : > { %v970_v18 = vld [vmem:[#allocation2] ss:$8 sm:$0xf0]  ;;  %840 = vst [vmem:[#allocation3 + $0x28] sm:$0xff] %v6772_v7 }
  0x34   : > { %v6992_v19 = vor.u32 %v970_v18, %v969_v17  ;;  %842 = vst [vmem:[#allocation3 + $0x38] sm:$0xff] %v6772_v7 }
  0x35   : > { %843 = vst [vmem:[#allocation3 + $0x40] sm:$0xff] %v6772_v7 }
  0x36   : > { %1115 = vrot.lane.b32.xlu2 %v6992_v19, %s11717_s4  ;;  %844 = vst [vmem:[#allocation3 + $0x48] sm:$0xff] %v6772_v7 }
  0x37   : > { %1087 = vrot.lane.b32.xlu0 %v6992_v19, %s11711_s1  ;;  %1073 = vrot.lane.b32.xlu1 %v6992_v19, %s11721_s11  ;;  %845 = vst [vmem:[#allocation3 + $0x50] sm:$0xff] %v6772_v7  ;;  %s11796_s1 = sld [smem:[#allocation32_spill]] }
  0x38   : > { %846 = vst [vmem:[#allocation3 + $0x58] sm:$0xff] %v6772_v7 }
  0x39   : > { %847 = vst [vmem:[#allocation3 + $0x60] sm:$0xff] %v6772_v7 }
  0x3a   : > { %849 = vst [vmem:[#allocation3 + $0x70] sm:$0xff] %v6772_v7 }
  0x3b   : > { %850 = vst [vmem:[#allocation3 + $0x78] sm:$0xff] %v6772_v7 }
  0x3c   : > { %851 = vst [vmem:[#allocation3 + $0x80] sm:$0xff] %v6772_v7 }
  0x3d   : > { %852 = vst [vmem:[#allocation3 + $0x88] sm:$0xff] %v6772_v7 }
  0x3e   : > { %1101 = vrot.lane.b32.xlu2 %v6992_v19, %s11719_s9  ;;  %853 = vst [vmem:[#allocation3 + $0x90] sm:$0xff] %v6772_v7 }
  0x3f   : > { %854 = vst [vmem:[#allocation3 + $0x98] sm:$0xff] %v6772_v7 }
  0x40   : > { %856 = vst [vmem:[#allocation3 + $0xa8] sm:$0xff] %v6772_v7 }
  0x41   : > { %857 = vst [vmem:[#allocation3 + $0xb0] sm:$0xff] %v6772_v7 }
  0x42   : > { %858 = vst [vmem:[#allocation3 + $0xb8] sm:$0xff] %v6772_v7 }
  0x43   : > { %859 = vst [vmem:[#allocation3 + $0xc0] sm:$0xff] %v6772_v7 }
  0x44   : > { %860 = vst [vmem:[#allocation3 + $0xc8] sm:$0xff] %v6772_v7 }
  0x45   : > { %861 = vst [vmem:[#allocation3 + $0xd0] sm:$0xff] %v6772_v7 }
  0x46   : > { %863 = vst [vmem:[#allocation3 + $0xe0] sm:$0xff] %v6772_v7 }
  0x47   : > { %864 = vst [vmem:[#allocation3 + $0xe8] sm:$0xff] %v6772_v7 }
  0x48   : > { %865 = vst [vmem:[#allocation3 + $0xf0] sm:$0xff] %v6772_v7 }
  0x49   : > { %866 = vst [vmem:[#allocation3 + $0xf8] sm:$0xff] %v6772_v7 }
  0x4a   : > { %867 = vst [vmem:[#allocation3 + $0x100] sm:$0xff] %v6772_v7 }
  0x4b   : > { %868 = vst [vmem:[#allocation3 + $0x108] sm:$0xff] %v6772_v7 }
  0x4c   : > { %870 = vst [vmem:[#allocation3 + $0x118] sm:$0xff] %v6772_v7 }
  0x4d   : > { %871 = vst [vmem:[#allocation3 + $0x120] sm:$0xff] %v6772_v7 }
  0x4e   : > { %872 = vst [vmem:[#allocation3 + $0x128] sm:$0xff] %v6772_v7 }
  0x4f   : > { %873 = vst [vmem:[#allocation3 + $0x130] sm:$0xff] %v6772_v7 }
  0x50   : > { %874 = vst [vmem:[#allocation3 + $0x138] sm:$0xff] %v6772_v7 }
  0x51   : > { %875 = vst [vmem:[#allocation3 + $0x140] sm:$0xff] %v6772_v7 }
  0x52   : > { %877 = vst [vmem:[#allocation3 + $0x150] sm:$0xff] %v6772_v7 }
  0x53   : > { %878 = vst [vmem:[#allocation3 + $0x158] sm:$0xff] %v6772_v7 }
  0x54   : > { %879 = vst [vmem:[#allocation3 + $0x160] sm:$0xff] %v6772_v7 }
  0x55   : > { %880 = vst [vmem:[#allocation3 + $0x168] sm:$0xff] %v6772_v7 }
  0x56   : > { %881 = vst [vmem:[#allocation3 + $0x170] sm:$0xff] %v6772_v7 }
  0x57   : > { %882 = vst [vmem:[#allocation3 + $0x178] sm:$0xff] %v6772_v7 }
  0x58   : > { %884 = vst [vmem:[#allocation3 + $0x188] sm:$0xff] %v6772_v7 }
  0x59   : > { %885 = vst [vmem:[#allocation3 + $0x190] sm:$0xff] %v6772_v7 }
  0x5a   : > { %886 = vst [vmem:[#allocation3 + $0x198] sm:$0xff] %v6772_v7 }
  0x5b   : > { %887 = vst [vmem:[#allocation3 + $0x1a0] sm:$0xff] %v6772_v7 }
  0x5c   : > { %888 = vst [vmem:[#allocation3 + $0x1a8] sm:$0xff] %v6772_v7 }
  0x5d   : > { %889 = vst [vmem:[#allocation3 + $0x1b0] sm:$0xff] %v6772_v7 }
  0x5e   : > { %891 = vst [vmem:[#allocation3 + $0x1c0] sm:$0xff] %v6772_v7 }
  0x5f   : > { %892 = vst [vmem:[#allocation3 + $0x1c8] sm:$0xff] %v6772_v7 }
  0x60   : > { %893 = vst [vmem:[#allocation3 + $0x1d0] sm:$0xff] %v6772_v7 }
  0x61   : > { %894 = vst [vmem:[#allocation3 + $0x1d8] sm:$0xff] %v6772_v7 }
  0x62   : > { %895 = vst [vmem:[#allocation3 + $0x1e0] sm:$0xff] %v6772_v7 }
  0x63   : > { %896 = vst [vmem:[#allocation3 + $0x1e8] sm:$0xff] %v6772_v7 }
  0x64   : > { %899 = vst [vmem:[#allocation3 + $0x200] sm:$0xff] %v6772_v7 }
  0x65   : > { %906 = vst [vmem:[#allocation3 + $0x238] sm:$0xff] %v6772_v7 }
  0x66   : > { %913 = vst [vmem:[#allocation3 + $0x270] sm:$0xff] %v6772_v7 }
  0x67   : > { %920 = vst [vmem:[#allocation3 + $0x2a8] sm:$0xff] %v6772_v7 }
  0x68   : > { %927 = vst [vmem:[#allocation3 + $0x2e0] sm:$0xff] %v6772_v7 }
  0x69   : > { %934 = vst [vmem:[#allocation3 + $0x318] sm:$0xff] %v6772_v7 }
  0x6a   : > { %941 = vst [vmem:[#allocation3 + $0x350] sm:$0xff] %v6772_v7 }
  0x6b   : > { %948 = vst [vmem:[#allocation3 + $0x388] sm:$0xff] %v6772_v7 }
  0x6c   : > { %955 = vst [vmem:[#allocation3 + $0x3c0] sm:$0xff] %v6772_v7 }
  0x6d   : > { %897 = vst.msk [vmem:[#allocation3 + $0x1f0] sm:$0xff] %vm824_vm4, %v6772_v7 }
  0x6e   : > { %841 = vst.msk [vmem:[#allocation3 + $0x30] sm:$0xff] %vm824_vm4, %v6772_v7 }
  0x6f   : > { %848 = vst.msk [vmem:[#allocation3 + $0x68] sm:$0xff] %vm824_vm4, %v6772_v7 }
  0x70   : > { %855 = vst.msk [vmem:[#allocation3 + $0xa0] sm:$0xff] %vm824_vm4, %v6772_v7 }
  0x71   : > { %862 = vst.msk [vmem:[#allocation3 + $0xd8] sm:$0xff] %vm824_vm4, %v6772_v7 }
  0x72   : > { %869 = vst.msk [vmem:[#allocation3 + $0x110] sm:$0xff] %vm824_vm4, %v6772_v7 }
  0x73   : > { %876 = vst.msk [vmem:[#allocation3 + $0x148] sm:$0xff] %vm824_vm4, %v6772_v7 }
  0x74   : > { %883 = vst.msk [vmem:[#allocation3 + $0x180] sm:$0xff] %vm824_vm4, %v6772_v7 }
  0x75   : > { %890 = vst.msk [vmem:[#allocation3 + $0x1b8] sm:$0xff] %vm824_vm4, %v6772_v7  ;;  %v1063_v7 = vrot.slane %v6992_v19, 1 }
  0x77   : > { %v1065_v8 = vmul.f32 %v1063_v7, %v1061_v6 }
  0x79   : > { %1067 = vst.msk [vmem:[#allocation3 + $0xe0] ss:$8 sm:$0xf] %vm6974_vm0, %v1065_v8 }
  0x7a   : > { %1068 = vst.msk [vmem:[#allocation3 + $0xe0] ss:$8 sm:$0x70] %vm6974_vm0, %v1065_v8 }
  0x81   : > { %v1158_v8 = vld [vmem:[#allocation3 + $0x100] sm:$0xff] }
  0x90   : > { %v1116_v23 = vpop.permute.xlu2 %1115 }
  0x91   : > { %v1117_v24 = vrot.slane %v1116_v23, 1  ;;  %v1118_v25 = vrot.slane %v1116_v23, 2 }
  0x93   : > { %v1119_v28 = vsel %vm979_vm2, %v1117_v24, %v1118_v25 }
  0x94   : > { %v1121_v30 = vmul.f32 %v1119_v28, %v1114_v22  ;;  %v1156_v28 = vld [vmem:[#allocation3 + $0xf0] sm:$0xff] }
  0x96   : > { %1123 = vst.msk [vmem:[#allocation3 + $0x1c0] ss:$8 sm:$0xf] %vm6974_vm0, %v1121_v30 }
  0x97   : > { %1124 = vst.msk [vmem:[#allocation3 + $0x1c0] ss:$8 sm:$0x70] %vm6974_vm0, %v1121_v30 }
  0x98   : > { %v1102_v41 = vpop.permute.xlu2 %1101 }
  0x99   : > { %v1042_v26 = vpop.permute.xlu0 %1041  ;;  %v998_v29 = vpop.permute.xlu1 %997  ;;  %v1103_v47 = vrot.slane %v1102_v41, 1  ;;  %v1104_v48 = vrot.slane %v1102_v41, 2 }
  0x9a   : > { %v1043_v27 = vrot.slane %v1042_v26, 7  ;;  %v999_v32 = vrot.slane %v998_v29, 7 }
  0x9b   : > { %v1105_v53 = vsel %vm11747_vm3, %v1103_v47, %v1104_v48 }
  0x9c   : > { %v1045_v31 = vsel %vm1044_vm1, %v1043_v27, %v1042_v26  ;;  %v1001_v34 = vsel %vm11747_vm3, %v999_v32, %v998_v29  ;;  %v1107_v55 = vmul.f32 %v1105_v53, %v1100_v51  ;;  %v1154_v26 = vld [vmem:[#allocation3 + $0xe0] sm:$0xff]  ;;  %v1155_v27 = vld [vmem:[#allocation3 + $0xe8] sm:$0xff]  ;;  %v1157_v29 = vld [vmem:[#allocation3 + $0xf8] sm:$0xff] }
  0x9d   : > { %v1047_v33 = vmul.f32 %v1045_v31, %v6992_v19  ;;  %v1003_v35 = vmul.f32 %v1001_v34, %v6992_v19  ;;  %v1182_v9 = vld [vmem:[#allocation3 + $0x1c0] sm:$0xff]  ;;  %v1183_v10 = vld [vmem:[#allocation3 + $0x1c8] sm:$0xff]  ;;  %v1184_v11 = vld [vmem:[#allocation3 + $0x1d0] sm:$0xff] }
  0x9e   : > { %1109 = vst.msk [vmem:[#allocation3 + $0x188] ss:$8 sm:$0xf] %vm6974_vm0, %v1107_v55  ;;  %1206 = vmatpush.msra.mxu0 %v1182_v9  ;;  %1226 = vmatpush.msra.mxu1 %v1183_v10  ;;  %v1185_v12 = vld [vmem:[#allocation3 + $0x1d8] sm:$0xff]  ;;  %v1159_v9 = vld [vmem:[#allocation3 + $0x108] sm:$0xff] }
  0x9f   : > { %1049 = vrot.lane.b32.xlu2 %v1047_v33, %s11715_s6  ;;  %1005 = vrot.lane.b32.xlu1 %v1003_v35, %s11707_s2  ;;  %1110 = vst.msk [vmem:[#allocation3 + $0x188] ss:$8 sm:$0x70] %vm6974_vm0, %v1107_v55  ;;  %s11801_s2 = smov 127   ;;  %s11807_s6 = smov 15  }
  0xa0   : > { %1246 = vmatpush.msra.mxu2 %v1184_v11  ;;  %1266 = vmatpush.msra.mxu3 %v1185_v12  ;;  %v1160_v11 = vld [vmem:[#allocation3 + $0x110] sm:$0xff] }
  0xa1   : > { %v1020_v36 = vpop.permute.xlu0 %1019  ;;  %v977_v38 = vpop.permute.xlu1 %976 }
  0xa2   : > { %v1021_v37 = vrot.slane %v1020_v36, 7  ;;  %v978_v40 = vrot.slane %v977_v38, 7 }
  0xa4   : > { %v1023_v39 = vsel %vm11749_vm5, %v1021_v37, %v1020_v36  ;;  %v980_v43 = vsel %vm979_vm2, %v978_v40, %v977_v38 }
  0xa5   : > { %v1025_v42 = vmul.f32 %v1023_v39, %v6992_v19  ;;  %v982_v45 = vmul.f32 %v980_v43, %v6992_v19  ;;  %v1175_v13 = vld [vmem:[#allocation3 + $0x188] sm:$0xff]  ;;  %v1176_v14 = vld [vmem:[#allocation3 + $0x190] sm:$0xff]  ;;  %v1177_v16 = vld [vmem:[#allocation3 + $0x198] sm:$0xff]  ;;  %v6780_v43 = vmov 0  }
  0xa6   : > { %1207 = vmatpush.msra.mxu0 %v1175_v13  ;;  %1227 = vmatpush.msra.mxu1 %v1176_v14  ;;  %v1178_v17 = vld [vmem:[#allocation3 + $0x1a0] sm:$0xff] }
  0xa7   : > { %1027 = vrot.lane.b32.xlu0 %v1025_v42, %s11709_s5  ;;  %984 = vrot.lane.b32.xlu2 %v982_v45, %s11713_s10  ;;  %s11798_s10 = smov 99   ;;  %s11725_s5 = smov 15  }
  0xa8   : > { %1247 = vmatpush.msra.mxu2 %v1177_v16  ;;  %1267 = vmatpush.msra.mxu3 %v1178_v17 }
  0xa9   : > { %v1088_v57 = vpop.permute.xlu0 %1087  ;;  %v1074_v59 = vpop.permute.xlu1 %1073  ;;  %6716 = vset.pattern.permute.xlu0 %v6780_v43  ;;  %6747 = vset.pattern.permute.xlu2 %v6780_v43 }
  0xaa   : > { %v1089_v60 = vrot.slane %v1088_v57, 1  ;;  %v1090_v61 = vrot.slane %v1088_v57, 2  ;;  %v1075_v62 = vrot.slane %v1074_v59, 1  ;;  %v1076_v63 = vrot.slane %v1074_v59, 2  ;;  %6758 = vset.pattern.permute.xlu1 %v6780_v43  ;;  %v1529_v43 = vld [vmem:[%s11797_s3 + $0x1e0] sm:$0xff] }
  0xac   : > { %v1091_v0 = vsel %vm11749_vm5, %v1089_v60, %v1090_v61  ;;  %v1077_v1 = vsel %vm1044_vm1, %v1075_v62, %v1076_v63  ;;  %v1186_v61 = vld [vmem:[#allocation3 + $0x1e0] sm:$0xff]  ;;  %v1187_v62 = vld [vmem:[#allocation3 + $0x1e8] sm:$0xff]  ;;  %v1188_v63 = vld [vmem:[#allocation3 + $0x1f0] sm:$0xff]  ;;  %vm3033_vm5 = vcmask 261120  }
  0xad   : > { %v1093_v2 = vmul.f32 %v1091_v0, %v1086_v56  ;;  %v1079_v3 = vmul.f32 %v1077_v1, %v1072_v58  ;;  %v7175_v58 = vld [vmem:[%s11796_s1] sm:$0xff]  ;;  %v1179_v0 = vld [vmem:[#allocation3 + $0x1a8] sm:$0xff]  ;;  %s11893_s1 = sld [smem:[#allocation45_spill]] }
  0xae   : > { %v1180_v1 = vld [vmem:[#allocation3 + $0x1b0] sm:$0xff] }
  0xaf   : > { %1095 = vst.msk [vmem:[#allocation3 + $0x150] ss:$8 sm:$0xf] %vm6974_vm0, %v1093_v2  ;;  %1192 = vperm.xlu0 %6716, %v1189_v44   ;;  %v1495_v44 = vld [vmem:[%s11797_s3 + $0xd0] sm:$0xff] }
  0xb0   : > { %1096 = vst.msk [vmem:[#allocation3 + $0x150] ss:$8 sm:$0x70] %vm6974_vm0, %v1093_v2  ;;  %v1181_v2 = vld [vmem:[#allocation3 + $0x1b8] sm:$0xff] }
  0xb1   : > { %1081 = vst.msk [vmem:[#allocation3 + $0x118] ss:$8 sm:$0xf] %vm6974_vm0, %v1079_v3 }
  0xb2   : > { %1082 = vst.msk [vmem:[#allocation3 + $0x118] ss:$8 sm:$0x70] %vm6974_vm0, %v1079_v3 }
  0xb6   : > { %v1168_v18 = vld [vmem:[#allocation3 + $0x150] sm:$0xff]  ;;  %v1169_v19 = vld [vmem:[#allocation3 + $0x158] sm:$0xff]  ;;  %v1170_v20 = vld [vmem:[#allocation3 + $0x160] sm:$0xff] }
  0xb7   : > { %v1171_v21 = vld [vmem:[#allocation3 + $0x168] sm:$0xff]  ;;  %1208 = vmatpush.msra.mxu0 %v1168_v18  ;;  %1228 = vmatpush.msra.mxu1 %v1169_v19  ;;  %v1172_v3 = vld [vmem:[#allocation3 + $0x170] sm:$0xff]  ;;  %v1173_v4 = vld [vmem:[#allocation3 + $0x178] sm:$0xff] }
  0xb8   : > { %v1161_v22 = vld [vmem:[#allocation3 + $0x118] sm:$0xff]  ;;  %v1162_v23 = vld [vmem:[#allocation3 + $0x120] sm:$0xff]  ;;  %v1163_v24 = vld [vmem:[#allocation3 + $0x128] sm:$0xff]  ;;  %1248 = vmatpush.msra.mxu2 %v1170_v20  ;;  %1268 = vmatpush.msra.mxu3 %v1171_v21 }
  0xb9   : > { %v1164_v25 = vld [vmem:[#allocation3 + $0x130] sm:$0xff]  ;;  %1209 = vmatpush.msra.mxu0 %v1161_v22  ;;  %1229 = vmatpush.msra.mxu1 %v1162_v23  ;;  %v1174_v5 = vld [vmem:[#allocation3 + $0x180] sm:$0xff]  ;;  %v1165_v6 = vld [vmem:[#allocation3 + $0x138] sm:$0xff] }
  0xba   : > { %1249 = vmatpush.msra.mxu2 %v1163_v24  ;;  %1269 = vmatpush.msra.mxu3 %v1164_v25  ;;  %v1166_v7 = vld [vmem:[#allocation3 + $0x140] sm:$0xff]  ;;  %v1167_v10 = vld [vmem:[#allocation3 + $0x148] sm:$0xff] }
  0xbb   : > { %1210 = vmatpush.msra.mxu0 %v1154_v26  ;;  %1230 = vmatpush.msra.mxu1 %v1155_v27 }
  0xbc   : > { %1250 = vmatpush.msra.mxu2 %v1156_v28  ;;  %1270 = vmatpush.msra.mxu3 %v1157_v29 }
  0xf9   : > { %v1050_v30 = vpop.permute.xlu2 %1049 }
  0xfa   : > { %v1051_v31 = vrot.slane %v1050_v30, 1 }
  0xfc   : > { %v1053_v32 = vsel %vm1052_vm6, %v1050_v30, %v1051_v31 }
  0xfd   : > { %1056 = vst.msk [vmem:[#allocation3 + $0xa8] ss:$8 sm:$0xf] %vm6974_vm0, %v1053_v32 }
  0xfe   : > { %1057 = vst.msk [vmem:[#allocation3 + $0xa8] ss:$8 sm:$0x70] %vm6974_vm0, %v1053_v32 }
 0x101   : > { %v985_v33 = vpop.permute.xlu2 %984 }
 0x102   : > { %v986_v37 = vrot.slane %v985_v33, 1 }
 0x104   : > { %v1147_v34 = vld [vmem:[#allocation3 + $0xa8] sm:$0xff]  ;;  %v1148_v35 = vld [vmem:[#allocation3 + $0xb0] sm:$0xff]  ;;  %v1149_v36 = vld [vmem:[#allocation3 + $0xb8] sm:$0xff]  ;;  %v988_v39 = vsel %vm11746_vm7, %v985_v33, %v986_v37  ;;  %vm2499_vm7 = vcmask 1040384  }
 0x105   : > { %1211 = vmatpush.msra.mxu0 %v1147_v34  ;;  %1231 = vmatpush.msra.mxu1 %v1148_v35  ;;  %v1150_v38 = vld [vmem:[#allocation3 + $0xc0] sm:$0xff]  ;;  %990 = vst.msk [vmem:[#allocation3] ss:$8 sm:$0xf] %vm6974_vm0, %v988_v39  ;;  %v1151_v12 = vld [vmem:[#allocation3 + $0xc8] sm:$0xff]  ;;  %v1152_v13 = vld [vmem:[#allocation3 + $0xd0] sm:$0xff] }
 0x106   : > { %1251 = vmatpush.msra.mxu2 %v1149_v36  ;;  %1271 = vmatpush.msra.mxu3 %v1150_v38  ;;  %991 = vst.msk [vmem:[#allocation3] ss:$8 sm:$0x70] %vm6974_vm0, %v988_v39  ;;  %v1153_v14 = vld [vmem:[#allocation3 + $0xd8] sm:$0xff] }
 0x10c   : > { %v1126_v56 = vld [vmem:[#allocation3] sm:$0xff]  ;;  %v1127_v57 = vld [vmem:[#allocation3 + $0x8] sm:$0xff]  ;;  %v1128_v59 = vld [vmem:[#allocation3 + $0x10] sm:$0xff] }
 0x10d   : > { %v1129_v60 = vld [vmem:[#allocation3 + $0x18] sm:$0xff]  ;;  %v1130_v22 = vld [vmem:[#allocation3 + $0x20] sm:$0xff]  ;;  %v1131_v23 = vld [vmem:[#allocation3 + $0x28] sm:$0xff] }
 0x10e   : > { %v1132_v24 = vld [vmem:[#allocation3 + $0x30] sm:$0xff] }
 0x111   : > { %v1006_v40 = vpop.permute.xlu1 %1005 }
 0x112   : > { %v1007_v41 = vrot.slane %v1006_v40, 1 }
 0x114   : > { %v1009_v42 = vsel %vm11738_vm8, %v1006_v40, %v1007_v41  ;;  %v1499_v40 = vld [vmem:[%s11797_s3 + $0xf0] sm:$0xff]  ;;  %v1497_v41 = vld [vmem:[%s11797_s3 + $0xe0] sm:$0xff]  ;;  %vm1962_vm8 = vcmask 924672  }
 0x115   : > { %1012 = vst.msk [vmem:[#allocation3 + $0x38] ss:$8 sm:$0xf] %vm6974_vm0, %v1009_v42 }
 0x116   : > { %1013 = vst.msk [vmem:[#allocation3 + $0x38] ss:$8 sm:$0x70] %vm6974_vm0, %v1009_v42  ;;  %v1531_v42 = vld [vmem:[%s11797_s3 + $0x1f0] sm:$0xff] }
 0x119   : > { %v1028_v45 = vpop.permute.xlu0 %1027 }
 0x11a   : > { %v1029_v46 = vrot.slane %v1028_v45, 1 }
 0x11c   : > { %v1031_v47 = vsel %vm11737_vm9, %v1028_v45, %v1029_v46  ;;  %v1133_v52 = vld [vmem:[#allocation3 + $0x38] sm:$0xff]  ;;  %v1134_v53 = vld [vmem:[#allocation3 + $0x40] sm:$0xff]  ;;  %v1135_v54 = vld [vmem:[#allocation3 + $0x48] sm:$0xff]  ;;  %vm1995_vm9 = vcmask 932864  }
 0x11d   : > { %1034 = vst.msk [vmem:[#allocation3 + $0x70] ss:$8 sm:$0xf] %vm6974_vm0, %v1031_v47  ;;  %v1136_v55 = vld [vmem:[#allocation3 + $0x50] sm:$0xff]  ;;  %v1137_v19 = vld [vmem:[#allocation3 + $0x58] sm:$0xff]  ;;  %v1138_v20 = vld [vmem:[#allocation3 + $0x60] sm:$0xff] }
 0x11e   : > { %1035 = vst.msk [vmem:[#allocation3 + $0x70] ss:$8 sm:$0x70] %vm6974_vm0, %v1031_v47  ;;  %v1139_v21 = vld [vmem:[#allocation3 + $0x68] sm:$0xff]  ;;  %v1527_v45 = vld [vmem:[%s11797_s3 + $0x1d0] sm:$0xff] }
 0x11f   : > { %v1595_v46 = vld [vmem:[%s11797_s3 + $0x3f0] sm:$0xff] }
 0x121   : > { %v7191_v25 = vpop.permute.xlu0 %1192 }
 0x124   : > { %v1140_v48 = vld [vmem:[#allocation3 + $0x70] sm:$0xff]  ;;  %v1141_v49 = vld [vmem:[#allocation3 + $0x78] sm:$0xff]  ;;  %v1142_v50 = vld [vmem:[#allocation3 + $0x80] sm:$0xff] }
 0x125   : > { %1212 = vmatpush.msra.mxu0 %v1140_v48  ;;  %1232 = vmatpush.msra.mxu1 %v1141_v49  ;;  %v1143_v51 = vld [vmem:[#allocation3 + $0x88] sm:$0xff]  ;;  %v1144_v16 = vld [vmem:[#allocation3 + $0x90] sm:$0xff]  ;;  %v1145_v17 = vld [vmem:[#allocation3 + $0x98] sm:$0xff] }
 0x126   : > { %1252 = vmatpush.msra.mxu2 %v1142_v50  ;;  %1272 = vmatpush.msra.mxu3 %v1143_v51  ;;  %v1146_v18 = vld [vmem:[#allocation3 + $0xa0] sm:$0xff]  ;;  %v1593_v48 = vld [vmem:[%s11797_s3 + $0x3e0] sm:$0xff] }
 0x127   : > { %1213 = vmatpush.msra.mxu0 %v1133_v52  ;;  %1233 = vmatpush.msra.mxu1 %v1134_v53  ;;  %v1493_v50 = vld [vmem:[%s11797_s3 + $0xc0] sm:$0xff]  ;;  %v1491_v53 = vld [vmem:[%s11797_s3 + $0xb0] sm:$0xff] }
 0x128   : > { %1253 = vmatpush.msra.mxu2 %v1135_v54  ;;  %1273 = vmatpush.msra.mxu3 %v1136_v55  ;;  %v1525_v51 = vld [vmem:[%s11797_s3 + $0x1c0] sm:$0xff]  ;;  %v1523_v54 = vld [vmem:[%s11797_s3 + $0x1b0] sm:$0xff] }
 0x129   : > { %1214 = vmatpush.msra.mxu0 %v1126_v56  ;;  %1234 = vmatpush.msra.mxu1 %v1127_v57  ;;  %v1591_v55 = vld [vmem:[%s11797_s3 + $0x3d0] sm:$0xff]  ;;  %v1489_v56 = vld [vmem:[%s11797_s3 + $0xa0] sm:$0xff] }
 0x12a   : > { %1254 = vmatpush.msra.mxu2 %v1128_v59  ;;  %1274 = vmatpush.msra.mxu3 %v1129_v60  ;;  %v1521_v57 = vld [vmem:[%s11797_s3 + $0x1a0] sm:$0xff]  ;;  %v1487_v60 = vld [vmem:[%s11797_s3 + $0x90] sm:$0xff] }
 0x12b   : > { %6558 = vmatmul.msk.f32.vlgmr.msra.gmra.mxu0 %vm11741_vm10, %v7175_v58  ;;  %6559 = vmatmul.msk.f32.vlgmr.msra.gmra.mxu1 %vm11741_vm10, %v7175_v58 }
 0x12c   : > { %6560 = vmatmul.msk.f32.vlgmr.msra.gmra.mxu2 %vm11741_vm10, %v7175_v58  ;;  %6561 = vmatmul.msk.f32.vlgmr.msra.gmra.mxu3 %vm11741_vm10, %v7175_v58 }
 0x12d   : > { %1286 = vmatpush.msrb.mxu0 %v1186_v61  ;;  %1306 = vmatpush.msrb.mxu1 %v1187_v62  ;;  %v1519_v61 = vld [vmem:[%s11797_s3 + $0x190] sm:$0xff] }
 0x12e   : > { %1326 = vmatpush.msrb.mxu2 %v1188_v63  ;;  %1668 = vmatpush.msrb.mxu3 %v1499_v40  ;;  %v1587_v63 = vld [vmem:[%s11797_s3 + $0x3b0] sm:$0xff]  ;;  %v1501_v40 = vld [vmem:[%s11797_s3 + $0x100] sm:$0xff] }
 0x12f   : > { %1287 = vmatpush.msrb.mxu0 %v1179_v0  ;;  %1307 = vmatpush.msrb.mxu1 %v1180_v1  ;;  %v1485_v0 = vld [vmem:[%s11797_s3 + $0x80] sm:$0xff] }
 0x130   : > { %1327 = vmatpush.msrb.mxu2 %v1181_v2  ;;  %1669 = vmatpush.msrb.mxu3 %v1497_v41  ;;  %v1517_v1 = vld [vmem:[%s11797_s3 + $0x180] sm:$0xff] }
 0x131   : > { %1288 = vmatpush.msrb.mxu0 %v1172_v3  ;;  %1308 = vmatpush.msrb.mxu1 %v1173_v4  ;;  %v1483_v3 = vld [vmem:[%s11797_s3 + $0x70] sm:$0xff]  ;;  %v1585_v4 = vld [vmem:[%s11797_s3 + $0x3a0] sm:$0xff] }
 0x132   : > { %1328 = vmatpush.msrb.mxu2 %v1174_v5  ;;  %1670 = vmatpush.msrb.mxu3 %v1495_v44  ;;  %v1561_v41 = vld [vmem:[%s11797_s3 + $0x2e0] sm:$0xff]  ;;  %v1659_v44 = vld [vmem:[%s11797_s3 + $0x5f0] sm:$0xff] }
 0x133   : > { %1289 = vmatpush.msrb.mxu0 %v1165_v6  ;;  %1309 = vmatpush.msrb.mxu1 %v1166_v7 }
 0x134   : > { %1329 = vmatpush.msrb.mxu2 %v1167_v10  ;;  %1671 = vmatpush.msrb.mxu3 %v1493_v50  ;;  %v1515_v10 = vld [vmem:[%s11797_s3 + $0x170] sm:$0xff]  ;;  %v1565_v50 = vld [vmem:[%s11797_s3 + $0x300] sm:$0xff] }
 0x135   : > { %1290 = vmatpush.msrb.mxu0 %v1158_v8  ;;  %1310 = vmatpush.msrb.mxu1 %v1159_v9  ;;  %v1481_v9 = vld [vmem:[%s11797_s3 + $0x60] sm:$0xff] }
 0x136   : > { %1330 = vmatpush.msrb.mxu2 %v1160_v11  ;;  %1672 = vmatpush.msrb.mxu3 %v1491_v53  ;;  %v1583_v11 = vld [vmem:[%s11797_s3 + $0x390] sm:$0xff] }
 0x137   : > { %1291 = vmatpush.msrb.mxu0 %v1151_v12  ;;  %1311 = vmatpush.msrb.mxu1 %v1152_v13  ;;  %v1479_v12 = vld [vmem:[%s11797_s3 + $0x50] sm:$0xff]  ;;  %v1513_v13 = vld [vmem:[%s11797_s3 + $0x160] sm:$0xff] }
 0x138   : > { %1331 = vmatpush.msrb.mxu2 %v1153_v14  ;;  %1673 = vmatpush.msrb.mxu3 %v1489_v56  ;;  %v1581_v14 = vld [vmem:[%s11797_s3 + $0x380] sm:$0xff]  ;;  %v1655_v53 = vld [vmem:[%s11797_s3 + $0x5d0] sm:$0xff] }
 0x139   : > { %1292 = vmatpush.msrb.mxu0 %v1144_v16  ;;  %1312 = vmatpush.msrb.mxu1 %v1145_v17  ;;  %v1477_v16 = vld [vmem:[%s11797_s3 + $0x40] sm:$0xff]  ;;  %v1511_v17 = vld [vmem:[%s11797_s3 + $0x150] sm:$0xff] }
 0x13a   : > { %1332 = vmatpush.msrb.mxu2 %v1146_v18  ;;  %1674 = vmatpush.msrb.mxu3 %v1487_v60  ;;  %v1579_v18 = vld [vmem:[%s11797_s3 + $0x370] sm:$0xff]  ;;  %v1617_v60 = vld [vmem:[%s11797_s3 + $0x4a0] sm:$0xff] }
 0x13b   : > { %1293 = vmatpush.msrb.mxu0 %v1137_v19  ;;  %1313 = vmatpush.msrb.mxu1 %v1138_v20  ;;  %v1475_v19 = vld [vmem:[%s11797_s3 + $0x30] sm:$0xff]  ;;  %v1509_v20 = vld [vmem:[%s11797_s3 + $0x140] sm:$0xff] }
 0x13c   : > { %1333 = vmatpush.msrb.mxu2 %v1139_v21  ;;  %1675 = vmatpush.msrb.mxu3 %v1485_v0  ;;  %v1577_v21 = vld [vmem:[%s11797_s3 + $0x360] sm:$0xff]  ;;  %v1619_v56 = vld [vmem:[%s11797_s3 + $0x4b0] sm:$0xff] }
 0x13d   : > { %1294 = vmatpush.msrb.mxu0 %v1130_v22  ;;  %1314 = vmatpush.msrb.mxu1 %v1131_v23  ;;  %v1473_v22 = vld [vmem:[%s11797_s3 + $0x20] sm:$0xff]  ;;  %v1507_v23 = vld [vmem:[%s11797_s3 + $0x130] sm:$0xff] }
 0x13e   : > { %1334 = vmatpush.msrb.mxu2 %v1132_v24  ;;  %6562 = vmatmul.msk.f32.vlgmr.msrb.gmra.mxu0 %vm11741_vm10, %v7175_v58  ;;  %v1563_v24 = vld [vmem:[%s11797_s3 + $0x2f0] sm:$0xff] }
 0x13f   : > { %6563 = vmatmul.msk.f32.vlgmr.msrb.gmra.mxu1 %vm11741_vm10, %v7175_v58  ;;  %6564 = vmatmul.msk.f32.vlgmr.msrb.gmra.mxu2 %vm11741_vm10, %v7175_v58  ;;  %v1589_v58 = vld [vmem:[%s11797_s3 + $0x3c0] sm:$0xff]  ;;  %v1551_v0 = vld [vmem:[%s11797_s3 + $0x290] sm:$0xff] }
 0x140   : > { %1688 = vmatpush.msra.mxu0 %v1531_v42  ;;  %1728 = vmatpush.msra.mxu2 %v1595_v46  ;;  %v1569_v42 = vld [vmem:[%s11797_s3 + $0x320] sm:$0xff]  ;;  %v1567_v46 = vld [vmem:[%s11797_s3 + $0x310] sm:$0xff] }
 0x141   : > { %1676 = vmatpush.msrb.mxu3 %v1483_v3  ;;  %1708 = vmatpush.msra.mxu1 %v1563_v24  ;;  %v1649_v3 = vld [vmem:[%s11797_s3 + $0x5a0] sm:$0xff] }
 0x142   : > { %1689 = vmatpush.msra.mxu0 %v1529_v43  ;;  %1729 = vmatpush.msra.mxu2 %v1593_v48  ;;  %v1625_v43 = vld [vmem:[%s11797_s3 + $0x4e0] sm:$0xff] }
 0x143   : > { %1677 = vmatpush.msrb.mxu3 %v1481_v9  ;;  %1709 = vmatpush.msra.mxu1 %v1561_v41  ;;  %v1657_v48 = vld [vmem:[%s11797_s3 + $0x5e0] sm:$0xff]  ;;  %v1492_v9 = vld [vmem:[%s11797_s3 + $0xb8] sm:$0xff] }
 0x144   : > { %1690 = vmatpush.msra.mxu0 %v1527_v45  ;;  %1730 = vmatpush.msra.mxu2 %v1591_v55  ;;  %v1559_v45 = vld [vmem:[%s11797_s3 + $0x2d0] sm:$0xff]  ;;  %v1605_v24 = vld [vmem:[%s11797_s3 + $0x440] sm:$0xff]  ;;  %v1480_v41 = vld [vmem:[%s11797_s3 + $0x58] sm:$0xff] }
 0x145   : > { %1678 = vmatpush.msrb.mxu3 %v1479_v12  ;;  %1710 = vmatpush.msra.mxu1 %v1559_v45  ;;  %v1555_v55 = vld [vmem:[%s11797_s3 + $0x2b0] sm:$0xff]  ;;  %v1645_v12 = vld [vmem:[%s11797_s3 + $0x580] sm:$0xff]  ;;  %v1478_v45 = vld [vmem:[%s11797_s3 + $0x48] sm:$0xff] }
 0x146   : > { %1691 = vmatpush.msra.mxu0 %v1525_v51  ;;  %1731 = vmatpush.msra.mxu2 %v1589_v58  ;;  %v1621_v51 = vld [vmem:[%s11797_s3 + $0x4c0] sm:$0xff]  ;;  %v1498_v58 = vld [vmem:[%s11797_s3 + $0xe8] sm:$0xff] }
 0x147   : > { %1679 = vmatpush.msrb.mxu3 %v1477_v16  ;;  %v1609_v16 = vld [vmem:[%s11797_s3 + $0x460] sm:$0xff] }
 0x148   : > { %1692 = vmatpush.msra.mxu0 %v1523_v54  ;;  %1732 = vmatpush.msra.mxu2 %v1587_v63  ;;  %v1500_v54 = vld [vmem:[%s11797_s3 + $0xf8] sm:$0xff] }
 0x149   : > { %1680 = vmatpush.msrb.mxu3 %v1475_v19  ;;  %v1496_v63 = vld [vmem:[%s11797_s3 + $0xd8] sm:$0xff]  ;;  %v1543_v19 = vld [vmem:[%s11797_s3 + $0x250] sm:$0xff] }
 0x14a   : > { %1693 = vmatpush.msra.mxu0 %v1521_v57  ;;  %1733 = vmatpush.msra.mxu2 %v1585_v4  ;;  %v1653_v57 = vld [vmem:[%s11797_s3 + $0x5c0] sm:$0xff]  ;;  %v1494_v4 = vld [vmem:[%s11797_s3 + $0xc8] sm:$0xff] }
 0x14b   : > { %1681 = vmatpush.msrb.mxu3 %v1473_v22  ;;  %v1486_v22 = vld [vmem:[%s11797_s3 + $0x88] sm:$0xff] }
 0x14c   : > { %1694 = vmatpush.msra.mxu0 %v1519_v61  ;;  %1734 = vmatpush.msra.mxu2 %v1583_v11  ;;  %v1651_v61 = vld [vmem:[%s11797_s3 + $0x5b0] sm:$0xff] }
 0x14d   : > { %v1611_v11 = vld [vmem:[%s11797_s3 + $0x470] sm:$0xff] }
 0x14e   : > { %1695 = vmatpush.msra.mxu0 %v1517_v1  ;;  %1735 = vmatpush.msra.mxu2 %v1581_v14  ;;  %v1615_v1 = vld [vmem:[%s11797_s3 + $0x490] sm:$0xff]  ;;  %v1545_v14 = vld [vmem:[%s11797_s3 + $0x260] sm:$0xff] }
 0x150   : > { %1696 = vmatpush.msra.mxu0 %v1515_v10  ;;  %1736 = vmatpush.msra.mxu2 %v1579_v18  ;;  %v1547_v10 = vld [vmem:[%s11797_s3 + $0x270] sm:$0xff]  ;;  %v1488_v18 = vld [vmem:[%s11797_s3 + $0x98] sm:$0xff] }
 0x152   : > { %1697 = vmatpush.msra.mxu0 %v1513_v13  ;;  %1737 = vmatpush.msra.mxu2 %v1577_v21  ;;  %v1490_v13 = vld [vmem:[%s11797_s3 + $0xa8] sm:$0xff]  ;;  %v1641_v21 = vld [vmem:[%s11797_s3 + $0x560] sm:$0xff] }
 0x154   : > { %1698 = vmatpush.msra.mxu0 %v1511_v17  ;;  %v1643_v17 = vld [vmem:[%s11797_s3 + $0x570] sm:$0xff] }
 0x156   : > { %1699 = vmatpush.msra.mxu0 %v1509_v20  ;;  %v1607_v20 = vld [vmem:[%s11797_s3 + $0x450] sm:$0xff] }
 0x158   : > { %1700 = vmatpush.msra.mxu0 %v1507_v23  ;;  %v1541_v23 = vld [vmem:[%s11797_s3 + $0x240] sm:$0xff] }
 0x1a8   : > { %v1216_v26 = vpop.f32.mrf.mxu0  ;;  %v1236_v27 = vpop.f32.mrf.mxu1 }
 0x1a9   : > { %v7194_v28 = vadd.f32 %v1216_v26, %v7191_v25  ;;  %v1237_v29 = vadd.f32 %v1236_v27, %v7191_v25  ;;  %v1471_v26 = vld [vmem:[%s11797_s3 + $0x10] sm:$0xff]  ;;  %v1505_v27 = vld [vmem:[%s11797_s3 + $0x120] sm:$0xff] }
 0x1aa   : > { %1682 = vmatpush.msrb.mxu3 %v1471_v26  ;;  %1701 = vmatpush.msra.mxu0 %v1505_v27  ;;  %v1484_v26 = vld [vmem:[%s11797_s3 + $0x78] sm:$0xff]  ;;  %v1539_v27 = vld [vmem:[%s11797_s3 + $0x230] sm:$0xff] }
 0x1ab   : > { %v1339_v30 = vmax.f32 %v7194_v28, 0.0  ;;  %v7198_v31 = vmax.f32 %v1237_v29, 0.0  ;;  %v1573_v29 = vld [vmem:[%s11797_s3 + $0x340] sm:$0xff]  ;;  %v1564_v28 = vld [vmem:[%s11797_s3 + $0x2f8] sm:$0xff] }
 0x1ad   : > { %1347 = vst [vmem:[#allocation2 + $0x10] sm:$0xff] %v7198_v31  ;;  %v6727_v32 = vpack.i.bf16 %v7198_v31, %v1339_v30 }
 0x1af   : > { %v1256_v33 = vpop.f32.mrf.mxu2  ;;  %v1276_v34 = vpop.f32.mrf.mxu3  ;;  %6728 = vrot.lane.b32.xlu0 %v6727_v32, %s11717_s4  ;;  %6723 = vrot.lane.b32.xlu2 %v6727_v32, %s11719_s9 }
 0x1b0   : > { %v7207_v35 = vadd.f32 %v1256_v33, %v7191_v25  ;;  %v7210_v36 = vadd.f32 %v1276_v34, %v7191_v25  ;;  %6718 = vrot.lane.b32.xlu1 %v6727_v32, %s11721_s11  ;;  %v1469_v32 = vld [vmem:[%s11797_s3] sm:$0xff]  ;;  %v1503_v33 = vld [vmem:[%s11797_s3 + $0x110] sm:$0xff] }
 0x1b1   : > { %v1571_v34 = vld [vmem:[%s11797_s3 + $0x330] sm:$0xff]  ;;  %1683 = vmatpush.msrb.mxu3 %v1469_v32  ;;  %1702 = vmatpush.msra.mxu0 %v1503_v33  ;;  %v1637_v32 = vld [vmem:[%s11797_s3 + $0x540] sm:$0xff]  ;;  %v1482_v33 = vld [vmem:[%s11797_s3 + $0x68] sm:$0xff] }
 0x1b2   : > { %v1341_v37 = vmax.f32 %v7207_v35, 0.0  ;;  %v1342_v38 = vmax.f32 %v7210_v36, 0.0  ;;  %v1550_v36 = vld [vmem:[%s11797_s3 + $0x288] sm:$0xff] }
 0x1b3   : > { %1703 = vmatpush.msra.mxu0 %v1501_v40  ;;  %v1635_v40 = vld [vmem:[%s11797_s3 + $0x530] sm:$0xff] }
 0x1b4   : > { %v6742_v39 = vpack.i.bf16 %v1342_v38, %v1341_v37 }
 0x1b5   : > { %1768 = vmatpush.msrb.mxu0 %v1659_v44  ;;  %v1633_v44 = vld [vmem:[%s11797_s3 + $0x520] sm:$0xff] }
 0x1b7   : > { %6743 = vrot.lane.b32.xlu0 %v6742_v39, %s11717_s4  ;;  %1769 = vmatpush.msrb.mxu0 %v1657_v48  ;;  %v1631_v48 = vld [vmem:[%s11797_s3 + $0x510] sm:$0xff]  ;;  %s11727_s4 = smov 13  }
 0x1b8   : > { %6733 = vrot.lane.b32.xlu1 %v6742_v39, %s11721_s11 }
 0x1b9   : > { %1770 = vmatpush.msrb.mxu0 %v1655_v53  ;;  %v1661_v53 = vld [vmem:[%s11797_s3 + $0x600] sm:$0xff] }
 0x1bb   : > { %v1296_v47 = vpop.f32.mrf.mxu0  ;;  %1771 = vmatpush.msrb.mxu0 %v1653_v57 }
 0x1bc   : > { %v1297_v49 = vadd.f32 %v1296_v47, %v7191_v25  ;;  %v1316_v5 = vpop.f32.mrf.mxu1  ;;  %v1623_v47 = vld [vmem:[%s11797_s3 + $0x4d0] sm:$0xff] }
 0x1bd   : > { %v1317_v7 = vadd.f32 %v1316_v5, %v7191_v25  ;;  %1772 = vmatpush.msrb.mxu0 %v1651_v61  ;;  %v1549_v5 = vld [vmem:[%s11797_s3 + $0x280] sm:$0xff] }
 0x1be   : > { %v7252_v52 = vmax.f32 %v1297_v49, 0.0  ;;  %v1557_v49 = vld [vmem:[%s11797_s3 + $0x2c0] sm:$0xff] }
 0x1bf   : > { %v7311_v8 = vmax.f32 %v1317_v7, 0.0  ;;  %1711 = vmatpush.msra.mxu1 %v1557_v49  ;;  %1773 = vmatpush.msrb.mxu0 %v1649_v3  ;;  %v1647_v7 = vld [vmem:[%s11797_s3 + $0x590] sm:$0xff] }
 0x1c0   : > { %1375 = vrot.lane.b32.xlu2 %v7252_v52, %s11721_s11  ;;  %6738 = vrot.lane.b32.xlu1 %v6742_v39, %s11719_s9  ;;  %v1627_v39 = vld [vmem:[%s11797_s3 + $0x4f0] sm:$0xff] }
 0x1c1   : > { %1748 = vmatpush.msra.mxu3 %v1627_v39  ;;  %1712 = vmatpush.msra.mxu1 %v1555_v55  ;;  %v1601_v39 = vld [vmem:[%s11797_s3 + $0x420] sm:$0xff]  ;;  %v1663_v49 = vld [vmem:[%s11797_s3 + $0x610] sm:$0xff]  ;;  %v1472_v55 = vld [vmem:[%s11797_s3 + $0x18] sm:$0xff] }
 0x1c2   : > { %v1336_v59 = vpop.f32.mrf.mxu2  ;;  %1774 = vmatpush.msrb.mxu0 %v1647_v7 }
 0x1c3   : > { %v7282_v62 = vadd.f32 %v1336_v59, %v7191_v25  ;;  %v1575_v25 = vld [vmem:[%s11797_s3 + $0x350] sm:$0xff]  ;;  %1749 = vmatpush.msra.mxu3 %v1625_v43  ;;  %v1553_v59 = vld [vmem:[%s11797_s3 + $0x2a0] sm:$0xff] }
 0x1c4   : > { %1738 = vmatpush.msra.mxu2 %v1575_v25  ;;  %1713 = vmatpush.msra.mxu1 %v1553_v59  ;;  %v1639_v25 = vld [vmem:[%s11797_s3 + $0x550] sm:$0xff]  ;;  %v1470_v59 = vld [vmem:[%s11797_s3 + $0x8] sm:$0xff] }
 0x1c5   : > { %v1345_v2 = vmax.f32 %v7282_v62, 0.0  ;;  %1750 = vmatpush.msra.mxu3 %v1623_v47  ;;  %1775 = vmatpush.msrb.mxu0 %v1645_v12  ;;  %v1599_v43 = vld [vmem:[%s11797_s3 + $0x410] sm:$0xff]  ;;  %v1597_v47 = vld [vmem:[%s11797_s3 + $0x400] sm:$0xff]  ;;  %v1542_v62 = vld [vmem:[%s11797_s3 + $0x248] sm:$0xff] }
 0x1c6   : > { %1739 = vmatpush.msra.mxu2 %v1573_v29  ;;  %1714 = vmatpush.msra.mxu1 %v1551_v0  ;;  %v1603_v29 = vld [vmem:[%s11797_s3 + $0x430] sm:$0xff] }
 0x1c7   : > { %1352 = vst.msk [vmem:[#allocation2 + $0x38] sm:$0xff] %vm824_vm4, %v1345_v2  ;;  %1751 = vmatpush.msra.mxu3 %v1621_v51  ;;  %1776 = vmatpush.msrb.mxu0 %v1643_v17  ;;  %v1629_v51 = vld [vmem:[%s11797_s3 + $0x500] sm:$0xff] }
 0x1c8   : > { %1409 = vrot.lane.b32.xlu2 %v7252_v52, %s11719_s9  ;;  %1443 = vrot.lane.b32.xlu1 %v7252_v52, %s11798_s10 }
 0x1c9   : > { %1740 = vmatpush.msra.mxu2 %v1571_v34  ;;  %1752 = vmatpush.msra.mxu3 %v1619_v56  ;;  %v1537_v34 = vld [vmem:[%s11797_s3 + $0x220] sm:$0xff] }
 0x1ca   : > { %1715 = vmatpush.msra.mxu1 %v1549_v5  ;;  %1777 = vmatpush.msrb.mxu0 %v1641_v21 }
 0x1cb   : > { %1741 = vmatpush.msra.mxu2 %v1569_v42  ;;  %1753 = vmatpush.msra.mxu3 %v1617_v60  ;;  %v1535_v42 = vld [vmem:[%s11797_s3 + $0x210] sm:$0xff] }
 0x1cc   : > { %1716 = vmatpush.msra.mxu1 %v1547_v10  ;;  %1778 = vmatpush.msrb.mxu0 %v1639_v25 }
 0x1cd   : > { %1742 = vmatpush.msra.mxu2 %v1567_v46  ;;  %1754 = vmatpush.msra.mxu3 %v1615_v1  ;;  %v1533_v46 = vld [vmem:[%s11797_s3 + $0x200] sm:$0xff] }
 0x1ce   : > { %v1359_v6 = vld [vmem:[#allocation2 + $0x38] sm:$0xff]  ;;  %1717 = vmatpush.msra.mxu1 %v1545_v14  ;;  %1779 = vmatpush.msrb.mxu0 %v1637_v32 }
 0x1cf   : > { %1413 = vrot.lane.b32.xlu0 %v1359_v6, %s11719_s9  ;;  %1743 = vmatpush.msra.mxu2 %v1565_v50  ;;  %v1476_v50 = vld [vmem:[%s11797_s3 + $0x38] sm:$0xff] }
 0x1d0   : > { %1379 = vrot.lane.b32.xlu2 %v1359_v6, %s11721_s11  ;;  %1447 = vrot.lane.b32.xlu1 %v1359_v6, %s11798_s10  ;;  %v1613_v6 = vld [vmem:[%s11797_s3 + $0x480] sm:$0xff] }
 0x1d1   : > { %1808 = vmatpush.msrb.mxu2 %v1500_v54  ;;  %1755 = vmatpush.msra.mxu3 %v1613_v6  ;;  %v1474_v54 = vld [vmem:[%s11797_s3 + $0x28] sm:$0xff] }
 0x1d2   : > { %1718 = vmatpush.msra.mxu1 %v1543_v19  ;;  %1780 = vmatpush.msrb.mxu0 %v1635_v40 }
 0x1d3   : > { %1809 = vmatpush.msrb.mxu2 %v1498_v58  ;;  %1756 = vmatpush.msra.mxu3 %v1611_v11 }
 0x1d4   : > { %1719 = vmatpush.msra.mxu1 %v1541_v23  ;;  %1781 = vmatpush.msrb.mxu0 %v1633_v44  ;;  %v1560_v23 = vld [vmem:[%s11797_s3 + $0x2d8] sm:$0xff] }
 0x1d5   : > { %1810 = vmatpush.msrb.mxu2 %v1496_v63  ;;  %1757 = vmatpush.msra.mxu3 %v1609_v16 }
 0x1d6   : > { %1720 = vmatpush.msra.mxu1 %v1539_v27  ;;  %1782 = vmatpush.msrb.mxu0 %v1631_v48 }
 0x1d7   : > { %1411 = vrot.lane.b32.xlu0 %v7311_v8, %s11719_s9  ;;  %1811 = vmatpush.msrb.mxu2 %v1494_v4 }
 0x1d8   : > { %1377 = vrot.lane.b32.xlu2 %v7311_v8, %s11721_s11  ;;  %1445 = vrot.lane.b32.xlu1 %v7311_v8, %s11798_s10  ;;  %s11799_s11 = sld [smem:[#allocation38_spill]] }
 0x1d9   : > { %1812 = vmatpush.msrb.mxu2 %v1492_v9  ;;  %1758 = vmatpush.msra.mxu3 %v1607_v20 }
 0x1da   : > { %1721 = vmatpush.msra.mxu1 %v1537_v34  ;;  %1783 = vmatpush.msrb.mxu0 %v1629_v51 }
 0x1db   : > { %1813 = vmatpush.msrb.mxu2 %v1490_v13  ;;  %1759 = vmatpush.msra.mxu3 %v1605_v24 }
 0x1dc   : > { %1722 = vmatpush.msra.mxu1 %v1535_v42 }
 0x1dd   : > { %1814 = vmatpush.msrb.mxu2 %v1488_v18  ;;  %1760 = vmatpush.msra.mxu3 %v1603_v29  ;;  %v1558_v29 = vld [vmem:[%s11797_s3 + $0x2c8] sm:$0xff] }
 0x1de   : > { %1723 = vmatpush.msra.mxu1 %v1533_v46  ;;  %v7592_v56 = vld [vmem:[%s11799_s11 + $0x10] ss:$8 sm:$0x3]  ;;  %v7608_v4 = vld [vmem:[%s11799_s11 + $0x7] ss:$8 sm:$0x3] }
 0x1df   : > { %1815 = vmatpush.msrb.mxu2 %v1486_v22  ;;  %1761 = vmatpush.msra.mxu3 %v1601_v39  ;;  %v2173_v58 = vperm.slane %v7592_v56, 1  ;;  %v2147_v10 = vperm.slane %v7608_v4, 0  ;;  %v6572_v12 = vld [vmem:[%s11799_s11 + $0x6] ss:$8 sm:$0x3]  ;;  %v1556_v39 = vld [vmem:[%s11797_s3 + $0x2b8] sm:$0xff] }
 0x1e0   : > { %1802 = vmatpush.msrb.mxu1 %v1663_v49  ;;  %v2122_v14 = vperm.slane %v6572_v12, 0  ;;  %v2123_v22 = vperm.slane %v6572_v12, 1  ;;  %v7640_v24 = vld [vmem:[%s11799_s11 + $0x5] ss:$8 sm:$0x3]  ;;  %v1528_v12 = vld [vmem:[%s11797_s3 + $0x1d8] sm:$0xff] }
 0x1e1   : > { %1816 = vmatpush.msrb.mxu2 %v1484_v26  ;;  %1762 = vmatpush.msra.mxu3 %v1599_v43  ;;  %v2098_v26 = vperm.slane %v7640_v24, 1  ;;  %v1554_v46 = vld [vmem:[%s11797_s3 + $0x2a8] sm:$0xff] }
 0x1e2   : > { %1803 = vmatpush.msrb.mxu1 %v1661_v53  ;;  %2176 = vrot.lane.b32.xlu0 %v2173_v58, %s11725_s5  ;;  %v7674_v35 = vld [vmem:[%s11799_s11 + $0x2] ss:$8 sm:$0x3]  ;;  %v1552_v53 = vld [vmem:[%s11797_s3 + $0x298] sm:$0xff] }
 0x1e3   : > { %1817 = vmatpush.msrb.mxu2 %v1482_v33  ;;  %1763 = vmatpush.msra.mxu3 %v1597_v47  ;;  %v7664_v47 = vld [vmem:[%s11799_s11 + $0x3] ss:$8 sm:$0x3]  ;;  %v2022_v58 = vperm.slane %v7674_v35, 0 }
 0x1e4   : > { %2149 = vrot.lane.b32.xlu1 %v2147_v10, %s11723_s29  ;;  %s11800_s29 = smov 1   ;;  %v1548_v10 = vld [vmem:[%s11797_s3 + $0x278] sm:$0xff] }
 0x1e5   : > { %1818 = vmatpush.msrb.mxu2 %v1480_v41 }
 0x1e7   : > { %1819 = vmatpush.msrb.mxu2 %v1478_v45 }
 0x1e9   : > { %1820 = vmatpush.msrb.mxu2 %v1476_v50 }
 0x1ea   : > { %2124 = vrot.lane.b32.xlu0 %v2122_v14, %s11727_s4  ;;  %v1628_v14 = vld [vmem:[%s11797_s3 + $0x4f8] sm:$0xff] }
 0x1eb   : > { %1821 = vmatpush.msrb.mxu2 %v1474_v54  ;;  %v2055_v54 = vperm.slane %v7664_v47, 0 }
 0x1ec   : > { %2126 = vrot.lane.b32.xlu1 %v2123_v22, %s11727_s4  ;;  %v1588_v22 = vld [vmem:[%s11797_s3 + $0x3b8] sm:$0xff]  ;;  %s11809_s4 = sld [smem:[#allocation36_spill]] }
 0x1ed   : > { %1822 = vmatpush.msrb.mxu2 %v1472_v55 }
 0x1ef   : > { %1823 = vmatpush.msrb.mxu2 %v1470_v59 }
 0x1f2   : > { %2101 = vrot.lane.b32.xlu0 %v2098_v26, %s11800_s29  ;;  %v1624_v26 = vld [vmem:[%s11797_s3 + $0x4d8] sm:$0xff] }
 0x1f4   : > { %2057 = vrot.lane.b32.xlu1 %v2055_v54, %s11801_s2 }
 0x209   : > { %v7594_v57 = vpop.permute.xlu2 %6723 }
 0x20a   : > { %v6726_v63 = vunpack.i.h.bf16 %v7594_v57  ;;  %v6725_v0 = vunpack.i.l.bf16 %v7594_v57 }
 0x20c   : > { %v1415_v13 = vsel %vm11747_vm3, %v6725_v0, %v6726_v63  ;;  %v1596_v0 = vld [vmem:[%s11797_s3 + $0x3f8] sm:$0xff] }
 0x21a   : > { %v7610_v5 = vpop.permute.xlu2 %1375 }
 0x221   : > { %v7601_v60 = vpop.permute.xlu0 %6728 }
 0x222   : > { %v6719_v61 = vpop.permute.xlu1 %6718  ;;  %v6731_v6 = vunpack.i.h.bf16 %v7601_v60  ;;  %v6730_v7 = vunpack.i.l.bf16 %v7601_v60  ;;  %v7642_v25 = vpop.permute.xlu2 %1409 }
 0x223   : > { %v6721_v1 = vunpack.i.h.bf16 %v6719_v61  ;;  %v6720_v3 = vunpack.i.l.bf16 %v6719_v61 }
 0x224   : > { %v1449_v17 = vsel %vm979_vm2, %v6730_v7, %v6731_v6  ;;  %v1594_v7 = vld [vmem:[%s11797_s3 + $0x3e8] sm:$0xff] }
 0x225   : > { %v1381_v9 = vsel %vm1044_vm1, %v6720_v3, %v6721_v1 }
 0x226   : > { %v1394_v11 = vmax.f32 %v1339_v30, %v1381_v9  ;;  %v1562_v30 = vld [vmem:[%s11797_s3 + $0x2e8] sm:$0xff] }
 0x228   : > { %v1428_v16 = vmax.f32 %v1394_v11, %v1415_v13  ;;  %v1592_v13 = vld [vmem:[%s11797_s3 + $0x3d8] sm:$0xff] }
 0x229   : > { %v6744_v27 = vpop.permute.xlu0 %6743 }
 0x22a   : > { %v6734_v18 = vpop.permute.xlu1 %6733  ;;  %v7625_v19 = vmax.f32 %v1428_v16, %v1449_v17  ;;  %v6746_v40 = vunpack.i.h.bf16 %v6744_v27  ;;  %v6745_v41 = vunpack.i.l.bf16 %v6744_v27  ;;  %v1546_v16 = vld [vmem:[%s11797_s3 + $0x268] sm:$0xff] }
 0x22b   : > { %v6736_v20 = vunpack.i.h.bf16 %v6734_v18  ;;  %v6735_v21 = vunpack.i.l.bf16 %v6734_v18  ;;  %v1526_v17 = vld [vmem:[%s11797_s3 + $0x1c8] sm:$0xff] }
 0x22c   : > { %1684 = vmatmul.f32.vlgmr.msrb.gmra.mxu3 %v7625_v19  ;;  %v1450_v55 = vsel %vm979_vm2, %v6731_v6, %v6745_v41  ;;  %v1451_v57 = vsel %vm979_vm2, %v6745_v41, %v6746_v40  ;;  %v1530_v6 = vld [vmem:[%s11797_s3 + $0x1e8] sm:$0xff]  ;;  %v1584_v41 = vld [vmem:[%s11797_s3 + $0x398] sm:$0xff] }
 0x22d   : > { %1848 = vmatpush.msrb.mxu3 %v1564_v28  ;;  %v1382_v32 = vsel %vm1044_vm1, %v6721_v1, %v6735_v21  ;;  %v1383_v33 = vsel %vm1044_vm1, %v6735_v21, %v6736_v20  ;;  %v1384_v48 = vsel %vm1044_vm1, %v6736_v20, %v7610_v5  ;;  %v1380_v1 = vpop.permute.xlu2 %1379  ;;  %v1590_v18 = vld [vmem:[%s11797_s3 + $0x3c8] sm:$0xff]  ;;  %v1524_v21 = vld [vmem:[%s11797_s3 + $0x1b8] sm:$0xff] }
 0x22e   : > { %v1395_v44 = vmax.f32 %v7198_v31, %v1382_v32  ;;  %v1396_v45 = vmax.f32 %v1341_v37, %v1383_v33  ;;  %v2172_v31 = vperm.slane %v7592_v56, 0  ;;  %v1397_v59 = vmax.f32 %v1342_v38, %v1384_v48  ;;  %v1626_v28 = vld [vmem:[%s11797_s3 + $0x4e8] sm:$0xff] }
 0x22f   : > { %1849 = vmatpush.msrb.mxu3 %v1562_v30  ;;  %v1544_v30 = vld [vmem:[%s11797_s3 + $0x258] sm:$0xff]  ;;  %v1400_v20 = vmax.f32 %v1345_v2, %v1380_v1  ;;  %v1586_v32 = vld [vmem:[%s11797_s3 + $0x3a8] sm:$0xff] }
 0x230   : > { %2174 = vrot.lane.b32.xlu2 %v2172_v31, %s11725_s5  ;;  %s11729_s5 = smov 115   ;;  %v1618_v48 = vld [vmem:[%s11797_s3 + $0x4a8] sm:$0xff] }
 0x231   : > { %1850 = vmatpush.msrb.mxu3 %v1560_v23  ;;  %2024 = vrot.lane.b32.xlu0 %v2022_v58, %s11729_s5  ;;  %s11733_s5 = smov 114  }
 0x232   : > { %v6739_v34 = vpop.permute.xlu1 %6738 }
 0x233   : > { %v6741_v42 = vunpack.i.h.bf16 %v6739_v34  ;;  %v6740_v43 = vunpack.i.l.bf16 %v6739_v34  ;;  %1851 = vmatpush.msrb.mxu3 %v1558_v29  ;;  %v1522_v29 = vld [vmem:[%s11797_s3 + $0x1a8] sm:$0xff] }
 0x234   : > { %v1622_v34 = vld [vmem:[%s11797_s3 + $0x4c8] sm:$0xff] }
 0x235   : > { %v1416_v49 = vsel %vm11747_vm3, %v6726_v63, %v6740_v43  ;;  %v1417_v50 = vsel %vm11747_vm3, %v6740_v43, %v6741_v42  ;;  %1852 = vmatpush.msrb.mxu3 %v1556_v39  ;;  %v1418_v56 = vsel %vm11747_vm3, %v6741_v42, %v7642_v25  ;;  %v1532_v63 = vld [vmem:[%s11797_s3 + $0x1f8] sm:$0xff]  ;;  %v1378_v33 = vpop.permute.xlu2 %1377 }
 0x236   : > { %v1429_v37 = vmax.f32 %v1395_v44, %v1416_v49  ;;  %v1430_v51 = vmax.f32 %v1396_v45, %v1417_v50  ;;  %v1431_v3 = vmax.f32 %v1397_v59, %v1418_v56  ;;  %v1620_v42 = vld [vmem:[%s11797_s3 + $0x4b8] sm:$0xff]  ;;  %v1385_v43 = vsel %vm1044_vm1, %v7610_v5, %v1378_v33  ;;  %v1518_v45 = vld [vmem:[%s11797_s3 + $0x188] sm:$0xff] }
 0x237   : > { %1853 = vmatpush.msrb.mxu3 %v1554_v46  ;;  %v1386_v44 = vsel %vm1044_vm1, %v1378_v33, %v1380_v1  ;;  %v1540_v46 = vld [vmem:[%s11797_s3 + $0x238] sm:$0xff]  ;;  %v1582_v5 = vld [vmem:[%s11797_s3 + $0x388] sm:$0xff]  ;;  %v1398_v50 = vmax.f32 %v7252_v52, %v1385_v43 }
 0x238   : > { %v7688_v60 = vmax.f32 %v1429_v37, %v1450_v55  ;;  %v7690_v61 = vmax.f32 %v1430_v51, %v1451_v57  ;;  %v1516_v49 = vld [vmem:[%s11797_s3 + $0x178] sm:$0xff]  ;;  %v1399_v31 = vmax.f32 %v7311_v8, %v1386_v44  ;;  %v1514_v8 = vld [vmem:[%s11797_s3 + $0x168] sm:$0xff] }
 0x239   : > { %1854 = vmatpush.msrb.mxu3 %v1552_v53  ;;  %v1580_v37 = vld [vmem:[%s11797_s3 + $0x378] sm:$0xff]  ;;  %v1538_v55 = vld [vmem:[%s11797_s3 + $0x228] sm:$0xff] }
 0x23a   : > { %v7703_v38 = vpop.permute.xlu1 %1443  ;;  %1704 = vmatmul.f32.vlgmr.msra.gmra.mxu0 %v7688_v60  ;;  %1724 = vmatmul.f32.vlgmr.msra.gmra.mxu1 %v7690_v61  ;;  %v1616_v51 = vld [vmem:[%s11797_s3 + $0x498] sm:$0xff]  ;;  %v1578_v59 = vld [vmem:[%s11797_s3 + $0x368] sm:$0xff] }
 0x23b   : > { %v1452_v9 = vsel %vm979_vm2, %v6746_v40, %v7703_v38  ;;  %1828 = vmatpush.msra.mxu1 %v1532_v63  ;;  %1868 = vmatpush.msra.mxu0 %v1596_v0  ;;  %v1520_v40 = vld [vmem:[%s11797_s3 + $0x198] sm:$0xff]  ;;  %v1614_v63 = vld [vmem:[%s11797_s3 + $0x488] sm:$0xff] }
 0x23c   : > { %v7718_v11 = vmax.f32 %v1431_v3, %v1452_v9  ;;  %1855 = vmatpush.msrb.mxu3 %v1550_v36  ;;  %v1512_v36 = vld [vmem:[%s11797_s3 + $0x158] sm:$0xff]  ;;  %v1574_v9 = vld [vmem:[%s11797_s3 + $0x348] sm:$0xff] }
 0x23d   : > { %1829 = vmatpush.msra.mxu1 %v1530_v6  ;;  %1869 = vmatpush.msra.mxu0 %v1594_v7  ;;  %v1612_v3 = vld [vmem:[%s11797_s3 + $0x478] sm:$0xff]  ;;  %v1510_v7 = vld [vmem:[%s11797_s3 + $0x148] sm:$0xff] }
 0x23e   : > { %1744 = vmatmul.f32.vlgmr.msra.gmra.mxu2 %v7718_v11  ;;  %1856 = vmatpush.msrb.mxu3 %v1548_v10  ;;  %v1536_v6 = vld [vmem:[%s11797_s3 + $0x218] sm:$0xff]  ;;  %v1610_v10 = vld [vmem:[%s11797_s3 + $0x468] sm:$0xff] }
 0x23f   : > { %1830 = vmatpush.msra.mxu1 %v1528_v12  ;;  %1870 = vmatpush.msra.mxu0 %v1592_v13  ;;  %v1534_v12 = vld [vmem:[%s11797_s3 + $0x208] sm:$0xff]  ;;  %v1508_v13 = vld [vmem:[%s11797_s3 + $0x138] sm:$0xff] }
 0x240   : > { %1888 = vmatpush.msra.mxu2 %v1628_v14  ;;  %1857 = vmatpush.msrb.mxu3 %v1546_v16  ;;  %v1572_v14 = vld [vmem:[%s11797_s3 + $0x338] sm:$0xff]  ;;  %v6567_v33 = vld [vmem:[%s11799_s11 + $0x1] ss:$8 sm:$0x3] }
 0x241   : > { %v1414_v23 = vpop.permute.xlu0 %1413  ;;  %1831 = vmatpush.msra.mxu1 %v1526_v17  ;;  %1871 = vmatpush.msra.mxu0 %v1590_v18  ;;  %v1608_v16 = vld [vmem:[%s11797_s3 + $0x458] sm:$0xff]  ;;  %v1506_v18 = vld [vmem:[%s11797_s3 + $0x128] sm:$0xff] }
 0x242   : > { %v1434_v2 = vmax.f32 %v1400_v20, %v1414_v23  ;;  %1889 = vmatpush.msra.mxu2 %v1626_v28  ;;  %v1448_v27 = vpop.permute.xlu1 %1447  ;;  %1858 = vmatpush.msrb.mxu3 %v1544_v30  ;;  %v1664_v17 = vld [vmem:[%s11797_s3 + $0x618] sm:$0xff]  ;;  %v1570_v28 = vld [vmem:[%s11797_s3 + $0x328] sm:$0xff] }
 0x243   : > { %1832 = vmatpush.msra.mxu1 %v1524_v21  ;;  %1872 = vmatpush.msra.mxu0 %v1588_v22  ;;  %v1606_v30 = vld [vmem:[%s11797_s3 + $0x448] sm:$0xff]  ;;  %v1504_v20 = vld [vmem:[%s11797_s3 + $0x118] sm:$0xff] }
 0x244   : > { %v7768_v39 = vmax.f32 %v1434_v2, %v1448_v27  ;;  %1890 = vmatpush.msra.mxu2 %v1624_v26  ;;  %1859 = vmatpush.msrb.mxu3 %v1542_v62  ;;  %v1568_v21 = vld [vmem:[%s11797_s3 + $0x318] sm:$0xff]  ;;  %v1502_v26 = vld [vmem:[%s11797_s3 + $0x108] sm:$0xff] }
 0x245   : > { %1833 = vmatpush.msra.mxu1 %v1522_v29  ;;  %1873 = vmatpush.msra.mxu0 %v1586_v32  ;;  %v1604_v22 = vld [vmem:[%s11797_s3 + $0x438] sm:$0xff]  ;;  %v1566_v62 = vld [vmem:[%s11797_s3 + $0x308] sm:$0xff]  ;;  %v2023_v32 = vperm.slane %v7674_v35, 1 }
 0x246   : > { %1891 = vmatpush.msra.mxu2 %v1622_v34  ;;  %6565 = vmatmul.msk.f32.vlgmr.msrb.gmra.mxu1 %vm824_vm4, %v7768_v39  ;;  %v1602_v2 = vld [vmem:[%s11797_s3 + $0x428] sm:$0xff]  ;;  %v1600_v29 = vld [vmem:[%s11797_s3 + $0x418] sm:$0xff] }
 0x247   : > { %1824 = vmatmul.f32.vlgmr.msrb.gmra.mxu2 %v7625_v19  ;;  %1834 = vmatpush.msra.mxu1 %v1520_v40  ;;  %v1658_v34 = vld [vmem:[%s11797_s3 + $0x5e8] sm:$0xff]  ;;  %v1656_v35 = vld [vmem:[%s11797_s3 + $0x5d8] sm:$0xff]  ;;  %v1990_v40 = vperm.slane %v6567_v33, 1 }
 0x248   : > { %1874 = vmatpush.msra.mxu0 %v1584_v41  ;;  %1892 = vmatpush.msra.mxu2 %v1620_v42  ;;  %v1652_v41 = vld [vmem:[%s11797_s3 + $0x5b8] sm:$0xff]  ;;  %v1650_v43 = vld [vmem:[%s11797_s3 + $0x5a8] sm:$0xff] }
 0x249   : > { %v1412_v19 = vpop.permute.xlu0 %1411  ;;  %1835 = vmatpush.msra.mxu1 %v1518_v45  ;;  %1860 = vmatpush.msrb.mxu3 %v1540_v46  ;;  %v1648_v44 = vld [vmem:[%s11797_s3 + $0x598] sm:$0xff]  ;;  %v2056_v46 = vperm.slane %v7664_v47, 1 }
 0x24a   : > { %v1419_v53 = vsel %vm11747_vm3, %v7642_v25, %v1412_v19  ;;  %v1420_v54 = vsel %vm11747_vm3, %v1412_v19, %v1414_v23  ;;  %1875 = vmatpush.msra.mxu0 %v1582_v5  ;;  %1893 = vmatpush.msra.mxu2 %v1618_v48  ;;  %v1446_v52 = vpop.permute.xlu1 %1445  ;;  %v1662_v23 = vld [vmem:[%s11797_s3 + $0x608] sm:$0xff]  ;;  %v1644_v45 = vld [vmem:[%s11797_s3 + $0x578] sm:$0xff]  ;;  %vm2492_vm3 = vcmask 400384  }
 0x24b   : > { %v1432_v57 = vmax.f32 %v1398_v50, %v1419_v53  ;;  %v1433_v56 = vmax.f32 %v1399_v31, %v1420_v54  ;;  %v1453_v58 = vsel %vm979_vm2, %v7703_v38, %v1446_v52  ;;  %v1454_v25 = vsel %vm979_vm2, %v1446_v52, %v1448_v27  ;;  %1836 = vmatpush.msra.mxu1 %v1516_v49  ;;  %v1576_v38 = vld [vmem:[%s11797_s3 + $0x358] sm:$0xff]  ;;  %v1642_v5 = vld [vmem:[%s11797_s3 + $0x568] sm:$0xff] }
 0x24c   : > { %1876 = vmatpush.msra.mxu0 %v1580_v37  ;;  %1894 = vmatpush.msra.mxu2 %v1616_v51  ;;  %v1660_v27 = vld [vmem:[%s11797_s3 + $0x5f8] sm:$0xff]  ;;  %v1638_v49 = vld [vmem:[%s11797_s3 + $0x548] sm:$0xff]  ;;  %v1989_v50 = vperm.slane %v6567_v33, 0 }
 0x24d   : > { %v7826_v0 = vmax.f32 %v1432_v57, %v1453_v58  ;;  %v7828_v1 = vmax.f32 %v1433_v56, %v1454_v25  ;;  %1837 = vmatpush.msra.mxu1 %v1514_v8  ;;  %1861 = vmatpush.msrb.mxu3 %v1538_v55  ;;  %v1640_v48 = vld [vmem:[%s11797_s3 + $0x558] sm:$0xff]  ;;  %v1634_v31 = vld [vmem:[%s11797_s3 + $0x528] sm:$0xff]  ;;  %v7987_v58 = vld [vmem:[#allocation2] sm:$0xff] }
 0x24e   : > { %1877 = vmatpush.msra.mxu0 %v1578_v59  ;;  %1895 = vmatpush.msra.mxu2 %v1614_v63  ;;  %v1636_v47 = vld [vmem:[%s11797_s3 + $0x538] sm:$0xff]  ;;  %v1630_v37 = vld [vmem:[%s11797_s3 + $0x508] sm:$0xff] }
 0x24f   : > { %1764 = vmatmul.f32.vlgmr.msra.gmra.mxu3 %v7826_v0  ;;  %1784 = vmatmul.f32.vlgmr.msrb.gmra.mxu0 %v7828_v1  ;;  %v1632_v19 = vld [vmem:[%s11797_s3 + $0x518] sm:$0xff] }
 0x250   : > { %1838 = vmatpush.msra.mxu1 %v1512_v36  ;;  %1878 = vmatpush.msra.mxu0 %v1576_v38 }
 0x251   : > { %1896 = vmatpush.msra.mxu2 %v1612_v3  ;;  %1862 = vmatpush.msrb.mxu3 %v1536_v6 }
 0x252   : > { %1839 = vmatpush.msra.mxu1 %v1510_v7  ;;  %1879 = vmatpush.msra.mxu0 %v1574_v9 }
 0x253   : > { %1897 = vmatpush.msra.mxu2 %v1610_v10  ;;  %1863 = vmatpush.msrb.mxu3 %v1534_v12 }
 0x254   : > { %1840 = vmatpush.msra.mxu1 %v1508_v13  ;;  %1880 = vmatpush.msra.mxu0 %v1572_v14  ;;  %v7977_v53 = vpop.permute.xlu0 %2176 }
 0x255   : > { %1898 = vmatpush.msra.mxu2 %v1608_v16  ;;  %1942 = vmatpush.msra.mxu3 %v1664_v17  ;;  %v6570_v16 = vld [vmem:[%s11799_s11 + $0x4] ss:$8 sm:$0x3] }
 0x256   : > { %1841 = vmatpush.msra.mxu1 %v1506_v18  ;;  %1881 = vmatpush.msra.mxu0 %v1570_v28  ;;  %v7979_v54 = vpop.permute.xlu1 %2149  ;;  %v2086_v28 = vperm.slane %v6570_v16, 0 }
 0x257   : > { %1899 = vmatpush.msra.mxu2 %v1606_v30  ;;  %1864 = vmatmul.f32.vlgmr.msrb.gmra.mxu3 %v7690_v61  ;;  %v2148_v61 = vperm.slane %v7608_v4, 1  ;;  %v1598_v4 = vld [vmem:[%s11797_s3 + $0x408] sm:$0xff] }
 0x258   : > { %1842 = vmatpush.msra.mxu1 %v1504_v20  ;;  %1882 = vmatpush.msra.mxu0 %v1568_v21 }
 0x259   : > { %1900 = vmatpush.msra.mxu2 %v1604_v22  ;;  %1943 = vmatpush.msra.mxu3 %v1662_v23 }
 0x25a   : > { %1843 = vmatpush.msra.mxu1 %v1502_v26  ;;  %1883 = vmatpush.msra.mxu0 %v1566_v62 }
 0x25b   : > { %1901 = vmatpush.msra.mxu2 %v1602_v2  ;;  %1844 = vmatmul.f32.vlgmr.msra.gmra.mxu1 %v7688_v60  ;;  %v1654_v60 = vld [vmem:[%s11797_s3 + $0x5c8] sm:$0xff] }
 0x25c   : > { %1884 = vmatmul.f32.vlgmr.msra.gmra.mxu0 %v7718_v11  ;;  %1908 = vmatpush.msrb.mxu1 %v1660_v27  ;;  %v1954_v11 = vld [vmem:[%s11799_s11] ss:$8 sm:$0x3]  ;;  %v7981_v52 = vpop.permute.xlu0 %2124 }
 0x25d   : > { %1902 = vmatpush.msra.mxu2 %v1600_v29  ;;  %2151 = vrot.lane.b32.xlu2 %v2148_v61, %s11802_s8  ;;  %v1956_v42 = vperm.slane %v1954_v11, 0  ;;  %v1957_v51 = vperm.slane %v1954_v11, 1 }
 0x25e   : > { %1909 = vmatpush.msrb.mxu1 %v1658_v34  ;;  %2026 = vrot.lane.b32.xlu1 %v2023_v32, %s11803_s0  ;;  %v7983_v8 = vpop.permute.xlu1 %2126 }
 0x25f   : > { %1903 = vmatpush.msra.mxu2 %v1598_v4  ;;  %6566 = vmatmul.msk.f32.vlgmr.msra.gmra.mxu3 %vm824_vm4, %v7768_v39  ;;  %v2097_v39 = vperm.slane %v7640_v24, 0  ;;  %v1646_v24 = vld [vmem:[%s11797_s3 + $0x588] sm:$0xff] }
 0x260   : > { %1904 = vmatmul.f32.vlgmr.msra.gmra.mxu2 %v7826_v0  ;;  %1910 = vmatpush.msrb.mxu1 %v1656_v35 }
 0x261   : > { %1993 = vrot.lane.b32.xlu0 %v1990_v40, %s11733_s5  ;;  %s11806_s5 = smov 13  }
 0x262   : > { %1911 = vmatpush.msrb.mxu1 %v1654_v60 }
 0x264   : > { %1912 = vmatpush.msrb.mxu1 %v1652_v41  ;;  %v7985_v55 = vpop.permute.xlu0 %2101 }
 0x265   : > { %2099 = vrot.lane.b32.xlu2 %v2097_v39, %s11800_s29 }
 0x266   : > { %1913 = vmatpush.msrb.mxu1 %v1650_v43  ;;  %1958 = vrot.lane.b32.xlu1 %v1956_v42, %s11735_s28  ;;  %s11804_s28 = smov 114   ;;  %v2058_v57 = vpop.permute.xlu1 %2057 }
 0x267   : > { %v2065_v25 = vmul.f32 %v7987_v58, %v2058_v57 }
 0x268   : > { %1914 = vmatpush.msrb.mxu1 %v1648_v44 }
 0x26a   : > { %1915 = vmatpush.msrb.mxu1 %v1646_v24 }
 0x26c   : > { %1916 = vmatpush.msrb.mxu1 %v1644_v45  ;;  %v2087_v45 = vperm.slane %v6570_v16, 1 }
 0x26d   : > { %2059 = vrot.lane.b32.xlu2 %v2056_v46, %s11801_s2 }
 0x26e   : > { %1917 = vmatpush.msrb.mxu1 %v1642_v5 }
 0x270   : > { %1918 = vmatpush.msrb.mxu1 %v1640_v48  ;;  %v2128_v48 = vsel %vm2045_vm15, %v7981_v52, %v7983_v8 }
 0x272   : > { %1919 = vmatpush.msrb.mxu1 %v1638_v49 }
 0x274   : > { %1920 = vmatpush.msrb.mxu1 %v1636_v47 }
 0x275   : > { %1991 = vrot.lane.b32.xlu2 %v1989_v50, %s11804_s28 }
 0x276   : > { %1921 = vmatpush.msrb.mxu1 %v1634_v31 }
 0x278   : > { %1922 = vmatpush.msrb.mxu1 %v1632_v19 }
 0x27a   : > { %1923 = vmatpush.msrb.mxu1 %v1630_v37 }
 0x27b   : > { %1924 = vmatmul.f32.vlgmr.msrb.gmra.mxu1 %v7828_v1 }
 0x27d   : > { %1960 = vrot.lane.b32.xlu2 %v1957_v51, %s11805_s27 }
 0x285   : > { %2071 = vrot.lane.b32.xlu2 %v2065_v25, %s11800_s29 }
 0x28a   : > { %v2175_v63 = vpop.permute.xlu2 %2174 }
 0x28b   : > { %v2178_v46 = vsel %vm1979_vm13, %v2175_v63, %v7977_v53 }
 0x2a3   : > { %v2025_v56 = vpop.permute.xlu0 %2024 }
 0x2a4   : > { %v2033_v59 = vmul.f32 %v7987_v58, %v2025_v56 }
 0x2a6   : > { %2039 = vrot.lane.b32.xlu1 %v2033_v59, %s11806_s5 }
 0x2af   : > { %v1685_v1 = vpop.f32.mrf.mxu3 }
 0x2b7   : > { %v1705_v0 = vpop.f32.mrf.mxu0  ;;  %v1725_v38 = vpop.f32.mrf.mxu1 }
 0x2b8   : > { %v1706_v36 = vadd.f32 %v1705_v0, %v1685_v1  ;;  %v2152_v7 = vpop.permute.xlu2 %2151 }
 0x2b9   : > { %v2153_v5 = vsel %vm2012_vm14, %v7979_v54, %v2152_v7 }
 0x2ba   : > { %v1726_v6 = vadd.f32 %v1725_v38, %v1706_v36 }
 0x2c0   : > { %v2100_v22 = vpop.permute.xlu2 %2099 }
 0x2c1   : > { %v1745_v3 = vpop.f32.mrf.mxu2  ;;  %v2103_v59 = vsel %vm1052_vm6, %v2100_v22, %v7985_v55  ;;  %v2215_v55 = vld [vmem:[%s11808_s25 + $0x8] sm:$0xff] }
 0x2c2   : > { %v1746_v9 = vadd.f32 %v1745_v3, %v1726_v6 }
 0x2c3   : > { %v1805_v17 = vpop.f32.mrf.mxu1 }
 0x2c8   : > { %v2060_v61 = vpop.permute.xlu2 %2059 }
 0x2c9   : > { %v2061_v29 = vsel %vm1044_vm1, %v2058_v57, %v2060_v61 }
 0x2ca   : > { %v1825_v34 = vpop.f32.mrf.mxu2 }
 0x2cc   : > { %v1785_v13 = vpop.f32.mrf.mxu0 }
 0x2d0   : > { %v2027_v26 = vpop.permute.xlu1 %2026  ;;  %v1992_v47 = vpop.permute.xlu2 %1991 }
 0x2d1   : > { %v2029_v62 = vsel %vm2028_vm11, %v2025_v56, %v2027_v26 }
 0x2d2   : > { %v1765_v10 = vpop.f32.mrf.mxu3 }
 0x2d3   : > { %v1766_v12 = vadd.f32 %v1765_v10, %v1746_v9  ;;  %v1994_v37 = vpop.permute.xlu0 %1993 }
 0x2d4   : > { %v1996_v53 = vsel %vm1995_vm9, %v1992_v47, %v1994_v37 }
 0x2d5   : > { %v1786_v14 = vadd.f32 %v1785_v13, %v1766_v12 }
 0x2d7   : > { %v7996_v18 = vadd.f32 %v1805_v17, %v1786_v14 }
 0x2d8   : > { %v1845_v33 = vpop.f32.mrf.mxu1  ;;  %v1961_v56 = vpop.permute.xlu2 %1960 }
 0x2d9   : > { %v2181_v30 = vmul.f32 %v2175_v63, %v7996_v18  ;;  %v2156_v20 = vmul.f32 %v7979_v54, %v7996_v18  ;;  %v2131_v21 = vmul.f32 %v7981_v52, %v7996_v18  ;;  %v8007_v23 = vmul.f32 %v2086_v28, %v7996_v18  ;;  %v1885_v60 = vpop.f32.mrf.mxu0  ;;  %v1959_v52 = vpop.permute.xlu1 %1958 }
 0x2da   : > { %v2106_v2 = vmul.f32 %v2100_v22, %v7996_v18  ;;  %v2034_v27 = vmul.f32 %v2029_v62, %v7996_v18  ;;  %v2066_v32 = vmul.f32 %v2061_v29, %v7996_v18  ;;  %v1846_v4 = vadd.f32 %v1845_v33, %v1825_v34  ;;  %v1865_v35 = vpop.f32.mrf.mxu3 }
 0x2db   : > { %2185 = vrot.lane.b32.xlu0 %v2181_v30, %s11805_s27  ;;  %2160 = vrot.lane.b32.xlu2 %v2156_v20, %s11804_s28  ;;  %v2000_v54 = vmul.f32 %v7987_v58, %v1992_v47  ;;  %v1967_v8 = vmul.f32 %v7987_v58, %v1959_v52  ;;  %v2001_v57 = vmul.f32 %v1996_v53, %v7996_v18 }
 0x2dc   : > { %2135 = vrot.lane.b32.xlu1 %v2131_v21, %s11803_s0  ;;  %v1866_v40 = vadd.f32 %v1865_v35, %v1846_v4  ;;  %v1963_v25 = vsel %vm1962_vm8, %v1959_v52, %v1961_v56  ;;  %v2214_v4 = vld [vmem:[%s11808_s25] sm:$0xff] }
 0x2dd   : > { %v1968_v0 = vmul.f32 %v1963_v25, %v7996_v18 }
 0x2de   : > { %v1886_v41 = vadd.f32 %v1885_v60, %v1866_v40 }
 0x2e0   : > { %v2072_v3 = vpop.permute.xlu2 %2071 }
 0x2e2   : > { %v1945_v44 = vpop.f32.mrf.mxu3 }
 0x2e3   : > { %2110 = vrot.lane.b32.xlu0 %v2106_v2, %s11801_s2  ;;  %2041 = vrot.lane.b32.xlu2 %v2034_v27, %s11806_s5  ;;  %v1905_v11 = vpop.f32.mrf.mxu2 }
 0x2e4   : > { %v1906_v39 = vadd.f32 %v1905_v11, %v1886_v41 }
 0x2eb   : > { %2073 = vrot.lane.b32.xlu0 %v2066_v32, %s11800_s29 }
 0x2f8   : > { %v1925_v42 = vpop.f32.mrf.mxu1 }
 0x2f9   : > { %v1926_v43 = vadd.f32 %v1925_v42, %v1906_v39 }
 0x2fb   : > { %v1946_v24 = vadd.f32 %v1945_v44, %v1926_v43  ;;  %v2194_v44 = vld [vmem:[%s11809_s4] sm:$0xff] }
 0x2fd   : > { %1950 = vst.msk [vmem:[#allocation2 + $0x10] sm:$0xff] %vm1949_vm12, %v1946_v24 }
 0x304   : > { %v1953_v49 = vld [vmem:[#allocation2 + $0x10] sm:$0xff] }
 0x305   : > { %v2182_v50 = vmul.f32 %v2178_v46, %v1953_v49  ;;  %v2157_v31 = vmul.f32 %v2153_v5, %v1953_v49  ;;  %v2132_v19 = vmul.f32 %v2128_v48, %v1953_v49  ;;  %v2091_v51 = vmul.f32 %v2087_v45, %v1953_v49  ;;  %v2195_v48 = vld [vmem:[%s11809_s4 + $0x8] sm:$0xff] }
 0x306   : > { %v2107_v63 = vmul.f32 %v2103_v59, %v1953_v49  ;;  %v2035_v1 = vmul.f32 %v2027_v26, %v1953_v49  ;;  %v2067_v58 = vmul.f32 %v2060_v61, %v1953_v49  ;;  %v2002_v36 = vmul.f32 %v1994_v37, %v1953_v49 }
 0x307   : > { %2187 = vrot.lane.b32.xlu1 %v2182_v50, %s11805_s27  ;;  %2162 = vrot.lane.b32.xlu0 %v2157_v31, %s11804_s28  ;;  %2093 = vst.msk [vmem:[#allocation3 + $0xe8] sm:$0xff] %vm1949_vm12, %v2091_v51  ;;  %v1969_v38 = vmul.f32 %v1961_v56, %v1953_v49 }
 0x308   : > { %2137 = vrot.lane.b32.xlu2 %v2132_v19, %s11803_s0 }
 0x30f   : > { %2006 = vrot.lane.b32.xlu0 %v2000_v54, %s11802_s8  ;;  %2008 = vrot.lane.b32.xlu1 %v2001_v57, %s11802_s8 }
 0x310   : > { %1973 = vrot.lane.b32.xlu2 %v1967_v8, %s11807_s6 }
 0x317   : > { %2112 = vrot.lane.b32.xlu1 %v2107_v63, %s11801_s2  ;;  %1975 = vrot.lane.b32.xlu0 %v1968_v0, %s11807_s6 }
 0x318   : > { %2043 = vrot.lane.b32.xlu2 %v2035_v1, %s11806_s5  ;;  %v2040_v13 = vpop.permute.xlu1 %2039 }
 0x31f   : > { %2075 = vrot.lane.b32.xlu1 %v2067_v58, %s11800_s29  ;;  %2010 = vrot.lane.b32.xlu0 %v2002_v36, %s11802_s8 }
 0x320   : > { %2218 = vperm.xlu2 %6747, %v2214_v4   ;;  %v2485_v4 = vld [vmem:[%s11811_s13 + $0x150] sm:$0x1] }
 0x327   : > { %1977 = vrot.lane.b32.xlu1 %v1969_v38, %s11807_s6  ;;  %2223 = vperm.xlu0 %6716, %v2215_v55   ;;  %v2363_v55 = vld [vmem:[%s11810_s7 + $0x78] sm:$0xff]  ;;  %v2372_v38 = vld [vmem:[%s11810_s7 + $0xc0] sm:$0xf] }
 0x328   : > { %2383 = vmatpush.msrb.mxu2 %v2363_v55 }
 0x335   : > { %v2161_v6 = vpop.permute.xlu2 %2160 }
 0x33d   : > { %v2042_v7 = vpop.permute.xlu2 %2041 }
 0x33e   : > { %v2046_v40 = vsel %vm2045_vm15, %v2040_v13, %v2042_v7  ;;  %v2369_v13 = vld [vmem:[%s11810_s7 + $0xa8] sm:$0xff] }
 0x34d   : > { %v2186_v9 = vpop.permute.xlu0 %2185 }
 0x34e   : > { %v2136_v16 = vpop.permute.xlu1 %2135 }
 0x355   : > { %v2111_v12 = vpop.permute.xlu0 %2110 }
 0x35d   : > { %v2074_v17 = vpop.permute.xlu0 %2073 }
 0x35e   : > { %v2077_v35 = vsel %vm1052_vm6, %v2072_v3, %v2074_v17  ;;  %v2362_v3 = vld [vmem:[%s11810_s7 + $0x70] sm:$0xff] }
 0x35f   : > { %2384 = vmatpush.msrb.mxu2 %v2362_v3 }
 0x362   : > { %v2138_v10 = vpop.permute.xlu2 %2137 }
 0x363   : > { %2143 = vst.msk [vmem:[#allocation3 + $0x158] sm:$0xff] %vm1949_vm12, %v2138_v10  ;;  %v2139_v26 = vsel %vm2028_vm11, %v2136_v16, %v2138_v10  ;;  %v2370_v10 = vld [vmem:[%s11810_s7 + $0xb0] sm:$0xff] }
 0x364   : > { %v2358_v16 = vld [vmem:[%s11810_s7 + $0x50] sm:$0xff] }
 0x36a   : > { %v1974_v14 = vpop.permute.xlu2 %1973  ;;  %v2209_v29 = vld [vmem:[#allocation3 + $0x158] sm:$0xff] }
 0x372   : > { %v2044_v18 = vpop.permute.xlu2 %2043 }
 0x373   : > { %v2047_v28 = vsel %vm2045_vm15, %v2042_v7, %v2044_v18  ;;  %v2361_v7 = vld [vmem:[%s11810_s7 + $0x68] sm:$0xff] }
 0x374   : > { %2051 = vst.msk [vmem:[#allocation3 + $0x78] sm:$0xff] %vm1949_vm12, %v2047_v28  ;;  %2385 = vmatpush.msrb.mxu2 %v2361_v7  ;;  %v2357_v18 = vld [vmem:[%s11810_s7 + $0x48] sm:$0xff]  ;;  %v2356_v28 = vld [vmem:[%s11810_s7 + $0x40] sm:$0xff] }
 0x379   : > { %v2188_v30 = vpop.permute.xlu1 %2187  ;;  %v2163_v20 = vpop.permute.xlu0 %2162 }
 0x37a   : > { %v2189_v21 = vsel %vm1962_vm8, %v2186_v9, %v2188_v30  ;;  %2193 = vst.msk [vmem:[#allocation3 + $0x1c8] sm:$0xff] %vm1949_vm12, %v2188_v30  ;;  %v2164_v22 = vsel %vm1995_vm9, %v2161_v6, %v2163_v20  ;;  %v2219_v19 = vpop.permute.xlu2 %2218  ;;  %v2371_v6 = vld [vmem:[%s11810_s7 + $0xb8] sm:$0xff]  ;;  %v2360_v9 = vld [vmem:[%s11810_s7 + $0x60] sm:$0xff] }
 0x37b   : > { %2168 = vst.msk [vmem:[#allocation3 + $0x190] sm:$0xff] %vm1949_vm12, %v2163_v20  ;;  %2239 = vmatpush.msrb.mxu3 %v2189_v21  ;;  %v2201_v49 = vld [vmem:[#allocation3 + $0x78] sm:$0xff]  ;;  %2386 = vmatpush.msrb.mxu2 %v2360_v9  ;;  %v2355_v30 = vld [vmem:[%s11810_s7 + $0x38] sm:$0xff]  ;;  %v2366_v20 = vld [vmem:[%s11810_s7 + $0x90] sm:$0xff] }
 0x37c   : > { %v2365_v21 = vld [vmem:[%s11810_s7 + $0x88] sm:$0xff]  ;;  %v2475_v9 = vld [vmem:[%s11811_s13 + $0x100] sm:$0xff] }
 0x37d   : > { %2240 = vmatpush.msrb.mxu3 %v2164_v22  ;;  %v2354_v22 = vld [vmem:[%s11810_s7 + $0x30] sm:$0xff] }
 0x37f   : > { %2241 = vmatpush.msrb.mxu3 %v2139_v26  ;;  %v2364_v26 = vld [vmem:[%s11810_s7 + $0x80] sm:$0xff] }
 0x381   : > { %v2007_v62 = vpop.permute.xlu0 %2006  ;;  %v2009_v2 = vpop.permute.xlu1 %2008  ;;  %v2213_v27 = vld [vmem:[#allocation3 + $0x1c8] sm:$0xff] }
 0x382   : > { %2262 = vmatpush.msrb.mxu0 %v2213_v27  ;;  %v2211_v61 = vld [vmem:[#allocation3 + $0x190] sm:$0xff]  ;;  %v2013_v39 = vsel %vm2012_vm14, %v2007_v62, %v2009_v2  ;;  %v2353_v62 = vld [vmem:[%s11810_s7 + $0x28] sm:$0xff]  ;;  %v2351_v27 = vld [vmem:[%s11810_s7 + $0x18] sm:$0xff] }
 0x384   : > { %2263 = vmatpush.msrb.mxu0 %v2211_v61  ;;  %v2350_v61 = vld [vmem:[%s11810_s7 + $0x10] sm:$0xff] }
 0x386   : > { %2264 = vmatpush.msrb.mxu0 %v2209_v29  ;;  %v2349_v29 = vld [vmem:[%s11810_s7 + $0x8] sm:$0xff] }
 0x389   : > { %v2113_v32 = vpop.permute.xlu1 %2112  ;;  %v1976_v33 = vpop.permute.xlu0 %1975 }
 0x38a   : > { %v2114_v34 = vsel %vm1044_vm1, %v2111_v12, %v2113_v32  ;;  %2118 = vst.msk [vmem:[#allocation3 + $0x120] sm:$0xff] %vm1949_vm12, %v2113_v32  ;;  %v1980_v24 = vsel %vm1979_vm13, %v1974_v14, %v1976_v33  ;;  %v2359_v12 = vld [vmem:[%s11810_s7 + $0x58] sm:$0xff]  ;;  %v2368_v14 = vld [vmem:[%s11810_s7 + $0xa0] sm:$0xff] }
 0x38b   : > { %2242 = vmatpush.msrb.mxu3 %v2114_v34  ;;  %2387 = vmatpush.msrb.mxu2 %v2359_v12  ;;  %v2348_v32 = vld [vmem:[%s11810_s7] sm:$0xff]  ;;  %v2465_v12 = vld [vmem:[%s11811_s13 + $0xb0] sm:$0xff] }
 0x38d   : > { %2243 = vmatpush.msrb.mxu3 %v8007_v23  ;;  %v2205_v23 = vld [vmem:[#allocation3 + $0xe8] sm:$0xff]  ;;  %2388 = vmatpush.msrb.mxu2 %v2358_v16  ;;  %v2457_v16 = vld [vmem:[%s11811_s13 + $0x70] sm:$0xff] }
 0x38f   : > { %2244 = vmatpush.msrb.mxu3 %v2077_v35  ;;  %2389 = vmatpush.msrb.mxu2 %v2357_v18  ;;  %v2486_v35 = vld [vmem:[%s11811_s13 + $0x158] sm:$0x1]  ;;  %v2460_v18 = vld [vmem:[%s11811_s13 + $0x88] sm:$0xff] }
 0x391   : > { %v2076_v60 = vpop.permute.xlu1 %2075  ;;  %v2011_v11 = vpop.permute.xlu0 %2010  ;;  %v2207_v41 = vld [vmem:[#allocation3 + $0x120] sm:$0xff]  ;;  %2245 = vmatpush.msrb.mxu3 %v2046_v40  ;;  %2390 = vmatpush.msrb.mxu2 %v2356_v28  ;;  %v2478_v40 = vld [vmem:[%s11811_s13 + $0x118] sm:$0xff] }
 0x392   : > { %v2078_v42 = vsel %vm1052_vm6, %v2074_v17, %v2076_v60  ;;  %v2014_v43 = vsel %vm2012_vm14, %v2009_v2, %v2011_v11  ;;  %2265 = vmatpush.msrb.mxu0 %v2207_v41  ;;  %v2367_v17 = vld [vmem:[%s11810_s7 + $0x98] sm:$0xff]  ;;  %v2352_v2 = vld [vmem:[%s11810_s7 + $0x20] sm:$0xff]  ;;  %v2488_v60 = vld [vmem:[%s11811_s13 + $0x168] sm:$0x1]  ;;  %s11814_s7 = sld [smem:[#allocation42_spill]] }
 0x393   : > { %2082 = vst.msk [vmem:[#allocation3 + $0xb0] sm:$0xff] %vm1949_vm12, %v2078_v42  ;;  %2246 = vmatpush.msrb.mxu3 %v2013_v39  ;;  %2391 = vmatpush.msrb.mxu2 %v2355_v30  ;;  %v2489_v11 = vld [vmem:[%s11811_s13 + $0x170] sm:$0x1]  ;;  %v2479_v41 = vld [vmem:[%s11811_s13 + $0x120] sm:$0xff]  ;;  %v2482_v42 = vld [vmem:[%s11811_s13 + $0x138] sm:$0xff] }
 0x394   : > { %2018 = vst.msk [vmem:[#allocation3 + $0x40] sm:$0xff] %vm1949_vm12, %v2014_v43  ;;  %2266 = vmatpush.msrb.mxu0 %v2205_v23  ;;  %v2481_v39 = vld [vmem:[%s11811_s13 + $0x130] sm:$0xff]  ;;  %v2450_v30 = vld [vmem:[%s11811_s13 + $0x38] sm:$0xff] }
 0x395   : > { %2247 = vmatpush.msrb.mxu3 %v1980_v24  ;;  %2392 = vmatpush.msrb.mxu2 %v2354_v22  ;;  %v2461_v28 = vld [vmem:[%s11811_s13 + $0x90] sm:$0xff]  ;;  %v2454_v22 = vld [vmem:[%s11811_s13 + $0x58] sm:$0xff] }
 0x396   : > { %6575 = vmatmul.msk.f32.vlgmr.msrb.gmra.mxu3 %vm11741_vm10, %v2194_v44 }
 0x397   : > { %2393 = vmatpush.msrb.mxu2 %v2353_v62  ;;  %6582 = vmatpush.msk.msra.mxu3 %vm2499_vm7, %v2485_v4  ;;  %v2444_v62 = vld [vmem:[%s11811_s13 + $0x8] sm:$0xff] }
 0x398   : > { %v2476_v4 = vld [vmem:[%s11811_s13 + $0x108] sm:$0xff] }
 0x399   : > { %v1978_v45 = vpop.permute.xlu1 %1977  ;;  %v2224_v51 = vpop.permute.xlu0 %2223  ;;  %2394 = vmatpush.msrb.mxu2 %v2352_v2  ;;  %2531 = vmatpush.msra.mxu3 %v2478_v40  ;;  %v2446_v2 = vld [vmem:[%s11811_s13 + $0x18] sm:$0xff]  ;;  %v2469_v40 = vld [vmem:[%s11811_s13 + $0xd0] sm:$0xff] }
 0x39a   : > { %v1981_v46 = vsel %vm1979_vm13, %v1976_v33, %v1978_v45  ;;  %v2203_v5 = vld [vmem:[#allocation3 + $0xb0] sm:$0xff] }
 0x39b   : > { %1985 = vst.msk [vmem:[#allocation3 + $0x8] sm:$0xff] %vm1949_vm12, %v1981_v46  ;;  %2267 = vmatpush.msrb.mxu0 %v2203_v5  ;;  %v2199_v47 = vld [vmem:[#allocation3 + $0x40] sm:$0xff]  ;;  %2395 = vmatpush.msrb.mxu2 %v2351_v27  ;;  %v2447_v27 = vld [vmem:[%s11811_s13 + $0x20] sm:$0xff] }
 0x39d   : > { %2268 = vmatpush.msrb.mxu0 %v2201_v49  ;;  %2396 = vmatpush.msrb.mxu2 %v2350_v61  ;;  %v2487_v61 = vld [vmem:[%s11811_s13 + $0x160] sm:$0x1] }
 0x39e   : > { %6576 = vmatmul.msk.f32.gmra.mxu3 %vm11741_vm10, %v2195_v48 }
 0x39f   : > { %2269 = vmatpush.msrb.mxu0 %v2199_v47  ;;  %2397 = vmatpush.msrb.mxu2 %v2349_v29  ;;  %v2490_v29 = vld [vmem:[%s11811_s13 + $0x178] sm:$0x1] }
 0x3a1   : > { %2398 = vmatpush.msrb.mxu2 %v2348_v32  ;;  %v2480_v32 = vld [vmem:[%s11811_s13 + $0x128] sm:$0xff] }
 0x3a2   : > { %v2197_v50 = vld [vmem:[#allocation3 + $0x8] sm:$0xff] }
 0x3a3   : > { %2270 = vmatpush.msrb.mxu0 %v2197_v50  ;;  %6594 = vmatpush.msk.msra.mxu2 %vm2499_vm7, %v2489_v11  ;;  %v2462_v11 = vld [vmem:[%s11811_s13 + $0x98] sm:$0xff] }
 0x3a4   : > { %6577 = vmatmul.msk.f32.vlgmr.msrb.gmra.mxu0 %vm11741_vm10, %v2194_v44 }
 0x3a5   : > { %6585 = vmatpush.msk.msra.mxu0 %vm2499_vm7, %v2486_v35  ;;  %2623 = vmatpush.msra.mxu2 %v2482_v42  ;;  %v2466_v35 = vld [vmem:[%s11811_s13 + $0xb8] sm:$0xff]  ;;  %v2445_v42 = vld [vmem:[%s11811_s13 + $0x10] sm:$0xff] }
 0x3a7   : > { %2554 = vmatpush.msra.mxu0 %v2479_v41  ;;  %2624 = vmatpush.msra.mxu2 %v2475_v9  ;;  %v2452_v41 = vld [vmem:[%s11811_s13 + $0x48] sm:$0xff]  ;;  %v2754_v9 = vld [vmem:[%s11812_s24 + $0x38] sm:$0xff] }
 0x3ac   : > { %6578 = vmatmul.msk.f32.gmra.mxu0 %vm11741_vm10, %v2195_v48  ;;  %vm2379_vm10 = vcmask 1043456  }
 0x3ad   : > { %6579 = vmatpush.msk.msra.mxu1 %vm2379_vm10, %v2372_v38 }
 0x3af   : > { %2414 = vmatpush.msra.mxu1 %v2371_v6 }
 0x3b1   : > { %2415 = vmatpush.msra.mxu1 %v2370_v10  ;;  %v2464_v10 = vld [vmem:[%s11811_s13 + $0xa8] sm:$0xff] }
 0x3b3   : > { %2416 = vmatpush.msra.mxu1 %v2369_v13  ;;  %v2467_v13 = vld [vmem:[%s11811_s13 + $0xc0] sm:$0xff] }
 0x3b5   : > { %2417 = vmatpush.msra.mxu1 %v2368_v14  ;;  %v2468_v14 = vld [vmem:[%s11811_s13 + $0xc8] sm:$0xff] }
 0x3b6   : > { %2625 = vmatpush.msra.mxu2 %v2468_v14  ;;  %v2752_v14 = vld [vmem:[%s11812_s24 + $0x28] sm:$0xff] }
 0x3b7   : > { %2418 = vmatpush.msra.mxu1 %v2367_v17  ;;  %v2458_v17 = vld [vmem:[%s11811_s13 + $0x78] sm:$0xff] }
 0x3b8   : > { %2626 = vmatpush.msra.mxu2 %v2461_v28  ;;  %v2750_v28 = vld [vmem:[%s11812_s24 + $0x18] sm:$0xff] }
 0x3b9   : > { %2419 = vmatpush.msra.mxu1 %v2366_v20  ;;  %v2451_v20 = vld [vmem:[%s11811_s13 + $0x40] sm:$0xff] }
 0x3ba   : > { %2627 = vmatpush.msra.mxu2 %v2454_v22  ;;  %v2766_v22 = vld [vmem:[%s11812_s24 + $0x98] sm:$0xff] }
 0x3bb   : > { %2420 = vmatpush.msra.mxu1 %v2365_v21  ;;  %v2453_v21 = vld [vmem:[%s11811_s13 + $0x50] sm:$0xff] }
 0x3bc   : > { %2628 = vmatpush.msra.mxu2 %v2447_v27  ;;  %v2804_v27 = vld [vmem:[%s11812_s24 + $0x1c8] sm:$0xff] }
 0x3bd   : > { %2421 = vmatpush.msra.mxu1 %v2364_v26  ;;  %v2443_v26 = vld [vmem:[%s11811_s13] sm:$0xff] }
 0x3bf   : > { %6591 = vmatpush.msk.msrb.mxu1 %vm2499_vm7, %v2488_v60  ;;  %v2459_v60 = vld [vmem:[%s11811_s13 + $0x80] sm:$0xff] }
 0x3c1   : > { %2600 = vmatpush.msrb.mxu1 %v2481_v39  ;;  %v2455_v39 = vld [vmem:[%s11811_s13 + $0x60] sm:$0xff] }
 0x419   : > { %v2249_v31 = vpop.f32.mrf.mxu3 }
 0x41a   : > { %v2250_v37 = vadd.f32 %v2249_v31, %v2219_v19 }
 0x41c   : > { %v8083_v52 = vmax.f32 %v2250_v37, 0.0 }
 0x421   : > { %v2272_v53 = vpop.f32.mrf.mxu0  ;;  %v2252_v54 = vpop.f32.mrf.mxu3 }
 0x422   : > { %v8085_v8 = vadd.f32 %v2272_v53, %v2219_v19  ;;  %v2253_v57 = vadd.f32 %v2252_v54, %v2224_v51 }
 0x424   : > { %v2279_v56 = vmax.f32 %v8085_v8, 0.0  ;;  %v8088_v25 = vmax.f32 %v2253_v57, 0.0 }
 0x426   : > { %2283 = vst.msk [vmem:[#allocation2 + $0x10] sm:$0xff] %vm1949_vm12, %v2279_v56  ;;  %v6753_v59 = vpack.i.bf16 %v8088_v25, %v8083_v52 }
 0x428   : > { %6754 = vrot.lane.b32.xlu0 %v6753_v59, %s11804_s28 }
 0x429   : > { %v2275_v63 = vpop.f32.mrf.mxu0 }
 0x42a   : > { %v8096_v0 = vadd.f32 %v2275_v63, %v2224_v51 }
 0x42c   : > { %v2281_v1 = vmax.f32 %v8096_v0, 0.0  ;;  %v2471_v0 = vld [vmem:[%s11811_s13 + $0xe0] sm:$0xff] }
 0x42d   : > { %v2287_v58 = vld [vmem:[#allocation2 + $0x10] sm:$0xff]  ;;  %2532 = vmatpush.msra.mxu3 %v2471_v0  ;;  %v2772_v0 = vld [vmem:[%s11812_s24 + $0xc8] sm:$0xff] }
 0x42e   : > { %2285 = vst.msk [vmem:[#allocation2 + $0x58] sm:$0xff] %vm1949_vm12, %v2281_v1  ;;  %2314 = vrot.lane.b32.xlu1 %v2287_v58, %s11804_s28  ;;  %2296 = vrot.lane.b32.xlu2 %v2287_v58, %s11801_s2 }
 0x42f   : > { %2533 = vmatpush.msra.mxu3 %v2464_v10  ;;  %v2770_v10 = vld [vmem:[%s11812_s24 + $0xb8] sm:$0xff] }
 0x430   : > { %2332 = vrot.lane.b32.xlu0 %v2287_v58, %s11805_s27 }
 0x431   : > { %2534 = vmatpush.msra.mxu3 %v2457_v16  ;;  %v2768_v16 = vld [vmem:[%s11812_s24 + $0xa8] sm:$0xff] }
 0x433   : > { %2535 = vmatpush.msra.mxu3 %v2450_v30  ;;  %v2767_v30 = vld [vmem:[%s11812_s24 + $0xa0] sm:$0xff] }
 0x435   : > { %v2289_v36 = vld [vmem:[#allocation2 + $0x58] sm:$0xff]  ;;  %2536 = vmatpush.msra.mxu3 %v2443_v26  ;;  %v2805_v26 = vld [vmem:[%s11812_s24 + $0x1d0] sm:$0xff] }
 0x436   : > { %2330 = vrot.lane.b32.xlu2 %v8083_v52, %s11805_s27  ;;  %6749 = vrot.lane.b32.xlu1 %v6753_v59, %s11801_s2 }
 0x437   : > { %6588 = vmatpush.msk.msrb.mxu3 %vm2499_vm7, %v2487_v61  ;;  %v2747_v61 = vld [vmem:[%s11812_s24] sm:$0xff] }
 0x438   : > { %2334 = vrot.lane.b32.xlu0 %v8088_v25, %s11805_s27 }
 0x439   : > { %2577 = vmatpush.msrb.mxu3 %v2480_v32  ;;  %v2803_v32 = vld [vmem:[%s11812_s24 + $0x1c0] sm:$0xff] }
 0x43e   : > { %2318 = vrot.lane.b32.xlu2 %v2289_v36, %s11804_s28  ;;  %2300 = vrot.lane.b32.xlu1 %v2289_v36, %s11801_s2 }
 0x446   : > { %2336 = vrot.lane.b32.xlu1 %v2289_v36, %s11805_s27 }
 0x488   : > { %v2297_v34 = vpop.permute.xlu2 %2296 }
 0x489   : > { %v2309_v43 = vmax.f32 %v2279_v56, %v2297_v34 }
 0x490   : > { %v2331_v47 = vpop.permute.xlu2 %2330 }
 0x498   : > { %v2319_v63 = vpop.permute.xlu2 %2318 }
 0x49a   : > { %v6755_v33 = vpop.permute.xlu0 %6754 }
 0x49b   : > { %v6756_v48 = vunpack.i.l.bf16 %v6755_v33  ;;  %v6757_v57 = vunpack.i.h.bf16 %v6755_v33  ;;  %v2483_v33 = vld [vmem:[%s11811_s13 + $0x140] sm:$0xff] }
 0x4a0   : > { %v2315_v23 = vpop.permute.xlu1 %2314 }
 0x4a1   : > { %v2327_v44 = vmax.f32 %v2309_v43, %v2315_v23  ;;  %v2320_v31 = vsel %vm1995_vm9, %v6756_v48, %v2315_v23  ;;  %v2448_v43 = vld [vmem:[%s11811_s13 + $0x28] sm:$0xff]  ;;  %v2470_v48 = vld [vmem:[%s11811_s13 + $0xd8] sm:$0xff] }
 0x4a2   : > { %v2333_v24 = vpop.permute.xlu0 %2332 }
 0x4a3   : > { %v2345_v45 = vmax.f32 %v2327_v44, %v2333_v24  ;;  %v2338_v51 = vsel %vm1962_vm8, %v2331_v47, %v2333_v24 }
 0x4a5   : > { %6580 = vmatmul.msk.f32.vlgmr.msra.gmra.mxu1 %vm1949_vm12, %v2345_v45  ;;  %v2491_v45 = vld [vmem:[%s11811_s13 + $0x180] sm:$0x1] }
 0x4a8   : > { %v6750_v46 = vpop.permute.xlu1 %6749 }
 0x4a9   : > { %v6751_v5 = vunpack.i.l.bf16 %v6750_v46  ;;  %v6752_v37 = vunpack.i.h.bf16 %v6750_v46  ;;  %v2484_v46 = vld [vmem:[%s11811_s13 + $0x148] sm:$0xff] }
 0x4aa   : > { %v2335_v36 = vpop.permute.xlu0 %2334 }
 0x4ab   : > { %v2302_v49 = vsel %vm1044_vm1, %v6751_v5, %v2297_v34  ;;  %v2473_v34 = vld [vmem:[%s11811_s13 + $0xf0] sm:$0xff] }
 0x4ac   : > { %v2308_v50 = vmax.f32 %v8083_v52, %v2302_v49  ;;  %v2321_v52 = vsel %vm1995_vm9, %v6757_v57, %v2319_v63  ;;  %2578 = vmatpush.msrb.mxu3 %v2473_v34  ;;  %v2477_v5 = vld [vmem:[%s11811_s13 + $0x110] sm:$0xff]  ;;  %v2760_v57 = vld [vmem:[%s11812_s24 + $0x68] sm:$0xff]  ;;  %v2763_v34 = vld [vmem:[%s11812_s24 + $0x80] sm:$0xff] }
 0x4ae   : > { %v2326_v19 = vmax.f32 %v2308_v50, %v2320_v31  ;;  %2579 = vmatpush.msrb.mxu3 %v2466_v35  ;;  %v2463_v31 = vld [vmem:[%s11811_s13 + $0xa0] sm:$0xff]  ;;  %v2825_v35 = vld [vmem:[%s11812_s24 + $0x270] sm:$0xff] }
 0x4b0   : > { %v2344_v53 = vmax.f32 %v2326_v19, %v2338_v51  ;;  %v2301_v54 = vpop.permute.xlu1 %2300  ;;  %2580 = vmatpush.msrb.mxu3 %v2459_v60  ;;  %v2762_v19 = vld [vmem:[%s11812_s24 + $0x78] sm:$0xff]  ;;  %v2456_v51 = vld [vmem:[%s11811_s13 + $0x68] sm:$0xff]  ;;  %v2801_v60 = vld [vmem:[%s11812_s24 + $0x1b0] sm:$0xff] }
 0x4b1   : > { %v2303_v8 = vsel %vm1044_vm1, %v6752_v37, %v2301_v54  ;;  %v2311_v56 = vmax.f32 %v2281_v1, %v2301_v54  ;;  %v2474_v1 = vld [vmem:[%s11811_s13 + $0xf8] sm:$0xff]  ;;  %v2777_v54 = vld [vmem:[%s11812_s24 + $0xf0] sm:$0xff] }
 0x4b2   : > { %2399 = vmatmul.f32.vlgmr.msrb.gmra.mxu2 %v2344_v53  ;;  %v2310_v59 = vmax.f32 %v8088_v25, %v2303_v8  ;;  %v2472_v25 = vld [vmem:[%s11811_s13 + $0xe8] sm:$0xff]  ;;  %2601 = vmatpush.msrb.mxu1 %v2474_v1  ;;  %v2778_v37 = vld [vmem:[%s11812_s24 + $0xf8] sm:$0xff]  ;;  %v2761_v53 = vld [vmem:[%s11812_s24 + $0x70] sm:$0xff] }
 0x4b3   : > { %v2329_v58 = vmax.f32 %v2311_v56, %v2319_v63  ;;  %2555 = vmatpush.msra.mxu0 %v2472_v25  ;;  %2581 = vmatpush.msrb.mxu3 %v2452_v41  ;;  %v2449_v8 = vld [vmem:[%s11811_s13 + $0x30] sm:$0xff]  ;;  %v2776_v56 = vld [vmem:[%s11812_s24 + $0xe8] sm:$0xff]  ;;  %v2775_v63 = vld [vmem:[%s11812_s24 + $0xe0] sm:$0xff]  ;;  %s11823_s13 = sld [smem:[#allocation47_spill]] }
 0x4b4   : > { %v2328_v38 = vmax.f32 %v2310_v59, %v2321_v52  ;;  %2602 = vmatpush.msrb.mxu1 %v2467_v13  ;;  %2869 = vmatpush.msrb.mxu2 %v2778_v37  ;;  %v2759_v59 = vld [vmem:[%s11812_s24 + $0x60] sm:$0xff]  ;;  %v2758_v52 = vld [vmem:[%s11812_s24 + $0x58] sm:$0xff]  ;;  %v2769_v13 = vld [vmem:[%s11812_s24 + $0xb0] sm:$0xff] }
 0x4b5   : > { %2556 = vmatpush.msra.mxu0 %v2465_v12  ;;  %2582 = vmatpush.msrb.mxu3 %v2445_v42  ;;  %v2755_v25 = vld [vmem:[%s11812_s24 + $0x40] sm:$0xff]  ;;  %v2753_v12 = vld [vmem:[%s11812_s24 + $0x30] sm:$0xff] }
 0x4b6   : > { %2603 = vmatpush.msrb.mxu1 %v2460_v18  ;;  %2870 = vmatpush.msrb.mxu2 %v2777_v54  ;;  %v2771_v1 = vld [vmem:[%s11812_s24 + $0xc0] sm:$0xff]  ;;  %v2841_v41 = vld [vmem:[%s11812_s24 + $0x2f0] sm:$0xff]  ;;  %v2836_v54 = vld [vmem:[%s11812_s24 + $0x2c8] sm:$0xff] }
 0x4b7   : > { %2557 = vmatpush.msra.mxu0 %v2458_v17  ;;  %v2751_v17 = vld [vmem:[%s11812_s24 + $0x20] sm:$0xff] }
 0x4b8   : > { %v2337_v55 = vpop.permute.xlu1 %2336  ;;  %2604 = vmatpush.msrb.mxu1 %v2453_v21  ;;  %2871 = vmatpush.msrb.mxu2 %v2776_v56  ;;  %v2807_v18 = vld [vmem:[%s11812_s24 + $0x1e0] sm:$0xff]  ;;  %v2749_v21 = vld [vmem:[%s11812_s24 + $0x10] sm:$0xff]  ;;  %v2818_v56 = vld [vmem:[%s11812_s24 + $0x238] sm:$0xff] }
 0x4b9   : > { %v2347_v3 = vmax.f32 %v2329_v58, %v2337_v55  ;;  %v2339_v6 = vsel %vm1962_vm8, %v2335_v36, %v2337_v55  ;;  %2558 = vmatpush.msra.mxu0 %v2451_v20  ;;  %v2810_v58 = vld [vmem:[%s11812_s24 + $0x1f8] sm:$0xff]  ;;  %v2809_v55 = vld [vmem:[%s11812_s24 + $0x1f0] sm:$0xff]  ;;  %v2823_v42 = vld [vmem:[%s11812_s24 + $0x260] sm:$0xff] }
 0x4ba   : > { %v2346_v7 = vmax.f32 %v2328_v38, %v2339_v6  ;;  %2605 = vmatpush.msrb.mxu1 %v2446_v2  ;;  %v2774_v36 = vld [vmem:[%s11812_s24 + $0xd8] sm:$0xff]  ;;  %2872 = vmatpush.msrb.mxu2 %v2775_v63  ;;  %v2757_v38 = vld [vmem:[%s11812_s24 + $0x50] sm:$0xff]  ;;  %v2808_v6 = vld [vmem:[%s11812_s24 + $0x1e8] sm:$0xff] }
 0x4bb   : > { %6581 = vmatmul.msk.f32.gmra.mxu1 %vm1949_vm12, %v2347_v3  ;;  %2559 = vmatpush.msra.mxu0 %v2444_v62  ;;  %v2773_v3 = vld [vmem:[%s11812_s24 + $0xd0] sm:$0xff]  ;;  %v2806_v20 = vld [vmem:[%s11812_s24 + $0x1d8] sm:$0xff]  ;;  %v2748_v62 = vld [vmem:[%s11812_s24 + $0x8] sm:$0xff] }
 0x4bc   : > { %2402 = vmatmul.f32.gmra.mxu2 %v2346_v7  ;;  %2849 = vmatpush.msra.mxu1 %v2762_v19  ;;  %v2756_v7 = vld [vmem:[%s11812_s24 + $0x48] sm:$0xff]  ;;  %v2765_v2 = vld [vmem:[%s11812_s24 + $0x90] sm:$0xff]  ;;  %v2791_v37 = vld [vmem:[%s11812_s24 + $0x160] sm:$0xff] }
 0x4bd   : > { %6597 = vmatpush.msk.msrb.mxu0 %vm2499_vm7, %v2490_v29  ;;  %2873 = vmatpush.msrb.mxu2 %v2774_v36  ;;  %v2764_v29 = vld [vmem:[%s11812_s24 + $0x88] sm:$0xff]  ;;  %v2837_v19 = vld [vmem:[%s11812_s24 + $0x2d0] sm:$0xff] }
 0x4be   : > { %2850 = vmatpush.msra.mxu1 %v2761_v53  ;;  %v2819_v53 = vld [vmem:[%s11812_s24 + $0x240] sm:$0xff]  ;;  %v2789_v63 = vld [vmem:[%s11812_s24 + $0x150] sm:$0xff]  ;;  %v2788_v36 = vld [vmem:[%s11812_s24 + $0x148] sm:$0xff] }
 0x4bf   : > { %2646 = vmatpush.msrb.mxu0 %v2483_v33  ;;  %2874 = vmatpush.msrb.mxu2 %v2773_v3  ;;  %v2826_v33 = vld [vmem:[%s11812_s24 + $0x278] sm:$0xff]  ;;  %v2787_v3 = vld [vmem:[%s11812_s24 + $0x140] sm:$0xff] }
 0x4c0   : > { %2851 = vmatpush.msra.mxu1 %v2760_v57  ;;  %v2795_v57 = vld [vmem:[%s11812_s24 + $0x180] sm:$0xff] }
 0x4c1   : > { %2647 = vmatpush.msrb.mxu0 %v2476_v4  ;;  %2875 = vmatpush.msrb.mxu2 %v2772_v0  ;;  %v2802_v4 = vld [vmem:[%s11812_s24 + $0x1b8] sm:$0xff] }
 0x4c2   : > { %2852 = vmatpush.msra.mxu1 %v2759_v59  ;;  %v2835_v59 = vld [vmem:[%s11812_s24 + $0x2c0] sm:$0xff] }
 0x4c3   : > { %2648 = vmatpush.msrb.mxu0 %v2469_v40  ;;  %2876 = vmatpush.msrb.mxu2 %v2771_v1  ;;  %v2842_v40 = vld [vmem:[%s11812_s24 + $0x2f8] sm:$0xff] }
 0x4c4   : > { %2853 = vmatpush.msra.mxu1 %v2758_v52  ;;  %v2834_v52 = vld [vmem:[%s11812_s24 + $0x2b8] sm:$0xff] }
 0x4c5   : > { %2649 = vmatpush.msrb.mxu0 %v2462_v11  ;;  %2877 = vmatpush.msrb.mxu2 %v2770_v10  ;;  %v2824_v11 = vld [vmem:[%s11812_s24 + $0x268] sm:$0xff]  ;;  %v2786_v1 = vld [vmem:[%s11812_s24 + $0x138] sm:$0xff]  ;;  %v2831_v10 = vld [vmem:[%s11812_s24 + $0x2a0] sm:$0xff] }
 0x4c6   : > { %2854 = vmatpush.msra.mxu1 %v2757_v38  ;;  %v2833_v38 = vld [vmem:[%s11812_s24 + $0x2b0] sm:$0xff] }
 0x4c7   : > { %2650 = vmatpush.msrb.mxu0 %v2455_v39  ;;  %2878 = vmatpush.msrb.mxu2 %v2769_v13  ;;  %v2800_v39 = vld [vmem:[%s11812_s24 + $0x1a8] sm:$0xff]  ;;  %v2813_v13 = vld [vmem:[%s11812_s24 + $0x210] sm:$0xff] }
 0x4c8   : > { %2855 = vmatpush.msra.mxu1 %v2756_v7  ;;  %v2832_v7 = vld [vmem:[%s11812_s24 + $0x2a8] sm:$0xff] }
 0x4c9   : > { %2651 = vmatpush.msrb.mxu0 %v2448_v43  ;;  %2879 = vmatpush.msrb.mxu2 %v2768_v16  ;;  %v2840_v43 = vld [vmem:[%s11812_s24 + $0x2e8] sm:$0xff] }
 0x4ca   : > { %2856 = vmatpush.msra.mxu1 %v2755_v25  ;;  %v8647_v16 = vld [vmem:[%s11813_s15 + $0x8] sm:$0xff] }
 0x4cb   : > { %2880 = vmatpush.msrb.mxu2 %v2767_v30  ;;  %v8661_v30 = vld [vmem:[%s11813_s15 + $0x18] sm:$0xff] }
 0x4cc   : > { %2857 = vmatpush.msra.mxu1 %v2754_v9  ;;  %v2814_v9 = vld [vmem:[%s11812_s24 + $0x218] sm:$0xff] }
 0x4cd   : > { %2881 = vmatpush.msrb.mxu2 %v2766_v22  ;;  %v8671_v22 = vld [vmem:[%s11813_s15 + $0x50] sm:$0xff] }
 0x4ce   : > { %2858 = vmatpush.msra.mxu1 %v2753_v12  ;;  %v2785_v12 = vld [vmem:[%s11812_s24 + $0x130] sm:$0xff] }
 0x4cf   : > { %2882 = vmatpush.msrb.mxu2 %v2765_v2  ;;  %v2811_v2 = vld [vmem:[%s11812_s24 + $0x200] sm:$0xff] }
 0x4d0   : > { %2859 = vmatpush.msra.mxu1 %v2752_v14  ;;  %v2830_v14 = vld [vmem:[%s11812_s24 + $0x298] sm:$0xff] }
 0x4d1   : > { %2883 = vmatpush.msrb.mxu2 %v2764_v29 }
 0x4d2   : > { %2860 = vmatpush.msra.mxu1 %v2751_v17  ;;  %v2784_v17 = vld [vmem:[%s11812_s24 + $0x128] sm:$0xff] }
 0x4d3   : > { %2884 = vmatpush.msrb.mxu2 %v2763_v34  ;;  %v2782_v34 = vld [vmem:[%s11812_s24 + $0x118] sm:$0xff] }
 0x4d4   : > { %2861 = vmatpush.msra.mxu1 %v2750_v28  ;;  %v2829_v28 = vld [vmem:[%s11812_s24 + $0x290] sm:$0xff] }
 0x4d6   : > { %2862 = vmatpush.msra.mxu1 %v2749_v21  ;;  %v8666_v21 = vld [vmem:[%s11813_s15 + $0x40] sm:$0xff] }
 0x4d8   : > { %2863 = vmatpush.msra.mxu1 %v2748_v62  ;;  %v2783_v62 = vld [vmem:[%s11812_s24 + $0x120] sm:$0xff] }
 0x4da   : > { %2864 = vmatpush.msra.mxu1 %v2747_v61 }
 0x522   : > { %v2423_v23 = vpop.f32.mrf.mxu1 }
 0x535   : > { %v2400_v44 = vpop.f32.mrf.mxu2 }
 0x536   : > { %v8335_v24 = vadd.f32 %v2423_v23, %v2400_v44  ;;  %v2794_v23 = vld [vmem:[%s11812_s24 + $0x178] sm:$0xff]  ;;  %v2799_v44 = vld [vmem:[%s11812_s24 + $0x1a0] sm:$0xff] }
 0x538   : > { %6583 = vmatmul.msk.f32.vlgmr.msra.gmra.mxu3 %vm2492_vm3, %v8335_v24  ;;  %6586 = vmatmul.msk.f32.vlgmr.msra.gmra.mxu0 %vm2492_vm3, %v8335_v24  ;;  %v2426_v49 = vpop.f32.mrf.mxu1 }
 0x539   : > { %6592 = vmatmul.msk.f32.vlgmr.msrb.gmra.mxu1 %vm2492_vm3, %v8335_v24  ;;  %6595 = vmatmul.msk.f32.vlgmr.msra.gmra.mxu2 %vm2492_vm3, %v8335_v24 }
 0x53a   : > { %6600 = vmatpush.msk.msra.mxu3 %vm2499_vm7, %v2491_v45  ;;  %2929 = vmatpush.msrb.mxu1 %v2826_v33  ;;  %v2839_v45 = vld [vmem:[%s11812_s24 + $0x2e0] sm:$0xff] }
 0x53b   : > { %2949 = vmatpush.msra.mxu2 %v2842_v40  ;;  %2889 = vmatpush.msra.mxu0 %v2794_v23  ;;  %v8711_v23 = vld [vmem:[%s11813_s15 + $0x20] sm:$0xff] }
 0x53c   : > { %2669 = vmatpush.msra.mxu3 %v2484_v46  ;;  %2930 = vmatpush.msrb.mxu1 %v2825_v35  ;;  %v2793_v46 = vld [vmem:[%s11812_s24 + $0x170] sm:$0xff] }
 0x53d   : > { %2950 = vmatpush.msra.mxu2 %v2841_v41  ;;  %2890 = vmatpush.msra.mxu0 %v2793_v46  ;;  %v2780_v41 = vld [vmem:[%s11812_s24 + $0x108] sm:$0xff] }
 0x53e   : > { %2670 = vmatpush.msra.mxu3 %v2477_v5  ;;  %2931 = vmatpush.msrb.mxu1 %v2824_v11  ;;  %v2798_v5 = vld [vmem:[%s11812_s24 + $0x198] sm:$0xff]  ;;  %v2781_v11 = vld [vmem:[%s11812_s24 + $0x110] sm:$0xff] }
 0x53f   : > { %v2403_v47 = vpop.f32.mrf.mxu2  ;;  %2951 = vmatpush.msra.mxu2 %v2840_v43  ;;  %v8706_v43 = vld [vmem:[%s11813_s15 + $0x38] sm:$0xff] }
 0x540   : > { %v8358_v50 = vadd.f32 %v2426_v49, %v2403_v47  ;;  %2671 = vmatpush.msra.mxu3 %v2470_v48  ;;  %2932 = vmatpush.msrb.mxu1 %v2823_v42  ;;  %v2821_v48 = vld [vmem:[%s11812_s24 + $0x250] sm:$0xff]  ;;  %v2838_v49 = vld [vmem:[%s11812_s24 + $0x2d8] sm:$0xff]  ;;  %v2792_v47 = vld [vmem:[%s11812_s24 + $0x168] sm:$0xff] }
 0x541   : > { %2952 = vmatpush.msra.mxu2 %v2839_v45  ;;  %2891 = vmatpush.msra.mxu0 %v2792_v47 }
 0x542   : > { %6584 = vmatmul.msk.f32.gmra.mxu3 %vm2492_vm3, %v8358_v50  ;;  %6587 = vmatmul.msk.f32.gmra.mxu0 %vm2492_vm3, %v8358_v50 }
 0x543   : > { %6593 = vmatmul.msk.f32.gmra.mxu1 %vm2492_vm3, %v8358_v50  ;;  %6596 = vmatmul.msk.f32.gmra.mxu2 %vm2492_vm3, %v8358_v50 }
 0x544   : > { %2672 = vmatpush.msra.mxu3 %v2463_v31  ;;  %2953 = vmatpush.msra.mxu2 %v2838_v49  ;;  %v2820_v31 = vld [vmem:[%s11812_s24 + $0x248] sm:$0xff] }
 0x545   : > { %2892 = vmatpush.msra.mxu0 %v2791_v37 }
 0x546   : > { %2673 = vmatpush.msra.mxu3 %v2456_v51  ;;  %2954 = vmatpush.msra.mxu2 %v2837_v19  ;;  %v2796_v51 = vld [vmem:[%s11812_s24 + $0x188] sm:$0xff] }
 0x548   : > { %2674 = vmatpush.msra.mxu3 %v2449_v8  ;;  %2955 = vmatpush.msra.mxu2 %v2836_v54  ;;  %v2790_v8 = vld [vmem:[%s11812_s24 + $0x158] sm:$0xff] }
 0x549   : > { %2893 = vmatpush.msra.mxu0 %v2790_v8 }
 0x54a   : > { %6589 = vmatmul.msk.f32.vlgmr.msrb.gmra.mxu3 %vm2492_vm3, %v8335_v24  ;;  %6598 = vmatmul.msk.f32.vlgmr.msrb.gmra.mxu0 %vm2492_vm3, %v8335_v24 }
 0x54b   : > { %2909 = vmatpush.msrb.mxu3 %v2810_v58  ;;  %2956 = vmatpush.msra.mxu2 %v2835_v59  ;;  %v2817_v58 = vld [vmem:[%s11812_s24 + $0x230] sm:$0xff] }
 0x54c   : > { %2894 = vmatpush.msra.mxu0 %v2789_v63 }
 0x54d   : > { %2910 = vmatpush.msrb.mxu3 %v2809_v55  ;;  %2957 = vmatpush.msra.mxu2 %v2834_v52  ;;  %v2816_v55 = vld [vmem:[%s11812_s24 + $0x228] sm:$0xff] }
 0x54e   : > { %2895 = vmatpush.msra.mxu0 %v2788_v36 }
 0x54f   : > { %2911 = vmatpush.msrb.mxu3 %v2808_v6  ;;  %2958 = vmatpush.msra.mxu2 %v2833_v38  ;;  %v2815_v6 = vld [vmem:[%s11812_s24 + $0x220] sm:$0xff] }
 0x550   : > { %2896 = vmatpush.msra.mxu0 %v2787_v3  ;;  %v8728_v3 = vld [vmem:[%s11813_s15 + $0x28] sm:$0xff] }
 0x551   : > { %2912 = vmatpush.msrb.mxu3 %v2807_v18  ;;  %2959 = vmatpush.msra.mxu2 %v2832_v7  ;;  %v2812_v18 = vld [vmem:[%s11812_s24 + $0x208] sm:$0xff]  ;;  %v8733_v7 = vld [vmem:[%s11813_s15 + $0x60] sm:$0xff] }
 0x552   : > { %6590 = vmatmul.msk.f32.gmra.mxu3 %vm2492_vm3, %v8358_v50  ;;  %6599 = vmatmul.msk.f32.gmra.mxu0 %vm2492_vm3, %v8358_v50 }
 0x553   : > { %2913 = vmatpush.msrb.mxu3 %v2806_v20  ;;  %2897 = vmatpush.msra.mxu0 %v2786_v1 }
 0x554   : > { %2960 = vmatpush.msra.mxu2 %v2831_v10 }
 0x555   : > { %2914 = vmatpush.msrb.mxu3 %v2805_v26  ;;  %2898 = vmatpush.msra.mxu0 %v2785_v12 }
 0x556   : > { %2961 = vmatpush.msra.mxu2 %v2830_v14 }
 0x557   : > { %2915 = vmatpush.msrb.mxu3 %v2804_v27  ;;  %2899 = vmatpush.msra.mxu0 %v2784_v17  ;;  %v2828_v27 = vld [vmem:[%s11812_s24 + $0x288] sm:$0xff] }
 0x558   : > { %2962 = vmatpush.msra.mxu2 %v2829_v28  ;;  %v8740_v28 = vld [vmem:[%s11813_s15 + $0x10] sm:$0xff] }
 0x559   : > { %2916 = vmatpush.msrb.mxu3 %v2803_v32  ;;  %2900 = vmatpush.msra.mxu0 %v2783_v62 }
 0x55a   : > { %6601 = vmatmul.msk.f32.vlgmr.msra.gmra.mxu3 %vm2492_vm3, %v8335_v24  ;;  %v2822_v24 = vld [vmem:[%s11812_s24 + $0x258] sm:$0xff]  ;;  %2963 = vmatpush.msra.mxu2 %v2828_v27 }
 0x55b   : > { %2917 = vmatpush.msrb.mxu3 %v2802_v4  ;;  %2933 = vmatpush.msrb.mxu1 %v2822_v24  ;;  %v2827_v4 = vld [vmem:[%s11812_s24 + $0x280] sm:$0xff]  ;;  %v8716_v24 = vld [vmem:[%s11813_s15 + $0x58] sm:$0xff] }
 0x55c   : > { %2901 = vmatpush.msra.mxu0 %v2782_v34  ;;  %2964 = vmatpush.msra.mxu2 %v2827_v4 }
 0x55d   : > { %2918 = vmatpush.msrb.mxu3 %v2801_v60  ;;  %2934 = vmatpush.msrb.mxu1 %v2821_v48 }
 0x55e   : > { %2902 = vmatpush.msra.mxu0 %v2781_v11 }
 0x55f   : > { %2919 = vmatpush.msrb.mxu3 %v2800_v39  ;;  %2935 = vmatpush.msrb.mxu1 %v2820_v31  ;;  %v8701_v39 = vld [vmem:[%s11813_s15] sm:$0xff] }
 0x560   : > { %2903 = vmatpush.msra.mxu0 %v2780_v41 }
 0x561   : > { %2920 = vmatpush.msrb.mxu3 %v2799_v44  ;;  %2936 = vmatpush.msrb.mxu1 %v2819_v53 }
 0x562   : > { %6602 = vmatmul.msk.f32.gmra.mxu3 %vm2492_vm3, %v8358_v50  ;;  %v2797_v50 = vld [vmem:[%s11812_s24 + $0x190] sm:$0xff] }
 0x563   : > { %2921 = vmatpush.msrb.mxu3 %v2798_v5  ;;  %2937 = vmatpush.msrb.mxu1 %v2818_v56 }
 0x565   : > { %2922 = vmatpush.msrb.mxu3 %v2797_v50  ;;  %2938 = vmatpush.msrb.mxu1 %v2817_v58  ;;  %v2779_v50 = vld [vmem:[%s11812_s24 + $0x100] sm:$0xff] }
 0x566   : > { %2904 = vmatpush.msra.mxu0 %v2779_v50  ;;  %v8763_v50 = vld [vmem:[%s11813_s15 + $0x68] sm:$0xff] }
 0x567   : > { %2923 = vmatpush.msrb.mxu3 %v2796_v51  ;;  %2939 = vmatpush.msrb.mxu1 %v2816_v55 }
 0x569   : > { %2924 = vmatpush.msrb.mxu3 %v2795_v57  ;;  %2940 = vmatpush.msrb.mxu1 %v2815_v6 }
 0x56b   : > { %2941 = vmatpush.msrb.mxu1 %v2814_v9 }
 0x56d   : > { %2942 = vmatpush.msrb.mxu1 %v2813_v13 }
 0x56f   : > { %2943 = vmatpush.msrb.mxu1 %v2812_v18 }
 0x571   : > { %2944 = vmatpush.msrb.mxu1 %v2811_v2 }
 0x5b5   : > { %v2561_v0 = vpop.f32.mrf.mxu0 }
 0x5b6   : > { %v2607_v25 = vpop.f32.mrf.mxu1  ;;  %v2683_v29 = vmul.f32 %v2561_v0, %v8647_v16 }
 0x5b7   : > { %v2685_v35 = vmul.f32 %v2607_v25, %v8661_v30 }
 0x5bb   : > { %v2538_v20 = vpop.f32.mrf.mxu3 }
 0x5bc   : > { %v2630_v26 = vpop.f32.mrf.mxu2  ;;  %v2682_v5 = vmul.f32 %v2538_v20, %v8701_v39  ;;  %v8745_v20 = vld [vmem:[%s11813_s15 + $0x48] sm:$0xff] }
 0x5bd   : > { %v2686_v31 = vmul.f32 %v2630_v26, %v8711_v23 }
 0x5bf   : > { %v2564_v61 = vpop.f32.mrf.mxu0 }
 0x5c0   : > { %v2690_v32 = vmul.f32 %v2564_v61, %v8666_v21  ;;  %v2610_v33 = vpop.f32.mrf.mxu1  ;;  %v2844_v61 = vld [vmem:[%s11812_s24 + $0x308] sm:$0xff] }
 0x5c1   : > { %v2692_v40 = vmul.f32 %v2610_v33, %v8671_v22  ;;  %2983 = vmatpush.msrb.mxu0 %v2844_v61  ;;  %v2991_v61 = vld [vmem:[%s11814_s7 + $0x10] sm:$0xff] }
 0x5c2   : > { %v2703_v60 = vadd.f32 %v2690_v32, %v2683_v29  ;;  %v2843_v29 = vld [vmem:[%s11812_s24 + $0x300] sm:$0xff] }
 0x5c3   : > { %v2717_v42 = vadd.f32 %v2692_v40, %v2685_v35  ;;  %2984 = vmatpush.msrb.mxu0 %v2843_v29  ;;  %v2992_v29 = vld [vmem:[%s11814_s7 + $0x18] sm:$0xff] }
 0x5c4   : > { %v2704_v44 = vrot.slane %v2703_v60, 4 }
 0x5c5   : > { %v2718_v45 = vrot.slane %v2717_v42, 4  ;;  %v2541_v46 = vpop.f32.mrf.mxu3 }
 0x5c6   : > { %v2705_v48 = vadd.f32 %v2704_v44, %v2703_v60  ;;  %v2689_v49 = vmul.f32 %v2541_v46, %v8706_v43  ;;  %v2633_v47 = vpop.f32.mrf.mxu2 }
 0x5c7   : > { %v2719_v19 = vadd.f32 %v2718_v45, %v2717_v42  ;;  %v2693_v37 = vmul.f32 %v2633_v47, %v8716_v24  ;;  %v2653_v51 = vpop.f32.mrf.mxu0 }
 0x5c8   : > { %v2706_v53 = vrot.slane %v2705_v48, 2  ;;  %v2696_v54 = vadd.f32 %v2689_v49, %v2682_v5  ;;  %v2687_v13 = vmul.f32 %v2653_v51, %v8728_v3  ;;  %v8758_v49 = vld [vmem:[%s11813_s15 + $0x30] sm:$0xff]  ;;  %s11815_s15 = sld [smem:[#allocation41_spill]] }
 0x5c9   : > { %v2720_v8 = vrot.slane %v2719_v19, 2  ;;  %v2724_v57 = vadd.f32 %v2693_v37, %v2686_v31 }
 0x5ca   : > { %v2707_v56 = vadd.f32 %v2706_v53, %v2705_v48  ;;  %v2697_v59 = vrot.slane %v2696_v54, 4 }
 0x5cb   : > { %v2721_v63 = vadd.f32 %v2720_v8, %v2719_v19  ;;  %v2725_v58 = vrot.slane %v2724_v57, 4 }
 0x5cc   : > { %v2708_v52 = vrot.slane %v2707_v56, 1  ;;  %v2698_v36 = vadd.f32 %v2697_v59, %v2696_v54 }
 0x5cd   : > { %v2722_v55 = vrot.slane %v2721_v63, 1  ;;  %v2726_v38 = vadd.f32 %v2725_v58, %v2724_v57  ;;  %v2584_v6 = vpop.f32.mrf.mxu3 }
 0x5ce   : > { %v2699_v0 = vrot.slane %v2698_v36, 2  ;;  %v2709_v25 = vadd.f32 %v2708_v52, %v2707_v56  ;;  %v2684_v32 = vmul.f32 %v2584_v6, %v8740_v28  ;;  %v3003_v6 = vld [vmem:[%s11814_s7 + $0x70] sm:$0xff] }
 0x5cf   : > { %v2656_v1 = vpop.f32.mrf.mxu0  ;;  %v2723_v9 = vadd.f32 %v2722_v55, %v2721_v63  ;;  %v2727_v12 = vrot.slane %v2726_v38, 2  ;;  %v3011_v55 = vld [vmem:[%s11814_s7 + $0xb0] sm:$0xff] }
 0x5d0   : > { %v2700_v10 = vadd.f32 %v2699_v0, %v2698_v36  ;;  %v2694_v14 = vmul.f32 %v2656_v1, %v8733_v7  ;;  %2885 = vmatmul.f32.vlgmr.msrb.gmra.mxu2 %v2709_v25  ;;  %v3010_v36 = vld [vmem:[%s11814_s7 + $0xa8] sm:$0xff]  ;;  %v3004_v0 = vld [vmem:[%s11814_s7 + $0x78] sm:$0xff]  ;;  %v3009_v25 = vld [vmem:[%s11814_s7 + $0xa0] sm:$0xff] }
 0x5d1   : > { %2925 = vmatmul.f32.vlgmr.msrb.gmra.mxu3 %v2723_v9  ;;  %v2728_v26 = vadd.f32 %v2727_v12, %v2726_v38  ;;  %v3016_v38 = vld [vmem:[%s11814_s7 + $0xd8] sm:$0xff]  ;;  %v2997_v9 = vld [vmem:[%s11814_s7 + $0x40] sm:$0xff] }
 0x5d2   : > { %v2701_v17 = vrot.slane %v2700_v10, 1  ;;  %v2731_v18 = vadd.f32 %v2694_v14, %v2687_v13  ;;  %3049 = vmatpush.msra.mxu3 %v3010_v36  ;;  %v2996_v1 = vld [vmem:[%s11814_s7 + $0x38] sm:$0xff]  ;;  %v2989_v12 = vld [vmem:[%s11814_s7] sm:$0xff]  ;;  %v2990_v13 = vld [vmem:[%s11814_s7 + $0x8] sm:$0xff] }
 0x5d3   : > { %v2729_v4 = vrot.slane %v2728_v26, 1  ;;  %v2995_v14 = vld [vmem:[%s11814_s7 + $0x30] sm:$0xff]  ;;  %v3000_v36 = vld [vmem:[%s11814_s7 + $0x58] sm:$0xff] }
 0x5d4   : > { %v2732_v62 = vrot.slane %v2731_v18, 4  ;;  %v2702_v2 = vadd.f32 %v2701_v17, %v2700_v10  ;;  %3050 = vmatpush.msra.mxu3 %v3003_v6  ;;  %v3002_v10 = vld [vmem:[%s11814_s7 + $0x68] sm:$0xff]  ;;  %v3012_v17 = vld [vmem:[%s11814_s7 + $0xb8] sm:$0xff]  ;;  %v3204_v6 = vld [vmem:[%s11684_s14 + $0x30] sm:$0xff] }
 0x5d5   : > { %v2587_v27 = vpop.f32.mrf.mxu3  ;;  %v2730_v44 = vadd.f32 %v2729_v4, %v2728_v26  ;;  %v3005_v26 = vld [vmem:[%s11814_s7 + $0x80] sm:$0xff] }
 0x5d6   : > { %v2733_v33 = vadd.f32 %v2732_v62, %v2731_v18  ;;  %v2691_v34 = vmul.f32 %v2587_v27, %v8745_v20  ;;  %2865 = vmatmul.f32.vlgmr.msra.gmra.mxu1 %v2702_v2  ;;  %3051 = vmatpush.msra.mxu3 %v2996_v1  ;;  %v3013_v18 = vld [vmem:[%s11814_s7 + $0xc0] sm:$0xff]  ;;  %v3006_v62 = vld [vmem:[%s11814_s7 + $0x88] sm:$0xff]  ;;  %v2999_v27 = vld [vmem:[%s11814_s7 + $0x50] sm:$0xff] }
 0x5d7   : > { %3169 = vmatpush.msra.mxu1 %v3016_v38  ;;  %v2998_v2 = vld [vmem:[%s11814_s7 + $0x48] sm:$0xff]  ;;  %v3001_v38 = vld [vmem:[%s11814_s7 + $0x60] sm:$0xff] }
 0x5d8   : > { %v2734_v35 = vrot.slane %v2733_v33, 2  ;;  %v2710_v40 = vadd.f32 %v2691_v34, %v2684_v32  ;;  %3052 = vmatpush.msra.mxu3 %v2989_v12  ;;  %v2845_v32 = vld [vmem:[%s11815_s15] sm:$0x1]  ;;  %v2994_v1 = vld [vmem:[%s11814_s7 + $0x28] sm:$0xff]  ;;  %v3245_v12 = vld [vmem:[%s11684_s14 + $0x178] sm:$0xff] }
 0x5d9   : > { %3170 = vmatpush.msra.mxu1 %v3009_v25  ;;  %v3259_v25 = vld [vmem:[%s11684_s14 + $0x1e8] sm:$0xff] }
 0x5da   : > { %v2735_v60 = vadd.f32 %v2734_v35, %v2733_v33  ;;  %v2711_v11 = vrot.slane %v2710_v40, 4  ;;  %3089 = vmatpush.msrb.mxu3 %v3012_v17  ;;  %v3202_v17 = vld [vmem:[%s11684_s14 + $0x20] sm:$0xff] }
 0x5db   : > { %3171 = vmatpush.msra.mxu1 %v3002_v10  ;;  %v3203_v10 = vld [vmem:[%s11684_s14 + $0x28] sm:$0xff] }
 0x5dc   : > { %v2736_v41 = vrot.slane %v2735_v60, 1  ;;  %v2712_v42 = vadd.f32 %v2711_v11, %v2710_v40  ;;  %3090 = vmatpush.msrb.mxu3 %v3005_v26  ;;  %v3213_v11 = vld [vmem:[%s11684_s14 + $0x78] sm:$0xff]  ;;  %v3227_v26 = vld [vmem:[%s11684_s14 + $0xe8] sm:$0xff] }
 0x5dd   : > { %v2676_v45 = vpop.f32.mrf.mxu3  ;;  %3172 = vmatpush.msra.mxu1 %v2995_v14  ;;  %3302 = vmatpush.msrb.mxu2 %v3213_v11  ;;  %v3258_v14 = vld [vmem:[%s11684_s14 + $0x1e0] sm:$0xff]  ;;  %v3241_v11 = vld [vmem:[%s11684_s14 + $0x158] sm:$0xff] }
 0x5de   : > { %v2713_v46 = vrot.slane %v2712_v42, 2  ;;  %2945 = vmatmul.f32.vlgmr.msrb.gmra.mxu1 %v2730_v44  ;;  %v2737_v5 = vadd.f32 %v2736_v41, %v2735_v60  ;;  %v2688_v31 = vmul.f32 %v2676_v45, %v8758_v49  ;;  %3091 = vmatpush.msrb.mxu3 %v2998_v2  ;;  %v3212_v41 = vld [vmem:[%s11684_s14 + $0x70] sm:$0xff]  ;;  %v3211_v44 = vld [vmem:[%s11684_s14 + $0x68] sm:$0xff]  ;;  %v3201_v2 = vld [vmem:[%s11684_s14 + $0x18] sm:$0xff] }
 0x5df   : > { %3303 = vmatpush.msrb.mxu2 %v3212_v41  ;;  %v3254_v41 = vld [vmem:[%s11684_s14 + $0x1c0] sm:$0xff] }
 0x5e0   : > { %v2714_v48 = vadd.f32 %v2713_v46, %v2712_v42  ;;  %2965 = vmatmul.f32.vlgmr.msra.gmra.mxu2 %v2737_v5  ;;  %v2738_v53 = vsel %vm824_vm4, %v2688_v31, 0.0  ;;  %3092 = vmatpush.msrb.mxu3 %v2991_v61  ;;  %v3210_v46 = vld [vmem:[%s11684_s14 + $0x60] sm:$0xff]  ;;  %v3208_v31 = vld [vmem:[%s11684_s14 + $0x50] sm:$0xff] }
 0x5e1   : > { %3304 = vmatpush.msrb.mxu2 %v3211_v44  ;;  %v3226_v61 = vld [vmem:[%s11684_s14 + $0xe0] sm:$0xff] }
 0x5e2   : > { %v2715_v47 = vrot.slane %v2714_v48, 1  ;;  %v3198_v44 = vld [vmem:[%s11684_s14] sm:$0xff] }
 0x5e3   : > { %3305 = vmatpush.msrb.mxu2 %v3210_v46  ;;  %v3277_v46 = vld [vmem:[%s11684_s14 + $0x278] sm:$0xff] }
 0x5e4   : > { %v2716_v19 = vadd.f32 %v2715_v47, %v2714_v48  ;;  %v3209_v48 = vld [vmem:[%s11684_s14 + $0x58] sm:$0xff] }
 0x5e5   : > { %v2679_v37 = vpop.f32.mrf.mxu3  ;;  %3306 = vmatpush.msrb.mxu2 %v3209_v48  ;;  %v3221_v48 = vld [vmem:[%s11684_s14 + $0xb8] sm:$0xff] }
 0x5e6   : > { %v2695_v51 = vmul.f32 %v2679_v37, %v8763_v50  ;;  %2905 = vmatmul.f32.vlgmr.msra.gmra.mxu0 %v2716_v19  ;;  %v3207_v37 = vld [vmem:[%s11684_s14 + $0x48] sm:$0xff] }
 0x5e7   : > { %3069 = vmatpush.msra.mxu0 %v3011_v55  ;;  %3307 = vmatpush.msrb.mxu2 %v3208_v31  ;;  %v3260_v55 = vld [vmem:[%s11684_s14 + $0x1f0] sm:$0xff]  ;;  %v3219_v31 = vld [vmem:[%s11684_s14 + $0xa8] sm:$0xff] }
 0x5e8   : > { %v2739_v54 = vsel %vm824_vm4, %v2695_v51, 0.0 }
 0x5e9   : > { %v2740_v8 = vadd.f32 %v2739_v54, %v2738_v53  ;;  %3070 = vmatpush.msra.mxu0 %v3004_v0  ;;  %3308 = vmatpush.msrb.mxu2 %v3207_v37  ;;  %v2993_v0 = vld [vmem:[%s11814_s7 + $0x20] sm:$0xff]  ;;  %v3217_v37 = vld [vmem:[%s11684_s14 + $0x98] sm:$0xff] }
 0x5eb   : > { %v2741_v57 = vrot.slane %v2740_v8, 4  ;;  %3071 = vmatpush.msra.mxu0 %v2997_v9  ;;  %v3229_v9 = vld [vmem:[%s11684_s14 + $0xf8] sm:$0xff] }
 0x5ed   : > { %v2742_v56 = vadd.f32 %v2741_v57, %v2740_v8  ;;  %3072 = vmatpush.msra.mxu0 %v2990_v13  ;;  %v3014_v8 = vld [vmem:[%s11814_s7 + $0xc8] sm:$0xff]  ;;  %v3015_v57 = vld [vmem:[%s11814_s7 + $0xd0] sm:$0xff] }
 0x5ee   : > { %v3228_v13 = vld [vmem:[%s11684_s14 + $0xf0] sm:$0xff] }
 0x5ef   : > { %v2743_v59 = vrot.slane %v2742_v56, 2 }
 0x5f1   : > { %v2744_v63 = vadd.f32 %v2743_v59, %v2742_v56  ;;  %v3206_v56 = vld [vmem:[%s11684_s14 + $0x40] sm:$0xff]  ;;  %v3007_v59 = vld [vmem:[%s11814_s7 + $0x90] sm:$0xff] }
 0x5f2   : > { %3309 = vmatpush.msrb.mxu2 %v3206_v56  ;;  %v3291_v56 = vld [vmem:[%s11684_s14 + $0x2e8] sm:$0xff] }
 0x5f3   : > { %v2745_v58 = vrot.slane %v2744_v63, 1 }
 0x5f5   : > { %v2746_v52 = vadd.f32 %v2745_v58, %v2744_v63  ;;  %v3261_v63 = vld [vmem:[%s11684_s14 + $0x1f8] sm:$0xff] }
 0x5f6   : > { %v3008_v58 = vld [vmem:[%s11814_s7 + $0x98] sm:$0xff]  ;;  %3371 = vmatpush.msrb.mxu1 %v3261_v63  ;;  %v3240_v63 = vld [vmem:[%s11684_s14 + $0x150] sm:$0xff] }
 0x5f7   : > { %6603 = vmatmul.msk.f32.vlgmr.msrb.gmra.mxu0 %vm824_vm4, %v2746_v52  ;;  %v3205_v52 = vld [vmem:[%s11684_s14 + $0x38] sm:$0xff] }
 0x5f8   : > { %3109 = vmatpush.msrb.mxu0 %v3013_v18  ;;  %3310 = vmatpush.msrb.mxu2 %v3205_v52  ;;  %v3244_v18 = vld [vmem:[%s11684_s14 + $0x170] sm:$0xff] }
 0x5f9   : > { %3372 = vmatpush.msrb.mxu1 %v3260_v55  ;;  %v3276_v52 = vld [vmem:[%s11684_s14 + $0x270] sm:$0xff]  ;;  %v3239_v55 = vld [vmem:[%s11684_s14 + $0x148] sm:$0xff] }
 0x5fa   : > { %3110 = vmatpush.msrb.mxu0 %v3006_v62  ;;  %3311 = vmatpush.msrb.mxu2 %v3204_v6  ;;  %v3257_v62 = vld [vmem:[%s11684_s14 + $0x1d8] sm:$0xff]  ;;  %v3275_v6 = vld [vmem:[%s11684_s14 + $0x268] sm:$0xff] }
 0x5fb   : > { %3373 = vmatpush.msrb.mxu1 %v3259_v25  ;;  %v3238_v25 = vld [vmem:[%s11684_s14 + $0x140] sm:$0xff] }
 0x5fc   : > { %3111 = vmatpush.msrb.mxu0 %v2999_v27  ;;  %3312 = vmatpush.msrb.mxu2 %v3203_v10  ;;  %v3243_v27 = vld [vmem:[%s11684_s14 + $0x168] sm:$0xff] }
 0x5fd   : > { %3374 = vmatpush.msrb.mxu1 %v3258_v14  ;;  %v3287_v10 = vld [vmem:[%s11684_s14 + $0x2c8] sm:$0xff]  ;;  %v3273_v14 = vld [vmem:[%s11684_s14 + $0x258] sm:$0xff] }
 0x5fe   : > { %3112 = vmatpush.msrb.mxu0 %v2992_v29  ;;  %3313 = vmatpush.msrb.mxu2 %v3202_v17  ;;  %v3256_v29 = vld [vmem:[%s11684_s14 + $0x1d0] sm:$0xff]  ;;  %v3286_v17 = vld [vmem:[%s11684_s14 + $0x2c0] sm:$0xff] }
 0x5ff   : > { %3375 = vmatpush.msrb.mxu1 %v3257_v62  ;;  %v3272_v62 = vld [vmem:[%s11684_s14 + $0x250] sm:$0xff] }
 0x600   : > { %3314 = vmatpush.msrb.mxu2 %v3201_v2  ;;  %v3285_v2 = vld [vmem:[%s11684_s14 + $0x2b8] sm:$0xff] }
 0x601   : > { %3376 = vmatpush.msrb.mxu1 %v3256_v29  ;;  %v3271_v29 = vld [vmem:[%s11684_s14 + $0x248] sm:$0xff] }
 0x653   : > { %v2866_v33 = vpop.f32.mrf.mxu1  ;;  %v2886_v4 = vpop.f32.mrf.mxu2 }
 0x654   : > { %v2867_v34 = vadd.f32 %v2866_v33, %v2845_v32  ;;  %v2926_v42 = vpop.f32.mrf.mxu3  ;;  %v3225_v32 = vld [vmem:[%s11684_s14 + $0xd8] sm:$0xff]  ;;  %v3200_v33 = vld [vmem:[%s11684_s14 + $0x10] sm:$0xff] }
 0x655   : > { %3315 = vmatpush.msrb.mxu2 %v3200_v33  ;;  %v3234_v33 = vld [vmem:[%s11684_s14 + $0x120] sm:$0xff] }
 0x656   : > { %v2887_v40 = vadd.f32 %v2886_v4, %v2867_v34  ;;  %v3242_v34 = vld [vmem:[%s11684_s14 + $0x160] sm:$0xff]  ;;  %v3255_v4 = vld [vmem:[%s11684_s14 + $0x1c8] sm:$0xff] }
 0x657   : > { %3377 = vmatpush.msrb.mxu1 %v3255_v4  ;;  %v3270_v4 = vld [vmem:[%s11684_s14 + $0x240] sm:$0xff] }
 0x659   : > { %3378 = vmatpush.msrb.mxu1 %v3254_v41  ;;  %v3269_v41 = vld [vmem:[%s11684_s14 + $0x238] sm:$0xff] }
 0x65b   : > { %v2946_v5 = vpop.f32.mrf.mxu1 }
 0x663   : > { %v2906_v35 = vpop.f32.mrf.mxu0  ;;  %v2966_v19 = vpop.f32.mrf.mxu2 }
 0x664   : > { %v2907_v60 = vadd.f32 %v2906_v35, %v2887_v40  ;;  %v8962_v35 = vld [vmem:[%s11689_s19] ss:$8 sm:$0x3]  ;;  %v3224_v40 = vld [vmem:[%s11684_s14 + $0xd0] sm:$0xff] }
 0x666   : > { %v2927_v45 = vadd.f32 %v2926_v42, %v2907_v60  ;;  %v3199_v60 = vld [vmem:[%s11684_s14 + $0x8] sm:$0xff] }
 0x667   : > { %v3223_v42 = vld [vmem:[%s11684_s14 + $0xc8] sm:$0xff]  ;;  %3316 = vmatpush.msrb.mxu2 %v3199_v60  ;;  %v3233_v60 = vld [vmem:[%s11684_s14 + $0x118] sm:$0xff] }
 0x668   : > { %v2947_v47 = vadd.f32 %v2946_v5, %v2927_v45  ;;  %v3551_v45 = vperm.slane %v8962_v35, 0  ;;  %v3222_v5 = vld [vmem:[%s11684_s14 + $0xc0] sm:$0xff] }
 0x669   : > { %3317 = vmatpush.msrb.mxu2 %v3198_v44  ;;  %v3232_v44 = vld [vmem:[%s11684_s14 + $0x110] sm:$0xff] }
 0x66a   : > { %v2967_v51 = vadd.f32 %v2966_v19, %v2947_v47  ;;  %3553 = vrot.lane.b32.xlu2 %v3551_v45, %s11805_s27  ;;  %v3220_v47 = vld [vmem:[%s11684_s14 + $0xb0] sm:$0xff]  ;;  %v3218_v19 = vld [vmem:[%s11684_s14 + $0xa0] sm:$0xff] }
 0x66b   : > { %3394 = vmatpush.msra.mxu2 %v3277_v46  ;;  %v3268_v45 = vld [vmem:[%s11684_s14 + $0x230] sm:$0xff]  ;;  %v3281_v46 = vld [vmem:[%s11684_s14 + $0x298] sm:$0xff] }
 0x66d   : > { %3395 = vmatpush.msra.mxu2 %v3276_v52 }
 0x66f   : > { %3396 = vmatpush.msra.mxu2 %v3275_v6 }
 0x674   : > { %v2986_v53 = vpop.f32.mrf.mxu0 }
 0x675   : > { %v8854_v54 = vadd.f32 %v2986_v53, %v2967_v51  ;;  %v3216_v51 = vld [vmem:[%s11684_s14 + $0x90] sm:$0xff]  ;;  %v3215_v53 = vld [vmem:[%s11684_s14 + $0x88] sm:$0xff] }
 0x677   : > { %6604 = vmatmul.msk.f32.vlgmr.msra.gmra.mxu3 %vm3033_vm5, %v8854_v54  ;;  %6605 = vmatmul.msk.f32.vlgmr.msra.gmra.mxu0 %vm3033_vm5, %v8854_v54 }
 0x678   : > { %6610 = vmatmul.msk.f32.vlgmr.msra.gmra.mxu1 %vm3033_vm5, %v8854_v54  ;;  %3129 = vmatpush.msra.mxu3 %v3014_v8  ;;  %v3293_v8 = vld [vmem:[%s11684_s14 + $0x2f8] sm:$0xff] }
 0x679   : > { %3149 = vmatpush.msra.mxu0 %v3015_v57  ;;  %v3292_v57 = vld [vmem:[%s11684_s14 + $0x2f0] sm:$0xff] }
 0x67a   : > { %3130 = vmatpush.msra.mxu3 %v3007_v59  ;;  %v3290_v59 = vld [vmem:[%s11684_s14 + $0x2e0] sm:$0xff] }
 0x67b   : > { %3150 = vmatpush.msra.mxu0 %v3008_v58  ;;  %v3253_v58 = vld [vmem:[%s11684_s14 + $0x1b8] sm:$0xff] }
 0x67c   : > { %3131 = vmatpush.msra.mxu3 %v3000_v36  ;;  %3379 = vmatpush.msrb.mxu1 %v3253_v58  ;;  %v3289_v36 = vld [vmem:[%s11684_s14 + $0x2d8] sm:$0xff]  ;;  %v3294_v58 = vld [vmem:[%s11684_s14 + $0x300] sm:$0xff] }
 0x67d   : > { %3151 = vmatpush.msra.mxu0 %v3001_v38  ;;  %v3252_v38 = vld [vmem:[%s11684_s14 + $0x1b0] sm:$0xff] }
 0x67e   : > { %3132 = vmatpush.msra.mxu3 %v2993_v0  ;;  %3380 = vmatpush.msrb.mxu1 %v3252_v38  ;;  %v3288_v0 = vld [vmem:[%s11684_s14 + $0x2d0] sm:$0xff] }
 0x67f   : > { %6606 = vmatmul.msk.f32.vlgmr.msrb.gmra.mxu3 %vm3033_vm5, %v8854_v54  ;;  %6607 = vmatmul.msk.f32.vlgmr.msrb.gmra.mxu0 %vm3033_vm5, %v8854_v54 }
 0x680   : > { %3152 = vmatpush.msra.mxu0 %v2994_v1  ;;  %3325 = vmatpush.msrb.mxu3 %v3229_v9  ;;  %v3251_v1 = vld [vmem:[%s11684_s14 + $0x1a8] sm:$0xff]  ;;  %v3274_v9 = vld [vmem:[%s11684_s14 + $0x260] sm:$0xff] }
 0x681   : > { %3381 = vmatpush.msrb.mxu1 %v3251_v1  ;;  %3397 = vmatpush.msra.mxu2 %v3274_v9 }
 0x682   : > { %3348 = vmatpush.msrb.mxu0 %v3245_v12  ;;  %3326 = vmatpush.msrb.mxu3 %v3228_v13  ;;  %v3237_v12 = vld [vmem:[%s11684_s14 + $0x138] sm:$0xff]  ;;  %v3250_v13 = vld [vmem:[%s11684_s14 + $0x1a0] sm:$0xff] }
 0x683   : > { %3382 = vmatpush.msrb.mxu1 %v3250_v13  ;;  %3398 = vmatpush.msra.mxu2 %v3273_v14 }
 0x684   : > { %3349 = vmatpush.msrb.mxu0 %v3244_v18  ;;  %3327 = vmatpush.msrb.mxu3 %v3227_v26  ;;  %v3236_v18 = vld [vmem:[%s11684_s14 + $0x130] sm:$0xff]  ;;  %v3249_v26 = vld [vmem:[%s11684_s14 + $0x198] sm:$0xff] }
 0x685   : > { %3383 = vmatpush.msrb.mxu1 %v3249_v26  ;;  %3399 = vmatpush.msra.mxu2 %v3272_v62 }
 0x686   : > { %3350 = vmatpush.msrb.mxu0 %v3243_v27  ;;  %3328 = vmatpush.msrb.mxu3 %v3226_v61  ;;  %v3235_v27 = vld [vmem:[%s11684_s14 + $0x128] sm:$0xff]  ;;  %v3248_v61 = vld [vmem:[%s11684_s14 + $0x190] sm:$0xff] }
 0x687   : > { %6608 = vmatmul.msk.f32.vlgmr.msra.gmra.mxu3 %vm3033_vm5, %v8854_v54  ;;  %6609 = vmatmul.msk.f32.vlgmr.msra.gmra.mxu0 %vm3033_vm5, %v8854_v54  ;;  %v3214_v54 = vld [vmem:[%s11684_s14 + $0x80] sm:$0xff]  ;;  %vm11843_vm5 = vcmask 818176  }
 0x688   : > { %3329 = vmatpush.msrb.mxu3 %v3225_v32  ;;  %3351 = vmatpush.msrb.mxu0 %v3242_v34  ;;  %v3284_v32 = vld [vmem:[%s11684_s14 + $0x2b0] sm:$0xff]  ;;  %v3247_v34 = vld [vmem:[%s11684_s14 + $0x188] sm:$0xff] }
 0x689   : > { %3384 = vmatpush.msrb.mxu1 %v3248_v61  ;;  %3400 = vmatpush.msra.mxu2 %v3271_v29 }
 0x68a   : > { %3330 = vmatpush.msrb.mxu3 %v3224_v40  ;;  %3352 = vmatpush.msrb.mxu0 %v3241_v11  ;;  %v3283_v40 = vld [vmem:[%s11684_s14 + $0x2a8] sm:$0xff]  ;;  %v3246_v11 = vld [vmem:[%s11684_s14 + $0x180] sm:$0xff] }
 0x68b   : > { %3385 = vmatpush.msrb.mxu1 %v3247_v34  ;;  %3401 = vmatpush.msra.mxu2 %v3270_v4 }
 0x68c   : > { %3331 = vmatpush.msrb.mxu3 %v3223_v42  ;;  %3353 = vmatpush.msrb.mxu0 %v3240_v63  ;;  %v3282_v42 = vld [vmem:[%s11684_s14 + $0x2a0] sm:$0xff]  ;;  %v3295_v63 = vld [vmem:[%s11684_s14 + $0x308] sm:$0xff] }
 0x68d   : > { %3386 = vmatpush.msrb.mxu1 %v3246_v11  ;;  %3402 = vmatpush.msra.mxu2 %v3269_v41 }
 0x68e   : > { %3332 = vmatpush.msrb.mxu3 %v3222_v5  ;;  %3354 = vmatpush.msrb.mxu0 %v3239_v55  ;;  %v3552_v5 = vperm.slane %v8962_v35, 1  ;;  %v3230_v35 = vld [vmem:[%s11684_s14 + $0x100] sm:$0xff] }
 0x68f   : > { %3403 = vmatpush.msra.mxu2 %v3268_v45 }
 0x690   : > { %3333 = vmatpush.msrb.mxu3 %v3221_v48  ;;  %3355 = vmatpush.msrb.mxu0 %v3238_v25  ;;  %v3231_v48 = vld [vmem:[%s11684_s14 + $0x108] sm:$0xff] }
 0x691   : > { %3555 = vrot.lane.b32.xlu0 %v3552_v5, %s11805_s27 }
 0x692   : > { %3334 = vmatpush.msrb.mxu3 %v3220_v47  ;;  %3356 = vmatpush.msrb.mxu0 %v3237_v12  ;;  %v3267_v47 = vld [vmem:[%s11684_s14 + $0x228] sm:$0xff] }
 0x693   : > { %3404 = vmatpush.msra.mxu2 %v3267_v47 }
 0x694   : > { %3335 = vmatpush.msrb.mxu3 %v3219_v31  ;;  %3357 = vmatpush.msrb.mxu0 %v3236_v18  ;;  %v3280_v31 = vld [vmem:[%s11684_s14 + $0x290] sm:$0xff] }
 0x696   : > { %3336 = vmatpush.msrb.mxu3 %v3218_v19  ;;  %3358 = vmatpush.msrb.mxu0 %v3235_v27  ;;  %v3266_v19 = vld [vmem:[%s11684_s14 + $0x220] sm:$0xff] }
 0x697   : > { %3405 = vmatpush.msra.mxu2 %v3266_v19  ;;  %v9185_v27 = vld [vmem:[#allocation2] sm:$0xff] }
 0x698   : > { %3337 = vmatpush.msrb.mxu3 %v3217_v37  ;;  %3359 = vmatpush.msrb.mxu0 %v3234_v33  ;;  %v3279_v37 = vld [vmem:[%s11684_s14 + $0x288] sm:$0xff] }
 0x69a   : > { %3338 = vmatpush.msrb.mxu3 %v3216_v51  ;;  %3360 = vmatpush.msrb.mxu0 %v3233_v60  ;;  %v3265_v51 = vld [vmem:[%s11684_s14 + $0x218] sm:$0xff] }
 0x69b   : > { %3406 = vmatpush.msra.mxu2 %v3265_v51 }
 0x69c   : > { %3339 = vmatpush.msrb.mxu3 %v3215_v53  ;;  %3361 = vmatpush.msrb.mxu0 %v3232_v44  ;;  %v3278_v53 = vld [vmem:[%s11684_s14 + $0x280] sm:$0xff] }
 0x69e   : > { %3340 = vmatpush.msrb.mxu3 %v3214_v54  ;;  %3362 = vmatpush.msrb.mxu0 %v3231_v48  ;;  %v3264_v54 = vld [vmem:[%s11684_s14 + $0x210] sm:$0xff] }
 0x69f   : > { %3407 = vmatpush.msra.mxu2 %v3264_v54 }
 0x6a0   : > { %3417 = vmatpush.msra.mxu3 %v3293_v8  ;;  %3363 = vmatpush.msrb.mxu0 %v3230_v35  ;;  %v3017_v8 = vld [vmem:[%s11682_s12] sm:$0x7f] }
 0x6a1   : > { %v3019_v38 = vperm.slane %v3017_v8, 0  ;;  %v3024_v62 = vperm.slane %v3017_v8, 5  ;;  %v3025_v44 = vperm.slane %v3017_v8, 6  ;;  %v6621_v35 = vld [vmem:[%s11689_s19 + $0x3] ss:$8 sm:$0x3] }
 0x6a2   : > { %3418 = vmatpush.msra.mxu3 %v3292_v57  ;;  %v3263_v57 = vld [vmem:[%s11684_s14 + $0x208] sm:$0xff]  ;;  %3454 = vmatpush.msra.mxu0 %v3295_v63  ;;  %v3474_v63 = vld [vmem:[%s11686_s16 + $0x58] sm:$0xff] }
 0x6a3   : > { %3408 = vmatpush.msra.mxu2 %v3263_v57  ;;  %v3475_v57 = vld [vmem:[%s11686_s16 + $0x60] sm:$0x1] }
 0x6a4   : > { %3419 = vmatpush.msra.mxu3 %v3291_v56  ;;  %v3262_v56 = vld [vmem:[%s11684_s14 + $0x200] sm:$0xff]  ;;  %3455 = vmatpush.msra.mxu0 %v3294_v58 }
 0x6a5   : > { %3409 = vmatpush.msra.mxu2 %v3262_v56  ;;  %v3476_v56 = vld [vmem:[%s11686_s16 + $0x68] sm:$0x1]  ;;  %6613 = vmatpush.msk.msra.mxu1 %vm2499_vm7, %v3475_v57  ;;  %v3471_v58 = vld [vmem:[%s11686_s16 + $0x40] sm:$0xff] }
 0x6a6   : > { %3420 = vmatpush.msra.mxu3 %v3290_v59  ;;  %v3020_v59 = vperm.slane %v3017_v8, 1 }
 0x6a8   : > { %3421 = vmatpush.msra.mxu3 %v3289_v36 }
 0x6aa   : > { %3422 = vmatpush.msra.mxu3 %v3288_v0  ;;  %v3022_v0 = vperm.slane %v3017_v8, 3 }
 0x6ac   : > { %3423 = vmatpush.msra.mxu3 %v3287_v10 }
 0x6ae   : > { %3424 = vmatpush.msra.mxu3 %v3286_v17  ;;  %v3021_v17 = vperm.slane %v3017_v8, 2 }
 0x6b0   : > { %3425 = vmatpush.msra.mxu3 %v3285_v2 }
 0x6b2   : > { %3426 = vmatpush.msra.mxu3 %v3284_v32 }
 0x6b4   : > { %3427 = vmatpush.msra.mxu3 %v3283_v40  ;;  %v3023_v40 = vperm.slane %v3017_v8, 4 }
 0x6b6   : > { %3428 = vmatpush.msra.mxu3 %v3282_v42 }
 0x6b8   : > { %3429 = vmatpush.msra.mxu3 %v3281_v46 }
 0x6ba   : > { %3430 = vmatpush.msra.mxu3 %v3280_v31 }
 0x6bc   : > { %3431 = vmatpush.msra.mxu3 %v3279_v37 }
 0x6be   : > { %3432 = vmatpush.msra.mxu3 %v3278_v53 }
 0x6c4   : > { %v9183_v2 = vpop.permute.xlu2 %3553 }
 0x6c5   : > { %v3561_v61 = vmul.f32 %v9185_v27, %v9183_v2 }
 0x6c7   : > { %3573 = vrot.lane.b32.xlu1 %v3561_v61, %s11807_s6 }
 0x6f4   : > { %v3074_v52 = vpop.f32.mrf.mxu0 }
 0x6f5   : > { %v3075_v36 = vadd.f32 %v3074_v52, %v3020_v59  ;;  %v3174_v46 = vpop.f32.mrf.mxu1  ;;  %v3473_v59 = vld [vmem:[%s11686_s16 + $0x50] sm:$0xff]  ;;  %v3472_v52 = vld [vmem:[%s11686_s16 + $0x48] sm:$0xff] }
 0x6f6   : > { %v3175_v5 = vadd.f32 %v3174_v46, %v3025_v44  ;;  %3499 = vmatpush.msra.mxu1 %v3473_v59  ;;  %v4542_v59 = vld [vmem:[%s11693_s23] ss:$8 sm:$0x70] }
 0x6f7   : > { %v3178_v55 = vperm.slane %v3075_v36, 0  ;;  %v3469_v36 = vld [vmem:[%s11686_s16 + $0x30] sm:$0xff] }
 0x6f8   : > { %v3183_v31 = vperm.slane %v3175_v5, 0  ;;  %3500 = vmatpush.msra.mxu1 %v3471_v58 }
 0x6f9   : > { %v3185_v6 = vmul.f32 %v3178_v55, %v8647_v16  ;;  %v3192_v26 = vmul.f32 %v3178_v55, %v8666_v21  ;;  %v9193_v21 = vld [vmem:[%s11689_s19 + $0x7] ss:$8 sm:$0x3]  ;;  %v3470_v55 = vld [vmem:[%s11686_s16 + $0x38] sm:$0xff] }
 0x6fa   : > { %v3054_v25 = vpop.f32.mrf.mxu3  ;;  %v3838_v60 = vperm.slane %v9193_v21, 0  ;;  %v3190_v19 = vmul.f32 %v3183_v31, %v8758_v49  ;;  %3501 = vmatpush.msra.mxu1 %v3469_v36  ;;  %v3949_v36 = vld [vmem:[%s11688_s18] sm:$0xff] }
 0x6fb   : > { %v3055_v1 = vadd.f32 %v3054_v25, %v3019_v38  ;;  %3341 = vmatmul.f32.vlgmr.msrb.gmra.mxu3 %v3185_v6  ;;  %v3839_v38 = vperm.slane %v9193_v21, 1  ;;  %v3467_v6 = vld [vmem:[%s11686_s16 + $0x20] sm:$0xff]  ;;  %v3465_v25 = vld [vmem:[%s11686_s16 + $0x10] sm:$0xff] }
 0x6fc   : > { %v3114_v9 = vpop.f32.mrf.mxu0  ;;  %3840 = vrot.lane.b32.xlu1 %v3838_v60, %s11802_s8  ;;  %3502 = vmatpush.msra.mxu1 %v3467_v6 }
 0x6fd   : > { %v3177_v10 = vperm.slane %v3055_v1, 0  ;;  %v3115_v12 = vadd.f32 %v3114_v9, %v3022_v0  ;;  %v3468_v0 = vld [vmem:[%s11686_s16 + $0x28] sm:$0xff]  ;;  %v3466_v1 = vld [vmem:[%s11686_s16 + $0x18] sm:$0xff]  ;;  %v3463_v9 = vld [vmem:[%s11686_s16] sm:$0xff]  ;;  %3842 = vrot.lane.b32.xlu2 %v3839_v38, %s11802_s8 }
 0x6fe   : > { %3503 = vmatpush.msra.mxu1 %v3465_v25 }
 0x6ff   : > { %v3184_v13 = vmul.f32 %v3177_v10, %v8701_v39  ;;  %v3180_v14 = vperm.slane %v3115_v12, 0  ;;  %v3191_v4 = vmul.f32 %v3177_v10, %v8706_v43  ;;  %v6624_v43 = vld [vmem:[%s11689_s19 + $0x6] ss:$8 sm:$0x3] }
 0x700   : > { %v3801_v47 = vperm.slane %v6624_v43, 1  ;;  %v3800_v53 = vperm.slane %v6624_v43, 0  ;;  %v3464_v10 = vld [vmem:[%s11686_s16 + $0x8] sm:$0xff]  ;;  %3504 = vmatpush.msra.mxu1 %v3463_v9 }
 0x701   : > { %v3187_v18 = vmul.f32 %v3180_v14, %v8661_v30  ;;  %3318 = vmatmul.f32.vlgmr.msrb.gmra.mxu2 %v3184_v13  ;;  %v3194_v41 = vmul.f32 %v3180_v14, %v8671_v22  ;;  %v6619_v14 = vld [vmem:[%s11689_s19 + $0x1] ss:$8 sm:$0x3] }
 0x702   : > { %v3094_v16 = vpop.f32.mrf.mxu3  ;;  %3802 = vrot.lane.b32.xlu0 %v3800_v53, %s11806_s5 }
 0x703   : > { %v3095_v29 = vadd.f32 %v3094_v16, %v3021_v17  ;;  %3344 = vmatmul.f32.gmra.mxu3 %v3192_v26  ;;  %3387 = vmatmul.f32.vlgmr.msrb.gmra.mxu1 %v3187_v18  ;;  %v3601_v18 = vperm.slane %v6619_v14, 1  ;;  %v3699_v26 = vperm.slane %v6621_v35, 1 }
 0x704   : > { %v3154_v39 = vpop.f32.mrf.mxu0  ;;  %3804 = vrot.lane.b32.xlu1 %v3801_v47, %s11806_s5 }
 0x705   : > { %v3179_v32 = vperm.slane %v3095_v29, 0  ;;  %v3155_v30 = vadd.f32 %v3154_v39, %v3024_v62  ;;  %v3600_v39 = vperm.slane %v6619_v14, 0 }
 0x707   : > { %v3186_v33 = vmul.f32 %v3179_v32, %v8740_v28  ;;  %v3182_v34 = vperm.slane %v3155_v30, 0  ;;  %v3193_v48 = vmul.f32 %v3179_v32, %v8745_v20  ;;  %v3197_v20 = vmul.f32 %v3183_v31, %v8763_v50  ;;  %v6623_v50 = vld [vmem:[%s11689_s19 + $0x5] ss:$8 sm:$0x3] }
 0x708   : > { %v3763_v54 = vperm.slane %v6623_v50, 1  ;;  %v3762_v12 = vperm.slane %v6623_v50, 0 }
 0x709   : > { %v3189_v11 = vmul.f32 %v3182_v34, %v8728_v3  ;;  %3321 = vmatmul.f32.gmra.mxu2 %v3191_v4  ;;  %3364 = vmatmul.f32.vlgmr.msrb.gmra.mxu0 %v3186_v33  ;;  %v3196_v22 = vmul.f32 %v3182_v34, %v8733_v7  ;;  %v6620_v7 = vld [vmem:[%s11689_s19 + $0x2] ss:$8 sm:$0x3] }
 0x70a   : > { %v3134_v42 = vpop.f32.mrf.mxu3  ;;  %v3650_v51 = vperm.slane %v6620_v7, 1  ;;  %3766 = vrot.lane.b32.xlu0 %v3763_v54, %s11800_s29  ;;  %v3649_v8 = vperm.slane %v6620_v7, 0  ;;  %6616 = vmatpush.msk.msrb.mxu0 %vm2499_vm7, %v3476_v56  ;;  %v9304_v7 = vpop.permute.xlu0 %3555  ;;  %v4541_v56 = vld [vmem:[%s11693_s23] ss:$8 sm:$0xf] }
 0x70b   : > { %v3135_v45 = vadd.f32 %v3134_v42, %v3023_v40  ;;  %3390 = vmatmul.f32.gmra.mxu1 %v3194_v41  ;;  %3433 = vmatmul.f32.vlgmr.msra.gmra.mxu3 %v3189_v11  ;;  %v3557_v9 = vsel %vm1962_vm8, %v9183_v2, %v9304_v7 }
 0x70c   : > { %3522 = vmatpush.msrb.mxu0 %v3474_v63  ;;  %3764 = vrot.lane.b32.xlu2 %v3762_v12, %s11800_s29  ;;  %v9330_v63 = vor.u32 %v4542_v59, %v4541_v56 }
 0x70d   : > { %v3181_v28 = vperm.slane %v3135_v45, 0 }
 0x70e   : > { %3523 = vmatpush.msrb.mxu0 %v3472_v52  ;;  %v4545_v58 = vperm.slane %v9330_v63, 0  ;;  %v4546_v52 = vperm.slane %v9330_v63, 1 }
 0x70f   : > { %v3188_v3 = vmul.f32 %v3181_v28, %v8711_v23  ;;  %v3195_v37 = vmul.f32 %v3181_v28, %v8716_v24  ;;  %v3698_v23 = vperm.slane %v6621_v35, 0  ;;  %v9224_v24 = vld [vmem:[%s11689_s19 + $0x10] ss:$8 sm:$0x3] }
 0x710   : > { %v3876_v49 = vperm.slane %v9224_v24, 0  ;;  %3524 = vmatpush.msrb.mxu0 %v3470_v55  ;;  %v3877_v41 = vperm.slane %v9224_v24, 1  ;;  %v6622_v55 = vld [vmem:[%s11689_s19 + $0x4] ss:$8 sm:$0x3] }
 0x711   : > { %3367 = vmatmul.f32.gmra.mxu0 %v3193_v48  ;;  %3410 = vmatmul.f32.vlgmr.msra.gmra.mxu2 %v3188_v3  ;;  %v3748_v2 = vperm.slane %v6622_v55, 1 }
 0x712   : > { %3700 = vrot.lane.b32.xlu1 %v3698_v23, %s11801_s2  ;;  %3651 = vrot.lane.b32.xlu0 %v3649_v8, %s11803_s0 }
 0x713   : > { %3436 = vmatmul.f32.gmra.mxu3 %v3196_v22  ;;  %3525 = vmatpush.msrb.mxu0 %v3468_v0 }
 0x714   : > { %3702 = vrot.lane.b32.xlu2 %v3699_v26, %s11801_s2 }
 0x715   : > { %3526 = vmatpush.msrb.mxu0 %v3466_v1  ;;  %v3747_v1 = vperm.slane %v6622_v55, 0 }
 0x717   : > { %3527 = vmatpush.msrb.mxu0 %v3464_v10 }
 0x719   : > { %3413 = vmatmul.f32.gmra.mxu2 %v3195_v37  ;;  %6611 = vmatmul.msk.f32.vlgmr.msra.gmra.mxu0 %vm824_vm4, %v3190_v19 }
 0x71a   : > { %3653 = vrot.lane.b32.xlu1 %v3650_v51, %s11803_s0  ;;  %3604 = vrot.lane.b32.xlu0 %v3601_v18, %s11804_s28 }
 0x71c   : > { %3602 = vrot.lane.b32.xlu2 %v3600_v39, %s11804_s28 }
 0x721   : > { %6612 = vmatmul.msk.f32.gmra.mxu0 %vm824_vm4, %v3197_v20 }
 0x722   : > { %3878 = vrot.lane.b32.xlu1 %v3876_v49, %s11807_s6 }
 0x724   : > { %3880 = vrot.lane.b32.xlu2 %v3877_v41, %s11807_s6 }
 0x72a   : > { %3579 = vrot.lane.b32.xlu1 %v3561_v61, %s11807_s6 }
 0x732   : > { %3952 = vperm.xlu1 %6758, %v3949_v36  }
 0x739   : > { %v9288_v11 = vpop.permute.xlu1 %3573 }
 0x757   : > { %v3843_v24 = vpop.permute.xlu2 %3842 }
 0x766   : > { %v9310_v53 = vpop.permute.xlu2 %3764 }
 0x76e   : > { %v9294_v22 = vpop.permute.xlu1 %3840  ;;  %v9315_v54 = vpop.permute.xlu2 %3702 }
 0x774   : > { %v9306_v20 = vpop.permute.xlu0 %3802 }
 0x776   : > { %v3805_v19 = vpop.permute.xlu1 %3804  ;;  %v9318_v8 = vpop.permute.xlu2 %3602 }
 0x777   : > { %v3610_v57 = vmul.f32 %v9185_v27, %v9318_v8 }
 0x779   : > { %3622 = vrot.lane.b32.xlu2 %v3610_v57, %s11802_s8 }
 0x77c   : > { %v3767_v51 = vpop.permute.xlu0 %3766 }
 0x77e   : > { %v3342_v13 = vpop.f32.mrf.mxu3 }
 0x780   : > { %v3388_v21 = vpop.f32.mrf.mxu1 }
 0x781   : > { %4552 = vrot.lane.b32.xlu2 %v4545_v58, %s11798_s10 }
 0x784   : > { %v3319_v17 = vpop.f32.mrf.mxu2  ;;  %v9298_v37 = vpop.permute.xlu1 %3700 }
 0x785   : > { %v3343_v61 = vadd.f32 %v3342_v13, %v3319_v17  ;;  %v3711_v23 = vmul.f32 %v9185_v27, %v9298_v37  ;;  %v9308_v49 = vpop.permute.xlu0 %3651 }
 0x786   : > { %v3365_v62 = vpop.f32.mrf.mxu0  ;;  %v3345_v16 = vpop.f32.mrf.mxu3  ;;  %v3662_v50 = vmul.f32 %v9185_v27, %v9308_v49 }
 0x787   : > { %v3366_v30 = vadd.f32 %v3365_v62, %v3343_v61  ;;  %3726 = vrot.lane.b32.xlu0 %v3711_v23, %s11800_s29  ;;  %v3806_v62 = vsel %vm2045_vm15, %v9306_v20, %v3805_v19 }
 0x788   : > { %v3391_v28 = vpop.f32.mrf.mxu1 }
 0x789   : > { %v3389_v34 = vadd.f32 %v3388_v21, %v3366_v30  ;;  %v3844_v21 = vsel %vm2012_vm14, %v9294_v22, %v3843_v24 }
 0x78c   : > { %v3322_v29 = vpop.f32.mrf.mxu2 }
 0x78d   : > { %v3346_v33 = vadd.f32 %v3345_v16, %v3322_v29 }
 0x78e   : > { %v3368_v32 = vpop.f32.mrf.mxu0  ;;  %v3434_v4 = vpop.f32.mrf.mxu3 }
 0x78f   : > { %v3369_v44 = vadd.f32 %v3368_v32, %v3346_v33  ;;  %3720 = vrot.lane.b32.xlu0 %v3711_v23, %s11800_s29 }
 0x791   : > { %v3392_v43 = vadd.f32 %v3391_v28, %v3369_v44  ;;  %v3654_v28 = vpop.permute.xlu1 %3653 }
 0x794   : > { %v3411_v40 = vpop.f32.mrf.mxu2 }
 0x795   : > { %v3412_v60 = vadd.f32 %v3411_v40, %v3389_v34  ;;  %v3768_v40 = vsel %vm1052_vm6, %v9310_v53, %v3767_v51 }
 0x796   : > { %v3457_v42 = vpop.f32.mrf.mxu0  ;;  %v3437_v48 = vpop.f32.mrf.mxu3 }
 0x797   : > { %v3435_v45 = vadd.f32 %v3434_v4, %v3412_v60  ;;  %3677 = vrot.lane.b32.xlu0 %v3662_v50, %s11806_s5 }
 0x799   : > { %v3458_v46 = vadd.f32 %v3457_v42, %v3435_v45  ;;  %v3704_v42 = vsel %vm1044_vm1, %v9298_v37, %v9315_v54  ;;  %v3879_v19 = vpop.permute.xlu1 %3878 }
 0x79b   : > { %6614 = vmatmul.msk.f32.vlgmr.msra.gmra.mxu1 %vm2492_vm3, %v3458_v46  ;;  %6617 = vmatmul.msk.f32.vlgmr.msrb.gmra.mxu0 %vm2492_vm3, %v3458_v46 }
 0x79c   : > { %v3414_v5 = vpop.f32.mrf.mxu2 }
 0x79d   : > { %v3415_v3 = vadd.f32 %v3414_v5, %v3392_v43  ;;  %v3605_v43 = vpop.permute.xlu0 %3604 }
 0x79e   : > { %v3460_v31 = vpop.f32.mrf.mxu0  ;;  %v3606_v5 = vsel %vm1995_vm9, %v9318_v8, %v3605_v43 }
 0x79f   : > { %v3438_v47 = vadd.f32 %v3437_v48, %v3415_v3  ;;  %3671 = vrot.lane.b32.xlu0 %v3662_v50, %s11806_s5  ;;  %v3655_v3 = vsel %vm2028_vm11, %v9308_v49, %v3654_v28 }
 0x7a1   : > { %v3461_v35 = vadd.f32 %v3460_v31, %v3438_v47 }
 0x7a3   : > { %6615 = vmatmul.msk.f32.gmra.mxu1 %vm2492_vm3, %v3461_v35  ;;  %6618 = vmatmul.msk.f32.gmra.mxu0 %vm2492_vm3, %v3461_v35  ;;  %v3881_v35 = vpop.permute.xlu2 %3880  ;;  %vm11842_vm3 = vcmask 826368  }
 0x7a4   : > { %v3882_v37 = vsel %vm1979_vm13, %v3879_v19, %v3881_v35 }
 0x7a7   : > { %3628 = vrot.lane.b32.xlu0 %v3610_v57, %s11802_s8 }
 0x7af   : > { %4554 = vrot.lane.b32.xlu0 %v4546_v52, %s11798_s10 }
 0x7d3   : > { %v9424_v55 = vpop.permute.xlu2 %3622 }
 0x818   : > { %v3506_v38 = vpop.f32.mrf.mxu1  ;;  %v3529_v6 = vpop.f32.mrf.mxu0 }
 0x819   : > { %v3535_v0 = vmax.f32 %v3506_v38, 0.0  ;;  %v3536_v25 = vmax.f32 %v3529_v6, 0.0  ;;  %v4549_v6 = vperm.slane %v9330_v63, 4 }
 0x81b   : > { %3540 = vst.msk [vmem:[#allocation2 + $0x10] sm:$0xff] %vm1949_vm12, %v3536_v25  ;;  %v3562_v10 = vmul.f32 %v3557_v9, %v3535_v0  ;;  %v9347_v12 = vmul.f32 %v3747_v1, %v3535_v0  ;;  %v3847_v29 = vmul.f32 %v9294_v22, %v3535_v0  ;;  %v3771_v4 = vmul.f32 %v9310_v53, %v3535_v0  ;;  %v9437_v25 = vpop.permute.xlu2 %4552 }
 0x81c   : > { %v3809_v44 = vmul.f32 %v9306_v20, %v3535_v0  ;;  %v3709_v45 = vmul.f32 %v3704_v42, %v3535_v0  ;;  %v3660_v48 = vmul.f32 %v3655_v3, %v3535_v0  ;;  %v3611_v47 = vmul.f32 %v3606_v5, %v3535_v0 }
 0x81d   : > { %3575 = vrot.lane.b32.xlu2 %v3562_v10, %s11807_s6  ;;  %v3885_v24 = vmul.f32 %v3879_v19, %v3535_v0  ;;  %v6643_v10 = vld [vmem:[%s11693_s23 + $0x1] ss:$8 sm:$0xf] }
 0x820   : > { %v3509_v13 = vpop.f32.mrf.mxu1  ;;  %v3532_v14 = vpop.f32.mrf.mxu0 }
 0x821   : > { %v9349_v17 = vmax.f32 %v3509_v13, 0.0  ;;  %v3538_v18 = vmax.f32 %v3532_v14, 0.0  ;;  %v6644_v13 = vld [vmem:[%s11693_s23 + $0x1] ss:$8 sm:$0x70]  ;;  %v4548_v14 = vperm.slane %v9330_v63, 3 }
 0x822   : > { %v3545_v26 = vld [vmem:[#allocation2 + $0x10] sm:$0xff] }
 0x823   : > { %v3810_v16 = vmul.f32 %v3806_v62, %v3545_v26  ;;  %v3563_v61 = vmul.f32 %v9304_v7, %v3545_v26  ;;  %3542 = vst.msk [vmem:[#allocation2 + $0x58] sm:$0xff] %vm1949_vm12, %v3538_v18  ;;  %v9360_v39 = vmul.f32 %v3557_v9, %v9349_v17  ;;  %v3752_v32 = vmul.f32 %v3748_v2, %v3545_v26 }
 0x824   : > { %v9363_v30 = vmul.f32 %v3747_v1, %v9349_v17  ;;  %v3848_v34 = vmul.f32 %v3844_v21, %v3545_v26  ;;  %v3772_v60 = vmul.f32 %v3768_v40, %v3545_v26  ;;  %v3710_v46 = vmul.f32 %v9315_v54, %v3545_v26 }
 0x825   : > { %3819 = vrot.lane.b32.xlu1 %v3810_v16, %s11803_s0  ;;  %3577 = vrot.lane.b32.xlu0 %v3563_v61, %s11807_s6  ;;  %3756 = vst.msk [vmem:[#allocation3 + $0x1c8] sm:$0xff] %vm1949_vm12, %v3752_v32  ;;  %v3661_v31 = vmul.f32 %v3654_v28, %v3545_v26  ;;  %v3886_v23 = vmul.f32 %v3882_v37, %v3545_v26  ;;  %v4547_v16 = vperm.slane %v9330_v63, 2  ;;  %v4550_v32 = vperm.slane %v9330_v63, 5 }
 0x826   : > { %3855 = vrot.lane.b32.xlu2 %v3847_v29, %s11804_s28  ;;  %v3612_v51 = vmul.f32 %v3605_v43, %v3545_v26  ;;  %v3849_v50 = vmul.f32 %v9294_v22, %v9349_v17  ;;  %v3811_v56 = vmul.f32 %v9306_v20, %v9349_v17  ;;  %v3773_v59 = vmul.f32 %v9310_v53, %v9349_v17  ;;  %v9418_v20 = vpop.permute.xlu0 %3726 }
 0x827   : > { %v3887_v22 = vmul.f32 %v3879_v19, %v9349_v17  ;;  %v3712_v58 = vmul.f32 %v3704_v42, %v9349_v17  ;;  %v3663_v36 = vmul.f32 %v3655_v3, %v9349_v17  ;;  %v3614_v0 = vmul.f32 %v3606_v5, %v9349_v17 }
 0x828   : > { %v4579_v1 = vmul.f32 %v9185_v27, %v9437_v25  ;;  %v4630_v18 = vor.u32 %v6644_v13, %v6643_v10 }
 0x82a   : > { %v9368_v33 = vld [vmem:[#allocation2 + $0x58] sm:$0xff]  ;;  %v4637_v29 = vperm.slane %v4630_v18, 5  ;;  %v4632_v42 = vperm.slane %v4630_v18, 0 }
 0x82b   : > { %v3754_v41 = vmul.f32 %v3748_v2, %v9368_v33  ;;  %v3850_v49 = vmul.f32 %v3844_v21, %v9368_v33  ;;  %v3812_v8 = vmul.f32 %v3806_v62, %v9368_v33  ;;  %v3774_v57 = vmul.f32 %v3768_v40, %v9368_v33  ;;  %v6645_v21 = vld [vmem:[%s11693_s23 + $0x2] ss:$8 sm:$0xf] }
 0x82c   : > { %v3713_v52 = vmul.f32 %v9315_v54, %v9368_v33  ;;  %v3566_v53 = vmul.f32 %v9304_v7, %v9368_v33  ;;  %v3664_v38 = vmul.f32 %v3654_v28, %v9368_v33  ;;  %v3615_v7 = vmul.f32 %v3605_v43, %v9368_v33 }
 0x82d   : > { %3857 = vrot.lane.b32.xlu0 %v3848_v34, %s11804_s28  ;;  %3779 = vrot.lane.b32.xlu1 %v3771_v4, %s11801_s2  ;;  %3758 = vst.msk [vmem:[#allocation3 + $0x200] sm:$0xff] %vm1949_vm12, %v3754_v41  ;;  %v3888_v17 = vmul.f32 %v3882_v37, %v9368_v33  ;;  %v4634_v62 = vperm.slane %v4630_v18, 2  ;;  %v6646_v33 = vld [vmem:[%s11693_s23 + $0x2] ss:$8 sm:$0x70]  ;;  %v4551_v34 = vperm.slane %v9330_v63, 6  ;;  %v9472_v4 = vpop.permute.xlu1 %3579 }
 0x82e   : > { %3781 = vrot.lane.b32.xlu2 %v3772_v60, %s11801_s2  ;;  %v9430_v54 = vpop.permute.xlu0 %3720  ;;  %v9478_v40 = vor.u32 %v6646_v33, %v6645_v21  ;;  %v4635_v28 = vperm.slane %v4630_v18, 3  ;;  %v4636_v43 = vperm.slane %v4630_v18, 4 }
 0x830   : > { %v4719_v41 = vperm.slane %v9478_v40, 0 }
 0x835   : > { %3817 = vrot.lane.b32.xlu0 %v3809_v44, %s11803_s0  ;;  %3722 = vrot.lane.b32.xlu1 %v3709_v45, %s11800_s29  ;;  %v4633_v44 = vperm.slane %v4630_v18, 1  ;;  %v9485_v63 = vpop.permute.xlu1 %3952 }
 0x836   : > { %3724 = vrot.lane.b32.xlu2 %v3710_v46, %s11800_s29  ;;  %v9442_v9 = vpop.permute.xlu0 %3677 }
 0x83d   : > { %3673 = vrot.lane.b32.xlu1 %v3660_v48, %s11806_s5  ;;  %3624 = vrot.lane.b32.xlu0 %v3611_v47, %s11802_s8 }
 0x83e   : > { %3675 = vrot.lane.b32.xlu2 %v3661_v31, %s11806_s5  ;;  %v9458_v61 = vpop.permute.xlu0 %3671  ;;  %v4638_v31 = vperm.slane %v4630_v18, 6 }
 0x845   : > { %3626 = vrot.lane.b32.xlu1 %v3612_v51, %s11802_s8  ;;  %3895 = vrot.lane.b32.xlu0 %v3886_v23, %s11805_s27 }
 0x846   : > { %3893 = vrot.lane.b32.xlu2 %v3885_v24, %s11805_s27  ;;  %v4720_v24 = vperm.slane %v9478_v40, 1 }
 0x84d   : > { %3861 = vrot.lane.b32.xlu1 %v3850_v49, %s11804_s28  ;;  %3859 = vrot.lane.b32.xlu0 %v3849_v50, %s11804_s28 }
 0x84e   : > { %3823 = vrot.lane.b32.xlu2 %v3812_v8, %s11803_s0 }
 0x855   : > { %3785 = vrot.lane.b32.xlu0 %v3774_v57, %s11801_s2  ;;  %3821 = vrot.lane.b32.xlu1 %v3811_v56, %s11803_s0 }
 0x856   : > { %3783 = vrot.lane.b32.xlu2 %v3773_v59, %s11801_s2 }
 0x85d   : > { %3897 = vrot.lane.b32.xlu0 %v3887_v22, %s11805_s27  ;;  %3728 = vrot.lane.b32.xlu1 %v3712_v58, %s11800_s29 }
 0x85e   : > { %3730 = vrot.lane.b32.xlu2 %v3713_v52, %s11800_s29 }
 0x865   : > { %3583 = vrot.lane.b32.xlu0 %v3566_v53, %s11807_s6  ;;  %3679 = vrot.lane.b32.xlu1 %v3663_v36, %s11806_s5 }
 0x866   : > { %3681 = vrot.lane.b32.xlu2 %v3664_v38, %s11806_s5  ;;  %s11819_s5 = smov 27  }
 0x86d   : > { %4560 = vrot.lane.b32.xlu0 %v4549_v6, %s11798_s10  ;;  %3630 = vrot.lane.b32.xlu1 %v3614_v0, %s11802_s8 }
 0x86e   : > { %3632 = vrot.lane.b32.xlu2 %v3615_v7, %s11802_s8  ;;  %s11817_s8 = smov 100  }
 0x875   : > { %4593 = vrot.lane.b32.xlu0 %v4579_v1, %s11816_s26  ;;  %3899 = vrot.lane.b32.xlu1 %v3888_v17, %s11805_s27 }
 0x876   : > { %4558 = vrot.lane.b32.xlu2 %v4548_v14, %s11798_s10 }
 0x877   : > { %v9455_v26 = vpop.permute.xlu2 %3575 }
 0x87d   : > { %4643 = vrot.lane.b32.xlu0 %v4634_v62, %s11817_s8  ;;  %4556 = vrot.lane.b32.xlu1 %v4547_v16, %s11798_s10 }
 0x87e   : > { %3581 = vrot.lane.b32.xlu2 %v9360_v39, %s11807_s6  ;;  %v9476_v39 = vpop.permute.xlu0 %3628  ;;  %s11818_s6 = smov 101  }
 0x880   : > { %v3856_v2 = vpop.permute.xlu2 %3855 }
 0x885   : > { %4649 = vrot.lane.b32.xlu0 %v4637_v29, %s11817_s8  ;;  %4562 = vrot.lane.b32.xlu1 %v4550_v32, %s11798_s10 }
 0x886   : > { %4564 = vrot.lane.b32.xlu2 %v4551_v34, %s11798_s10  ;;  %v9488_v45 = vpop.permute.xlu0 %4554 }
 0x888   : > { %v3782_v60 = vpop.permute.xlu2 %3781 }
 0x889   : > { %3794 = vst.msk [vmem:[#allocation3 + $0x238] sm:$0xff] %vm1949_vm12, %v3782_v60 }
 0x88d   : > { %4726 = vrot.lane.b32.xlu0 %v4719_v41, %s11818_s6  ;;  %4639 = vrot.lane.b32.xlu1 %v4632_v42, %s11817_s8 }
 0x88e   : > { %4641 = vrot.lane.b32.xlu2 %v4633_v44, %s11817_s8 }
 0x890   : > { %v3725_v46 = vpop.permute.xlu2 %3724  ;;  %v3934_v44 = vld [vmem:[#allocation3 + $0x238] sm:$0xff] }
 0x895   : > { %4645 = vrot.lane.b32.xlu1 %v4635_v28, %s11817_s8 }
 0x896   : > { %4647 = vrot.lane.b32.xlu2 %v4636_v43, %s11817_s8  ;;  %v3930_v43 = vld [vmem:[#allocation3 + $0x1c8] sm:$0xff] }
 0x897   : > { %v3820_v5 = vpop.permute.xlu1 %3819  ;;  %v3578_v3 = vpop.permute.xlu0 %3577 }
 0x898   : > { %3832 = vst.msk [vmem:[#allocation3 + $0x2a8] sm:$0xff] %vm1949_vm12, %v3820_v5  ;;  %v3586_v48 = vsel %vm1979_vm13, %v9455_v26, %v3578_v3  ;;  %v3676_v47 = vpop.permute.xlu2 %3675 }
 0x899   : > { %3594 = vst.msk [vmem:[#allocation3 + $0x8] sm:$0xff] %vm1949_vm12, %v3586_v48 }
 0x89d   : > { %4651 = vrot.lane.b32.xlu1 %v4638_v31, %s11817_s8 }
 0x89f   : > { %v3858_v35 = vpop.permute.xlu0 %3857  ;;  %v3780_v19 = vpop.permute.xlu1 %3779  ;;  %v3938_v21 = vld [vmem:[#allocation3 + $0x2a8] sm:$0xff] }
 0x8a0   : > { %v3863_v37 = vsel %vm1995_vm9, %v3856_v2, %v3858_v35  ;;  %3870 = vst.msk [vmem:[#allocation3 + $0x318] sm:$0xff] %vm1949_vm12, %v3858_v35  ;;  %v3787_v23 = vsel %vm1044_vm1, %v3780_v19, %v3782_v60  ;;  %v3894_v51 = vpop.permute.xlu2 %3893  ;;  %v4723_v35 = vperm.slane %v9478_v40, 4 }
 0x8a5   : > { %4728 = vrot.lane.b32.xlu1 %v4720_v24, %s11818_s6 }
 0x8a7   : > { %v3818_v49 = vpop.permute.xlu0 %3817  ;;  %v3723_v50 = vpop.permute.xlu1 %3722  ;;  %v3942_v29 = vld [vmem:[#allocation3 + $0x318] sm:$0xff] }
 0x8a8   : > { %v3825_v8 = vsel %vm2028_vm11, %v3818_v49, %v3820_v5  ;;  %v3733_v57 = vsel %vm1052_vm6, %v3723_v50, %v3725_v46  ;;  %v3824_v56 = vpop.permute.xlu2 %3823  ;;  %v3932_v46 = vld [vmem:[#allocation3 + $0x200] sm:$0xff]  ;;  %v4722_v5 = vperm.slane %v9478_v40, 3  ;;  %v3732_v3 = vsel %vm1052_vm6, %v9430_v54, %v3723_v50 }
 0x8a9   : > { %3741 = vst.msk [vmem:[#allocation3 + $0x158] sm:$0xff] %vm1949_vm12, %v3733_v57  ;;  %v6647_v57 = vld [vmem:[%s11693_s23 + $0x3] ss:$8 sm:$0xf] }
 0x8aa   : > { %3834 = vst.msk [vmem:[#allocation3 + $0x2e0] sm:$0xff] %vm1949_vm12, %v3824_v56  ;;  %4732 = vrot.lane.b32.xlu0 %v4722_v5, %s11818_s6  ;;  %v4132_v5 = vld [vmem:[%s11690_s20 + $0x2e0] sm:$0xff] }
 0x8ad   : > { %4734 = vrot.lane.b32.xlu1 %v4723_v35, %s11818_s6 }
 0x8af   : > { %v9506_v59 = vpop.permute.xlu1 %3673  ;;  %v9508_v22 = vpop.permute.xlu0 %3624 }
 0x8b0   : > { %v3684_v58 = vsel %vm2045_vm15, %v9506_v59, %v3676_v47  ;;  %v3784_v52 = vpop.permute.xlu2 %3783  ;;  %v3683_v19 = vsel %vm2045_vm15, %v9458_v61, %v9506_v59 }
 0x8b1   : > { %3692 = vst.msk [vmem:[#allocation3 + $0xe8] sm:$0xff] %vm1949_vm12, %v3684_v58  ;;  %v3940_v32 = vld [vmem:[#allocation3 + $0x2e0] sm:$0xff]  ;;  %v3585_v58 = vsel %vm1979_vm13, %v9288_v11, %v9455_v26 }
 0x8b7   : > { %v3627_v53 = vpop.permute.xlu1 %3626  ;;  %v3896_v36 = vpop.permute.xlu0 %3895 }
 0x8b8   : > { %v3635_v38 = vsel %vm2012_vm14, %v9508_v22, %v3627_v53  ;;  %v9516_v6 = vsel %vm1962_vm8, %v3894_v51, %v3896_v36  ;;  %3908 = vst.msk [vmem:[#allocation3 + $0x388] sm:$0xff] %vm1949_vm12, %v3896_v36  ;;  %v3731_v0 = vpop.permute.xlu2 %3730  ;;  %v3922_v50 = vld [vmem:[#allocation3 + $0xe8] sm:$0xff] }
 0x8b9   : > { %3643 = vst.msk [vmem:[#allocation3 + $0x78] sm:$0xff] %vm1949_vm12, %v3635_v38  ;;  %v3912_v38 = vld [vmem:[%s11687_s17 + $0x8] sm:$0xff] }
 0x8bf   : > { %v3862_v7 = vpop.permute.xlu1 %3861  ;;  %v3860_v1 = vpop.permute.xlu0 %3859 }
 0x8c0   : > { %3872 = vst.msk [vmem:[#allocation3 + $0x350] sm:$0xff] %vm1949_vm12, %v3862_v7  ;;  %v3864_v10 = vsel %vm1995_vm9, %v3860_v1, %v3862_v7  ;;  %v3682_v13 = vpop.permute.xlu2 %3681  ;;  %v3918_v11 = vld [vmem:[#allocation3 + $0x78] sm:$0xff]  ;;  %vm11847_vm9 = vmmov %vm11842_vm3 }
 0x8c1   : > { %3958 = vmatpush.msrb.mxu1 %v3864_v10 }
 0x8c3   : > { %3959 = vmatpush.msrb.mxu1 %v3863_v37  ;;  %v3926_v37 = vld [vmem:[#allocation3 + $0x158] sm:$0xff] }
 0x8c7   : > { %v3786_v14 = vpop.permute.xlu0 %3785  ;;  %v3822_v17 = vpop.permute.xlu1 %3821  ;;  %v3944_v18 = vld [vmem:[#allocation3 + $0x350] sm:$0xff] }
 0x8c8   : > { %v3788_v62 = vsel %vm1044_vm1, %v3784_v52, %v3786_v14  ;;  %3796 = vst.msk [vmem:[#allocation3 + $0x270] sm:$0xff] %vm1949_vm12, %v3786_v14  ;;  %v3826_v16 = vsel %vm2028_vm11, %v3822_v17, %v3824_v56  ;;  %3998 = vmatpush.msrb.mxu3 %v3944_v18  ;;  %v3633_v2 = vpop.permute.xlu2 %3632  ;;  %vm11849_vm11 = vcmask 228352  }
 0x8c9   : > { %3960 = vmatpush.msrb.mxu1 %v3826_v16 }
 0x8ca   : > { %3999 = vmatpush.msrb.mxu3 %v3942_v29 }
 0x8cb   : > { %3961 = vmatpush.msrb.mxu1 %v3825_v8  ;;  %v3634_v8 = vsel %vm2012_vm14, %v9424_v55, %v9508_v22  ;;  %v3911_v55 = vld [vmem:[%s11687_s17] sm:$0xff] }
 0x8cc   : > { %4000 = vmatpush.msrb.mxu3 %v3940_v32  ;;  %v4721_v32 = vperm.slane %v9478_v40, 2 }
 0x8cd   : > { %3962 = vmatpush.msrb.mxu1 %v3788_v62 }
 0x8ce   : > { %4001 = vmatpush.msrb.mxu3 %v3938_v21 }
 0x8cf   : > { %v9525_v33 = vpop.permute.xlu0 %3897  ;;  %v3729_v34 = vpop.permute.xlu1 %3728  ;;  %v3936_v60 = vld [vmem:[#allocation3 + $0x270] sm:$0xff]  ;;  %3963 = vmatpush.msrb.mxu1 %v3787_v23 }
 0x8d0   : > { %v3735_v41 = vsel %vm1052_vm6, %v3729_v34, %v3731_v0  ;;  %4002 = vmatpush.msrb.mxu3 %v3936_v60  ;;  %v9528_v42 = vpop.permute.xlu2 %4558  ;;  %v3734_v28 = vsel %vm1052_vm6, %v9418_v20, %v3729_v34  ;;  %v3914_v0 = vld [vmem:[#allocation3 + $0x8] sm:$0xff]  ;;  %v6652_v34 = vld [vmem:[%s11693_s23 + $0x5] ss:$8 sm:$0x70] }
 0x8d1   : > { %3743 = vst.msk [vmem:[#allocation3 + $0x190] sm:$0xff] %vm1949_vm12, %v3735_v41  ;;  %3964 = vmatpush.msrb.mxu1 %v9363_v30 }
 0x8d2   : > { %4003 = vmatpush.msrb.mxu3 %v3934_v44 }
 0x8d3   : > { %3965 = vmatpush.msrb.mxu1 %v9347_v12 }
 0x8d4   : > { %4004 = vmatpush.msrb.mxu3 %v3932_v46  ;;  %v4139_v46 = vld [vmem:[%s11690_s20 + $0x318] sm:$0xff] }
 0x8d5   : > { %3966 = vmatpush.msrb.mxu1 %v3734_v28 }
 0x8d6   : > { %4005 = vmatpush.msrb.mxu3 %v3930_v43 }
 0x8d7   : > { %v3584_v48 = vpop.permute.xlu0 %3583  ;;  %v3680_v47 = vpop.permute.xlu1 %3679  ;;  %3967 = vmatpush.msrb.mxu1 %v3732_v3  ;;  %v6653_v3 = vld [vmem:[%s11693_s23 + $0x6] ss:$8 sm:$0xf] }
 0x8d8   : > { %v3685_v12 = vsel %vm2045_vm15, %v9442_v9, %v3680_v47  ;;  %v3686_v30 = vsel %vm2045_vm15, %v3680_v47, %v3682_v13  ;;  %v3928_v20 = vld [vmem:[#allocation3 + $0x190] sm:$0xff]  ;;  %v3582_v31 = vpop.permute.xlu2 %3581  ;;  %v4725_v9 = vperm.slane %v9478_v40, 6  ;;  %v3946_v13 = vld [vmem:[#allocation3 + $0x388] sm:$0xff]  ;;  %v4125_v47 = vld [vmem:[%s11690_s20 + $0x2a8] sm:$0xff] }
 0x8d9   : > { %3694 = vst.msk [vmem:[#allocation3 + $0x120] sm:$0xff] %vm1949_vm12, %v3686_v30  ;;  %4006 = vmatpush.msrb.mxu3 %v3928_v20  ;;  %v3588_v54 = vsel %vm1979_vm13, %v3582_v31, %v3584_v48  ;;  %3968 = vmatpush.msrb.mxu1 %v3685_v12  ;;  %v3587_v59 = vsel %vm1979_vm13, %v9472_v4, %v3582_v31  ;;  %v6654_v48 = vld [vmem:[%s11693_s23 + $0x6] ss:$8 sm:$0x70]  ;;  %v4111_v20 = vld [vmem:[%s11690_s20 + $0x238] sm:$0xff]  ;;  %vm11851_vm13 = vcmask 220160   ;;  %vm11853_vm15 = vmmov %vm11843_vm5 }
 0x8da   : > { %3596 = vst.msk [vmem:[#allocation3 + $0x40] sm:$0xff] %vm1949_vm12, %v3588_v54  ;;  %4738 = vrot.lane.b32.xlu0 %v4725_v9, %s11818_s6  ;;  %v9652_v12 = vor.u32 %v6654_v48, %v6653_v3  ;;  %v4118_v30 = vld [vmem:[%s11690_s20 + $0x270] sm:$0xff]  ;;  %v4104_v54 = vld [vmem:[%s11690_s20 + $0x200] sm:$0xff] }
 0x8db   : > { %4007 = vmatpush.msrb.mxu3 %v3926_v37  ;;  %3969 = vmatpush.msrb.mxu1 %v3683_v19  ;;  %v4145_v19 = vld [vmem:[%s11690_s20 + $0x348] sm:$0xff]  ;;  %v4208_v9 = vld [vmem:[%s11690_s20 + $0x540] sm:$0xf] }
 0x8dc   : > { %v5019_v31 = vperm.slane %v9652_v12, 0  ;;  %v4097_v37 = vld [vmem:[%s11690_s20 + $0x1c8] sm:$0xff]  ;;  %v4140_v3 = vld [vmem:[%s11690_s20 + $0x320] sm:$0xff] }
 0x8dd   : > { %v4148_v48 = vld [vmem:[%s11690_s20 + $0x360] sm:$0xff] }
 0x8df   : > { %v9551_v23 = vpop.permute.xlu0 %4560  ;;  %v3631_v51 = vpop.permute.xlu1 %3630 }
 0x8e0   : > { %v3636_v24 = vsel %vm2012_vm14, %v9476_v39, %v3631_v51  ;;  %v3637_v49 = vsel %vm2012_vm14, %v3631_v51, %v3633_v2  ;;  %v3924_v61 = vld [vmem:[#allocation3 + $0x120] sm:$0xff]  ;;  %v4201_v51 = vld [vmem:[%s11690_s20 + $0x508] sm:$0xff]  ;;  %vm11852_vm14 = vmmov %vm11849_vm11 }
 0x8e1   : > { %3645 = vst.msk [vmem:[#allocation3 + $0xb0] sm:$0xff] %vm1949_vm12, %v3637_v49  ;;  %4008 = vmatpush.msrb.mxu3 %v3924_v61  ;;  %3970 = vmatpush.msrb.mxu1 %v3636_v24  ;;  %v6648_v39 = vld [vmem:[%s11693_s23 + $0x3] ss:$8 sm:$0x70] }
 0x8e2   : > { %v9567_v56 = vor.u32 %v6648_v39, %v6647_v57  ;;  %v3916_v26 = vld [vmem:[#allocation3 + $0x40] sm:$0xff]  ;;  %v5022_v57 = vperm.slane %v9652_v12, 3 }
 0x8e3   : > { %4009 = vmatpush.msrb.mxu3 %v3922_v50  ;;  %3971 = vmatpush.msrb.mxu1 %v3634_v8  ;;  %v4138_v24 = vld [vmem:[%s11690_s20 + $0x310] sm:$0xff]  ;;  %v4131_v50 = vld [vmem:[%s11690_s20 + $0x2d8] sm:$0xff] }
 0x8e4   : > { %v4807_v22 = vperm.slane %v9567_v56, 1  ;;  %v4810_v14 = vperm.slane %v9567_v56, 4  ;;  %v4808_v29 = vperm.slane %v9567_v56, 2  ;;  %v4811_v21 = vperm.slane %v9567_v56, 5  ;;  %v4090_v49 = vld [vmem:[%s11690_s20 + $0x190] sm:$0xff]  ;;  %v4083_v8 = vld [vmem:[%s11690_s20 + $0x158] sm:$0xff] }
 0x8e5   : > { %3972 = vmatpush.msrb.mxu1 %v3587_v59  ;;  %v4806_v44 = vperm.slane %v9567_v56, 0  ;;  %v4809_v43 = vperm.slane %v9567_v56, 3  ;;  %v4812_v35 = vperm.slane %v9567_v56, 6  ;;  %v4194_v61 = vld [vmem:[%s11690_s20 + $0x4d0] sm:$0xff]  ;;  %v4187_v56 = vld [vmem:[%s11690_s20 + $0x498] sm:$0xff]  ;;  %v4124_v59 = vld [vmem:[%s11690_s20 + $0x2a0] sm:$0xff] }
 0x8e6   : > { %4815 = vrot.lane.b32.xlu0 %v4807_v22, %s11801_s2  ;;  %v6657_v22 = vld [vmem:[%s11693_s23 + $0x38] ss:$8 sm:$0xf] }
 0x8e7   : > { %v9578_v52 = vpop.permute.xlu0 %4593  ;;  %v3900_v53 = vpop.permute.xlu1 %3899  ;;  %3973 = vmatpush.msrb.mxu1 %v3585_v58  ;;  %v6658_v58 = vld [vmem:[%s11693_s23 + $0x38] ss:$8 sm:$0x70] }
 0x8e8   : > { %v3902_v4 = vsel %vm1962_vm8, %v9525_v33, %v3900_v53  ;;  %3910 = vst.msk [vmem:[#allocation3 + $0x3c0] sm:$0xff] %vm1949_vm12, %v3900_v53  ;;  %v3920_v36 = vld [vmem:[#allocation3 + $0xb0] sm:$0xff]  ;;  %3974 = vmatmul.f32.vlgmr.msrb.gmra.mxu1 %v3911_v55  ;;  %v4724_v33 = vperm.slane %v9478_v40, 5  ;;  %v4146_v40 = vld [vmem:[%s11690_s20 + $0x350] sm:$0xff]  ;;  %v4117_v53 = vld [vmem:[%s11690_s20 + $0x268] sm:$0xff]  ;;  %vm11846_vm8 = vcmask 236544  }
 0x8e9   : > { %4010 = vmatpush.msrb.mxu3 %v3920_v36  ;;  %3992 = vmatpush.msrb.mxu2 %v3902_v4  ;;  %v4069_v4 = vld [vmem:[%s11690_s20 + $0xe8] sm:$0xff]  ;;  %v9720_v36 = vor.u32 %v6658_v58, %v6657_v22  ;;  %v5020_v58 = vperm.slane %v9652_v12, 1 }
 0x8ea   : > { %4279 = vmatpush.msra.mxu1 %v4146_v40 }
 0x8eb   : > { %4011 = vmatpush.msrb.mxu3 %v3918_v11  ;;  %3993 = vmatpush.msrb.mxu2 %v9516_v6  ;;  %v4173_v11 = vld [vmem:[%s11690_s20 + $0x428] sm:$0xff]  ;;  %v5197_v22 = vperm.slane %v9720_v36, 4 }
 0x8ec   : > { %6627 = vmatmul.msk.f32.vlgmr.msrb.gmra.mxu2 %vm824_vm4, %v3912_v38  ;;  %4280 = vmatpush.msra.mxu1 %v4139_v46  ;;  %v4152_v46 = vld [vmem:[%s11690_s20 + $0x380] sm:$0xff] }
 0x8ed   : > { %4012 = vmatpush.msrb.mxu3 %v3916_v26  ;;  %4239 = vmatpush.msra.mxu2 %v4145_v19  ;;  %v4110_v26 = vld [vmem:[%s11690_s20 + $0x230] sm:$0xff]  ;;  %v4075_v19 = vld [vmem:[%s11690_s20 + $0x118] sm:$0xff] }
 0x8ee   : > { %4821 = vrot.lane.b32.xlu0 %v4810_v14, %s11801_s2  ;;  %4281 = vmatpush.msra.mxu1 %v4132_v5  ;;  %v4055_v14 = vld [vmem:[%s11690_s20 + $0x78] sm:$0xff] }
 0x8ef   : > { %v9589_v7 = vpop.permute.xlu0 %4643  ;;  %v9591_v1 = vpop.permute.xlu1 %4556  ;;  %4013 = vmatpush.msrb.mxu3 %v3914_v0  ;;  %v3948_v10 = vld [vmem:[#allocation3 + $0x3c0] sm:$0xff]  ;;  %4240 = vmatpush.msra.mxu2 %v4138_v24  ;;  %v4195_v5 = vld [vmem:[%s11690_s20 + $0x4d8] sm:$0xff]  ;;  %v4068_v24 = vld [vmem:[%s11690_s20 + $0xe0] sm:$0xff] }
 0x8f0   : > { %4014 = vmatmul.f32.vlgmr.msrb.gmra.mxu3 %v3911_v55  ;;  %4032 = vmatpush.msra.mxu0 %v3948_v10  ;;  %v4076_v55 = vld [vmem:[%s11690_s20 + $0x120] sm:$0xff]  ;;  %v4062_v0 = vld [vmem:[%s11690_s20 + $0xb0] sm:$0xff] }
 0x8f1   : > { %4282 = vmatpush.msra.mxu1 %v4125_v47  ;;  %4241 = vmatpush.msra.mxu2 %v4131_v50  ;;  %v4166_v10 = vld [vmem:[%s11690_s20 + $0x3f0] sm:$0xff]  ;;  %v4119_v50 = vld [vmem:[%s11690_s20 + $0x278] sm:$0xff] }
 0x8f2   : > { %4033 = vmatpush.msra.mxu0 %v3946_v13  ;;  %v4103_v13 = vld [vmem:[%s11690_s20 + $0x1f8] sm:$0xff]  ;;  %v4082_v47 = vld [vmem:[%s11690_s20 + $0x150] sm:$0xff] }
 0x8f3   : > { %6628 = vmatmul.msk.f32.vlgmr.msra.gmra.mxu0 %vm824_vm4, %v3912_v38  ;;  %4283 = vmatpush.msra.mxu1 %v4118_v30  ;;  %v4180_v38 = vld [vmem:[%s11690_s20 + $0x460] sm:$0xff] }
 0x8f4   : > { %6629 = vmatpush.msk.msrb.mxu0 %vm2379_vm10, %v4208_v9  ;;  %4242 = vmatpush.msra.mxu2 %v4124_v59  ;;  %v4188_v30 = vld [vmem:[%s11690_s20 + $0x4a0] sm:$0xff]  ;;  %v4126_v9 = vld [vmem:[%s11690_s20 + $0x2b0] sm:$0xff] }
 0x8f5   : > { %4284 = vmatpush.msra.mxu1 %v4111_v20  ;;  %v4133_v20 = vld [vmem:[%s11690_s20 + $0x2e8] sm:$0xff]  ;;  %v4120_v59 = vld [vmem:[%s11690_s20 + $0x280] sm:$0xff] }
 0x8f6   : > { %4267 = vmatpush.msrb.mxu0 %v4201_v51  ;;  %4243 = vmatpush.msra.mxu2 %v4117_v53  ;;  %v4134_v51 = vld [vmem:[%s11690_s20 + $0x2f0] sm:$0xff]  ;;  %v4160_v53 = vld [vmem:[%s11690_s20 + $0x3c0] sm:$0xff] }
 0x8f7   : > { %v9596_v6 = vpop.permute.xlu0 %4649  ;;  %v9598_v17 = vpop.permute.xlu1 %4562  ;;  %4285 = vmatpush.msra.mxu1 %v4104_v54  ;;  %v4141_v54 = vld [vmem:[%s11690_s20 + $0x328] sm:$0xff] }
 0x8f8   : > { %4268 = vmatpush.msrb.mxu0 %v4194_v61  ;;  %4244 = vmatpush.msra.mxu2 %v4110_v26  ;;  %v4174_v61 = vld [vmem:[%s11690_s20 + $0x430] sm:$0xff]  ;;  %v4153_v26 = vld [vmem:[%s11690_s20 + $0x388] sm:$0xff] }
 0x8f9   : > { %4286 = vmatpush.msra.mxu1 %v4097_v37  ;;  %v4181_v37 = vld [vmem:[%s11690_s20 + $0x468] sm:$0xff] }
 0x8fa   : > { %4269 = vmatpush.msrb.mxu0 %v4187_v56  ;;  %4245 = vmatpush.msra.mxu2 %v4103_v13  ;;  %v4112_v56 = vld [vmem:[%s11690_s20 + $0x240] sm:$0xff]  ;;  %v4211_v13 = vld [vmem:[%s11690_s20 + $0x558] sm:$0xf] }
 0x8fb   : > { %4287 = vmatpush.msra.mxu1 %v4090_v49  ;;  %v9821_v49 = vpop.permute.xlu2 %4564 }
 0x8fc   : > { %4270 = vmatpush.msrb.mxu0 %v4180_v38  ;;  %11821 = vst [vmem:[#allocation8_spill] sm:$0xff] %v9821_v49  ;;  %v4113_v38 = vld [vmem:[%s11690_s20 + $0x248] sm:$0xff] }
 0x8fd   : > { %4288 = vmatpush.msra.mxu1 %v4083_v8  ;;  %v4127_v8 = vld [vmem:[%s11690_s20 + $0x2b8] sm:$0xff] }
 0x8fe   : > { %4271 = vmatpush.msrb.mxu0 %v4173_v11  ;;  %v4047_v11 = vld [vmem:[%s11690_s20 + $0x38] sm:$0xff] }
 0x8ff   : > { %v9600_v18 = vpop.permute.xlu0 %4726  ;;  %v9602_v62 = vpop.permute.xlu1 %4639  ;;  %4289 = vmatpush.msra.mxu1 %v4076_v55  ;;  %v4054_v55 = vld [vmem:[%s11690_s20 + $0x70] sm:$0xff] }
 0x900   : > { %v4753_v16 = vmul.f32 %v9185_v27, %v9600_v18  ;;  %v4666_v2 = vmul.f32 %v9185_v27, %v9602_v62  ;;  %v6651_v27 = vld [vmem:[%s11693_s23 + $0x5] ss:$8 sm:$0xf]  ;;  %4272 = vmatpush.msrb.mxu0 %v4166_v10 }
 0x901   : > { %v9624_v60 = vor.u32 %v6652_v34, %v6651_v27  ;;  %4290 = vmatpush.msra.mxu1 %v4069_v4  ;;  %v6656_v27 = vld [vmem:[%s11693_s23 + $0x7] ss:$8 sm:$0x70] }
 0x902   : > { %4767 = vrot.lane.b32.xlu1 %v4753_v16, %s11819_s5  ;;  %4680 = vrot.lane.b32.xlu2 %v4666_v2, %s11820_s21  ;;  %v4209_v16 = vld [vmem:[%s11690_s20 + $0x548] sm:$0xf]  ;;  %v5195_v2 = vperm.slane %v9720_v36, 2  ;;  %v4048_v34 = vld [vmem:[%s11690_s20 + $0x40] sm:$0xff] }
 0x903   : > { %v4934_v41 = vperm.slane %v9624_v60, 2  ;;  %v4937_v28 = vperm.slane %v9624_v60, 5  ;;  %v4932_v39 = vperm.slane %v9624_v60, 0  ;;  %4291 = vmatpush.msra.mxu1 %v4062_v0  ;;  %6631 = vmatpush.msk.msra.mxu3 %vm2379_vm10, %v4209_v16  ;;  %v4105_v4 = vld [vmem:[%s11690_s20 + $0x208] sm:$0xff]  ;;  %v4098_v0 = vld [vmem:[%s11690_s20 + $0x1d0] sm:$0xff]  ;;  %v4091_v16 = vld [vmem:[%s11690_s20 + $0x198] sm:$0xff] }
 0x904   : > { %v4106_v10 = vld [vmem:[%s11690_s20 + $0x210] sm:$0xff] }
 0x905   : > { %4292 = vmatpush.msra.mxu1 %v4055_v14  ;;  %v4040_v14 = vld [vmem:[%s11690_s20] sm:$0xff] }
 0x907   : > { %4293 = vmatpush.msra.mxu1 %v4048_v34  ;;  %v5198_v34 = vperm.slane %v9720_v36, 5 }
 0x90a   : > { %4817 = vrot.lane.b32.xlu1 %v4808_v29, %s11801_s2  ;;  %4730 = vrot.lane.b32.xlu2 %v4721_v32, %s11818_s6  ;;  %v4935_v29 = vperm.slane %v9624_v60, 3  ;;  %v4159_v32 = vld [vmem:[%s11690_s20 + $0x3b8] sm:$0xff] }
 0x90b   : > { %4273 = vmatpush.msrb.mxu0 %v4159_v32  ;;  %v4099_v32 = vld [vmem:[%s11690_s20 + $0x1d8] sm:$0xff] }
 0x90d   : > { %4274 = vmatpush.msrb.mxu0 %v4152_v46  ;;  %v4092_v46 = vld [vmem:[%s11690_s20 + $0x1a0] sm:$0xff] }
 0x912   : > { %4823 = vrot.lane.b32.xlu1 %v4811_v21, %s11801_s2  ;;  %4736 = vrot.lane.b32.xlu2 %v4724_v33, %s11818_s6  ;;  %v4096_v21 = vld [vmem:[%s11690_s20 + $0x1c0] sm:$0xff] }
 0x913   : > { %v6655_v33 = vld [vmem:[%s11693_s23 + $0x7] ss:$8 sm:$0xf]  ;;  %4246 = vmatpush.msra.mxu2 %v4096_v21 }
 0x914   : > { %v9772_v40 = vor.u32 %v6656_v27, %v6655_v33  ;;  %v4204_v21 = vld [vmem:[%s11690_s20 + $0x520] sm:$0xff]  ;;  %v9898_v27 = vpop.permute.xlu1 %4645 }
 0x915   : > { %v4084_v33 = vld [vmem:[%s11690_s20 + $0x160] sm:$0xff] }
 0x91a   : > { %4943 = vrot.lane.b32.xlu1 %v4934_v41, %s11800_s29  ;;  %4813 = vrot.lane.b32.xlu2 %v4806_v44, %s11801_s2  ;;  %v4089_v41 = vld [vmem:[%s11690_s20 + $0x188] sm:$0xff] }
 0x91b   : > { %v4041_v44 = vld [vmem:[%s11690_s20 + $0x8] sm:$0xff]  ;;  %4247 = vmatpush.msra.mxu2 %v4089_v41  ;;  %v5023_v41 = vperm.slane %v9652_v12, 4 }
 0x91c   : > { %4294 = vmatpush.msra.mxu1 %v4041_v44  ;;  %v4203_v44 = vld [vmem:[%s11690_s20 + $0x518] sm:$0xff] }
 0x91d   : > { %4248 = vmatpush.msra.mxu2 %v4082_v47  ;;  %v4070_v47 = vld [vmem:[%s11690_s20 + $0xf0] sm:$0xff] }
 0x91e   : > { %4359 = vmatpush.msrb.mxu1 %v4148_v48  ;;  %v4190_v48 = vld [vmem:[%s11690_s20 + $0x4b0] sm:$0xff] }
 0x91f   : > { %4249 = vmatpush.msra.mxu2 %v4075_v19  ;;  %v4182_v19 = vld [vmem:[%s11690_s20 + $0x470] sm:$0xff] }
 0x920   : > { %4360 = vmatpush.msrb.mxu1 %v4141_v54  ;;  %v4063_v54 = vld [vmem:[%s11690_s20 + $0xb8] sm:$0xff] }
 0x921   : > { %4250 = vmatpush.msra.mxu2 %v4068_v24  ;;  %v4176_v24 = vld [vmem:[%s11690_s20 + $0x440] sm:$0xff] }
 0x922   : > { %4949 = vrot.lane.b32.xlu1 %v4937_v28, %s11800_s29  ;;  %4819 = vrot.lane.b32.xlu2 %v4809_v43, %s11801_s2  ;;  %v4202_v28 = vld [vmem:[%s11690_s20 + $0x510] sm:$0xff]  ;;  %v4147_v43 = vld [vmem:[%s11690_s20 + $0x358] sm:$0xff] }
 0x923   : > { %4307 = vmatpush.msra.mxu3 %v4202_v28  ;;  %4319 = vmatpush.msra.mxu0 %v4147_v43  ;;  %v4197_v28 = vld [vmem:[%s11690_s20 + $0x4e8] sm:$0xff] }
 0x924   : > { %4361 = vmatpush.msrb.mxu1 %v4134_v51  ;;  %v4077_v43 = vld [vmem:[%s11690_s20 + $0x128] sm:$0xff]  ;;  %v5196_v51 = vperm.slane %v9720_v36, 3 }
 0x925   : > { %4308 = vmatpush.msra.mxu3 %v4195_v5  ;;  %4320 = vmatpush.msra.mxu0 %v4140_v3  ;;  %v4196_v5 = vld [vmem:[%s11690_s20 + $0x4e0] sm:$0xff]  ;;  %v4085_v3 = vld [vmem:[%s11690_s20 + $0x168] sm:$0xff] }
 0x926   : > { %4362 = vmatpush.msrb.mxu1 %v4127_v8  ;;  %v4175_v8 = vld [vmem:[%s11690_s20 + $0x438] sm:$0xff] }
 0x927   : > { %4309 = vmatpush.msra.mxu3 %v4188_v30  ;;  %4321 = vmatpush.msra.mxu0 %v4133_v20  ;;  %v4189_v30 = vld [vmem:[%s11690_s20 + $0x4a8] sm:$0xff]  ;;  %v4078_v20 = vld [vmem:[%s11690_s20 + $0x130] sm:$0xff] }
 0x928   : > { %4363 = vmatpush.msrb.mxu1 %v4120_v59  ;;  %v4168_v59 = vld [vmem:[%s11690_s20 + $0x400] sm:$0xff] }
 0x929   : > { %4310 = vmatpush.msra.mxu3 %v4181_v37  ;;  %4322 = vmatpush.msra.mxu0 %v4126_v9  ;;  %v4071_v37 = vld [vmem:[%s11690_s20 + $0xf8] sm:$0xff]  ;;  %v5112_v9 = vperm.slane %v9772_v40, 6 }
 0x92a   : > { %5026 = vrot.lane.b32.xlu1 %v5019_v31, %s11819_s5  ;;  %4825 = vrot.lane.b32.xlu2 %v4812_v35, %s11801_s2  ;;  %v5108_v31 = vperm.slane %v9772_v40, 2  ;;  %v4938_v35 = vperm.slane %v9624_v60, 6 }
 0x92b   : > { %4311 = vmatpush.msra.mxu3 %v4174_v61  ;;  %4323 = vmatpush.msra.mxu0 %v4119_v50  ;;  %v9954_v61 = vpop.permute.xlu1 %4651  ;;  %v4056_v50 = vld [vmem:[%s11690_s20 + $0x80] sm:$0xff] }
 0x92c   : > { %4364 = vmatpush.msrb.mxu1 %v4113_v38  ;;  %v4050_v38 = vld [vmem:[%s11690_s20 + $0x50] sm:$0xff] }
 0x92d   : > { %4324 = vmatpush.msra.mxu0 %v4112_v56  ;;  %v4049_v56 = vld [vmem:[%s11690_s20 + $0x48] sm:$0xff] }
 0x92e   : > { %4365 = vmatpush.msrb.mxu1 %v4106_v10  ;;  %v4154_v10 = vld [vmem:[%s11690_s20 + $0x390] sm:$0xff] }
 0x92f   : > { %4325 = vmatpush.msra.mxu0 %v4105_v4  ;;  %v4161_v4 = vld [vmem:[%s11690_s20 + $0x3c8] sm:$0xff] }
 0x930   : > { %4366 = vmatpush.msrb.mxu1 %v4099_v32 }
 0x931   : > { %4326 = vmatpush.msra.mxu0 %v4098_v0  ;;  %v5109_v0 = vperm.slane %v9772_v40, 3 }
 0x932   : > { %5032 = vrot.lane.b32.xlu1 %v5022_v57, %s11819_s5  ;;  %4939 = vrot.lane.b32.xlu2 %v4932_v39, %s11800_s29  ;;  %v4061_v57 = vld [vmem:[%s11690_s20 + $0xa8] sm:$0xff]  ;;  %v4167_v39 = vld [vmem:[%s11690_s20 + $0x3f8] sm:$0xff] }
 0x933   : > { %4251 = vmatpush.msra.mxu2 %v4061_v57  ;;  %4312 = vmatpush.msra.mxu3 %v4167_v39  ;;  %v4064_v57 = vld [vmem:[%s11690_s20 + $0xc0] sm:$0xff]  ;;  %v4169_v39 = vld [vmem:[%s11690_s20 + $0x408] sm:$0xff] }
 0x934   : > { %4327 = vmatpush.msra.mxu0 %v4091_v16  ;;  %4367 = vmatpush.msrb.mxu1 %v4092_v46  ;;  %v5512_v16 = vld [vmem:[%s11823_s13] ss:$8 sm:$0x70] }
 0x935   : > { %4252 = vmatpush.msra.mxu2 %v4054_v55  ;;  %4313 = vmatpush.msra.mxu3 %v4160_v53  ;;  %v4057_v55 = vld [vmem:[%s11690_s20 + $0x88] sm:$0xff] }
 0x936   : > { %4328 = vmatpush.msra.mxu0 %v4084_v33  ;;  %4368 = vmatpush.msrb.mxu1 %v4085_v3 }
 0x937   : > { %4253 = vmatpush.msra.mxu2 %v4047_v11  ;;  %4314 = vmatpush.msra.mxu3 %v4153_v26  ;;  %v4155_v11 = vld [vmem:[%s11690_s20 + $0x398] sm:$0xff]  ;;  %v5339_v26 = vld [vmem:[%s11692_s22] sm:$0xf] }
 0x938   : > { %4329 = vmatpush.msra.mxu0 %v4077_v43  ;;  %4369 = vmatpush.msrb.mxu1 %v4078_v20 }
 0x939   : > { %6635 = vmatpush.msk.msrb.mxu3 %vm2379_vm10, %v4211_v13  ;;  %4254 = vmatpush.msra.mxu2 %v4040_v14  ;;  %v4043_v13 = vld [vmem:[%s11690_s20 + $0x18] sm:$0xff] }
 0x93a   : > { %5204 = vrot.lane.b32.xlu1 %v5195_v2, %s11816_s26  ;;  %4945 = vrot.lane.b32.xlu2 %v4935_v29, %s11800_s29  ;;  %v9883_v2 = vpop.permute.xlu2 %4641  ;;  %v4210_v29 = vld [vmem:[%s11690_s20 + $0x550] sm:$0xf] }
 0x93b   : > { %6633 = vmatpush.msk.msrb.mxu2 %vm2379_vm10, %v4210_v29  ;;  %4387 = vmatpush.msrb.mxu3 %v4204_v21  ;;  %v5511_v14 = vld [vmem:[%s11823_s13] ss:$8 sm:$0xf]  ;;  %v10012_v29 = vpop.permute.xlu1 %4728 }
 0x93c   : > { %4330 = vmatpush.msra.mxu0 %v4070_v47  ;;  %4370 = vmatpush.msrb.mxu1 %v4071_v37  ;;  %v10015_v32 = vor.u32 %v5512_v16, %v5511_v14  ;;  %v6667_v47 = vld [vmem:[%s11823_s13 + $0x1] ss:$8 sm:$0x70] }
 0x93d   : > { %4347 = vmatpush.msrb.mxu2 %v4203_v44  ;;  %4388 = vmatpush.msrb.mxu3 %v4197_v28 }
 0x93e   : > { %4331 = vmatpush.msra.mxu0 %v4063_v54  ;;  %4371 = vmatpush.msrb.mxu1 %v4064_v57  ;;  %v5517_v33 = vperm.slane %v10015_v32, 2  ;;  %v5520_v43 = vperm.slane %v10015_v32, 5  ;;  %v4149_v54 = vld [vmem:[%s11690_s20 + $0x368] sm:$0xff]  ;;  %v6761_v57 = vld [vmem:[#allocation2] sm:$0xff] }
 0x93f   : > { %4348 = vmatpush.msrb.mxu2 %v4196_v5  ;;  %4389 = vmatpush.msrb.mxu3 %v4190_v48  ;;  %v5199_v5 = vperm.slane %v9720_v36, 6  ;;  %v6666_v48 = vld [vmem:[%s11823_s13 + $0x1] ss:$8 sm:$0xf] }
 0x940   : > { %4332 = vmatpush.msra.mxu0 %v4056_v50  ;;  %4372 = vmatpush.msrb.mxu1 %v4057_v55  ;;  %v5024_v55 = vperm.slane %v9652_v12, 5 }
 0x941   : > { %4349 = vmatpush.msrb.mxu2 %v4189_v30 }
 0x942   : > { %5117 = vrot.lane.b32.xlu1 %v5108_v31, %s11820_s21  ;;  %4951 = vrot.lane.b32.xlu2 %v4938_v35, %s11800_s29  ;;  %v9935_v31 = vpop.permute.xlu2 %4647  ;;  %v4183_v35 = vld [vmem:[%s11690_s20 + $0x478] sm:$0xff] }
 0x943   : > { %4390 = vmatpush.msrb.mxu3 %v4183_v35  ;;  %4350 = vmatpush.msrb.mxu2 %v4182_v19  ;;  %v10040_v35 = vor.u32 %v6667_v47, %v6666_v48  ;;  %v4213_v19 = vld [vmem:[%s11690_s20 + $0x568] sm:$0xf]  ;;  %v4122_v48 = vld [vmem:[%s11690_s20 + $0x290] sm:$0xff] }
 0x944   : > { %4333 = vmatpush.msra.mxu0 %v4049_v56  ;;  %4373 = vmatpush.msrb.mxu1 %v4050_v38  ;;  %v4150_v38 = vld [vmem:[%s11690_s20 + $0x370] sm:$0xff]  ;;  %v4121_v47 = vld [vmem:[%s11690_s20 + $0x288] sm:$0xff] }
 0x945   : > { %4391 = vmatpush.msrb.mxu3 %v4176_v24  ;;  %4351 = vmatpush.msrb.mxu2 %v4175_v8  ;;  %v4142_v8 = vld [vmem:[%s11690_s20 + $0x330] sm:$0xff] }
 0x946   : > { %4374 = vmatpush.msrb.mxu1 %v4043_v13  ;;  %v4933_v13 = vperm.slane %v9624_v60, 1 }
 0x947   : > { %4392 = vmatpush.msrb.mxu3 %v4169_v39  ;;  %4352 = vmatpush.msrb.mxu2 %v4168_v59  ;;  %v5602_v59 = vperm.slane %v10040_v35, 0 }
 0x949   : > { %4353 = vmatpush.msrb.mxu2 %v4161_v4  ;;  %v4212_v4 = vld [vmem:[%s11690_s20 + $0x560] sm:$0xf] }
 0x94a   : > { %5208 = vrot.lane.b32.xlu1 %v5197_v22, %s11816_s26  ;;  %5028 = vrot.lane.b32.xlu2 %v5020_v58, %s11819_s5  ;;  %v4162_v22 = vld [vmem:[%s11690_s20 + $0x3d0] sm:$0xff] }
 0x94b   : > { %v4042_v58 = vld [vmem:[%s11690_s20 + $0x10] sm:$0xff]  ;;  %4393 = vmatpush.msrb.mxu3 %v4162_v22  ;;  %4354 = vmatpush.msrb.mxu2 %v4154_v10  ;;  %v4135_v22 = vld [vmem:[%s11690_s20 + $0x2f8] sm:$0xff] }
 0x94c   : > { %4334 = vmatpush.msra.mxu0 %v4042_v58  ;;  %v4143_v10 = vld [vmem:[%s11690_s20 + $0x338] sm:$0xff] }
 0x94d   : > { %4394 = vmatpush.msrb.mxu3 %v4155_v11  ;;  %v4199_v11 = vld [vmem:[%s11690_s20 + $0x4f8] sm:$0xff] }
 0x952   : > { %5210 = vrot.lane.b32.xlu1 %v5198_v34, %s11816_s26  ;;  %5034 = vrot.lane.b32.xlu2 %v5023_v41, %s11819_s5  ;;  %v5106_v34 = vperm.slane %v9772_v40, 0  ;;  %v10023_v41 = vpop.permute.xlu1 %4734 }
 0x95a   : > { %5125 = vrot.lane.b32.xlu1 %v5112_v9, %s11820_s21  ;;  %5206 = vrot.lane.b32.xlu2 %v5196_v51, %s11816_s26 }
 0x95c   : > { %v9985_v53 = vpop.permute.xlu2 %4680 }
 0x95d   : > { %11822 = vst [vmem:[#allocation9_spill] sm:$0xff] %v9985_v53 }
 0x962   : > { %5342 = vperm.xlu1 %6758, %v5339_v26   ;;  %5119 = vrot.lane.b32.xlu2 %v5109_v0, %s11820_s21  ;;  %v4128_v26 = vld [vmem:[%s11690_s20 + $0x2c0] sm:$0xff]  ;;  %v4205_v0 = vld [vmem:[%s11690_s20 + $0x528] sm:$0xff] }
 0x964   : > { %v10017_v21 = vpop.permute.xlu2 %4730 }
 0x965   : > { %v3975_v44 = vpop.f32.mrf.mxu1 }
 0x966   : > { %v3976_v28 = vadd.f32 %v3975_v44, %v9485_v63  ;;  %v4136_v44 = vld [vmem:[%s11690_s20 + $0x300] sm:$0xff] }
 0x96a   : > { %5526 = vrot.lane.b32.xlu1 %v5517_v33, %s11798_s10  ;;  %5113 = vrot.lane.b32.xlu2 %v5106_v34, %s11820_s21  ;;  %v4192_v33 = vld [vmem:[%s11690_s20 + $0x4c0] sm:$0xff]  ;;  %v4198_v34 = vld [vmem:[%s11690_s20 + $0x4f0] sm:$0xff] }
 0x96c   : > { %v10025_v46 = vpop.permute.xlu2 %4736 }
 0x96f   : > { %v3995_v3 = vpop.f32.mrf.mxu2 }
 0x970   : > { %v3996_v30 = vadd.f32 %v3995_v3, %v3976_v28  ;;  %v4035_v9 = vpop.f32.mrf.mxu0  ;;  %v4191_v28 = vld [vmem:[%s11690_s20 + $0x4b8] sm:$0xff]  ;;  %v4184_v3 = vld [vmem:[%s11690_s20 + $0x480] sm:$0xff] }
 0x972   : > { %5532 = vrot.lane.b32.xlu1 %v5520_v43, %s11798_s10  ;;  %5212 = vrot.lane.b32.xlu2 %v5199_v5, %s11816_s26  ;;  %v10038_v20 = vmax.f32 %v3996_v30, 0.0  ;;  %v4129_v43 = vld [vmem:[%s11690_s20 + $0x2c8] sm:$0xff]  ;;  %v5515_v5 = vperm.slane %v10015_v32, 0 }
 0x973   : > { %v4015_v37 = vpop.f32.mrf.mxu3  ;;  %v4177_v30 = vld [vmem:[%s11690_s20 + $0x448] sm:$0xff] }
 0x974   : > { %v4016_v51 = vadd.f32 %v4015_v37, %v9485_v63  ;;  %v10049_v24 = vpop.permute.xlu1 %4767  ;;  %v10051_v50 = vpop.permute.xlu2 %4813  ;;  %4255 = vmatmul.f32.vlgmr.msra.gmra.mxu2 %v10038_v20  ;;  %4295 = vmatmul.f32.vlgmr.msra.gmra.mxu1 %v10038_v20  ;;  %v4206_v63 = vld [vmem:[%s11690_s20 + $0x530] sm:$0xff]  ;;  %v4115_v37 = vld [vmem:[%s11690_s20 + $0x258] sm:$0xff] }
 0x975   : > { %v4841_v39 = vmul.f32 %v6761_v57, %v10051_v50  ;;  %4399 = vmatpush.msra.mxu2 %v4149_v54  ;;  %6639 = vmatpush.msk.msra.mxu1 %vm2379_vm10, %v4213_v19  ;;  %v4185_v54 = vld [vmem:[%s11690_s20 + $0x488] sm:$0xff]  ;;  %v4178_v57 = vld [vmem:[%s11690_s20 + $0x450] sm:$0xff] }
 0x976   : > { %v4036_v56 = vadd.f32 %v4035_v9, %v4016_v51  ;;  %v4114_v51 = vld [vmem:[%s11690_s20 + $0x250] sm:$0xff] }
 0x977   : > { %4857 = vrot.lane.b32.xlu0 %v4841_v39, %s11800_s29  ;;  %4400 = vmatpush.msra.mxu2 %v4142_v8  ;;  %v4170_v8 = vld [vmem:[%s11690_s20 + $0x410] sm:$0xff]  ;;  %v4936_v39 = vperm.slane %v9624_v60, 4  ;;  %v4101_v60 = vld [vmem:[%s11690_s20 + $0x1e8] sm:$0xff] }
 0x978   : > { %v10069_v58 = vmax.f32 %v4036_v56, 0.0  ;;  %4467 = vmatpush.msra.mxu1 %v4206_v63  ;;  %v4108_v63 = vld [vmem:[%s11690_s20 + $0x220] sm:$0xff]  ;;  %v4107_v56 = vld [vmem:[%s11690_s20 + $0x218] sm:$0xff] }
 0x979   : > { %4401 = vmatpush.msra.mxu2 %v4135_v22  ;;  %v4100_v22 = vld [vmem:[%s11690_s20 + $0x1e0] sm:$0xff] }
 0x97a   : > { %5609 = vrot.lane.b32.xlu1 %v5602_v59, %s11817_s8  ;;  %5036 = vrot.lane.b32.xlu2 %v5024_v55, %s11819_s5  ;;  %v4163_v59 = vld [vmem:[%s11690_s20 + $0x3d8] sm:$0xff] }
 0x97b   : > { %6630 = vmatmul.msk.f32.vlgmr.msrb.gmra.mxu0 %vm1949_vm12, %v10069_v58  ;;  %6632 = vmatmul.msk.f32.vlgmr.msra.gmra.mxu3 %vm1949_vm12, %v10069_v58  ;;  %v4171_v55 = vld [vmem:[%s11690_s20 + $0x418] sm:$0xff] }
 0x97c   : > { %6637 = vmatpush.msk.msrb.mxu0 %vm2379_vm10, %v4212_v4  ;;  %4439 = vmatpush.msra.mxu3 %v4150_v38  ;;  %v10097_v14 = vpop.permute.xlu1 %4817  ;;  %v10099_v16 = vpop.permute.xlu2 %4819  ;;  %v4156_v4 = vld [vmem:[%s11690_s20 + $0x3a0] sm:$0xff]  ;;  %v4094_v38 = vld [vmem:[%s11690_s20 + $0x1b0] sm:$0xff] }
 0x97d   : > { %4468 = vmatpush.msra.mxu1 %v4199_v11  ;;  %4402 = vmatpush.msra.mxu2 %v4128_v26  ;;  %v4164_v11 = vld [vmem:[%s11690_s20 + $0x3e0] sm:$0xff]  ;;  %v4093_v26 = vld [vmem:[%s11690_s20 + $0x1a8] sm:$0xff] }
 0x97e   : > { %4427 = vmatpush.msrb.mxu0 %v4205_v0  ;;  %4440 = vmatpush.msra.mxu3 %v4143_v10  ;;  %v4151_v0 = vld [vmem:[%s11690_s20 + $0x378] sm:$0xff] }
 0x97f   : > { %4941 = vrot.lane.b32.xlu0 %v4933_v13, %s11800_s29  ;;  %4469 = vmatpush.msra.mxu1 %v4192_v33  ;;  %v4087_v13 = vld [vmem:[%s11690_s20 + $0x178] sm:$0xff] }
 0x980   : > { %4428 = vmatpush.msrb.mxu0 %v4198_v34  ;;  %4441 = vmatpush.msra.mxu3 %v4136_v44  ;;  %v4157_v34 = vld [vmem:[%s11690_s20 + $0x3a8] sm:$0xff]  ;;  %v4086_v44 = vld [vmem:[%s11690_s20 + $0x170] sm:$0xff] }
 0x981   : > { %6634 = vmatmul.msk.f32.vlgmr.msrb.gmra.mxu2 %vm1949_vm12, %v10069_v58  ;;  %4375 = vmatmul.f32.vlgmr.msrb.gmra.mxu1 %v10038_v20 }
 0x982   : > { %4429 = vmatpush.msrb.mxu0 %v4191_v28  ;;  %4442 = vmatpush.msra.mxu3 %v4129_v43  ;;  %v4144_v28 = vld [vmem:[%s11690_s20 + $0x340] sm:$0xff]  ;;  %v5021_v43 = vperm.slane %v9652_v12, 2 }
 0x983   : > { %5522 = vrot.lane.b32.xlu2 %v5515_v5, %s11798_s10  ;;  %4335 = vmatmul.f32.vlgmr.msra.gmra.mxu0 %v10038_v20  ;;  %v4080_v5 = vld [vmem:[%s11690_s20 + $0x140] sm:$0xff] }
 0x984   : > { %6636 = vmatmul.msk.f32.vlgmr.msrb.gmra.mxu3 %vm1949_vm12, %v10069_v58  ;;  %4430 = vmatpush.msrb.mxu0 %v4184_v3  ;;  %v10140_v19 = vpop.permute.xlu1 %4823  ;;  %v10145_v9 = vpop.permute.xlu2 %4825  ;;  %v4137_v3 = vld [vmem:[%s11690_s20 + $0x308] sm:$0xff] }
 0x985   : > { %11824 = vst [vmem:[#allocation10_spill] sm:$0xff] %v10145_v9  ;;  %4443 = vmatpush.msra.mxu3 %v4122_v48  ;;  %4403 = vmatpush.msra.mxu2 %v4121_v47  ;;  %v4079_v48 = vld [vmem:[%s11690_s20 + $0x138] sm:$0xff]  ;;  %v5518_v47 = vperm.slane %v10015_v32, 3 }
 0x986   : > { %4431 = vmatpush.msrb.mxu0 %v4177_v30  ;;  %4470 = vmatpush.msra.mxu1 %v4185_v54  ;;  %v4073_v30 = vld [vmem:[%s11690_s20 + $0x108] sm:$0xff]  ;;  %v4130_v54 = vld [vmem:[%s11690_s20 + $0x2d0] sm:$0xff] }
 0x987   : > { %4444 = vmatpush.msra.mxu3 %v4115_v37  ;;  %4404 = vmatpush.msra.mxu2 %v4114_v51  ;;  %v4072_v37 = vld [vmem:[%s11690_s20 + $0x100] sm:$0xff]  ;;  %v4066_v51 = vld [vmem:[%s11690_s20 + $0xd0] sm:$0xff] }
 0x988   : > { %4432 = vmatpush.msrb.mxu0 %v4170_v8  ;;  %4471 = vmatpush.msra.mxu1 %v4178_v57  ;;  %v4123_v8 = vld [vmem:[%s11690_s20 + $0x298] sm:$0xff] }
 0x989   : > { %4445 = vmatpush.msra.mxu3 %v4108_v63  ;;  %4947 = vrot.lane.b32.xlu0 %v4936_v39, %s11800_s29  ;;  %v4065_v39 = vld [vmem:[%s11690_s20 + $0xc8] sm:$0xff] }
 0x98a   : > { %4405 = vmatpush.msra.mxu2 %v4107_v56  ;;  %4433 = vmatpush.msrb.mxu0 %v4163_v59  ;;  %v4059_v56 = vld [vmem:[%s11690_s20 + $0x98] sm:$0xff]  ;;  %v4116_v59 = vld [vmem:[%s11690_s20 + $0x260] sm:$0xff] }
 0x98b   : > { %4446 = vmatpush.msra.mxu3 %v4101_v60  ;;  %4472 = vmatpush.msra.mxu1 %v4171_v55  ;;  %v4058_v60 = vld [vmem:[%s11690_s20 + $0x90] sm:$0xff]  ;;  %v5194_v55 = vperm.slane %v9720_v36, 1 }
 0x98c   : > { %4406 = vmatpush.msra.mxu2 %v4100_v22  ;;  %4434 = vmatpush.msrb.mxu0 %v4156_v4  ;;  %v10191_v10 = vpop.permute.xlu1 %4943  ;;  %v10196_v33 = vpop.permute.xlu2 %4939  ;;  %v4052_v22 = vld [vmem:[%s11690_s20 + $0x60] sm:$0xff]  ;;  %v4109_v4 = vld [vmem:[%s11690_s20 + $0x228] sm:$0xff] }
 0x98d   : > { %4447 = vmatpush.msra.mxu3 %v4094_v38  ;;  %4473 = vmatpush.msra.mxu1 %v4164_v11  ;;  %v4051_v38 = vld [vmem:[%s11690_s20 + $0x58] sm:$0xff]  ;;  %v5521_v11 = vperm.slane %v10015_v32, 6 }
 0x98e   : > { %6638 = vmatmul.msk.f32.vlgmr.msrb.gmra.mxu0 %vm1949_vm12, %v10069_v58  ;;  %4407 = vmatpush.msra.mxu2 %v4093_v26  ;;  %v4045_v26 = vld [vmem:[%s11690_s20 + $0x28] sm:$0xff] }
 0x98f   : > { %4479 = vmatpush.msra.mxu0 %v4151_v0  ;;  %4448 = vmatpush.msra.mxu3 %v4087_v13  ;;  %v4102_v0 = vld [vmem:[%s11690_s20 + $0x1f0] sm:$0xff]  ;;  %v4044_v13 = vld [vmem:[%s11690_s20 + $0x20] sm:$0xff] }
 0x990   : > { %4474 = vmatpush.msra.mxu1 %v4157_v34  ;;  %4408 = vmatpush.msra.mxu2 %v4086_v44  ;;  %v4095_v34 = vld [vmem:[%s11690_s20 + $0x1b8] sm:$0xff] }
 0x991   : > { %6640 = vmatmul.msk.f32.vlgmr.msra.gmra.mxu1 %vm1949_vm12, %v10069_v58  ;;  %4480 = vmatpush.msra.mxu0 %v4144_v28 }
 0x992   : > { %4449 = vmatpush.msra.mxu3 %v4080_v5  ;;  %5030 = vrot.lane.b32.xlu0 %v5021_v43, %s11819_s5  ;;  %v4214_v43 = vld [vmem:[%s11690_s20 + $0x570] sm:$0xf]  ;;  %v4088_v5 = vld [vmem:[%s11690_s20 + $0x180] sm:$0xff] }
 0x993   : > { %4481 = vmatpush.msra.mxu0 %v4137_v3  ;;  %4409 = vmatpush.msra.mxu2 %v4079_v48  ;;  %v5107_v3 = vperm.slane %v9772_v40, 1  ;;  %v4207_v48 = vld [vmem:[%s11690_s20 + $0x538] sm:$0xff] }
 0x994   : > { %4450 = vmatpush.msra.mxu3 %v4073_v30  ;;  %v10238_v57 = vpop.permute.xlu1 %4949  ;;  %v10243_v63 = vpop.permute.xlu2 %4945  ;;  %5528 = vrot.lane.b32.xlu2 %v5518_v47, %s11798_s10  ;;  %v4081_v47 = vld [vmem:[%s11690_s20 + $0x148] sm:$0xff]  ;;  %v5603_v30 = vperm.slane %v10040_v35, 1 }
 0x995   : > { %4482 = vmatpush.msra.mxu0 %v4130_v54  ;;  %4410 = vmatpush.msra.mxu2 %v4072_v37  ;;  %v4200_v54 = vld [vmem:[%s11690_s20 + $0x500] sm:$0xff]  ;;  %v4074_v37 = vld [vmem:[%s11690_s20 + $0x110] sm:$0xff] }
 0x996   : > { %4451 = vmatpush.msra.mxu3 %v4066_v51  ;;  %v4193_v51 = vld [vmem:[%s11690_s20 + $0x4c8] sm:$0xff] }
 0x997   : > { %4483 = vmatpush.msra.mxu0 %v4123_v8  ;;  %4411 = vmatpush.msra.mxu2 %v4065_v39  ;;  %v4067_v8 = vld [vmem:[%s11690_s20 + $0xd8] sm:$0xff] }
 0x998   : > { %4452 = vmatpush.msra.mxu3 %v4059_v56 }
 0x999   : > { %4484 = vmatpush.msra.mxu0 %v4116_v59  ;;  %4412 = vmatpush.msra.mxu2 %v4058_v60  ;;  %v4186_v59 = vld [vmem:[%s11690_s20 + $0x490] sm:$0xff]  ;;  %v4060_v60 = vld [vmem:[%s11690_s20 + $0xa0] sm:$0xff] }
 0x99a   : > { %4453 = vmatpush.msra.mxu3 %v4052_v22  ;;  %5202 = vrot.lane.b32.xlu0 %v5194_v55, %s11816_s26  ;;  %v5193_v55 = vperm.slane %v9720_v36, 0  ;;  %v4179_v22 = vld [vmem:[%s11690_s20 + $0x458] sm:$0xff]  ;;  %v4046_v36 = vld [vmem:[%s11690_s20 + $0x30] sm:$0xff] }
 0x99b   : > { %4485 = vmatpush.msra.mxu0 %v4109_v4  ;;  %4413 = vmatpush.msra.mxu2 %v4051_v38  ;;  %v4053_v4 = vld [vmem:[%s11690_s20 + $0x68] sm:$0xff]  ;;  %v4172_v38 = vld [vmem:[%s11690_s20 + $0x420] sm:$0xff] }
 0x99c   : > { %4454 = vmatpush.msra.mxu3 %v4045_v26  ;;  %v10279_v44 = vpop.permute.xlu1 %5026  ;;  %v10281_v28 = vpop.permute.xlu2 %4951  ;;  %5534 = vrot.lane.b32.xlu2 %v5521_v11, %s11798_s10  ;;  %v4165_v11 = vld [vmem:[%s11690_s20 + $0x3e8] sm:$0xff] }
 0x99d   : > { %11825 = vst [vmem:[#allocation11_spill] sm:$0xff] %v10281_v28  ;;  %4455 = vmatmul.f32.vlgmr.msra.gmra.mxu3 %v10038_v20  ;;  %4486 = vmatpush.msra.mxu0 %v4102_v0 }
 0x99e   : > { %4414 = vmatpush.msra.mxu2 %v4044_v13  ;;  %v4158_v13 = vld [vmem:[%s11690_s20 + $0x3b0] sm:$0xff] }
 0x99f   : > { %4415 = vmatmul.f32.vlgmr.msra.gmra.mxu2 %v10038_v20  ;;  %4487 = vmatpush.msra.mxu0 %v4095_v34  ;;  %v5110_v34 = vperm.slane %v9772_v40, 4 }
 0x9a0   : > { %6641 = vmatpush.msk.msrb.mxu2 %vm2379_vm10, %v4214_v43 }
 0x9a1   : > { %4488 = vmatpush.msra.mxu0 %v4088_v5 }
 0x9a2   : > { %4507 = vmatpush.msrb.mxu2 %v4207_v48  ;;  %5115 = vrot.lane.b32.xlu0 %v5107_v3, %s11820_s21  ;;  %v5111_v3 = vperm.slane %v9772_v40, 5  ;;  %v5605_v48 = vperm.slane %v10040_v35, 3 }
 0x9a3   : > { %4489 = vmatpush.msra.mxu0 %v4081_v47 }
 0x9a4   : > { %4508 = vmatpush.msrb.mxu2 %v4200_v54  ;;  %v10314_v39 = vpop.permute.xlu1 %5032  ;;  %v10316_v56 = vpop.permute.xlu2 %5028  ;;  %5611 = vrot.lane.b32.xlu2 %v5603_v30, %s11817_s8  ;;  %v5608_v30 = vperm.slane %v10040_v35, 6 }
 0x9a5   : > { %4490 = vmatpush.msra.mxu0 %v4074_v37  ;;  %5615 = vrot.lane.b32.xlu1 %v5605_v48, %s11817_s8  ;;  %v5606_v37 = vperm.slane %v10040_v35, 4 }
 0x9a6   : > { %4509 = vmatpush.msrb.mxu2 %v4193_v51  ;;  %v10375_v51 = vpop.permute.xlu0 %4732 }
 0x9a7   : > { %4491 = vmatpush.msra.mxu0 %v4067_v8  ;;  %v5516_v8 = vperm.slane %v10015_v32, 1 }
 0x9a8   : > { %4510 = vmatpush.msrb.mxu2 %v4186_v59  ;;  %v6669_v59 = vld [vmem:[%s11823_s13 + $0x2] ss:$8 sm:$0x70] }
 0x9a9   : > { %4492 = vmatpush.msra.mxu0 %v4060_v60 }
 0x9aa   : > { %4511 = vmatpush.msrb.mxu2 %v4179_v22  ;;  %5200 = vrot.lane.b32.xlu0 %v5193_v55, %s11816_s26 }
 0x9ab   : > { %4493 = vmatpush.msra.mxu0 %v4053_v4 }
 0x9ac   : > { %4512 = vmatpush.msrb.mxu2 %v4172_v38  ;;  %v10342_v26 = vpop.permute.xlu1 %5204  ;;  %v10344_v0 = vpop.permute.xlu2 %5034  ;;  %5617 = vrot.lane.b32.xlu2 %v5606_v37, %s11817_s8  ;;  %v5519_v38 = vperm.slane %v10015_v32, 4 }
 0x9ad   : > { %4494 = vmatpush.msra.mxu0 %v4046_v36  ;;  %5621 = vrot.lane.b32.xlu1 %v5608_v30, %s11817_s8  ;;  %v6680_v36 = vld [vmem:[%s11823_s13 + $0x38] ss:$8 sm:$0xf]  ;;  %v6679_v30 = vld [vmem:[%s11823_s13 + $0x7] ss:$8 sm:$0x70] }
 0x9ae   : > { %4513 = vmatpush.msrb.mxu2 %v4165_v11  ;;  %4495 = vmatmul.f32.vlgmr.msra.gmra.mxu0 %v10038_v20  ;;  %v6681_v11 = vld [vmem:[%s11823_s13 + $0x38] ss:$8 sm:$0x70] }
 0x9b0   : > { %4514 = vmatpush.msrb.mxu2 %v4158_v13  ;;  %v10401_v13 = vpop.permute.xlu0 %4738 }
 0x9b1   : > { %6642 = vmatmul.msk.f32.vlgmr.msrb.gmra.mxu2 %vm1949_vm12, %v10069_v58  ;;  %v5025_v58 = vperm.slane %v9652_v12, 6  ;;  %v6668_v12 = vld [vmem:[%s11823_s13 + $0x2] ss:$8 sm:$0xf]  ;;  %vm11850_vm12 = vmmov %vm11843_vm5 }
 0x9b2   : > { %5121 = vrot.lane.b32.xlu0 %v5110_v34, %s11820_s21  ;;  %v10385_v60 = vor.u32 %v6669_v59, %v6668_v12  ;;  %v10403_v34 = vor.u32 %v6681_v11, %v6680_v36  ;;  %v10423_v59 = vld [vmem:[#allocation2] sm:$0xf]  ;;  %v6676_v11 = vld [vmem:[%s11823_s13 + $0x6] ss:$8 sm:$0xf] }
 0x9b3   : > { %11832 = vst [vmem:[#allocation18_spill] sm:$0xff] %v10423_v59 }
 0x9b4   : > { %v10354_v43 = vpop.permute.xlu1 %5117  ;;  %v10356_v5 = vpop.permute.xlu2 %5206  ;;  %11827 = vst [vmem:[#allocation13_spill] sm:$0xff] %v10385_v60  ;;  %v5690_v55 = vperm.slane %v10385_v60, 1  ;;  %v6166_v53 = vperm.slane %v10403_v34, 3 }
 0x9b6   : > { %5698 = vrot.lane.b32.xlu1 %v5690_v55, %s11818_s6 }
 0x9ba   : > { %5123 = vrot.lane.b32.xlu0 %v5111_v3, %s11820_s21  ;;  %v6165_v3 = vperm.slane %v10403_v34, 2 }
 0x9bc   : > { %v10362_v20 = vpop.permute.xlu1 %5208  ;;  %v10364_v47 = vpop.permute.xlu2 %5119 }
 0x9be   : > { %6174 = vrot.lane.b32.xlu1 %v6165_v3, %s11816_s26  ;;  %v6677_v3 = vld [vmem:[%s11823_s13 + $0x6] ss:$8 sm:$0x70] }
 0x9c2   : > { %5038 = vrot.lane.b32.xlu0 %v5025_v58, %s11819_s5  ;;  %v6678_v58 = vld [vmem:[%s11823_s13 + $0x7] ss:$8 sm:$0xf] }
 0x9c3   : > { %v10418_v37 = vor.u32 %v6679_v30, %v6678_v58  ;;  %v10438_v58 = vor.u32 %v6677_v3, %v6676_v11  ;;  %v5607_v11 = vperm.slane %v10040_v35, 5 }
 0x9c4   : > { %v10370_v54 = vpop.permute.xlu1 %5210  ;;  %v10372_v40 = vpop.permute.xlu2 %5113 }
 0x9c5   : > { %11826 = vst [vmem:[#allocation12_spill] sm:$0xff] %v10370_v54  ;;  %v6078_v12 = vperm.slane %v10418_v37, 2 }
 0x9c6   : > { %11835 = vst [vmem:[#allocation21_spill] sm:$0xff] %v10438_v58 }
 0x9c7   : > { %6087 = vrot.lane.b32.xlu1 %v6078_v12, %s11820_s21  ;;  %v5991_v12 = vperm.slane %v10438_v58, 2 }
 0x9ca   : > { %5524 = vrot.lane.b32.xlu0 %v5516_v8, %s11798_s10  ;;  %v10420_v8 = vpop.permute.xlu0 %4815 }
 0x9cc   : > { %v10390_v22 = vpop.permute.xlu1 %5125  ;;  %v10392_v4 = vpop.permute.xlu2 %5212 }
 0x9cd   : > { %11828 = vst [vmem:[#allocation14_spill] sm:$0xff] %v10390_v22 }
 0x9ce   : > { %11829 = vst [vmem:[#allocation15_spill] sm:$0xff] %v10392_v4 }
 0x9cf   : > { %6000 = vrot.lane.b32.xlu1 %v5991_v12, %s11819_s5  ;;  %v5691_v12 = vperm.slane %v10385_v60, 2 }
 0x9d2   : > { %5530 = vrot.lane.b32.xlu0 %v5519_v38, %s11798_s10  ;;  %v10441_v30 = vpop.permute.xlu0 %4821 }
 0x9d4   : > { %v10408_v48 = vpop.permute.xlu1 %5342  ;;  %v10410_v32 = vpop.permute.xlu2 %5036 }
 0x9d5   : > { %11830 = vst [vmem:[#allocation16_spill] sm:$0xff] %v10408_v48 }
 0x9d6   : > { %11831 = vst [vmem:[#allocation17_spill] sm:$0xff] %v10410_v32 }
 0x9dc   : > { %v10426_v55 = vpop.permute.xlu1 %5526 }
 0x9dd   : > { %11833 = vst [vmem:[#allocation19_spill] sm:$0xff] %v10426_v55  ;;  %v10428_v38 = vpop.permute.xlu2 %5522  ;;  %v5604_v55 = vperm.slane %v10040_v35, 2  ;;  %v5689_v35 = vperm.slane %v10385_v60, 0 }
 0x9de   : > { %11834 = vst [vmem:[#allocation20_spill] sm:$0xff] %v10428_v38  ;;  %v5549_v36 = vmul.f32 %v10428_v38, %v10423_v59 }
 0x9e0   : > { %5563 = vrot.lane.b32.xlu0 %v5549_v36, %s11816_s26 }
 0x9e4   : > { %v10445_v15 = vpop.permute.xlu1 %5532 }
 0x9e5   : > { %11836 = vst [vmem:[#allocation22_spill] sm:$0xff] %v10445_v15  ;;  %v6650_v15 = vld [vmem:[%s11693_s23 + $0x4] ss:$8 sm:$0x70] }
 0x9e8   : > { %5613 = vrot.lane.b32.xlu0 %v5604_v55, %s11817_s8  ;;  %v6649_v55 = vld [vmem:[%s11693_s23 + $0x4] ss:$8 sm:$0xf] }
 0x9e9   : > { %v10449_v38 = vpop.permute.xlu0 %4857  ;;  %v10468_v28 = vor.u32 %v6650_v15, %v6649_v55  ;;  %v4566_v15 = vsel %vm979_vm2, %v9437_v25, %v9488_v45  ;;  %v6164_v55 = vperm.slane %v10403_v34, 1 }
 0x9eb   : > { %v4900_v25 = vperm.slane %v10468_v28, 1 }
 0x9ec   : > { %v10451_v48 = vpop.permute.xlu1 %5609 }
 0x9ed   : > { %11837 = vst [vmem:[#allocation23_spill] sm:$0xff] %v10451_v48  ;;  %v5636_v36 = vmul.f32 %v10451_v48, %v10423_v59  ;;  %v4899_v59 = vperm.slane %v10468_v28, 0 }
 0x9ef   : > { %5650 = vrot.lane.b32.xlu2 %v5636_v36, %s11820_s21 }
 0x9f0   : > { %5619 = vrot.lane.b32.xlu0 %v5607_v11, %s11817_s8 }
 0x9f1   : > { %v10458_v3 = vpop.permute.xlu0 %4941 }
 0x9f7   : > { %5700 = vrot.lane.b32.xlu2 %v5691_v12, %s11818_s6  ;;  %v4256_v36 = vpop.f32.mrf.mxu2  ;;  %v4296_v12 = vpop.f32.mrf.mxu1 }
 0x9f8   : > { %v4276_v11 = vpop.f32.mrf.mxu0  ;;  %5696 = vrot.lane.b32.xlu0 %v5689_v35, %s11818_s6 }
 0x9f9   : > { %v4277_v48 = vadd.f32 %v4276_v11, %v4256_v36 }
 0x9fb   : > { %v10473_v22 = vpop.permute.xlu0 %4947  ;;  %v10476_v32 = vmax.f32 %v4277_v48, 0.0 }
 0x9fd   : > { %4526 = vst [vmem:[#allocation2 + $0x8] sm:$0xff] %v10476_v32  ;;  %v4580_v35 = vmul.f32 %v4566_v15, %v10476_v32  ;;  %v10485_v11 = vmul.f32 %v4899_v59, %v10476_v32  ;;  %v6079_v15 = vperm.slane %v10418_v37, 3  ;;  %v4827_v59 = vsel %vm1044_vm1, %v10051_v50, %v10420_v8 }
 0x9fe   : > { %v4316_v36 = vpop.f32.mrf.mxu3 }
 0x9ff   : > { %11838 = vst [vmem:[#allocation24_spill] sm:$0xff] %v10485_v11  ;;  %v4317_v60 = vadd.f32 %v4316_v36, %v4296_v12  ;;  %6176 = vrot.lane.b32.xlu2 %v6166_v53, %s11816_s26  ;;  %4595 = vrot.lane.b32.xlu1 %v4580_v35, %s11816_s26  ;;  %v4376_v4 = vpop.f32.mrf.mxu1 }
 0xa00   : > { %6172 = vrot.lane.b32.xlu0 %v6164_v55, %s11816_s26  ;;  %4920 = vst [vmem:[#allocation3 + $0xe0] sm:$0xff] %v10485_v11  ;;  %v4336_v54 = vpop.f32.mrf.mxu0  ;;  %v6077_v55 = vperm.slane %v10418_v37, 1  ;;  %v4901_v11 = vperm.slane %v10468_v28, 2 }
 0xa01   : > { %v10492_v48 = vmax.f32 %v4317_v60, 0.0  ;;  %v4842_v60 = vmul.f32 %v4827_v59, %v10476_v32  ;;  %v4902_v59 = vperm.slane %v10468_v28, 3 }
 0xa03   : > { %4527 = vst [vmem:[#allocation2 + $0x10] sm:$0xff] %v10492_v48  ;;  %v10503_v35 = vmul.f32 %v4900_v25, %v10492_v48 }
 0xa04   : > { %v10499_v53 = vpop.permute.xlu0 %5030  ;;  %v4356_v12 = vpop.f32.mrf.mxu2 }
 0xa05   : > { %11839 = vst [vmem:[#allocation25_spill] sm:$0xff] %v10503_v35  ;;  %v4357_v36 = vadd.f32 %v4356_v12, %v4336_v54  ;;  %v5992_v12 = vperm.slane %v10438_v58, 3 }
 0xa06   : > { %4921 = vst [vmem:[#allocation3 + $0xe8] sm:$0xff] %v10503_v35  ;;  %v10553_v35 = vpop.permute.xlu2 %5528 }
 0xa07   : > { %v4396_v9 = vpop.f32.mrf.mxu3  ;;  %6089 = vrot.lane.b32.xlu2 %v6079_v15, %s11820_s21  ;;  %v10509_v50 = vmax.f32 %v4357_v36, 0.0  ;;  %4859 = vrot.lane.b32.xlu1 %v4842_v60, %s11800_s29  ;;  %v5990_v36 = vperm.slane %v10438_v58, 1  ;;  %v4567_v60 = vsel %vm979_vm2, %v9488_v45, %v9591_v1  ;;  %11844 = vst [vmem:[#allocation28_spill] sm:$0xff] %v10553_v35 }
 0xa08   : > { %v4397_v49 = vadd.f32 %v4396_v9, %v4376_v4  ;;  %6085 = vrot.lane.b32.xlu0 %v6077_v55, %s11820_s21 }
 0xa09   : > { %4528 = vst [vmem:[#allocation2 + $0x18] sm:$0xff] %v10509_v50  ;;  %v10517_v25 = vmul.f32 %v4901_v11, %v10509_v50  ;;  %v6163_v11 = vperm.slane %v10403_v34, 0 }
 0xa0a   : > { %v10514_v54 = vmax.f32 %v4397_v49, 0.0  ;;  %v4740_v49 = vsel %vm11842_vm3, %v9600_v18, %v10012_v29 }
 0xa0b   : > { %11840 = vst [vmem:[#allocation26_spill] sm:$0xff] %v10517_v25  ;;  %v4754_v55 = vmul.f32 %v4740_v49, %v10476_v32 }
 0xa0c   : > { %4529 = vst [vmem:[#allocation2 + $0x20] sm:$0xff] %v10514_v54  ;;  %v10522_v15 = vpop.permute.xlu0 %5202  ;;  %v10527_v9 = vmul.f32 %v4902_v59, %v10514_v54 }
 0xa0d   : > { %4922 = vst [vmem:[#allocation3 + $0xf0] sm:$0xff] %v10517_v25 }
 0xa0e   : > { %11841 = vst [vmem:[#allocation27_spill] sm:$0xff] %v10527_v9  ;;  %v4476_v49 = vpop.f32.mrf.mxu1 }
 0xa0f   : > { %6002 = vrot.lane.b32.xlu2 %v5992_v12, %s11819_s5  ;;  %4923 = vst [vmem:[#allocation3 + $0xf8] sm:$0xff] %v10527_v9  ;;  %v4653_v12 = vsel %vm11843_vm5, %v9602_v62, %v9883_v2  ;;  %vm11854_vm5 = vmmov %vm11846_vm8 }
 0xa10   : > { %5998 = vrot.lane.b32.xlu0 %v5990_v36, %s11819_s5  ;;  %v4581_v36 = vmul.f32 %v4567_v60, %v10492_v48  ;;  %v4667_v9 = vmul.f32 %v4653_v12, %v10476_v32  ;;  %v4828_v60 = vsel %vm1044_vm1, %v10420_v8, %v10097_v14 }
 0xa14   : > { %v10535_v4 = vpop.permute.xlu0 %5115 }
 0xa17   : > { %4769 = vrot.lane.b32.xlu2 %v4754_v55, %s11819_s5  ;;  %v4436_v55 = vpop.f32.mrf.mxu0 }
 0xa18   : > { %6170 = vrot.lane.b32.xlu0 %v6163_v11, %s11816_s26 }
 0xa1c   : > { %v5201_v59 = vpop.permute.xlu0 %5200 }
 0xa1d   : > { %v5227_v18 = vmul.f32 %v5201_v59, %v10476_v32 }
 0xa1f   : > { %5241 = vrot.lane.b32.xlu1 %v5227_v18, %s11798_s10  ;;  %4597 = vrot.lane.b32.xlu2 %v4581_v36, %s11816_s26  ;;  %v5140_v18 = vmul.f32 %v10372_v40, %v10476_v32  ;;  %v4843_v36 = vmul.f32 %v4828_v60, %v10492_v48  ;;  %v4741_v60 = vsel %vm11847_vm9, %v10012_v29, %v10017_v21  ;;  %vm11856_vm9 = vmmov %vm11851_vm13 }
 0xa20   : > { %v4456_v11 = vpop.f32.mrf.mxu3  ;;  %4682 = vrot.lane.b32.xlu0 %v4667_v9, %s11820_s21 }
 0xa21   : > { %v4477_v45 = vadd.f32 %v4476_v49, %v4456_v11  ;;  %v4903_v49 = vperm.slane %v10468_v28, 4  ;;  %v4904_v11 = vperm.slane %v10468_v28, 5 }
 0xa22   : > { %v4416_v25 = vpop.f32.mrf.mxu2 }
 0xa23   : > { %v10555_v62 = vmax.f32 %v4477_v45, 0.0  ;;  %v4437_v58 = vadd.f32 %v4436_v55, %v4416_v25  ;;  %v4966_v25 = vmul.f32 %v10196_v33, %v10476_v32  ;;  %v5214_v45 = vsel %vm11846_vm8, %v5201_v59, %v10522_v15  ;;  %vm11855_vm8 = vmmov %vm11850_vm12 }
 0xa24   : > { %v10560_v12 = vpop.permute.xlu0 %5121  ;;  %v5127_v59 = vsel %vm11849_vm11, %v10372_v40, %v10535_v4  ;;  %vm11857_vm11 = vmmov %vm11842_vm3 }
 0xa25   : > { %4531 = vst [vmem:[#allocation2 + $0x30] sm:$0xff] %v10555_v62  ;;  %v10565_v9 = vmax.f32 %v4437_v58, 0.0  ;;  %v10580_v58 = vmul.f32 %v4904_v11, %v10555_v62  ;;  %v4755_v11 = vmul.f32 %v4741_v60, %v10492_v48  ;;  %v5141_v60 = vmul.f32 %v5127_v59, %v10492_v48 }
 0xa26   : > { %v4829_v59 = vsel %vm1044_vm1, %v10097_v14, %v10099_v16 }
 0xa27   : > { %4530 = vst [vmem:[#allocation2 + $0x28] sm:$0xff] %v10565_v9  ;;  %5154 = vrot.lane.b32.xlu1 %v5140_v18, %s11817_s8  ;;  %4861 = vrot.lane.b32.xlu2 %v4843_v36, %s11800_s29  ;;  %v10577_v8 = vmul.f32 %v4903_v49, %v10565_v9  ;;  %v10591_v18 = vpop.permute.xlu2 %5534  ;;  %v5228_v36 = vmul.f32 %v5214_v45, %v10492_v48 }
 0xa28   : > { %4980 = vrot.lane.b32.xlu0 %v4966_v25, %s11801_s2  ;;  %11845 = vst [vmem:[#allocation29_spill] sm:$0xff] %v10580_v58  ;;  %v5053_v49 = vmul.f32 %v10279_v44, %v10476_v32  ;;  %v4654_v25 = vsel %vm11850_vm12, %v9883_v2, %v9589_v7  ;;  %v4568_v32 = vsel %vm979_vm2, %v9591_v1, %v9528_v42  ;;  %vm11858_vm12 = vmmov %vm11856_vm9 }
 0xa29   : > { %4924 = vst [vmem:[#allocation3 + $0x100] sm:$0xff] %v10577_v8  ;;  %v4582_v40 = vmul.f32 %v4568_v32, %v10509_v50  ;;  %v5040_v1 = vsel %vm11851_vm13, %v10279_v44, %v10316_v56  ;;  %v4953_v2 = vsel %vm1052_vm6, %v10196_v33, %v10458_v3  ;;  %vm11859_vm13 = vmmov %vm11854_vm5 }
 0xa2a   : > { %4925 = vst [vmem:[#allocation3 + $0x108] sm:$0xff] %v10580_v58 }
 0xa2b   : > { %11848 = vst [vmem:[#allocation30_spill] sm:$0xff] %v10591_v18  ;;  %v4496_v29 = vpop.f32.mrf.mxu0 }
 0xa2c   : > { %v10585_v55 = vpop.permute.xlu0 %5123 }
 0xa2f   : > { %5067 = vrot.lane.b32.xlu1 %v5053_v49, %s11818_s6  ;;  %5243 = vrot.lane.b32.xlu2 %v5228_v36, %s11798_s10  ;;  %v4668_v36 = vmul.f32 %v4654_v25, %v10492_v48  ;;  %v10616_v35 = vpop.permute.xlu2 %5611  ;;  %v4967_v25 = vmul.f32 %v4953_v2, %v10492_v48 }
 0xa30   : > { %4771 = vrot.lane.b32.xlu0 %v4755_v11, %s11819_s5  ;;  %v10611_v11 = vpop.permute.xlu1 %5615 }
 0xa34   : > { %v4516_v45 = vpop.f32.mrf.mxu2  ;;  %v10613_v18 = vpop.permute.xlu0 %5038 }
 0xa35   : > { %v4517_v49 = vadd.f32 %v4516_v45, %v4496_v29  ;;  %v4905_v29 = vperm.slane %v10468_v28, 6  ;;  %v5054_v45 = vmul.f32 %v5040_v1, %v10492_v48  ;;  %v5128_v28 = vsel %vm11852_vm14, %v10535_v4, %v10354_v43 }
 0xa36   : > { %v4655_v48 = vsel %vm11853_vm15, %v9589_v7, %v9898_v27  ;;  %v5142_v1 = vmul.f32 %v5128_v28, %v10509_v50  ;;  %v5215_v7 = vsel %vm11854_vm5, %v10522_v15, %v10342_v26  ;;  %v4569_v28 = vsel %vm979_vm2, %v9528_v42, %v9551_v23  ;;  %vm11860_vm15 = vmmov %vm11842_vm3 }
 0xa37   : > { %v4525_v58 = vmax.f32 %v4517_v49, 0.0  ;;  %4684 = vrot.lane.b32.xlu1 %v4668_v36, %s11820_s21  ;;  %5156 = vrot.lane.b32.xlu2 %v5141_v60, %s11817_s8  ;;  %v10637_v44 = vpop.permute.xlu2 %5617  ;;  %v4742_v49 = vsel %vm11842_vm3, %v10017_v21, %v10375_v51  ;;  %v4743_v42 = vsel %vm11857_vm11, %v10375_v51, %v10023_v41  ;;  %vm11861_vm3 = vmmov %vm11855_vm8 }
 0xa38   : > { %4599 = vrot.lane.b32.xlu0 %v4582_v40, %s11816_s26  ;;  %v10639_v32 = vpop.permute.xlu1 %5621  ;;  %v4756_v36 = vmul.f32 %v4742_v49, %v10509_v50  ;;  %v4669_v40 = vmul.f32 %v4655_v48, %v10509_v50  ;;  %v4955_v48 = vsel %vm1052_vm6, %v10191_v10, %v10243_v63  ;;  %v4583_v49 = vmul.f32 %v4569_v28, %v10514_v54  ;;  %vm11864_vm11 = vmmov %vm11852_vm14 }
 0xa39   : > { %4532 = vst.msk [vmem:[#allocation2 + $0x38] sm:$0xff] %vm824_vm4, %v4525_v58  ;;  %v4844_v58 = vmul.f32 %v4829_v59, %v10509_v50  ;;  %v4954_v59 = vsel %vm1052_vm6, %v10458_v3, %v10191_v10  ;;  %v5041_v3 = vsel %vm11856_vm9, %v10316_v56, %v10499_v53  ;;  %v4830_v10 = vsel %vm1044_vm1, %v10099_v16, %v10441_v30 }
 0xa3c   : > { %v10643_v60 = vpop.permute.xlu0 %5524 }
 0xa3f   : > { %4982 = vrot.lane.b32.xlu1 %v4967_v25, %s11801_s2  ;;  %5069 = vrot.lane.b32.xlu2 %v5054_v45, %s11818_s6  ;;  %v5229_v25 = vmul.f32 %v5215_v7, %v10509_v50  ;;  %v4968_v45 = vmul.f32 %v4954_v59, %v10509_v50  ;;  %v4845_v7 = vmul.f32 %v4830_v10, %v10514_v54 }
 0xa40   : > { %v10641_v33 = vld [vmem:[#allocation2 + $0x38] sm:$0xff]  ;;  %4863 = vrot.lane.b32.xlu0 %v4844_v58, %s11800_s29  ;;  %v10665_v2 = vpop.permute.xlu1 %5698  ;;  %v4757_v59 = vmul.f32 %v4743_v42, %v10514_v54 }
 0xa41   : > { %v4919_v14 = vmul.f32 %v4905_v29, %v10641_v33  ;;  %v4656_v29 = vsel %vm11855_vm8, %v9898_v27, %v9935_v31  ;;  %vm11862_vm8 = vmmov %vm11856_vm9 }
 0xa42   : > { %v4670_v58 = vmul.f32 %v4656_v29, %v10514_v54  ;;  %vm11863_vm9 = vmmov %vm11854_vm5 }
 0xa43   : > { %4926 = vst.msk [vmem:[#allocation3 + $0x110] sm:$0xff] %vm824_vm4, %v4919_v14 }
 0xa44   : > { %v10670_v21 = vpop.permute.xlu0 %5530 }
 0xa47   : > { %4773 = vrot.lane.b32.xlu1 %v4756_v36, %s11819_s5  ;;  %4686 = vrot.lane.b32.xlu2 %v4669_v40, %s11820_s21  ;;  %v5055_v36 = vmul.f32 %v5041_v3, %v10509_v50  ;;  %v4969_v40 = vmul.f32 %v4955_v48, %v10514_v54  ;;  %v5042_v50 = vsel %vm11858_vm12, %v10499_v53, %v10314_v39  ;;  %vm11865_vm12 = vmmov %vm11854_vm5 }
 0xa48   : > { %5158 = vrot.lane.b32.xlu0 %v5142_v1, %s11817_s8  ;;  %v10691_v27 = vpop.permute.xlu1 %6174  ;;  %v5216_v53 = vsel %vm11859_vm13, %v10342_v26, %v10356_v5  ;;  %vm11866_vm13 = vmmov %vm11861_vm3 }
 0xa49   : > { %v10663_v4 = vpop.permute.xlu2 %5650  ;;  %v5230_v28 = vmul.f32 %v5216_v53, %v10514_v54  ;;  %v4956_v53 = vsel %vm1052_vm6, %v10243_v63, %v10473_v22 }
 0xa4f   : > { %5245 = vrot.lane.b32.xlu1 %v5229_v25, %s11798_s10  ;;  %4984 = vrot.lane.b32.xlu2 %v4968_v45, %s11801_s2  ;;  %v5056_v25 = vmul.f32 %v5042_v50, %v10514_v54  ;;  %v5129_v45 = vsel %vm11852_vm14, %v10354_v43, %v10364_v47  ;;  %vm11867_vm14 = vmmov %vm11860_vm15 }
 0xa50   : > { %4688 = vrot.lane.b32.xlu0 %v4670_v58, %s11820_s21  ;;  %v10720_v29 = vpop.permute.xlu1 %6087  ;;  %v4744_v58 = vsel %vm11860_vm15, %v10023_v41, %v10025_v46  ;;  %v5143_v3 = vmul.f32 %v5129_v45, %v10514_v54  ;;  %v4570_v41 = vsel %vm979_vm2, %v9551_v23, %v9598_v17  ;;  %v4657_v54 = vsel %vm11861_vm3, %v9935_v31, %v9596_v6  ;;  %vm11868_vm15 = vmmov %vm11862_vm8 }
 0xa51   : > { %v10684_v15 = vpop.permute.xlu2 %5700  ;;  %v4758_v48 = vmul.f32 %v4744_v58, %v10565_v9  ;;  %v4584_v42 = vmul.f32 %v4570_v41, %v10565_v9  ;;  %v5043_v41 = vsel %vm11868_vm15, %v10314_v39, %v10344_v0  ;;  %v4957_v39 = vsel %vm1052_vm6, %v10473_v22, %v10238_v57  ;;  %vm11871_vm3 = vmmov %vm11864_vm11 }
 0xa52   : > { %v10689_v14 = vpop.permute.xlu0 %5563  ;;  %v5131_v22 = vsel %vm11871_vm3, %v10560_v12, %v10585_v55  ;;  %vm11881_vm15 = vcmask 826368  }
 0xa57   : > { %4601 = vrot.lane.b32.xlu1 %v4583_v49, %s11816_s26  ;;  %5071 = vrot.lane.b32.xlu2 %v5055_v36, %s11818_s6  ;;  %v5217_v36 = vsel %vm11854_vm5, %v10356_v5, %v10362_v20 }
 0xa58   : > { %4986 = vrot.lane.b32.xlu0 %v4969_v40, %s11801_s2  ;;  %v10744_v49 = vpop.permute.xlu1 %6000  ;;  %v4671_v40 = vmul.f32 %v4657_v54, %v10565_v9  ;;  %v5231_v10 = vmul.f32 %v5217_v36, %v10565_v9  ;;  %v5057_v36 = vmul.f32 %v5043_v41, %v10565_v9  ;;  %v11874_v41 = vld [vmem:[#allocation17_spill] sm:$0xff] }
 0xa59   : > { %v10705_v56 = vpop.permute.xlu2 %6176 }
 0xa5a   : > { %v10707_v1 = vpop.permute.xlu0 %5613 }
 0xa5f   : > { %4865 = vrot.lane.b32.xlu1 %v4845_v7, %s11800_s29  ;;  %4775 = vrot.lane.b32.xlu2 %v4757_v59, %s11819_s5  ;;  %v5130_v59 = vsel %vm11864_vm11, %v10364_v47, %v10560_v12  ;;  %vm11878_vm11 = vmmov %vm11871_vm3 }
 0xa60   : > { %5073 = vrot.lane.b32.xlu0 %v5056_v25, %s11818_s6  ;;  %v4831_v25 = vsel %vm1044_vm1, %v10441_v30, %v10140_v19  ;;  %v5144_v45 = vmul.f32 %v5130_v59, %v10565_v9 }
 0xa61   : > { %v10726_v51 = vpop.permute.xlu2 %6089 }
 0xa62   : > { %v10728_v16 = vpop.permute.xlu0 %5619 }
 0xa67   : > { %5160 = vrot.lane.b32.xlu1 %v5143_v3, %s11817_s8  ;;  %5247 = vrot.lane.b32.xlu2 %v5230_v28, %s11798_s10  ;;  %v4658_v28 = vsel %vm11866_vm13, %v9596_v6, %v9954_v61 }
 0xa68   : > { %4777 = vrot.lane.b32.xlu0 %v4758_v48, %s11819_s5  ;;  %v4745_v48 = vsel %vm11867_vm14, %v10025_v46, %v10401_v13  ;;  %v11869_v13 = vld [vmem:[#allocation8_spill] sm:$0xff]  ;;  %vm11880_vm14 = vmmov %vm11862_vm8 }
 0xa69   : > { %v10747_v26 = vpop.permute.xlu2 %6002  ;;  %v4759_v54 = vmul.f32 %v4745_v48, %v10555_v62 }
 0xa6a   : > { %v10749_v43 = vpop.permute.xlu0 %5696 }
 0xa6f   : > { %4690 = vrot.lane.b32.xlu1 %v4671_v40, %s11820_s21  ;;  %4603 = vrot.lane.b32.xlu2 %v4584_v42, %s11816_s26  ;;  %v11870_v40 = vld [vmem:[#allocation10_spill] sm:$0xff] }
 0xa70   : > { %5249 = vrot.lane.b32.xlu0 %v5231_v10, %s11798_s10  ;;  %v4848_v42 = vmul.f32 %v11870_v40, %v10641_v33  ;;  %v4971_v10 = vmul.f32 %v4957_v39, %v10555_v62 }
 0xa71   : > { %v10766_v23 = vpop.permute.xlu2 %4769  ;;  %v4596_v50 = vpop.permute.xlu1 %4595 }
 0xa72   : > { %v10768_v31 = vpop.permute.xlu0 %6172  ;;  %v10773_v5 = vsel %vm11862_vm8, %v10049_v24, %v10766_v23  ;;  %v10777_v7 = vsel %vm11863_vm9, %v9578_v52, %v4596_v50  ;;  %v4970_v24 = vmul.f32 %v4956_v53, %v10565_v9  ;;  %v4846_v52 = vmul.f32 %v4831_v25, %v10565_v9  ;;  %v11872_v25 = vld [vmem:[#allocation15_spill] sm:$0xff]  ;;  %v11873_v53 = vld [vmem:[#allocation12_spill] sm:$0xff]  ;;  %vm11876_vm9 = vmmov %vm11871_vm3 }
 0xa73   : > { %4794 = vst [vmem:[#allocation3 + $0x70] sm:$0xff] %v10773_v5  ;;  %v4571_v9 = vsel %vm979_vm2, %v9598_v17, %v11869_v13  ;;  %v6674_v13 = vld [vmem:[%s11823_s13 + $0x5] ss:$8 sm:$0xf]  ;;  %vm11882_vm3 = vmmov %vm11862_vm8 }
 0xa74   : > { %4620 = vst [vmem:[#allocation3] sm:$0xff] %v10777_v7 }
 0xa77   : > { %4988 = vrot.lane.b32.xlu1 %v4970_v24, %s11801_s2  ;;  %4867 = vrot.lane.b32.xlu2 %v4846_v52, %s11800_s29  ;;  %v5219_v24 = vsel %vm11854_vm5, %v11873_v53, %v11872_v25  ;;  %v4832_v52 = vsel %vm1044_vm1, %v10140_v19, %v11870_v40 }
 0xa78   : > { %5162 = vrot.lane.b32.xlu0 %v5144_v45, %s11817_s8  ;;  %v5145_v45 = vmul.f32 %v5131_v22, %v10555_v62 }
 0xa79   : > { %v10796_v47 = vpop.permute.xlu2 %4597  ;;  %v4860_v30 = vpop.permute.xlu1 %4859 }
 0xa7a   : > { %v10798_v58 = vpop.permute.xlu0 %6085  ;;  %v10802_v63 = vsel %vm11865_vm12, %v4596_v50, %v10796_v47  ;;  %v10806_v3 = vsel %vm1052_vm6, %v10449_v38, %v4860_v30  ;;  %v4672_v38 = vmul.f32 %v4658_v28, %v10555_v62  ;;  %v4585_v50 = vmul.f32 %v4571_v9, %v10555_v62  ;;  %v11877_v9 = vld [vmem:[#allocation14_spill] sm:$0xff]  ;;  %vm11879_vm12 = vmmov %vm11854_vm5 }
 0xa7b   : > { %4621 = vst [vmem:[#allocation3 + $0x8] sm:$0xff] %v10802_v63  ;;  %v4847_v28 = vmul.f32 %v4832_v52, %v10555_v62  ;;  %v5132_v40 = vsel %vm11878_vm11, %v10585_v55, %v11877_v9  ;;  %vm11884_vm5 = vmmov %vm11876_vm9 }
 0xa7c   : > { %4887 = vst [vmem:[#allocation3 + $0xa8] sm:$0xff] %v10806_v3  ;;  %vm11887_vm11 = vmmov %vm11881_vm15 }
 0xa7f   : > { %4779 = vrot.lane.b32.xlu1 %v4759_v54, %s11819_s5  ;;  %4692 = vrot.lane.b32.xlu2 %v4672_v38, %s11820_s21  ;;  %v5045_v54 = vsel %vm11862_vm8, %v11874_v41, %v10613_v18  ;;  %v6675_v18 = vld [vmem:[%s11823_s13 + $0x5] ss:$8 sm:$0x70]  ;;  %vm11885_vm8 = vmmov %vm11884_vm5 }
 0xa80   : > { %5075 = vrot.lane.b32.xlu0 %v5057_v36, %s11818_s6  ;;  %v11875_v36 = vld [vmem:[#allocation9_spill] sm:$0xff]  ;;  %v10895_v55 = vor.u32 %v6675_v18, %v6674_v13 }
 0xa81   : > { %v10825_v6 = vpop.permute.xlu2 %4861 }
 0xa82   : > { %v10827_v61 = vpop.permute.xlu0 %5998  ;;  %v10831_v46 = vsel %vm1052_vm6, %v4860_v30, %v10825_v6  ;;  %v5233_v30 = vmul.f32 %v5219_v24, %v10641_v33 }
 0xa83   : > { %4888 = vst [vmem:[#allocation3 + $0xb0] sm:$0xff] %v10831_v46 }
 0xa87   : > { %4871 = vrot.lane.b32.xlu1 %v4848_v42, %s11800_s29  ;;  %4990 = vrot.lane.b32.xlu2 %v4971_v10, %s11801_s2  ;;  %v5218_v42 = vsel %vm11879_vm12, %v10362_v20, %v11873_v53  ;;  %v5059_v10 = vmul.f32 %v5045_v54, %v10641_v33  ;;  %v5903_v53 = vperm.slane %v10895_v55, 1 }
 0xa88   : > { %4605 = vrot.lane.b32.xlu0 %v4585_v50, %s11816_s26  ;;  %v5146_v50 = vmul.f32 %v5132_v40, %v10641_v33  ;;  %v5232_v22 = vmul.f32 %v5218_v42, %v10555_v62 }
 0xa89   : > { %v10847_v59 = vpop.permute.xlu2 %5243 }
 0xa8a   : > { %v10852_v17 = vpop.permute.xlu0 %6170 }
 0xa8f   : > { %5253 = vrot.lane.b32.xlu1 %v5233_v30, %s11798_s10  ;;  %5164 = vrot.lane.b32.xlu2 %v5145_v45, %s11817_s8  ;;  %v5904_v45 = vperm.slane %v10895_v55, 2  ;;  %v5044_v30 = vsel %vm11880_vm14, %v10344_v0, %v11874_v41  ;;  %v6076_v0 = vperm.slane %v10418_v37, 0  ;;  %v11883_v41 = vld [vmem:[#allocation11_spill] sm:$0xff]  ;;  %vm11892_vm14 = vcmask 818176  }
 0xa90   : > { %4869 = vrot.lane.b32.xlu0 %v4847_v28, %s11800_s29  ;;  %v5058_v28 = vmul.f32 %v5044_v30, %v10555_v62  ;;  %v6167_v62 = vperm.slane %v10403_v34, 4  ;;  %v4958_v9 = vsel %vm1052_vm6, %v10238_v57, %v11883_v41  ;;  %v11888_v41 = vld [vmem:[#allocation21_spill] sm:$0xff] }
 0xa91   : > { %v5242_v12 = vpop.permute.xlu1 %5241  ;;  %v10866_v48 = vpop.permute.xlu2 %5156  ;;  %v4972_v40 = vmul.f32 %v4958_v9, %v10641_v33  ;;  %v6080_v33 = vperm.slane %v10418_v37, 4 }
 0xa92   : > { %v5255_v19 = vsel %vm979_vm2, %v5242_v12, %v10847_v59  ;;  %v4683_v38 = vpop.permute.xlu0 %4682 }
 0xa93   : > { %5268 = vst [vmem:[#allocation3 + $0x1c0] sm:$0xff] %v5255_v19  ;;  %v10875_v39 = vsel %vm11876_vm9, %v11875_v36, %v4683_v38  ;;  %5355 = vmatpush.msrb.mxu1 %v5255_v19  ;;  %vm11886_vm9 = vmmov %vm11879_vm12 }
 0xa94   : > { %4707 = vst [vmem:[#allocation3 + $0x38] sm:$0xff] %v10875_v39  ;;  %vm11890_vm12 = vmmov %vm11882_vm3 }
 0xa97   : > { %5079 = vrot.lane.b32.xlu1 %v5059_v10, %s11818_s6  ;;  %5166 = vrot.lane.b32.xlu2 %v5146_v50, %s11817_s8 }
 0xa98   : > { %5251 = vrot.lane.b32.xlu0 %v5232_v22, %s11798_s10  ;;  %v6168_v22 = vperm.slane %v10403_v34, 5 }
 0xa99   : > { %v5155_v25 = vpop.permute.xlu1 %5154  ;;  %v5070_v24 = vpop.permute.xlu2 %5069 }
 0xa9a   : > { %v5168_v52 = vsel %vm11866_vm13, %v5155_v25, %v10866_v48  ;;  %v4981_v20 = vpop.permute.xlu0 %4980  ;;  %v5905_v25 = vperm.slane %v10895_v55, 3  ;;  %vm11891_vm13 = vmmov %vm11882_vm3 }
 0xa9b   : > { %5181 = vst [vmem:[#allocation3 + $0x188] sm:$0xff] %v5168_v52  ;;  %5356 = vmatpush.msrb.mxu1 %v5168_v52  ;;  %v6671_v52 = vld [vmem:[%s11823_s13 + $0x3] ss:$8 sm:$0x70] }
 0xa9f   : > { %5911 = vrot.lane.b32.xlu1 %v5903_v53, %s11800_s29  ;;  %5913 = vrot.lane.b32.xlu2 %v5904_v45, %s11800_s29 }
 0xaa0   : > { %5077 = vrot.lane.b32.xlu0 %v5058_v28, %s11818_s6 }
 0xaa1   : > { %v5068_v12 = vpop.permute.xlu1 %5067  ;;  %v10909_v54 = vpop.permute.xlu2 %4686 }
 0xaa2   : > { %v5081_v19 = vsel %vm11881_vm15, %v5068_v12, %v5070_v24  ;;  %v4772_v36 = vpop.permute.xlu0 %4771  ;;  %vm11894_vm15 = vcmask 588800  }
 0xaa3   : > { %5094 = vst [vmem:[#allocation3 + $0x150] sm:$0xff] %v5081_v19  ;;  %v10914_v13 = vsel %vm11882_vm3, %v10766_v23, %v4772_v36  ;;  %5357 = vmatpush.msrb.mxu1 %v5081_v19  ;;  %vm11895_vm3 = vmmov %vm11884_vm5 }
 0xaa4   : > { %4795 = vst [vmem:[#allocation3 + $0x78] sm:$0xff] %v10914_v13 }
 0xaa7   : > { %6083 = vrot.lane.b32.xlu1 %v6076_v0, %s11820_s21  ;;  %6178 = vrot.lane.b32.xlu2 %v6167_v62, %s11816_s26 }
 0xaa8   : > { %4992 = vrot.lane.b32.xlu0 %v4972_v40, %s11801_s2  ;;  %v11889_v40 = vld [vmem:[#allocation24_spill] sm:$0xff] }
 0xaa9   : > { %v4685_v23 = vpop.permute.xlu1 %4684  ;;  %v10926_v18 = vpop.permute.xlu2 %4984 }
 0xaaa   : > { %v10929_v42 = vsel %vm11884_vm5, %v4683_v38, %v4685_v23  ;;  %v10933_v10 = vsel %vm11885_vm8, %v4685_v23, %v10909_v54  ;;  %v10935_v50 = vpop.permute.xlu0 %4599  ;;  %v6670_v38 = vld [vmem:[%s11823_s13 + $0x3] ss:$8 sm:$0xf]  ;;  %vm11897_vm5 = vmmov %vm11886_vm9 }
 0xaab   : > { %4708 = vst [vmem:[#allocation3 + $0x40] sm:$0xff] %v10929_v42  ;;  %v10941_v57 = vsel %vm11886_vm9, %v10796_v47, %v10935_v50  ;;  %v10956_v47 = vor.u32 %v6671_v52, %v6670_v38  ;;  %v5993_v38 = vperm.slane %v11888_v41, 4  ;;  %vm11898_vm8 = vmmov %vm11897_vm5 }
 0xaac   : > { %4709 = vst [vmem:[#allocation3 + $0x48] sm:$0xff] %v10933_v10  ;;  %vm11900_vm9 = vmmov %vm11887_vm11 }
 0xaad   : > { %4622 = vst [vmem:[#allocation3 + $0x10] sm:$0xff] %v10941_v57  ;;  %v5778_v62 = vperm.slane %v10956_v47, 2  ;;  %v5777_v9 = vperm.slane %v10956_v47, 1 }
 0xaaf   : > { %6091 = vrot.lane.b32.xlu1 %v6080_v33, %s11820_s21  ;;  %6180 = vrot.lane.b32.xlu2 %v6168_v22, %s11816_s26 }
 0xab0   : > { %5915 = vrot.lane.b32.xlu0 %v5905_v25, %s11800_s29  ;;  %v5902_v25 = vperm.slane %v10895_v55, 0 }
 0xab1   : > { %v4983_v53 = vpop.permute.xlu1 %4982  ;;  %v10959_v45 = vpop.permute.xlu2 %5071 }
 0xab2   : > { %v4994_v30 = vsel %vm1044_vm1, %v4981_v20, %v4983_v53  ;;  %v4995_v28 = vsel %vm1044_vm1, %v4983_v53, %v10926_v18  ;;  %v10964_v12 = vpop.permute.xlu0 %4863  ;;  %v5082_v0 = vsel %vm11887_vm11, %v5070_v24, %v10959_v45  ;;  %v5989_v20 = vperm.slane %v11888_v41, 0  ;;  %vm11901_vm11 = vmmov %vm11894_vm15 }
 0xab3   : > { %5007 = vst [vmem:[#allocation3 + $0x118] sm:$0xff] %v4994_v30  ;;  %v10969_v19 = vsel %vm1052_vm6, %v10825_v6, %v10964_v12  ;;  %5358 = vmatpush.msrb.mxu1 %v4994_v30  ;;  %v11896_v30 = vld [vmem:[#allocation13_spill] sm:$0xff] }
 0xab4   : > { %5008 = vst [vmem:[#allocation3 + $0x120] sm:$0xff] %v4995_v28 }
 0xab5   : > { %4889 = vst [vmem:[#allocation3 + $0xb8] sm:$0xff] %v10969_v19  ;;  %5359 = vmatpush.msrb.mxu1 %v11889_v40 }
 0xab6   : > { %5095 = vst [vmem:[#allocation3 + $0x158] sm:$0xff] %v5082_v0 }
 0xab7   : > { %5787 = vrot.lane.b32.xlu2 %v5778_v62, %s11801_s2  ;;  %5360 = vmatpush.msrb.mxu1 %v10806_v3  ;;  %v5692_v62 = vperm.slane %v11896_v30, 3 }
 0xab8   : > { %5996 = vrot.lane.b32.xlu0 %v5989_v20, %s11819_s5  ;;  %5785 = vrot.lane.b32.xlu1 %v5777_v9, %s11801_s2  ;;  %v5779_v20 = vperm.slane %v10956_v47, 3 }
 0xab9   : > { %v4774_v6 = vpop.permute.xlu1 %4773  ;;  %v10982_v24 = vpop.permute.xlu2 %4775  ;;  %5361 = vmatpush.msrb.mxu1 %v10773_v5  ;;  %v11003_v5 = vld [vmem:[%s11893_s1] sm:$0xf] }
 0xaba   : > { %v10986_v23 = vsel %vm11890_vm12, %v4772_v36, %v4774_v6  ;;  %v10988_v33 = vpop.permute.xlu0 %5158  ;;  %v10992_v22 = vsel %vm11891_vm13, %v4774_v6, %v10982_v24  ;;  %v6169_v36 = vperm.slane %v10403_v34, 6  ;;  %vm11902_vm12 = vmmov %vm11892_vm14 }
 0xabb   : > { %4796 = vst [vmem:[#allocation3 + $0x80] sm:$0xff] %v10986_v23  ;;  %v5169_v3 = vsel %vm11892_vm14, %v10866_v48, %v10988_v33  ;;  %5362 = vmatpush.msrb.mxu1 %v10875_v39  ;;  %vm11904_vm14 = vmmov %vm11895_vm3 }
 0xabc   : > { %5182 = vst [vmem:[#allocation3 + $0x190] sm:$0xff] %v5169_v3 }
 0xabd   : > { %4797 = vst [vmem:[#allocation3 + $0x88] sm:$0xff] %v10992_v22  ;;  %5363 = vmatpush.msrb.mxu1 %v10777_v7 }
 0xabe   : > { %6659 = vmatmul.msk.f32.vlgmr.msrb.gmra.mxu1 %vm11894_vm15, %v11003_v5  ;;  %vm11905_vm15 = vmmov %vm11895_vm3 }
 0xabf   : > { %6004 = vrot.lane.b32.xlu2 %v5993_v38, %s11819_s5  ;;  %v5995_v38 = vperm.slane %v11888_v41, 6 }
 0xac0   : > { %6182 = vrot.lane.b32.xlu0 %v6169_v36, %s11816_s26  ;;  %5909 = vrot.lane.b32.xlu1 %v5902_v25, %s11800_s29  ;;  %v11899_v36 = vld [vmem:[#allocation25_spill] sm:$0xff] }
 0xac1   : > { %v5246_v48 = vpop.permute.xlu1 %5245  ;;  %v11014_v39 = vpop.permute.xlu2 %5247 }
 0xac2   : > { %v5256_v34 = vsel %vm979_vm2, %v10847_v59, %v5246_v48  ;;  %v11018_v52 = vpop.permute.xlu0 %4688  ;;  %v5257_v7 = vsel %vm979_vm2, %v5246_v48, %v11014_v39  ;;  %v6082_v59 = vperm.slane %v10418_v37, 6  ;;  %v5908_v48 = vperm.slane %v10895_v55, 6 }
 0xac3   : > { %5269 = vst [vmem:[#allocation3 + $0x1c8] sm:$0xff] %v5256_v34  ;;  %v11025_v53 = vsel %vm11895_vm3, %v10909_v54, %v11018_v52  ;;  %5375 = vmatpush.msrb.mxu3 %v5256_v34  ;;  %5395 = vmatpush.msra.mxu2 %v5257_v7  ;;  %vm11906_vm3 = vmmov %vm11901_vm11 }
 0xac4   : > { %4710 = vst [vmem:[#allocation3 + $0x50] sm:$0xff] %v11025_v53 }
 0xac5   : > { %5270 = vst [vmem:[#allocation3 + $0x1d0] sm:$0xff] %v5257_v7  ;;  %5376 = vmatpush.msrb.mxu3 %v5169_v3 }
 0xac7   : > { %5702 = vrot.lane.b32.xlu2 %v5692_v62, %s11818_s6  ;;  %5377 = vmatpush.msrb.mxu3 %v5082_v0  ;;  %v5782_v62 = vperm.slane %v10956_v47, 6 }
 0xac8   : > { %5789 = vrot.lane.b32.xlu0 %v5779_v20, %s11801_s2  ;;  %6095 = vrot.lane.b32.xlu1 %v6082_v59, %s11820_s21  ;;  %v5776_v20 = vperm.slane %v10956_v47, 0 }
 0xac9   : > { %v4602_v54 = vpop.permute.xlu1 %4601  ;;  %v11034_v9 = vpop.permute.xlu2 %4603  ;;  %5378 = vmatpush.msrb.mxu3 %v4995_v28  ;;  %v5994_v28 = vperm.slane %v11888_v41, 5 }
 0xaca   : > { %v11038_v40 = vsel %vm11897_vm5, %v10935_v50, %v4602_v54  ;;  %v11040_v6 = vpop.permute.xlu0 %4986  ;;  %v11044_v3 = vsel %vm11898_vm8, %v4602_v54, %v11034_v9  ;;  %v6081_v50 = vperm.slane %v10418_v37, 5  ;;  %v11903_v54 = vld [vmem:[#allocation26_spill] sm:$0xff]  ;;  %vm11907_vm5 = vmmov %vm11902_vm12 }
 0xacb   : > { %4623 = vst [vmem:[#allocation3 + $0x18] sm:$0xff] %v11038_v40  ;;  %v4996_v0 = vsel %vm1044_vm1, %v10926_v18, %v11040_v6  ;;  %5379 = vmatpush.msrb.mxu3 %v11899_v36  ;;  %vm11908_vm8 = vmmov %vm11907_vm5 }
 0xacc   : > { %5009 = vst [vmem:[#allocation3 + $0x128] sm:$0xff] %v4996_v0 }
 0xacd   : > { %4624 = vst [vmem:[#allocation3 + $0x20] sm:$0xff] %v11044_v3  ;;  %5380 = vmatpush.msrb.mxu3 %v10831_v46 }
 0xacf   : > { %6008 = vrot.lane.b32.xlu2 %v5995_v38, %s11819_s5  ;;  %5381 = vmatpush.msrb.mxu3 %v10914_v13 }
 0xad0   : > { %6093 = vrot.lane.b32.xlu0 %v6081_v50, %s11820_s21  ;;  %6006 = vrot.lane.b32.xlu1 %v5994_v28, %s11819_s5  ;;  %v5695_v50 = vperm.slane %v11896_v30, 6 }
 0xad1   : > { %v4866_v18 = vpop.permute.xlu1 %4865  ;;  %v11060_v25 = vpop.permute.xlu2 %4867  ;;  %5382 = vmatpush.msrb.mxu3 %v10929_v42  ;;  %v5906_v42 = vperm.slane %v10895_v55, 4 }
 0xad2   : > { %v11065_v37 = vsel %vm1052_vm6, %v10964_v12, %v4866_v18  ;;  %v11067_v41 = vpop.permute.xlu0 %5073  ;;  %v11071_v46 = vsel %vm1052_vm6, %v4866_v18, %v11060_v25  ;;  %v5907_v12 = vperm.slane %v10895_v55, 5 }
 0xad3   : > { %4890 = vst [vmem:[#allocation3 + $0xc0] sm:$0xff] %v11065_v37  ;;  %v5083_v13 = vsel %vm11900_vm9, %v10959_v45, %v11067_v41  ;;  %5383 = vmatpush.msrb.mxu3 %v10802_v63  ;;  %vm11910_vm9 = vmmov %vm11891_vm13 }
 0xad4   : > { %5096 = vst [vmem:[#allocation3 + $0x160] sm:$0xff] %v5083_v13  ;;  %6660 = vmatmul.msk.f32.vlgmr.msrb.gmra.mxu3 %vm11901_vm11, %v11003_v5  ;;  %vm11911_vm11 = vmmov %vm11907_vm5 }
 0xad5   : > { %4891 = vst [vmem:[#allocation3 + $0xc8] sm:$0xff] %v11071_v46 }
 0xad7   : > { %5921 = vrot.lane.b32.xlu2 %v5908_v48, %s11800_s29 }
 0xad8   : > { %5917 = vrot.lane.b32.xlu0 %v5906_v42, %s11800_s29  ;;  %5919 = vrot.lane.b32.xlu1 %v5907_v12, %s11800_s29 }
 0xad9   : > { %v5161_v45 = vpop.permute.xlu1 %5160  ;;  %v4693_v34 = vpop.permute.xlu2 %4692 }
 0xada   : > { %v5170_v63 = vsel %vm11902_vm12, %v10988_v33, %v5161_v45  ;;  %v4778_v7 = vpop.permute.xlu0 %4777  ;;  %4713 = vst.msk [vmem:[#allocation3 + $0x68] sm:$0xff] %vm824_vm4, %v4693_v34  ;;  %vm11912_vm12 = vcmask 826368  }
 0xadb   : > { %5183 = vst [vmem:[#allocation3 + $0x198] sm:$0xff] %v5170_v63  ;;  %v11092_v55 = vsel %vm11891_vm13, %v10982_v24, %v4778_v7  ;;  %5396 = vmatpush.msra.mxu2 %v5170_v63  ;;  %vm11914_vm13 = vcmask 236544  }
 0xadc   : > { %4798 = vst [vmem:[#allocation3 + $0x90] sm:$0xff] %v11092_v55 }
 0xadd   : > { %5397 = vmatpush.msra.mxu2 %v5083_v13 }
 0xadf   : > { %5795 = vrot.lane.b32.xlu2 %v5782_v62, %s11801_s2  ;;  %5398 = vmatpush.msra.mxu2 %v4996_v0  ;;  %v11913_v62 = vld [vmem:[#allocation27_spill] sm:$0xff] }
 0xae0   : > { %5783 = vrot.lane.b32.xlu0 %v5776_v20, %s11801_s2 }
 0xae1   : > { %v4691_v33 = vpop.permute.xlu1 %4690  ;;  %v11099_v59 = vpop.permute.xlu2 %4990  ;;  %5399 = vmatpush.msra.mxu2 %v11903_v54 }
 0xae2   : > { %v11104_v24 = vsel %vm11904_vm14, %v11018_v52, %v4691_v33  ;;  %v11107_v38 = vsel %vm11905_vm15, %v4691_v33, %v4693_v34  ;;  %v11109_v36 = vpop.permute.xlu0 %5249  ;;  %v5780_v52 = vperm.slane %v10956_v47, 4  ;;  %vm11915_vm14 = vmmov %vm11906_vm3 }
 0xae3   : > { %4711 = vst [vmem:[#allocation3 + $0x58] sm:$0xff] %v11104_v24  ;;  %v5258_v0 = vsel %vm979_vm2, %v11014_v39, %v11109_v36  ;;  %5400 = vmatpush.msra.mxu2 %v10969_v19  ;;  %vm11916_vm15 = vmmov %vm11914_vm13 }
 0xae4   : > { %4712 = vst [vmem:[#allocation3 + $0x60] sm:$0xff] %v11107_v38  ;;  %5415 = vmatpush.msrb.mxu0 %v5258_v0 }
 0xae5   : > { %5271 = vst [vmem:[#allocation3 + $0x1d8] sm:$0xff] %v5258_v0  ;;  %5401 = vmatpush.msra.mxu2 %v10986_v23 }
 0xae7   : > { %5708 = vrot.lane.b32.xlu2 %v5695_v50, %s11818_s6  ;;  %5402 = vmatpush.msra.mxu2 %v10933_v10 }
 0xae8   : > { %5791 = vrot.lane.b32.xlu0 %v5780_v52, %s11801_s2 }
 0xae9   : > { %v4989_v28 = vpop.permute.xlu1 %4988  ;;  %v5165_v39 = vpop.permute.xlu2 %5164  ;;  %5403 = vmatpush.msra.mxu2 %v10941_v57  ;;  %v11909_v57 = vld [vmem:[#allocation18_spill] sm:$0xff] }
 0xaea   : > { %v4997_v19 = vsel %vm1044_vm1, %v11040_v6, %v4989_v28  ;;  %v11128_v18 = vsel %vm1044_vm1, %v4989_v28, %v11099_v59  ;;  %v5163_v13 = vpop.permute.xlu0 %5162  ;;  %6661 = vmatmul.msk.f32.vlgmr.msra.gmra.mxu2 %vm11906_vm3, %v11003_v5  ;;  %v5723_v48 = vmul.f32 %v10749_v43, %v11909_v57  ;;  %vm11917_vm3 = vmmov %vm11912_vm12 }
 0xaeb   : > { %5010 = vst [vmem:[#allocation3 + $0x130] sm:$0xff] %v4997_v19  ;;  %v5171_v10 = vsel %vm11907_vm5, %v5161_v45, %v5163_v13  ;;  %v5172_v23 = vsel %vm11908_vm8, %v5163_v13, %v5165_v39  ;;  %vm11918_vm5 = vmmov %vm11917_vm3 }
 0xaec   : > { %5011 = vst [vmem:[#allocation3 + $0x138] sm:$0xff] %v11128_v18  ;;  %5416 = vmatpush.msrb.mxu0 %v5171_v10  ;;  %vm11920_vm8 = vmmov %vm11915_vm14 }
 0xaed   : > { %5184 = vst [vmem:[#allocation3 + $0x1a0] sm:$0xff] %v5171_v10 }
 0xaee   : > { %5185 = vst [vmem:[#allocation3 + $0x1a8] sm:$0xff] %v5172_v23 }
 0xaef   : > { %5737 = vrot.lane.b32.xlu2 %v5723_v48, %s11819_s5 }
 0xaf1   : > { %v4780_v6 = vpop.permute.xlu1 %4779  ;;  %v5167_v42 = vpop.permute.xlu2 %5166 }
 0xaf2   : > { %v11139_v12 = vsel %vm11910_vm9, %v4778_v7, %v4780_v6  ;;  %4800 = vst.msk [vmem:[#allocation3 + $0xa0] sm:$0xff] %vm824_vm4, %v4780_v6  ;;  %v5076_v45 = vpop.permute.xlu0 %5075  ;;  %v5173_v34 = vsel %vm11911_vm11, %v5165_v39, %v5167_v42  ;;  %vm11923_vm11 = vmmov %vm11914_vm13 }
 0xaf3   : > { %4799 = vst [vmem:[#allocation3 + $0x98] sm:$0xff] %v11139_v12  ;;  %v5084_v63 = vsel %vm11912_vm12, %v11067_v41, %v5076_v45  ;;  %v5693_v41 = vperm.slane %v11896_v30, 4  ;;  %vm11925_vm12 = vcmask 228352  }
 0xaf4   : > { %5097 = vst [vmem:[#allocation3 + $0x168] sm:$0xff] %v5084_v63  ;;  %5417 = vmatpush.msrb.mxu0 %v5084_v63  ;;  %v5781_v63 = vperm.slane %v10956_v47, 5  ;;  %v5694_v47 = vperm.slane %v11896_v30, 5 }
 0xaf5   : > { %5186 = vst [vmem:[#allocation3 + $0x1b0] sm:$0xff] %v5173_v34  ;;  %5704 = vrot.lane.b32.xlu0 %v5693_v41, %s11818_s6 }
 0xaf6   : > { %5187 = vst.msk [vmem:[#allocation3 + $0x1b8] sm:$0xff] %vm824_vm4, %v5167_v42  ;;  %5418 = vmatpush.msrb.mxu0 %v4997_v19  ;;  %5793 = vrot.lane.b32.xlu1 %v5781_v63, %s11801_s2 }
 0xaf8   : > { %5419 = vmatpush.msrb.mxu0 %v11913_v62 }
 0xaf9   : > { %v4872_v7 = vpop.permute.xlu1 %4871  ;;  %v11148_v20 = vpop.permute.xlu2 %5913 }
 0xafa   : > { %v4606_v33 = vpop.permute.xlu0 %4605  ;;  %5420 = vmatpush.msrb.mxu0 %v11065_v37 }
 0xafb   : > { %v11153_v54 = vsel %vm11914_vm13, %v11034_v9, %v4606_v33  ;;  %4626 = vst.msk [vmem:[#allocation3 + $0x30] sm:$0xff] %vm824_vm4, %v4606_v33  ;;  %vm11927_vm13 = vcmask 818176  }
 0xafc   : > { %4625 = vst [vmem:[#allocation3 + $0x28] sm:$0xff] %v11153_v54  ;;  %5421 = vmatpush.msrb.mxu0 %v10992_v22 }
 0xafd   : > { %v5331_v13 = vld [vmem:[#allocation3 + $0x1b8] sm:$0xff] }
 0xafe   : > { %5422 = vmatpush.msrb.mxu0 %v11025_v53  ;;  %5706 = vrot.lane.b32.xlu1 %v5694_v47, %s11818_s6  ;;  %v6762_v47 = vld [vmem:[#allocation2] sm:$0xf] }
 0xb00   : > { %5423 = vmatpush.msrb.mxu0 %v11038_v40 }
 0xb01   : > { %v5254_v0 = vpop.permute.xlu1 %5253  ;;  %v11162_v37 = vpop.permute.xlu2 %6178  ;;  %6662 = vmatmul.msk.f32.vlgmr.msrb.gmra.mxu0 %vm11915_vm14, %v11003_v5  ;;  %vm11928_vm14 = vmmov %vm11917_vm3 }
 0xb02   : > { %5274 = vst.msk [vmem:[#allocation3 + $0x1f0] sm:$0xff] %vm824_vm4, %v5254_v0  ;;  %v4870_v9 = vpop.permute.xlu0 %4869 }
 0xb03   : > { %v4878_v22 = vsel %vm1052_vm6, %v11060_v25, %v4870_v9  ;;  %v4879_v50 = vsel %vm1052_vm6, %v4870_v9, %v4872_v7 }
 0xb04   : > { %4892 = vst [vmem:[#allocation3 + $0xd0] sm:$0xff] %v4878_v22 }
 0xb05   : > { %4893 = vst.msk [vmem:[#allocation3 + $0xd8] sm:$0xff] %vm824_vm4, %v4879_v50 }
 0xb09   : > { %v5080_v53 = vpop.permute.xlu1 %5079  ;;  %v5338_v52 = vld [vmem:[#allocation3 + $0x1f0] sm:$0xff]  ;;  %v11171_v40 = vpop.permute.xlu2 %6180 }
 0xb0a   : > { %5100 = vst.msk [vmem:[#allocation3 + $0x180] sm:$0xff] %vm824_vm4, %v5080_v53  ;;  %v5252_v28 = vpop.permute.xlu0 %5251  ;;  %5475 = vmatpush.msrb.mxu2 %v5338_v52  ;;  %v11177_v39 = vsel %vm11916_vm15, %v11162_v37, %v11171_v40  ;;  %vm11931_vm15 = vmmov %vm11925_vm12 }
 0xb0b   : > { %v5259_v25 = vsel %vm979_vm2, %v11109_v36, %v5252_v28  ;;  %v5260_v19 = vsel %vm979_vm2, %v5252_v28, %v5254_v0  ;;  %v6672_v0 = vld [vmem:[%s11823_s13 + $0x4] ss:$8 sm:$0xf] }
 0xb0c   : > { %5272 = vst [vmem:[#allocation3 + $0x1e0] sm:$0xff] %v5259_v25  ;;  %5476 = vmatpush.msrb.mxu2 %v5331_v13  ;;  %5435 = vmatpush.msra.mxu1 %v5259_v25  ;;  %v11926_v28 = vld [vmem:[#allocation23_spill] sm:$0xff] }
 0xb0d   : > { %5273 = vst [vmem:[#allocation3 + $0x1e8] sm:$0xff] %v5260_v19  ;;  %5455 = vmatpush.msra.mxu3 %v5260_v19  ;;  %v5623_v25 = vsel %vm11927_vm13, %v11926_v28, %v10616_v35 }
 0xb0e   : > { %5436 = vmatpush.msra.mxu1 %v5172_v23 }
 0xb0f   : > { %5456 = vmatpush.msra.mxu3 %v5173_v34  ;;  %v5282_v34 = vld [vmem:[#allocation3 + $0x30] sm:$0xff] }
 0xb11   : > { %v11182_v10 = vpop.permute.xlu1 %5911  ;;  %v5324_v57 = vld [vmem:[#allocation3 + $0x180] sm:$0xff] }
 0xb12   : > { %v11187_v48 = vsel %vm1052_vm6, %v11182_v10, %v11148_v20  ;;  %v5078_v6 = vpop.permute.xlu0 %5077  ;;  %5477 = vmatpush.msrb.mxu2 %v5324_v57 }
 0xb13   : > { %v5085_v36 = vsel %vm11917_vm3, %v5076_v45, %v5078_v6  ;;  %v5086_v42 = vsel %vm11918_vm5, %v5078_v6, %v5080_v53  ;;  %vm11932_vm3 = vcmask 220160   ;;  %vm11934_vm5 = vmmov %vm11927_vm13 }
 0xb14   : > { %5098 = vst [vmem:[#allocation3 + $0x170] sm:$0xff] %v5085_v36  ;;  %5437 = vmatpush.msra.mxu1 %v5085_v36  ;;  %5457 = vmatpush.msra.mxu3 %v5086_v42  ;;  %vm11940_vm13 = vmmov %vm11934_vm5 }
 0xb15   : > { %5099 = vst [vmem:[#allocation3 + $0x178] sm:$0xff] %v5086_v42 }
 0xb16   : > { %5438 = vmatpush.msra.mxu1 %v11128_v18  ;;  %v11919_v18 = vld [vmem:[#allocation29_spill] sm:$0xff] }
 0xb18   : > { %5439 = vmatpush.msra.mxu1 %v10577_v8 }
 0xb19   : > { %v6084_v7 = vpop.permute.xlu1 %6083 }
 0xb1a   : > { %v4993_v23 = vpop.permute.xlu0 %4992  ;;  %5440 = vmatpush.msra.mxu1 %v11071_v46 }
 0xb1b   : > { %v4999_v45 = vsel %vm1044_vm1, %v11099_v59, %v4993_v23  ;;  %5013 = vst.msk [vmem:[#allocation3 + $0x148] sm:$0xff] %vm824_vm4, %v4993_v23  ;;  %v5303_v59 = vld [vmem:[#allocation3 + $0xd8] sm:$0xff]  ;;  %vm11921_vm4 = vmmov %vm11920_vm8 }
 0xb1c   : > { %5012 = vst [vmem:[#allocation3 + $0x140] sm:$0xff] %v4999_v45  ;;  %5441 = vmatpush.msra.mxu1 %v11092_v55  ;;  %5458 = vmatpush.msra.mxu3 %v4999_v45  ;;  %v5310_v55 = vld [vmem:[#allocation3 + $0x110] sm:$0xff]  ;;  %vm11922_vm9 = vmmov %vm11921_vm4 }
 0xb1e   : > { %5442 = vmatpush.msra.mxu1 %v11104_v24  ;;  %5459 = vmatpush.msra.mxu3 %v11919_v18 }
 0xb20   : > { %5443 = vmatpush.msra.mxu1 %v11044_v3  ;;  %5460 = vmatpush.msra.mxu3 %v4878_v22  ;;  %v5296_v3 = vld [vmem:[#allocation3 + $0xa0] sm:$0xff] }
 0xb21   : > { %6663 = vmatmul.msk.f32.vlgmr.msra.gmra.mxu1 %vm11920_vm8, %v11003_v5  ;;  %v11235_v50 = vpop.permute.xlu1 %6091  ;;  %vm11935_vm8 = vmmov %vm11923_vm11 }
 0xb22   : > { %v5916_v8 = vpop.permute.xlu0 %5915  ;;  %v5317_v46 = vld [vmem:[#allocation3 + $0x148] sm:$0xff]  ;;  %5461 = vmatpush.msra.mxu3 %v11139_v12 }
 0xb23   : > { %v11210_v30 = vsel %vm1052_vm6, %v11148_v20, %v5916_v8  ;;  %5478 = vmatpush.msrb.mxu2 %v5317_v46  ;;  %v5289_v12 = vld [vmem:[#allocation3 + $0x68] sm:$0xff] }
 0xb24   : > { %5462 = vmatpush.msra.mxu3 %v11107_v38 }
 0xb25   : > { %5479 = vmatpush.msrb.mxu2 %v5310_v55 }
 0xb26   : > { %5463 = vmatpush.msra.mxu3 %v11153_v54  ;;  %v11924_v54 = vld [vmem:[#allocation16_spill] sm:$0xff] }
 0xb27   : > { %5480 = vmatpush.msrb.mxu2 %v5303_v59  ;;  %6664 = vmatmul.msk.f32.vlgmr.msra.gmra.mxu3 %vm11921_vm4, %v11003_v5  ;;  %vm11936_vm4 = vmmov %vm11935_vm8 }
 0xb29   : > { %5481 = vmatpush.msrb.mxu2 %v5296_v3 }
 0xb2a   : > { %v11216_v24 = vpop.permute.xlu0 %5996  ;;  %v5786_v63 = vpop.permute.xlu1 %5785 }
 0xb2b   : > { %5482 = vmatpush.msrb.mxu2 %v5289_v12  ;;  %v11929_v12 = vld [vmem:[#allocation20_spill] sm:$0xff] }
 0xb2d   : > { %5483 = vmatpush.msrb.mxu2 %v5282_v34  ;;  %v5536_v34 = vsel %vm979_vm2, %v11929_v12, %v10643_v60 }
 0xb2e   : > { %6665 = vmatmul.msk.f32.vlgmr.msrb.gmra.mxu2 %vm11922_vm9, %v11003_v5  ;;  %v6673_v5 = vld [vmem:[%s11823_s13 + $0x4] ss:$8 sm:$0x70]  ;;  %vm11937_vm9 = vmmov %vm11932_vm3 }
 0xb2f   : > { %v11233_v22 = vor.u32 %v6673_v5, %v6672_v0  ;;  %v11930_v0 = vld [vmem:[#allocation19_spill] sm:$0xff] }
 0xb32   : > { %v6183_v38 = vpop.permute.xlu0 %6182 }
 0xb33   : > { %v11222_v62 = vsel %vm11923_vm11, %v11171_v40, %v6183_v38  ;;  %v5869_v40 = vperm.slane %v11233_v22, 0  ;;  %vm11938_vm11 = vmmov %vm11928_vm14 }
 0xb3a   : > { %v11224_v20 = vpop.permute.xlu0 %5789 }
 0xb3b   : > { %v5365_v33 = vpop.f32.mrf.mxu1 }
 0xb3c   : > { %v5366_v41 = vadd.f32 %v5365_v33, %v11924_v54 }
 0xb3e   : > { %v5488_v9 = vmax.f32 %v5366_v41, 0.0  ;;  %v5870_v41 = vperm.slane %v11233_v22, 1 }
 0xb40   : > { %5495 = vst [vmem:[#allocation2 + $0x8] sm:$0xf] %v5488_v9 }
 0xb42   : > { %v11237_v53 = vpop.permute.xlu0 %6093 }
 0xb43   : > { %v11242_v52 = vsel %vm11925_vm12, %v11235_v50, %v11237_v53  ;;  %vm11939_vm12 = vmmov %vm11938_vm11 }
 0xb47   : > { %v5504_v19 = vld [vmem:[#allocation2 + $0x8] sm:$0xf] }
 0xb48   : > { %v5637_v13 = vmul.f32 %v5623_v25, %v5504_v19  ;;  %v5883_v57 = vmul.f32 %v5869_v40, %v5504_v19  ;;  %v6197_v42 = vmul.f32 %v10852_v17, %v5504_v19  ;;  %v5550_v33 = vmul.f32 %v5536_v34, %v5504_v19  ;;  %v5788_v25 = vpop.permute.xlu2 %5787 }
 0xb49   : > { %v6110_v9 = vmul.f32 %v6084_v7, %v5504_v19  ;;  %v5798_v12 = vsel %vm1044_vm1, %v5786_v63, %v5788_v25 }
 0xb4a   : > { %v11248_v6 = vpop.permute.xlu0 %5917  ;;  %5652 = vrot.lane.b32.xlu0 %v5637_v13, %s11820_s21  ;;  %5890 = vst [vmem:[#allocation3 + $0xe0] sm:$0xf] %v5883_v57  ;;  %v6097_v13 = vsel %vm11931_vm15, %v6084_v7, %v10798_v58  ;;  %v6023_v57 = vmul.f32 %v11216_v24, %v5504_v19  ;;  %vm11942_vm15 = vmmov %vm11936_vm4 }
 0xb4b   : > { %v11253_v36 = vsel %vm1052_vm6, %v5916_v8, %v11248_v6  ;;  %v5710_v8 = vsel %vm11928_vm14, %v10749_v43, %v10665_v2  ;;  %v5537_v43 = vsel %vm979_vm2, %v10643_v60, %v11930_v0  ;;  %vm11941_vm14 = vmmov %vm11934_vm5 }
 0xb4c   : > { %v5724_v3 = vmul.f32 %v5710_v8, %v5504_v19 }
 0xb50   : > { %v11284_v8 = vpop.permute.xlu2 %6004 }
 0xb52   : > { %v5784_v23 = vpop.permute.xlu0 %5783  ;;  %6211 = vrot.lane.b32.xlu0 %v6197_v42, %s11798_s10 }
 0xb53   : > { %v5797_v45 = vsel %vm1044_vm1, %v5784_v23, %v5786_v63  ;;  %v5811_v18 = vmul.f32 %v6762_v47, %v5784_v23  ;;  %v5910_v47 = vpop.permute.xlu1 %5909 }
 0xb54   : > { %v5812_v46 = vmul.f32 %v5797_v45, %v5504_v19 }
 0xb55   : > { %5827 = vrot.lane.b32.xlu1 %v5811_v18, %s11800_s29  ;;  %v6010_v18 = vsel %vm11932_vm3, %v11216_v24, %v10827_v61  ;;  %v5624_v24 = vsel %vm11934_vm5, %v10616_v35, %v10707_v1  ;;  %v6185_v35 = vsel %vm11935_vm8, %v10768_v31, %v10691_v27  ;;  %vm11943_vm3 = vcmask 228352   ;;  %vm11945_vm8 = vmmov %vm11940_vm13 }
 0xb56   : > { %5829 = vrot.lane.b32.xlu2 %v5812_v46, %s11800_s29  ;;  %v5936_v46 = vmul.f32 %v5910_v47, %v5504_v19  ;;  %vm11944_vm5 = vmmov %vm11943_vm3 }
 0xb57   : > { %v5385_v55 = vpop.f32.mrf.mxu3 }
 0xb58   : > { %v5386_v59 = vadd.f32 %v5385_v55, %v11924_v54  ;;  %v5871_v55 = vperm.slane %v11233_v22, 2 }
 0xb5a   : > { %v5489_v38 = vmax.f32 %v5386_v59, 0.0  ;;  %5739 = vrot.lane.b32.xlu0 %v5724_v3, %s11819_s5  ;;  %v11933_v59 = vld [vmem:[#allocation28_spill] sm:$0xff] }
 0xb5b   : > { %v5538_v3 = vsel %vm979_vm2, %v11930_v0, %v11933_v59 }
 0xb5c   : > { %5496 = vst [vmem:[#allocation2 + $0x10] sm:$0xf] %v5489_v38 }
 0xb5d   : > { %5565 = vrot.lane.b32.xlu1 %v5550_v33, %s11816_s26 }
 0xb63   : > { %v5505_v5 = vld [vmem:[#allocation2 + $0x10] sm:$0xf] }
 0xb64   : > { %v5551_v40 = vmul.f32 %v5537_v43, %v5505_v5  ;;  %v5884_v28 = vmul.f32 %v5870_v41, %v5505_v5  ;;  %v6111_v42 = vmul.f32 %v6097_v13, %v5505_v5  ;;  %v6024_v7 = vmul.f32 %v6010_v18, %v5505_v5  ;;  %v11302_v43 = vpop.permute.xlu2 %5702 }
 0xb65   : > { %6124 = vrot.lane.b32.xlu1 %v6110_v9, %s11817_s8  ;;  %v5638_v38 = vmul.f32 %v5624_v24, %v5505_v5  ;;  %v5813_v33 = vmul.f32 %v5798_v12, %v5505_v5  ;;  %v5923_v9 = vsel %vm1052_vm6, %v5910_v47, %v11182_v10  ;;  %v5799_v10 = vsel %vm1044_vm1, %v5788_v25, %v11224_v20 }
 0xb66   : > { %5567 = vrot.lane.b32.xlu2 %v5551_v40, %s11816_s26  ;;  %5891 = vst [vmem:[#allocation3 + $0xe8] sm:$0xf] %v5884_v28  ;;  %v6184_v28 = vsel %vm11936_vm4, %v10852_v17, %v10768_v31  ;;  %v6011_v31 = vsel %vm11937_vm9, %v10827_v61, %v10744_v49  ;;  %v5711_v47 = vsel %vm11938_vm11, %v10665_v2, %v10684_v15  ;;  %vm11946_vm4 = vmmov %vm11937_vm9 }
 0xb67   : > { %v5712_v61 = vsel %vm11939_vm12, %v10684_v15, %v11302_v43  ;;  %v5539_v2 = vsel %vm979_vm2, %v11933_v59, %v10670_v21  ;;  %v5626_v15 = vsel %vm11941_vm14, %v10611_v11, %v10637_v44  ;;  %v11357_v59 = vpop.permute.xlu1 %6095  ;;  %vm11947_vm9 = vmmov %vm11942_vm15  ;;  %vm5501_vm12 = vcmask 125952  }
 0xb68   : > { %vm11950_vm14 = vmmov %vm11943_vm3 }
 0xb6d   : > { %6037 = vrot.lane.b32.xlu1 %v6023_v57, %s11818_s6  ;;  %v5405_v23 = vpop.f32.mrf.mxu2  ;;  %v6198_v57 = vmul.f32 %v6184_v28, %v5505_v5 }
 0xb6e   : > { %v5406_v60 = vadd.f32 %v5405_v23, %v11924_v54  ;;  %6126 = vrot.lane.b32.xlu2 %v6111_v42, %s11817_s8  ;;  %v5937_v42 = vmul.f32 %v5923_v9, %v5505_v5  ;;  %v11318_v23 = vpop.permute.xlu2 %6008 }
 0xb70   : > { %v5490_v45 = vmax.f32 %v5406_v60, 0.0  ;;  %v5872_v60 = vperm.slane %v11233_v22, 3 }
 0xb72   : > { %5497 = vst [vmem:[#allocation2 + $0x18] sm:$0xf] %v5490_v45 }
 0xb75   : > { %5950 = vrot.lane.b32.xlu1 %v5936_v46, %s11801_s2  ;;  %v5725_v46 = vmul.f32 %v5711_v47, %v5505_v5  ;;  %v5625_v5 = vsel %vm11940_vm13, %v10707_v1, %v10611_v11  ;;  %v6186_v1 = vsel %vm11942_vm15, %v10691_v27, %v10705_v56  ;;  %v11373_v27 = vpop.permute.xlu0 %5791  ;;  %vm11948_vm13 = vmmov %vm11943_vm3 }
 0xb76   : > { %6039 = vrot.lane.b32.xlu2 %v6024_v7, %s11818_s6  ;;  %v11343_v7 = vpop.permute.xlu2 %5921  ;;  %vm11951_vm15 = vmmov %vm11946_vm4 }
 0xb79   : > { %v11293_v34 = vld [vmem:[#allocation2 + $0x18] sm:$0xf] }
 0xb7a   : > { %v5552_v19 = vmul.f32 %v5538_v3, %v11293_v34  ;;  %v5885_v41 = vmul.f32 %v5871_v55, %v11293_v34  ;;  %v6199_v13 = vmul.f32 %v6185_v35, %v11293_v34  ;;  %v5814_v45 = vmul.f32 %v5799_v10, %v11293_v34 }
 0xb7b   : > { %v6025_v18 = vmul.f32 %v6011_v31, %v11293_v34  ;;  %v5726_v55 = vmul.f32 %v5712_v61, %v11293_v34  ;;  %v5639_v12 = vmul.f32 %v5625_v5, %v11293_v34  ;;  %v5800_v35 = vsel %vm1044_vm1, %v11224_v20, %v11373_v27 }
 0xb7c   : > { %5569 = vrot.lane.b32.xlu0 %v5552_v19, %s11816_s26  ;;  %5892 = vst [vmem:[#allocation3 + $0xf0] sm:$0xf] %v5885_v41  ;;  %v6098_v19 = vsel %vm11943_vm3, %v10798_v58, %v10720_v29  ;;  %v6099_v58 = vsel %vm11944_vm5, %v10720_v29, %v10726_v51  ;;  %v5873_v20 = vperm.slane %v11233_v22, 4  ;;  %vm11952_vm3 = vmmov %vm11946_vm4 }
 0xb7d   : > { %5654 = vrot.lane.b32.xlu1 %v5638_v38, %s11820_s21  ;;  %v6112_v11 = vmul.f32 %v6098_v19, %v11293_v34 }
 0xb7e   : > { %v5425_v0 = vpop.f32.mrf.mxu0  ;;  %5831 = vrot.lane.b32.xlu2 %v5813_v33, %s11800_s29  ;;  %v11367_v33 = vpop.permute.xlu2 %5795 }
 0xb7f   : > { %v5426_v63 = vadd.f32 %v5425_v0, %v11924_v54 }
 0xb81   : > { %v5491_v40 = vmax.f32 %v5426_v63, 0.0 }
 0xb83   : > { %5498 = vst [vmem:[#allocation2 + $0x20] sm:$0xf] %v5491_v40  ;;  %v11383_v40 = vpop.permute.xlu1 %6006 }
 0xb84   : > { %6215 = vrot.lane.b32.xlu0 %v6199_v13, %s11798_s10  ;;  %v5938_v13 = vmul.f32 %v11187_v48, %v11293_v34  ;;  %v6012_v48 = vsel %vm11946_vm4, %v10744_v49, %v10747_v26  ;;  %vm11953_vm4 = vmmov %vm11952_vm3 }
 0xb85   : > { %6213 = vrot.lane.b32.xlu1 %v6198_v57, %s11798_s10  ;;  %v5627_v57 = vsel %vm11945_vm8, %v10637_v44, %v10728_v16 }
 0xb86   : > { %5952 = vrot.lane.b32.xlu2 %v5937_v42, %s11801_s2  ;;  %v11390_v29 = vpop.permute.xlu2 %5708 }
 0xb8a   : > { %v11326_v17 = vld [vmem:[#allocation2 + $0x20] sm:$0xf] }
 0xb8b   : > { %v5886_v25 = vmul.f32 %v5872_v60, %v11326_v17  ;;  %v5553_v3 = vmul.f32 %v5539_v2, %v11326_v17  ;;  %v5640_v24 = vmul.f32 %v5626_v15, %v11326_v17  ;;  %v6200_v38 = vmul.f32 %v6186_v1, %v11326_v17  ;;  %v11408_v47 = vpop.permute.xlu1 %5919 }
 0xb8c   : > { %5833 = vrot.lane.b32.xlu0 %v5814_v45, %s11800_s29  ;;  %v6113_v9 = vmul.f32 %v6099_v58, %v11326_v17  ;;  %v5815_v28 = vmul.f32 %v5800_v35, %v11326_v17  ;;  %v5939_v60 = vmul.f32 %v11210_v30, %v11326_v17  ;;  %v6026_v45 = vmul.f32 %v6012_v48, %v11326_v17  ;;  %v11412_v30 = vpop.permute.xlu0 %5704 }
 0xb8d   : > { %6041 = vrot.lane.b32.xlu1 %v6025_v18, %s11818_s6  ;;  %5893 = vst [vmem:[#allocation3 + $0xf8] sm:$0xf] %v5886_v25  ;;  %v5713_v25 = vsel %vm11938_vm11, %v11302_v43, %v11412_v30  ;;  %v5875_v1 = vperm.slane %v11233_v22, 6  ;;  %v6013_v58 = vsel %vm11951_vm15, %v10747_v26, %v11284_v8  ;;  %v5928_v26 = vsel %vm1052_vm6, %v11408_v47, %v11343_v7  ;;  %vm11954_vm11 = vmmov %vm11947_vm9 }
 0xb8e   : > { %5741 = vrot.lane.b32.xlu2 %v5725_v46, %s11819_s5  ;;  %v5738_v49 = vpop.permute.xlu2 %5737  ;;  %v6187_v46 = vsel %vm11947_vm9, %v10705_v56, %v11162_v37  ;;  %v5874_v56 = vperm.slane %v11233_v22, 5  ;;  %vm11958_vm15 = vcmask 826368  }
 0xb93   : > { %v11427_v15 = vpop.permute.xlu1 %5793 }
 0xb94   : > { %5743 = vrot.lane.b32.xlu0 %v5726_v55, %s11819_s5 }
 0xb95   : > { %5571 = vrot.lane.b32.xlu1 %v5553_v3, %s11816_s26  ;;  %v5727_v3 = vmul.f32 %v5713_v25, %v11326_v17 }
 0xb96   : > { %5656 = vrot.lane.b32.xlu2 %v5639_v12, %s11820_s21 }
 0xb9c   : > { %5658 = vrot.lane.b32.xlu0 %v5640_v24, %s11820_s21  ;;  %v11949_v24 = vld [vmem:[#allocation22_spill] sm:$0xff] }
 0xb9d   : > { %6217 = vrot.lane.b32.xlu1 %v6200_v38, %s11798_s10  ;;  %v5540_v19 = vsel %vm979_vm2, %v10670_v21, %v11949_v24 }
 0xb9e   : > { %v5445_v41 = vpop.f32.mrf.mxu1  ;;  %6128 = vrot.lane.b32.xlu2 %v6112_v11, %s11817_s8 }
 0xb9f   : > { %v5446_v0 = vadd.f32 %v5445_v41, %v11924_v54 }
 0xba1   : > { %v5492_v63 = vmax.f32 %v5446_v0, 0.0  ;;  %v11455_v0 = vpop.permute.xlu1 %5706 }
 0xba3   : > { %5499 = vst [vmem:[#allocation2 + $0x28] sm:$0xf] %v5492_v63 }
 0xba4   : > { %6130 = vrot.lane.b32.xlu0 %v6113_v9, %s11817_s8  ;;  %v6102_v9 = vsel %vm11944_vm5, %v11237_v53, %v11357_v59  ;;  %v5628_v53 = vsel %vm11945_vm8, %v10728_v16, %v10639_v32  ;;  %v11955_v16 = vld [vmem:[#allocation30_spill] sm:$0xff]  ;;  %vm11960_vm5 = vmmov %vm11953_vm4 }
 0xba5   : > { %5835 = vrot.lane.b32.xlu1 %v5815_v28, %s11800_s29 }
 0xba6   : > { %5954 = vrot.lane.b32.xlu2 %v5938_v13, %s11801_s2 }
 0xbaa   : > { %v11397_v42 = vld [vmem:[#allocation2 + $0x28] sm:$0xf]  ;;  %v5465_v10 = vpop.f32.mrf.mxu3 }
 0xbab   : > { %v5466_v34 = vadd.f32 %v5465_v10, %v11924_v54  ;;  %v5641_v31 = vmul.f32 %v5627_v57, %v11397_v42  ;;  %v5887_v18 = vmul.f32 %v5873_v20, %v11397_v42  ;;  %v6201_v55 = vmul.f32 %v6187_v46, %v11397_v42 }
 0xbac   : > { %5956 = vrot.lane.b32.xlu0 %v5939_v60, %s11801_s2  ;;  %v5940_v5 = vmul.f32 %v11253_v36, %v11397_v42  ;;  %v6100_v36 = vsel %vm11948_vm13, %v10726_v51, %v11235_v50  ;;  %v5554_v11 = vmul.f32 %v5540_v19, %v11397_v42  ;;  %vm11956_vm13 = vmmov %vm11952_vm3 }
 0xbad   : > { %v5493_v44 = vmax.f32 %v5466_v34, 0.0  ;;  %5660 = vrot.lane.b32.xlu1 %v5641_v31, %s11820_s21  ;;  %5894 = vst [vmem:[#allocation3 + $0x100] sm:$0xf] %v5887_v18  ;;  %v6114_v17 = vmul.f32 %v6100_v36, %v11397_v42  ;;  %v6014_v18 = vsel %vm11956_vm13, %v11284_v8, %v11383_v40  ;;  %v5801_v8 = vsel %vm1044_vm1, %v11373_v27, %v11427_v15 }
 0xbae   : > { %6043 = vrot.lane.b32.xlu2 %v6026_v45, %s11818_s6  ;;  %v5541_v45 = vsel %vm979_vm2, %v11949_v24, %v11955_v16  ;;  %v5802_v27 = vsel %vm1044_vm1, %v11427_v15, %v11367_v33  ;;  %v6275_v16 = vld [vmem:[#allocation3 + $0xe8] sm:$0xff] }
 0xbaf   : > { %5500 = vst [vmem:[#allocation2 + $0x30] sm:$0xf] %v5493_v44 }
 0xbb1   : > { %v5485_v61 = vpop.f32.mrf.mxu2 }
 0xbb2   : > { %v5486_v2 = vadd.f32 %v5485_v61, %v11924_v54  ;;  %v11435_v54 = vpop.permute.xlu2 %5829 }
 0xbb4   : > { %v5494_v12 = vmax.f32 %v5486_v2, 0.0  ;;  %6219 = vrot.lane.b32.xlu0 %v6201_v55, %s11798_s10  ;;  %v5715_v2 = vsel %vm11958_vm15, %v11455_v0, %v11390_v29  ;;  %v5816_v55 = vmul.f32 %v5801_v8, %v11397_v42 }
 0xbb5   : > { %5958 = vrot.lane.b32.xlu1 %v5940_v5, %s11801_s2 }
 0xbb6   : > { %5502 = vst.msk [vmem:[#allocation2 + $0x38] sm:$0xf] %vm5501_vm12, %v5494_v12  ;;  %5745 = vrot.lane.b32.xlu2 %v5727_v3, %s11819_s5  ;;  %v11433_v37 = vld [vmem:[#allocation2 + $0x30] sm:$0xf] }
 0xbb7   : > { %v5888_v43 = vmul.f32 %v5874_v56, %v11433_v37  ;;  %v5642_v10 = vmul.f32 %v5628_v53, %v11433_v37  ;;  %v5555_v44 = vmul.f32 %v5541_v45, %v11433_v37  ;;  %v5729_v5 = vmul.f32 %v5715_v2, %v11433_v37  ;;  %v6309_v56 = vld [vmem:[#allocation4] sm:$0x1] }
 0xbb8   : > { %v5817_v29 = vmul.f32 %v5802_v27, %v11433_v37 }
 0xbb9   : > { %5895 = vst [vmem:[#allocation3 + $0x108] sm:$0xf] %v5888_v43 }
 0xbbc   : > { %v11446_v38 = vpop.permute.xlu0 %5652  ;;  %6132 = vrot.lane.b32.xlu0 %v6114_v17, %s11817_s8 }
 0xbbd   : > { %v5664_v51 = vsel %vm11950_vm14, %v10663_v4, %v11446_v38  ;;  %v5510_v50 = vld [vmem:[#allocation2 + $0x38] sm:$0xf]  ;;  %v6027_v4 = vmul.f32 %v6013_v58, %v11397_v42  ;;  %vm11957_vm14 = vmmov %vm11945_vm8 }
 0xbbe   : > { %5677 = vst [vmem:[#allocation3 + $0x38] sm:$0xf] %v5664_v51  ;;  %v5889_v41 = vmul.f32 %v5875_v1, %v5510_v50  ;;  %v6203_v22 = vmul.f32 %v11222_v62, %v5510_v50  ;;  %5573 = vrot.lane.b32.xlu2 %v5554_v11, %s11816_s26  ;;  %v6015_v62 = vsel %vm11952_vm3, %v11383_v40, %v11318_v23  ;;  %vm11959_vm3 = vmmov %vm11958_vm15 }
 0xbbf   : > { %v6029_v35 = vmul.f32 %v6015_v62, %v5510_v50  ;;  %v6116_v28 = vmul.f32 %v6102_v9, %v5510_v50  ;;  %v5942_v57 = vmul.f32 %v5928_v26, %v5510_v50  ;;  %v5818_v60 = vmul.f32 %v11367_v33, %v5510_v50  ;;  %vm11961_vm8 = vmmov %vm11959_vm3 }
 0xbc0   : > { %5896 = vst.msk [vmem:[#allocation3 + $0x110] sm:$0xf] %vm5501_vm12, %v5889_v41  ;;  %6223 = vrot.lane.b32.xlu1 %v6203_v22, %s11798_s10  ;;  %v11459_v21 = vpop.permute.xlu2 %5567  ;;  %v5927_v33 = vsel %vm1052_vm6, %v11248_v6, %v11408_v47  ;;  %v5714_v24 = vsel %vm11961_vm8, %v11412_v30, %v11455_v0  ;;  %vm11965_vm13 = vmmov %vm11957_vm14 }
 0xbc1   : > { %v5941_v17 = vmul.f32 %v5927_v33, %v11433_v37  ;;  %v5728_v51 = vmul.f32 %v5714_v24, %v11397_v42  ;;  %vm11967_vm15 = vmmov %vm11960_vm5 }
 0xbc4   : > { %v11468_v63 = vpop.permute.xlu0 %6211  ;;  %6045 = vrot.lane.b32.xlu0 %v6027_v4, %s11818_s6 }
 0xbc5   : > { %v6253_v45 = vld [vmem:[#allocation3 + $0x38] sm:$0xff] }
 0xbc6   : > { %6049 = vrot.lane.b32.xlu2 %v6029_v35, %s11818_s6 }
 0xbc7   : > { %v5828_v13 = vpop.permute.xlu1 %5827 }
 0xbc8   : > { %v5843_v23 = vsel %vm1052_vm6, %v5828_v13, %v11435_v54  ;;  %6136 = vrot.lane.b32.xlu1 %v6116_v28, %s11817_s8  ;;  %v11481_v20 = vpop.permute.xlu2 %6126 }
 0xbc9   : > { %5857 = vst [vmem:[#allocation3 + $0xa8] sm:$0xf] %v5843_v23 }
 0xbcc   : > { %v5740_v59 = vpop.permute.xlu0 %5739  ;;  %5962 = vrot.lane.b32.xlu0 %v5942_v57, %s11801_s2 }
 0xbcd   : > { %v5751_v7 = vsel %vm11953_vm4, %v5738_v49, %v5740_v59  ;;  %v6115_v49 = vmul.f32 %v11242_v52, %v11433_v37  ;;  %v6202_v52 = vmul.f32 %v11177_v39, %v11433_v37  ;;  %vm11962_vm4 = vmmov %vm11947_vm9 }
 0xbce   : > { %5764 = vst [vmem:[#allocation3 + $0x70] sm:$0xf] %v5751_v7  ;;  %5662 = vrot.lane.b32.xlu2 %v5642_v10, %s11820_s21  ;;  %v6274_v10 = vld [vmem:[#allocation3 + $0xe0] sm:$0xff]  ;;  %s11994_s21 = sld [smem:[#allocation48_spill]] }
 0xbcf   : > { %v5566_v48 = vpop.permute.xlu1 %5565 }
 0xbd0   : > { %v5577_v34 = vsel %vm11947_vm9, %v10689_v14, %v5566_v48  ;;  %v5578_v31 = vsel %vm11954_vm11, %v5566_v48, %v11459_v21  ;;  %5841 = vrot.lane.b32.xlu1 %v5818_v60, %s11800_s29  ;;  %v11496_v32 = vpop.permute.xlu2 %6039  ;;  %v6028_v14 = vmul.f32 %v6014_v18, %v11433_v37  ;;  %vm11963_vm9 = vcmask 228352  }
 0xbd1   : > { %5590 = vst [vmem:[#allocation3] sm:$0xf] %v5577_v34  ;;  %vm11964_vm11 = vmmov %vm11963_vm9  ;;  %v6267_v34 = vld [vmem:[#allocation3 + $0xa8] sm:$0xff] }
 0xbd2   : > { %5591 = vst [vmem:[#allocation3 + $0x8] sm:$0xf] %v5578_v31 }
 0xbd4   : > { %5575 = vrot.lane.b32.xlu0 %v5555_v44, %s11816_s26  ;;  %s11992_s26 = sld [smem:[#allocation6_spill]] }
 0xbd6   : > { %6047 = vrot.lane.b32.xlu2 %v6028_v14, %s11818_s6 }
 0xbd7   : > { %v6125_v46 = vpop.permute.xlu1 %6124 }
 0xbd8   : > { %v6138_v25 = vsel %vm11957_vm14, %v6125_v46, %v11481_v20  ;;  %6134 = vrot.lane.b32.xlu1 %v6115_v49, %s11817_s8  ;;  %v5832_v61 = vpop.permute.xlu2 %5831  ;;  %vm11966_vm14 = vmmov %vm11959_vm3 }
 0xbd9   : > { %6151 = vst [vmem:[#allocation3 + $0x188] sm:$0xf] %v6138_v25  ;;  %v5844_v40 = vsel %vm1052_vm6, %v11435_v54, %v5832_v61 }
 0xbda   : > { %5858 = vst [vmem:[#allocation3 + $0xb0] sm:$0xf] %v5844_v40  ;;  %s11993_s8 = smul.u32 7, %s11992_s26 }
 0xbdc   : > { %6221 = vrot.lane.b32.xlu0 %v6202_v52, %s11798_s10  ;;  %s815_s30 = scalar_lea.vmem %s11994_s21, %s11993_s8 }
 0xbde   : > { %5837 = vrot.lane.b32.xlu2 %v5816_v55, %s11800_s29  ;;  %v6247_v55 = vld [vmem:[#allocation3 + $0x8] sm:$0xff] }
 0xbdf   : > { %v6038_v3 = vpop.permute.xlu1 %6037 }
 0xbe0   : > { %v6051_v39 = vsel %vm11959_vm3, %v6038_v3, %v11496_v32  ;;  %5749 = vrot.lane.b32.xlu1 %v5729_v5, %s11819_s5  ;;  %v5953_v12 = vpop.permute.xlu2 %5952  ;;  %v6295_v28 = vld [vmem:[#allocation3 + $0x188] sm:$0xff]  ;;  %vm11968_vm3 = vmmov %vm11962_vm4 }
 0xbe1   : > { %6064 = vst [vmem:[#allocation3 + $0x150] sm:$0xf] %v6051_v39  ;;  %v6268_v18 = vld [vmem:[#allocation3 + $0xb0] sm:$0xff] }
 0xbe4   : > { %5839 = vrot.lane.b32.xlu0 %v5817_v29, %s11800_s29 }
 0xbe7   : > { %v5951_v54 = vpop.permute.xlu1 %5950 }
 0xbe8   : > { %v5964_v36 = vsel %vm1044_vm1, %v5951_v54, %v5953_v12  ;;  %6312 = vperm.xlu1 %6758, %v6309_v56   ;;  %v5742_v43 = vpop.permute.xlu2 %5741  ;;  %v6288_v13 = vld [vmem:[#allocation3 + $0x150] sm:$0xff] }
 0xbe9   : > { %5977 = vst [vmem:[#allocation3 + $0x118] sm:$0xf] %v5964_v36  ;;  %v5752_v15 = vsel %vm11960_vm5, %v5740_v59, %v5742_v43  ;;  %vm11969_vm5 = vmmov %vm11961_vm8 }
 0xbea   : > { %5765 = vst [vmem:[#allocation3 + $0x78] sm:$0xf] %v5752_v15  ;;  %vm11971_vm8 = vmmov %vm11963_vm9 }
 0xbec   : > { %5960 = vrot.lane.b32.xlu0 %v5941_v17, %s11801_s2  ;;  %s11970_s2 = sld [smem:[#allocation46_spill]] }
 0xbee   : > { %v5570_v1 = vpop.permute.xlu0 %5569 }
 0xbef   : > { %v5655_v19 = vpop.permute.xlu1 %5654  ;;  %v5579_v11 = vsel %vm11962_vm4, %v11459_v21, %v5570_v1  ;;  %vm11972_vm4 = vmmov %vm11967_vm15 }
 0xbf0   : > { %v5665_v6 = vsel %vm11963_vm9, %v11446_v38, %v5655_v19  ;;  %5592 = vst [vmem:[#allocation3 + $0x10] sm:$0xf] %v5579_v11  ;;  %v11549_v47 = vpop.permute.xlu2 %5656  ;;  %v6281_v23 = vld [vmem:[#allocation3 + $0x118] sm:$0xff]  ;;  %vm11973_vm9 = vcmask 588800  }
 0xbf1   : > { %5678 = vst [vmem:[#allocation3 + $0x40] sm:$0xf] %v5665_v6  ;;  %v5666_v37 = vsel %vm11964_vm11, %v5655_v19, %v11549_v47  ;;  %v6261_v8 = vld [vmem:[#allocation3 + $0x78] sm:$0xff]  ;;  %vm11974_vm11 = vmmov %vm11973_vm9 }
 0xbf2   : > { %5679 = vst [vmem:[#allocation3 + $0x48] sm:$0xf] %v5666_v37  ;;  %v11582_v49 = vld [vmem:[%s11970_s2] sm:$0x1] }
 0xbf4   : > { %5747 = vrot.lane.b32.xlu0 %v5728_v51, %s11819_s5 }
 0xbf6   : > { %v6216_v30 = vpop.permute.xlu0 %6215 }
 0xbf7   : > { %v6214_v50 = vpop.permute.xlu1 %6213 }
 0xbf8   : > { %v6225_v41 = vsel %vm979_vm2, %v11468_v63, %v6214_v50  ;;  %v6226_v22 = vsel %vm979_vm2, %v6214_v50, %v6216_v30  ;;  %v11558_v38 = vpop.permute.xlu2 %6128  ;;  %v6254_v2 = vld [vmem:[#allocation3 + $0x40] sm:$0xff] }
 0xbf9   : > { %6238 = vst [vmem:[#allocation3 + $0x1c0] sm:$0xf] %v6225_v41  ;;  %v6139_v0 = vsel %vm11965_vm13, %v11481_v20, %v11558_v38 }
 0xbfa   : > { %6239 = vst [vmem:[#allocation3 + $0x1c8] sm:$0xf] %v6226_v22 }
 0xbfb   : > { %6152 = vst [vmem:[#allocation3 + $0x190] sm:$0xf] %v6139_v0  ;;  %v6255_v0 = vld [vmem:[#allocation3 + $0x48] sm:$0xff] }
 0xbfe   : > { %v11563_v42 = vpop.permute.xlu0 %5833 }
 0xbff   : > { %v6042_v21 = vpop.permute.xlu1 %6041  ;;  %v5845_v58 = vsel %vm1052_vm6, %v5832_v61, %v11563_v42  ;;  %v6246_v61 = vld [vmem:[#allocation3] sm:$0xff] }
 0xc00   : > { %v6052_v4 = vsel %vm11966_vm14, %v11496_v32, %v6042_v21  ;;  %v6302_v62 = vld [vmem:[#allocation3 + $0x1c0] sm:$0xff]  ;;  %5859 = vst [vmem:[#allocation3 + $0xb8] sm:$0xf] %v5845_v58  ;;  %v11569_v63 = vpop.permute.xlu2 %5954  ;;  %v6260_v32 = vld [vmem:[#allocation3 + $0x70] sm:$0xff]  ;;  %vm11975_vm14 = vmmov %vm11968_vm3 }
 0xc01   : > { %6065 = vst [vmem:[#allocation3 + $0x158] sm:$0xf] %v6052_v4  ;;  %6326 = vmatpush.msra.mxu0 %v6302_v62  ;;  %v6303_v35 = vld [vmem:[#allocation3 + $0x1c8] sm:$0xff]  ;;  %v5965_v9 = vsel %vm1044_vm1, %v5953_v12, %v11569_v63  ;;  %v6248_v4 = vld [vmem:[#allocation3 + $0x10] sm:$0xff] }
 0xc02   : > { %6346 = vmatpush.msrb.mxu1 %v6303_v35  ;;  %5978 = vst [vmem:[#allocation3 + $0x120] sm:$0xf] %v5965_v9  ;;  %v6296_v26 = vld [vmem:[#allocation3 + $0x190] sm:$0xff] }
 0xc03   : > { %6327 = vmatpush.msra.mxu0 %v6295_v28 }
 0xc04   : > { %6347 = vmatpush.msrb.mxu1 %v6296_v26 }
 0xc05   : > { %6328 = vmatpush.msra.mxu0 %v6288_v13 }
 0xc06   : > { %v5744_v20 = vpop.permute.xlu0 %5743 }
 0xc07   : > { %v5572_v57 = vpop.permute.xlu1 %5571  ;;  %6329 = vmatpush.msra.mxu0 %v6281_v23  ;;  %v5753_v53 = vsel %vm11967_vm15, %v5742_v43, %v5744_v20  ;;  %vm11976_vm15 = vmmov %vm11971_vm8  ;;  %v6269_v50 = vld [vmem:[#allocation3 + $0xb8] sm:$0xff] }
 0xc08   : > { %v5580_v59 = vsel %vm11968_vm3, %v5570_v1, %v5572_v57  ;;  %v6289_v7 = vld [vmem:[#allocation3 + $0x158] sm:$0xff]  ;;  %5766 = vst [vmem:[#allocation3 + $0x80] sm:$0xf] %v5753_v53  ;;  %v11575_v60 = vpop.permute.xlu2 %6043  ;;  %vm11977_vm3 = vmmov %vm11971_vm8 }
 0xc09   : > { %5593 = vst [vmem:[#allocation3 + $0x18] sm:$0xf] %v5580_v59  ;;  %6330 = vmatpush.msra.mxu0 %v6274_v10  ;;  %6348 = vmatpush.msrb.mxu1 %v6289_v7  ;;  %v6053_v48 = vsel %vm11969_vm5, %v6042_v21, %v11575_v60  ;;  %v6282_v31 = vld [vmem:[#allocation3 + $0x120] sm:$0xff]  ;;  %vm11978_vm5 = vmmov %vm11965_vm13 }
 0xc0a   : > { %6066 = vst [vmem:[#allocation3 + $0x160] sm:$0xf] %v6053_v48 }
 0xc0b   : > { %6331 = vmatpush.msra.mxu0 %v6267_v34  ;;  %6349 = vmatpush.msrb.mxu1 %v6282_v31 }
 0xc0d   : > { %6332 = vmatpush.msra.mxu0 %v6260_v32  ;;  %6350 = vmatpush.msrb.mxu1 %v6275_v16 }
 0xc0e   : > { %v5659_v44 = vpop.permute.xlu0 %5658 }
 0xc0f   : > { %v6218_v14 = vpop.permute.xlu1 %6217  ;;  %6333 = vmatpush.msra.mxu0 %v6253_v45  ;;  %v5667_v46 = vsel %vm11971_vm8, %v11549_v47, %v5659_v44  ;;  %6351 = vmatpush.msrb.mxu1 %v6268_v18  ;;  %v6262_v41 = vld [vmem:[#allocation3 + $0x80] sm:$0xff]  ;;  %vm11979_vm8 = vcmask 826368  }
 0xc10   : > { %v6227_v25 = vsel %vm979_vm2, %v6216_v30, %v6218_v14  ;;  %5680 = vst [vmem:[#allocation3 + $0x50] sm:$0xf] %v5667_v46  ;;  %v11587_v40 = vpop.permute.xlu2 %5745  ;;  %v6276_v30 = vld [vmem:[#allocation3 + $0xf0] sm:$0xff] }
 0xc11   : > { %6240 = vst [vmem:[#allocation3 + $0x1d0] sm:$0xf] %v6227_v25  ;;  %6334 = vmatpush.msra.mxu0 %v6246_v61  ;;  %6352 = vmatpush.msrb.mxu1 %v6261_v8  ;;  %v5754_v52 = vsel %vm11972_vm4, %v5744_v20, %v11587_v40  ;;  %v6290_v1 = vld [vmem:[#allocation3 + $0x160] sm:$0xff]  ;;  %vm11980_vm4 = vmmov %vm11973_vm9  ;;  %v6249_v61 = vld [vmem:[#allocation3 + $0x18] sm:$0xff] }
 0xc12   : > { %6682 = vmatmul.msk.f32.vlgmr.msra.gmra.mxu0 %vm11973_vm9, %v11582_v49  ;;  %5767 = vst [vmem:[#allocation3 + $0x88] sm:$0xf] %v5754_v52  ;;  %vm11981_vm9 = vmmov %vm11979_vm8 }
 0xc13   : > { %6353 = vmatpush.msrb.mxu1 %v6254_v2 }
 0xc15   : > { %6354 = vmatpush.msrb.mxu1 %v6247_v55 }
 0xc16   : > { %6683 = vmatmul.msk.f32.vlgmr.msrb.gmra.mxu1 %vm11974_vm11, %v11582_v49  ;;  %v6131_v5 = vpop.permute.xlu0 %6130  ;;  %vm11982_vm11 = vmmov %vm11979_vm8 }
 0xc17   : > { %v11595_v27 = vpop.permute.xlu1 %5835  ;;  %v6140_v3 = vsel %vm11965_vm13, %v11558_v38, %v6131_v5  ;;  %vm11983_vm13 = vmmov %vm11975_vm14  ;;  %v6256_v18 = vld [vmem:[#allocation3 + $0x50] sm:$0xff] }
 0xc18   : > { %v5846_v39 = vsel %vm1052_vm6, %v11563_v42, %v11595_v27  ;;  %v6304_v12 = vld [vmem:[#allocation3 + $0x1d0] sm:$0xff]  ;;  %6153 = vst [vmem:[#allocation3 + $0x198] sm:$0xf] %v6140_v3  ;;  %v11602_v29 = vpop.permute.xlu2 %5573 }
 0xc19   : > { %5860 = vst [vmem:[#allocation3 + $0xc0] sm:$0xf] %v5846_v39  ;;  %6366 = vmatpush.msrb.mxu3 %v6304_v12  ;;  %v5581_v56 = vsel %vm11975_vm14, %v5572_v57, %v11602_v29  ;;  %v6263_v45 = vld [vmem:[#allocation3 + $0x88] sm:$0xff]  ;;  %vm11984_vm14 = vmmov %vm11978_vm5 }
 0xc1a   : > { %5594 = vst [vmem:[#allocation3 + $0x20] sm:$0xf] %v5581_v56 }
 0xc1e   : > { %v5957_v54 = vpop.permute.xlu0 %5956 }
 0xc1f   : > { %v5966_v36 = vsel %vm1044_vm1, %v11569_v63, %v5957_v54  ;;  %v5661_v43 = vpop.permute.xlu1 %5660  ;;  %v6297_v33 = vld [vmem:[#allocation3 + $0x198] sm:$0xff] }
 0xc20   : > { %5979 = vst [vmem:[#allocation3 + $0x128] sm:$0xf] %v5966_v36  ;;  %v5668_v15 = vsel %vm11976_vm15, %v5659_v44, %v5661_v43  ;;  %6367 = vmatpush.msrb.mxu3 %v6297_v33  ;;  %v6050_v17 = vpop.permute.xlu2 %6049  ;;  %v6270_v34 = vld [vmem:[#allocation3 + $0xc0] sm:$0xff]  ;;  %v6280_v44 = vld [vmem:[#allocation3 + $0x110] sm:$0xff]  ;;  %vm11985_vm15 = vmmov %vm11978_vm5 }
 0xc21   : > { %5681 = vst [vmem:[#allocation3 + $0x58] sm:$0xf] %v5668_v15 }
 0xc22   : > { %6070 = vst.msk [vmem:[#allocation3 + $0x180] sm:$0xf] %vm5501_vm12, %v6050_v17  ;;  %6368 = vmatpush.msrb.mxu3 %v6290_v1 }
 0xc26   : > { %v11610_v24 = vpop.permute.xlu0 %6219 }
 0xc27   : > { %v6228_v19 = vsel %vm979_vm2, %v6218_v14, %v11610_v24  ;;  %v11614_v11 = vpop.permute.xlu1 %5958  ;;  %v6283_v6 = vld [vmem:[#allocation3 + $0x128] sm:$0xff] }
 0xc28   : > { %6241 = vst [vmem:[#allocation3 + $0x1d8] sm:$0xf] %v6228_v19  ;;  %v5967_v47 = vsel %vm1044_vm1, %v5957_v54, %v11614_v11  ;;  %6369 = vmatpush.msrb.mxu3 %v6283_v6  ;;  %v5663_v37 = vpop.permute.xlu2 %5662 }
 0xc29   : > { %5980 = vst [vmem:[#allocation3 + $0x130] sm:$0xf] %v5967_v47  ;;  %v5669_v51 = vsel %vm11977_vm3, %v5661_v43, %v5663_v37  ;;  %v6294_v48 = vld [vmem:[#allocation3 + $0x180] sm:$0xff]  ;;  %vm11986_vm3 = vmmov %vm11980_vm4 }
 0xc2a   : > { %5682 = vst [vmem:[#allocation3 + $0x60] sm:$0xf] %v5669_v51  ;;  %6370 = vmatpush.msrb.mxu3 %v6276_v30  ;;  %v6278_v30 = vld [vmem:[#allocation3 + $0x100] sm:$0xff] }
 0xc2b   : > { %5683 = vst.msk [vmem:[#allocation3 + $0x68] sm:$0xf] %vm5501_vm12, %v5663_v37 }
 0xc2c   : > { %6371 = vmatpush.msrb.mxu3 %v6269_v50  ;;  %v6279_v50 = vld [vmem:[#allocation3 + $0x108] sm:$0xff] }
 0xc2e   : > { %v6133_v22 = vpop.permute.xlu0 %6132  ;;  %6372 = vmatpush.msrb.mxu3 %v6262_v41 }
 0xc2f   : > { %v6141_v38 = vsel %vm11978_vm5, %v6131_v5, %v6133_v22  ;;  %v6305_v42 = vld [vmem:[#allocation3 + $0x1d8] sm:$0xff] }
 0xc30   : > { %6154 = vst [vmem:[#allocation3 + $0x1a0] sm:$0xf] %v6141_v38  ;;  %6373 = vmatpush.msrb.mxu3 %v6255_v0  ;;  %6386 = vmatpush.msra.mxu2 %v6305_v42  ;;  %v6048_v21 = vpop.permute.xlu2 %6047  ;;  %v6284_v59 = vld [vmem:[#allocation3 + $0x130] sm:$0xff]  ;;  %v6257_v0 = vld [vmem:[#allocation3 + $0x58] sm:$0xff] }
 0xc31   : > { %v6056_v58 = vsel %vm11979_vm8, %v6048_v21, %v6050_v17  ;;  %v6258_v42 = vld [vmem:[#allocation3 + $0x60] sm:$0xff]  ;;  %vm6473_vm8 = vcmask 1042434  }
 0xc32   : > { %v6224_v62 = vpop.permute.xlu1 %6223  ;;  %6069 = vst [vmem:[#allocation3 + $0x178] sm:$0xf] %v6056_v58  ;;  %6374 = vmatpush.msrb.mxu3 %v6248_v4 }
 0xc33   : > { %6244 = vst.msk [vmem:[#allocation3 + $0x1f0] sm:$0xf] %vm5501_vm12, %v6224_v62  ;;  %6684 = vmatmul.msk.f32.vlgmr.msrb.gmra.mxu3 %vm11980_vm4, %v11582_v49  ;;  %vm6477_vm4 = vcmask 1044484  }
 0xc36   : > { %v6046_v63 = vpop.permute.xlu0 %6045 }
 0xc37   : > { %v6054_v35 = vsel %vm11981_vm9, %v11575_v60, %v6046_v63  ;;  %v6055_v9 = vsel %vm11982_vm11, %v6046_v63, %v6048_v21  ;;  %v6298_v28 = vld [vmem:[#allocation3 + $0x1a0] sm:$0xff]  ;;  %v6277_v60 = vld [vmem:[#allocation3 + $0xf8] sm:$0xff]  ;;  %vm6475_vm9 = vcmask 1041408   ;;  %vm6479_vm11 = vcmask 1045508  }
 0xc38   : > { %6067 = vst [vmem:[#allocation3 + $0x168] sm:$0xf] %v6054_v35  ;;  %6387 = vmatpush.msra.mxu2 %v6298_v28  ;;  %v5838_v26 = vpop.permute.xlu2 %5837  ;;  %v6250_v21 = vld [vmem:[#allocation3 + $0x20] sm:$0xff] }
 0xc39   : > { %6068 = vst [vmem:[#allocation3 + $0x170] sm:$0xf] %v6055_v9  ;;  %v5847_v13 = vsel %vm1052_vm6, %v11595_v27, %v5838_v26  ;;  %v6293_v36 = vld [vmem:[#allocation3 + $0x178] sm:$0xff] }
 0xc3a   : > { %v6137_v23 = vpop.permute.xlu1 %6136  ;;  %v6308_v20 = vld [vmem:[#allocation3 + $0x1f0] sm:$0xff]  ;;  %5861 = vst [vmem:[#allocation3 + $0xc8] sm:$0xf] %v5847_v13 }
 0xc3b   : > { %6157 = vst.msk [vmem:[#allocation3 + $0x1b8] sm:$0xf] %vm5501_vm12, %v6137_v23  ;;  %6446 = vmatpush.msra.mxu3 %v6308_v20 }
 0xc3e   : > { %v5963_v57 = vpop.permute.xlu0 %5962 }
 0xc3f   : > { %5983 = vst.msk [vmem:[#allocation3 + $0x148] sm:$0xf] %vm5501_vm12, %v5963_v57  ;;  %v6291_v53 = vld [vmem:[#allocation3 + $0x168] sm:$0xff] }
 0xc40   : > { %6388 = vmatpush.msra.mxu2 %v6291_v53  ;;  %v6292_v54 = vld [vmem:[#allocation3 + $0x170] sm:$0xff] }
 0xc41   : > { %v6271_v41 = vld [vmem:[#allocation3 + $0xc8] sm:$0xff] }
 0xc42   : > { %v5842_v10 = vpop.permute.xlu1 %5841  ;;  %v6301_v7 = vld [vmem:[#allocation3 + $0x1b8] sm:$0xff]  ;;  %6389 = vmatpush.msra.mxu2 %v6284_v59 }
 0xc43   : > { %6447 = vmatpush.msra.mxu3 %v6301_v7 }
 0xc44   : > { %6390 = vmatpush.msra.mxu2 %v6277_v60 }
 0xc45   : > { %6448 = vmatpush.msra.mxu3 %v6294_v48 }
 0xc46   : > { %v5576_v31 = vpop.permute.xlu0 %5575  ;;  %6391 = vmatpush.msra.mxu2 %v6270_v34  ;;  %v6287_v32 = vld [vmem:[#allocation3 + $0x148] sm:$0xff] }
 0xc47   : > { %v5582_v16 = vsel %vm11983_vm13, %v11602_v29, %v5576_v31  ;;  %5596 = vst.msk [vmem:[#allocation3 + $0x30] sm:$0xf] %vm5501_vm12, %v5576_v31  ;;  %6449 = vmatpush.msra.mxu3 %v6287_v32 }
 0xc48   : > { %5595 = vst [vmem:[#allocation3 + $0x28] sm:$0xf] %v5582_v16  ;;  %6392 = vmatpush.msra.mxu2 %v6263_v45 }
 0xc49   : > { %6450 = vmatpush.msra.mxu3 %v6280_v44 }
 0xc4a   : > { %v6135_v14 = vpop.permute.xlu1 %6134  ;;  %6393 = vmatpush.msra.mxu2 %v6256_v18 }
 0xc4b   : > { %v6142_v46 = vsel %vm11984_vm14, %v6133_v22, %v6135_v14  ;;  %v6143_v25 = vsel %vm11985_vm15, %v6135_v14, %v6137_v23 }
 0xc4c   : > { %6155 = vst [vmem:[#allocation3 + $0x1a8] sm:$0xf] %v6142_v46  ;;  %6394 = vmatpush.msra.mxu2 %v6249_v61 }
 0xc4d   : > { %6156 = vst [vmem:[#allocation3 + $0x1b0] sm:$0xf] %v6143_v25  ;;  %6685 = vmatmul.msk.f32.vlgmr.msra.gmra.mxu2 %vm11986_vm3, %v11582_v49 }
 0xc4e   : > { %v6222_v8 = vpop.permute.xlu0 %6221  ;;  %v6252_v6 = vld [vmem:[#allocation3 + $0x30] sm:$0xff] }
 0xc4f   : > { %v6229_v52 = vsel %vm979_vm2, %v11610_v24, %v6222_v8  ;;  %v6230_v2 = vsel %vm979_vm2, %v6222_v8, %v6224_v62  ;;  %v6259_v24 = vld [vmem:[#allocation3 + $0x68] sm:$0xff]  ;;  %vm11987_vm2 = vcmask 220160  }
 0xc50   : > { %6242 = vst [vmem:[#allocation3 + $0x1e0] sm:$0xf] %v6229_v52  ;;  %v6251_v58 = vld [vmem:[#allocation3 + $0x28] sm:$0xff] }
 0xc51   : > { %6243 = vst [vmem:[#allocation3 + $0x1e8] sm:$0xf] %v6230_v2 }
 0xc52   : > { %v5750_v55 = vpop.permute.xlu1 %5749 }
 0xc53   : > { %5770 = vst.msk [vmem:[#allocation3 + $0xa0] sm:$0xf] %vm5501_vm12, %v5750_v55  ;;  %v6299_v29 = vld [vmem:[#allocation3 + $0x1a8] sm:$0xff] }
 0xc54   : > { %v6300_v56 = vld [vmem:[#allocation3 + $0x1b0] sm:$0xff] }
 0xc56   : > { %v5840_v5 = vpop.permute.xlu0 %5839 }
 0xc57   : > { %v5848_v27 = vsel %vm1052_vm6, %v5838_v26, %v5840_v5  ;;  %v5849_v3 = vsel %vm1052_vm6, %v5840_v5, %v5842_v10  ;;  %v6306_v39 = vld [vmem:[#allocation3 + $0x1e0] sm:$0xff]  ;;  %vm11988_vm6 = vmmov %vm11987_vm2 }
 0xc58   : > { %5862 = vst [vmem:[#allocation3 + $0xd0] sm:$0xf] %v5848_v27  ;;  %6406 = vmatpush.msrb.mxu0 %v6306_v39  ;;  %v6307_v12 = vld [vmem:[#allocation3 + $0x1e8] sm:$0xff] }
 0xc59   : > { %5863 = vst.msk [vmem:[#allocation3 + $0xd8] sm:$0xf] %vm5501_vm12, %v5849_v3  ;;  %6426 = vmatpush.msra.mxu1 %v6307_v12 }
 0xc5a   : > { %6407 = vmatpush.msrb.mxu0 %v6299_v29  ;;  %v6266_v1 = vld [vmem:[#allocation3 + $0xa0] sm:$0xff]  ;;  %v6313_v62 = vpop.permute.xlu1 %6312 }
 0xc5b   : > { %6427 = vmatpush.msra.mxu1 %v6300_v56  ;;  %v6315_v28 = vperm.slane %v6313_v62, 0 }
 0xc5c   : > { %6408 = vmatpush.msrb.mxu0 %v6292_v54 }
 0xc5d   : > { %6428 = vmatpush.msra.mxu1 %v6293_v36 }
 0xc5e   : > { %v5961_v43 = vpop.permute.xlu0 %5960 }
 0xc5f   : > { %v5968_v33 = vsel %vm1044_vm1, %v11614_v11, %v5961_v43  ;;  %v5969_v15 = vsel %vm1044_vm1, %v5961_v43, %v5963_v57  ;;  %vm11989_vm1 = vmmov %vm11986_vm3  ;;  %v6272_v22 = vld [vmem:[#allocation3 + $0xd0] sm:$0xff] }
 0xc60   : > { %5981 = vst [vmem:[#allocation3 + $0x138] sm:$0xf] %v5968_v33  ;;  %v6273_v17 = vld [vmem:[#allocation3 + $0xd8] sm:$0xff]  ;;  %vm11990_vm12 = vmmov %vm11989_vm1 }
 0xc61   : > { %5982 = vst [vmem:[#allocation3 + $0x140] sm:$0xf] %v5969_v15  ;;  %6451 = vmatpush.msra.mxu3 %v6273_v17  ;;  %vm11991_vm5 = vmmov %vm11989_vm1 }
 0xc63   : > { %6452 = vmatpush.msra.mxu3 %v6266_v1 }
 0xc65   : > { %6453 = vmatpush.msra.mxu3 %v6259_v24 }
 0xc66   : > { %v5748_v19 = vpop.permute.xlu0 %5747 }
 0xc67   : > { %v5755_v47 = vsel %vm11987_vm2, %v11587_v40, %v5748_v19  ;;  %v5756_v37 = vsel %vm11988_vm6, %v5748_v19, %v5750_v55  ;;  %6454 = vmatpush.msra.mxu3 %v6252_v6  ;;  %v6285_v51 = vld [vmem:[#allocation3 + $0x138] sm:$0xff] }
 0xc68   : > { %5768 = vst [vmem:[#allocation3 + $0x90] sm:$0xf] %v5755_v47  ;;  %6688 = vmatmul.msk.f32.vlgmr.msra.gmra.mxu3 %vm11989_vm1, %v11582_v49  ;;  %6409 = vmatpush.msrb.mxu0 %v6285_v51  ;;  %v6286_v11 = vld [vmem:[#allocation3 + $0x140] sm:$0xff] }
 0xc69   : > { %5769 = vst [vmem:[#allocation3 + $0x98] sm:$0xf] %v5756_v37  ;;  %6429 = vmatpush.msra.mxu1 %v6286_v11 }
 0xc6a   : > { %6410 = vmatpush.msrb.mxu0 %v6278_v30 }
 0xc6b   : > { %6430 = vmatpush.msra.mxu1 %v6279_v50 }
 0xc6c   : > { %6411 = vmatpush.msrb.mxu0 %v6271_v41 }
 0xc6d   : > { %6431 = vmatpush.msra.mxu1 %v6272_v22 }
 0xc6f   : > { %v6264_v40 = vld [vmem:[#allocation3 + $0x90] sm:$0xff] }
 0xc70   : > { %6412 = vmatpush.msrb.mxu0 %v6264_v40  ;;  %v6265_v38 = vld [vmem:[#allocation3 + $0x98] sm:$0xff] }
 0xc71   : > { %6432 = vmatpush.msra.mxu1 %v6265_v38 }
 0xc72   : > { %6413 = vmatpush.msrb.mxu0 %v6257_v0 }
 0xc73   : > { %6433 = vmatpush.msra.mxu1 %v6258_v42 }
 0xc74   : > { %6414 = vmatpush.msrb.mxu0 %v6250_v21 }
 0xc75   : > { %6434 = vmatpush.msra.mxu1 %v6251_v58  ;;  %6686 = vmatmul.msk.f32.vlgmr.msrb.gmra.mxu0 %vm11990_vm12, %v11582_v49 }
 0xc76   : > { %6687 = vmatmul.msk.f32.vlgmr.msra.gmra.mxu1 %vm11991_vm5, %v11582_v49 }
 0xc8f   : > { %v6336_v63 = vpop.f32.mrf.mxu0 }
 0xc90   : > { %v6337_v34 = vadd.f32 %v6336_v63, %v6315_v28 }
 0xc93   : > { %v6356_v35 = vpop.f32.mrf.mxu1 }
 0xc94   : > { %v6357_v13 = vadd.f32 %v6356_v35, %v6315_v28 }
 0xc96   : > { %v6466_v60 = vrot.slane %v6357_v13, 7 }
 0xc98   : > { %v6472_v44 = vsel %vm2499_vm7, %v6337_v34, %v6466_v60 }
 0xcb6   : > { %v6376_v4 = vpop.f32.mrf.mxu3 }
 0xcb7   : > { %v6377_v23 = vadd.f32 %v6376_v4, %v6315_v28 }
 0xcb9   : > { %v6467_v48 = vrot.slane %v6377_v23, 6 }
 0xcd0   : > { %v6396_v9 = vpop.f32.mrf.mxu2 }
 0xcd1   : > { %v6397_v26 = vadd.f32 %v6396_v9, %v6315_v28 }
 0xcd3   : > { %v6468_v57 = vrot.slane %v6397_v26, 5 }
 0xcd5   : > { %v6474_v32 = vsel %vm6473_vm8, %v6467_v48, %v6468_v57 }
 0xcd6   : > { %v6476_v14 = vsel %vm6475_vm9, %v6472_v44, %v6474_v32 }
 0xceb   : > { %v6456_v20 = vpop.f32.mrf.mxu3 }
 0xcec   : > { %v6457_v59 = vadd.f32 %v6456_v20, %v6315_v28 }
 0xcee   : > { %v6471_v45 = vrot.slane %v6457_v59, 2 }
 0xcf2   : > { %v6416_v53 = vpop.f32.mrf.mxu0 }
 0xcf3   : > { %v6417_v10 = vadd.f32 %v6416_v53, %v6315_v28  ;;  %v6436_v7 = vpop.f32.mrf.mxu1 }
 0xcf4   : > { %v6437_v49 = vadd.f32 %v6436_v7, %v6315_v28 }
 0xcf5   : > { %v6469_v31 = vrot.slane %v6417_v10, 4 }
 0xcf6   : > { %v6470_v16 = vrot.slane %v6437_v49, 3 }
 0xcf8   : > { %v6478_v18 = vsel %vm6477_vm4, %v6469_v31, %v6470_v16 }
 0xcf9   : > { %v6480_v46 = vsel %vm6479_vm11, %v6478_v18, %v6471_v45 }
 0xcfa   : > { %v6481_v25 = vsel %vm2379_vm10, %v6476_v14, %v6480_v46 }
 0xcfb   : > { %6483 = vst.msk [vmem:[%s815_s30] sm:$0x7f] %vm6974_vm0, %v6481_v25 }
 0xcfc PF: > { %s11996_s0 = sld [smem:[#allocation5_spill]] }
 0xd02   : > { %s39_s8 = sadd.s32 1, %s11996_s0  }
 0xd03   : > { %p36_p4 = scmp.ge.s32.totalorder %s39_s8, 4  }
 0xd05   :  { %38 = sbr.rel (!%p36_p4) target bundleno = 19 (0x13), region = 207 }

</bundles_post_ra>
